<compile_context>
chip_gen: v7x
topology: tpu7x:2x2x1
jax: 0.10.0
libtpu: 0.0.40
codegen_flags: <defaults>
</compile_context>

<pallas_src>
import jax
import jax.numpy as jnp
from jax.experimental import pallas as pl
from jax.experimental.pallas import tpu as pltpu


# --------------------------- fused Pallas kernel -----------------------------

def _fe_kernel(
        xpad_ref,                      # (N, OH+3, OW+3, 4*Cin) padded s2d input
        w1, b1,                        # stem: (4,4,4*Cin,32), (1,32)
        l1c1w, l1c1b, l1c2w, l1c2b,    # layer1 (32->32)
        l2c1w, l2c1b, l2c2w, l2c2b,    # layer2 (32->32)
        l3c1w, l3c1b, l3c2w, l3c2b, l3scw, l3scb,   # layer3 (32->64, shortcut)
        l4c1w, l4c1b, l4c2w, l4c2b,    # layer4 (64->64)
        fcw, fcb,                      # (64,512), (1,512)
        o_ref,                         # (N, 512)
        pad32_ref, pad64_ref):         # VMEM scratch: padded activations
    f32 = jnp.float32
    N = o_ref.shape[0]
    OH = xpad_ref.shape[1] - 3
    OW = xpad_ref.shape[2] - 3
    M = N * OH * OW

    def conv_from_pad(pad_ref, w_ref, b_ref, k):
        """Stride-1 kxk conv over a zero-padded VMEM activation as a sum of
        kxk shifted (M,Cin)x(Cin,Cout) matmuls, fp32 accumulation."""
        cout = w_ref.shape[3]
        acc = jnp.zeros((M, cout), f32)
        for di in range(k):
            for dj in range(k):
                patch = pad_ref[:, di:di + OH, dj:dj + OW, :]   # (N,OH,OW,Cin)
                patch = patch.reshape(M, patch.shape[-1])
                acc = acc + jnp.dot(patch, w_ref[di, dj],
                                    preferred_element_type=f32)
        return acc + b_ref[...]

    def conv3x3(act_flat, pad_ref, w_ref, b_ref):
        c = act_flat.shape[1]
        # write interior of the padded scratch (borders stay zero)
        pad_ref[:, 1:OH + 1, 1:OW + 1, :] = act_flat.reshape(N, OH, OW, c)
        return conv_from_pad(pad_ref, w_ref, b_ref, 3)

    def res_block(act, pad_in, pad_mid, c1w, c1b, c2w, c2b, scw=None, scb=None):
        h = jnp.maximum(conv3x3(act, pad_in, c1w, c1b), 0.0)
        out = conv3x3(h, pad_mid, c2w, c2b)
        if scw is None:
            res = act
        else:                          # 1x1 shortcut conv == plain GEMM
            res = jnp.dot(act, scw[...], preferred_element_type=f32) + scb[...]
        return jnp.maximum(out + res, 0.0)

    # Zero the padded-activation scratch once; every conv rewrites the interior.
    pad32_ref[...] = jnp.zeros_like(pad32_ref)
    pad64_ref[...] = jnp.zeros_like(pad64_ref)

    # Stem: original 7x7/stride-2/pad-3 conv, re-expressed as a 4x4/stride-1
    # conv over the space-to-depth(2) input (weights rearranged in wrapper).
    x = jnp.maximum(conv_from_pad(xpad_ref, w1, b1, 4), 0.0)      # (M, 32)

    x = res_block(x, pad32_ref, pad32_ref, l1c1w, l1c1b, l1c2w, l1c2b)
    x = res_block(x, pad32_ref, pad32_ref, l2c1w, l2c1b, l2c2w, l2c2b)
    x = res_block(x, pad32_ref, pad64_ref, l3c1w, l3c1b, l3c2w, l3c2b,
                  l3scw, l3scb)
    x = res_block(x, pad64_ref, pad64_ref, l4c1w, l4c1b, l4c2w, l4c2b)

    # Head: AdaptiveAvgPool2d((1,1)) + Flatten + Linear + F.normalize(p=2,dim=1)
    cfin = x.shape[1]
    pooled = jnp.mean(x.reshape(N, OH * OW, cfin), axis=1)        # (N, 64)
    y = jnp.dot(pooled, fcw[...], preferred_element_type=f32) + fcb[...]
    ssq = jnp.sum(y * y, axis=1, keepdims=True)
    # y / max(||y||, 1e-12)  ==  y * rsqrt(max(||y||^2, 1e-24))   (EUP rsqrt)
    o_ref[...] = y * jax.lax.rsqrt(jnp.maximum(ssq, 1e-24))


# --------------------------- wrapper ------------------------------------------

_VMEM = pl.BlockSpec(memory_space=pltpu.MemorySpace.VMEM)


def _hwio(w_oihw):
    return jnp.transpose(w_oihw, (2, 3, 1, 0))           # OIHW -> HWIO


def _s2d_conv1_weight(w_oihw):
    """Rearrange 7x7/stride-2/pad-3 OIHW weights into a 4x4/stride-1 HWIO
    weight over the space-to-depth(2) input (channel order = (u, v, ci))."""
    cout, cin, _, _ = w_oihw.shape                        # (32, Cin, 7, 7)
    wp = jnp.pad(w_oihw, ((0, 0), (0, 0), (1, 0), (1, 0)))   # (co,ci,8,8)
    wp = wp.reshape(cout, cin, 4, 2, 4, 2)                # (co,ci,m,u,p,v)
    w4 = jnp.transpose(wp, (2, 4, 3, 5, 1, 0))            # (m,p,u,v,ci,co)
    return w4.reshape(4, 4, 4 * cin, cout)


@jax.jit
def feature_extractor(x_nhwc, params):
    N, H, W, C = x_nhwc.shape
    OH, OW = H // 2, W // 2

    # space-to-depth(2): (N,H,W,C) -> (N,H/2,W/2,4C); then pad (2 before, 1 after)
    xs = x_nhwc.reshape(N, OH, 2, OW, 2, C)
    xs = xs.transpose(0, 1, 3, 2, 4, 5).reshape(N, OH, OW, 4 * C)
    xpad = jnp.pad(xs, ((0, 0), (2, 1), (2, 1), (0, 0)))

    def cb(p, wk, bk):
        return _hwio(p[wk]), p[bk].reshape(1, -1)

    l1, l2, l3, l4 = (params['layer1'], params['layer2'],
                      params['layer3'], params['layer4'])
    args = [
        xpad,
        _s2d_conv1_weight(params['conv1_w']), params['conv1_b'].reshape(1, -1),
        *cb(l1, 'c1_w', 'c1_b'), *cb(l1, 'c2_w', 'c2_b'),
        *cb(l2, 'c1_w', 'c1_b'), *cb(l2, 'c2_w', 'c2_b'),
        *cb(l3, 'c1_w', 'c1_b'), *cb(l3, 'c2_w', 'c2_b'),
        l3['sc_w'][:, :, 0, 0].T, l3['sc_b'].reshape(1, -1),
        *cb(l4, 'c1_w', 'c1_b'), *cb(l4, 'c2_w', 'c2_b'),
        params['fc_w'], params['fc_b'].reshape(1, -1),
    ]

    out_dim = params['fc_w'].shape[1]
    return pl.pallas_call(
        _fe_kernel,
        out_shape=jax.ShapeDtypeStruct((N, out_dim), jnp.float32),
        in_specs=[_VMEM] * len(args),
        out_specs=_VMEM,
        scratch_shapes=[
            pltpu.VMEM((N, OH + 2, OW + 2, 32), jnp.float32),   # pad buf C=32
            pltpu.VMEM((N, OH + 2, OW + 2, 64), jnp.float32),   # pad buf C=64
        ],
    )(*args)


# --------------------------- parameter init ----------------------------------

def init_params(key, in_channels):
    keys = iter(jax.random.split(key, 32))

    def conv_p(cout, cin, k):
        std = (2.0 / (cin * k * k)) ** 0.5
        w = jax.random.normal(next(keys), (cout, cin, k, k), jnp.float32) * std
        b = jax.random.normal(next(keys), (cout,), jnp.float32) * 0.01
        return w, b

    def block(cin, cout, first):
        p = {}
        p['c1_w'], p['c1_b'] = conv_p(cout, cin, 3)
        p['c2_w'], p['c2_b'] = conv_p(cout, cout, 3)
        if first:
            p['sc_w'], p['sc_b'] = conv_p(cout, cin, 1)
        return p

    params = {}
    params['conv1_w'], params['conv1_b'] = conv_p(32, in_channels, 7)
    params['layer1'] = block(32, 32, False)
    params['layer2'] = block(32, 32, False)
    params['layer3'] = block(32, 64, True)
    params['layer4'] = block(64, 64, False)
    params['fc_w'] = jax.random.normal(next(keys), (64, 512), jnp.float32) * (2.0 / 64) ** 0.5
    params['fc_b'] = jax.random.normal(next(keys), (512,), jnp.float32) * 0.01
    return params


# --------------------------- pure-JAX reference (correctness check) ----------

def _ref_conv(x, w_oihw, b, stride, pad):
    y = jax.lax.conv_general_dilated(
        x, jnp.transpose(w_oihw, (2, 3, 1, 0)),
        window_strides=(stride, stride),
        padding=[(pad, pad), (pad, pad)],
        dimension_numbers=('NHWC', 'HWIO', 'NHWC'))
    return y + b


def _ref_forward(x, params):
    def rb(x, p, first):
        out = jax.nn.relu(_ref_conv(x, p['c1_w'], p['c1_b'], 1, 1))
        out = _ref_conv(out, p['c2_w'], p['c2_b'], 1, 1)
        res = _ref_conv(x, p['sc_w'], p['sc_b'], 1, 0) if first else x
        return jax.nn.relu(out + res)

    x = jax.nn.relu(_ref_conv(x, params['conv1_w'], params['conv1_b'], 2, 3))
    x = rb(x, params['layer1'], False)
    x = rb(x, params['layer2'], False)
    x = rb(x, params['layer3'], True)
    x = rb(x, params['layer4'], False)
    x = jnp.mean(x, axis=(1, 2))
    y = x @ params['fc_w'] + params['fc_b']
    nrm = jnp.sqrt(jnp.sum(y * y, axis=1, keepdims=True))
    return y / jnp.maximum(nrm, 1e-12)


# --------------------------- main --------------------------------------------

if __name__ == "__main__":
    key = jax.random.PRNGKey(0)
    kx, kp = jax.random.split(key)

    # PyTorch input would be NCHW (2, 4, 16, 16); we use NHWC (2, 16, 16, 4).
    x = jax.random.normal(kx, (2, 16, 16, 4), jnp.float32)
    params = init_params(kp, in_channels=4)

    out = jax.block_until_ready(feature_extractor(x, params))
    assert out.shape == (2, 512)

    ref = _ref_forward(x, params)
    err = float(jnp.max(jnp.abs(out - ref)))
    assert jnp.allclose(out, ref, rtol=1e-3, atol=5e-4), err

    print("KERNEL_OK")
</pallas_src>

<mosaic_0001>
module attributes {stable_mosaic.version = 11 : i64} {
  func.func @_fe_kernel(%arg0: memref<2x11x11x16xf32, #tpu.memory_space<vmem>>, %arg1: memref<4x4x16x32xf32, #tpu.memory_space<vmem>>, %arg2: memref<1x32xf32, #tpu.memory_space<vmem>>, %arg3: memref<3x3x32x32xf32, #tpu.memory_space<vmem>>, %arg4: memref<1x32xf32, #tpu.memory_space<vmem>>, %arg5: memref<3x3x32x32xf32, #tpu.memory_space<vmem>>, %arg6: memref<1x32xf32, #tpu.memory_space<vmem>>, %arg7: memref<3x3x32x32xf32, #tpu.memory_space<vmem>>, %arg8: memref<1x32xf32, #tpu.memory_space<vmem>>, %arg9: memref<3x3x32x32xf32, #tpu.memory_space<vmem>>, %arg10: memref<1x32xf32, #tpu.memory_space<vmem>>, %arg11: memref<3x3x32x64xf32, #tpu.memory_space<vmem>>, %arg12: memref<1x64xf32, #tpu.memory_space<vmem>>, %arg13: memref<3x3x64x64xf32, #tpu.memory_space<vmem>>, %arg14: memref<1x64xf32, #tpu.memory_space<vmem>>, %arg15: memref<32x64xf32, #tpu.memory_space<vmem>>, %arg16: memref<1x64xf32, #tpu.memory_space<vmem>>, %arg17: memref<3x3x64x64xf32, #tpu.memory_space<vmem>>, %arg18: memref<1x64xf32, #tpu.memory_space<vmem>>, %arg19: memref<3x3x64x64xf32, #tpu.memory_space<vmem>>, %arg20: memref<1x64xf32, #tpu.memory_space<vmem>>, %arg21: memref<64x512xf32, #tpu.memory_space<vmem>>, %arg22: memref<1x512xf32, #tpu.memory_space<vmem>>, %arg23: memref<2x512xf32, #tpu.memory_space<vmem>>, %arg24: memref<2x10x10x32xf32, #tpu.memory_space<vmem>>, %arg25: memref<2x10x10x64xf32, #tpu.memory_space<vmem>>) attributes {dimension_semantics = [], scalar_prefetch = 0 : i64, scratch_operands = 2 : i64, tpu.core_type = #tpu.core_type<tc>} {
    %cst = arith.constant 0.000000e+00 : f32
    %0 = vector.broadcast %cst : f32 to vector<2x10x10x32xf32>
    %c0 = arith.constant 0 : index
    %c0_0 = arith.constant 0 : index
    %c0_1 = arith.constant 0 : index
    %c0_2 = arith.constant 0 : index
    %1 = vector.load %arg24[%c0, %c0_0, %c0_1, %c0_2] : memref<2x10x10x32xf32, #tpu.memory_space<vmem>>, vector<2x10x10x32xf32>
    tpu.vector_store %arg24[%c0, %c0_0, %c0_1, %c0_2], %0 {strides = array<i32>} : memref<2x10x10x32xf32, #tpu.memory_space<vmem>>, vector<2x10x10x32xf32>,
    %cst_3 = arith.constant 0.000000e+00 : f32
    %2 = vector.broadcast %cst_3 : f32 to vector<2x10x10x64xf32>
    %c0_4 = arith.constant 0 : index
    %c0_5 = arith.constant 0 : index
    %c0_6 = arith.constant 0 : index
    %c0_7 = arith.constant 0 : index
    %3 = vector.load %arg25[%c0_4, %c0_5, %c0_6, %c0_7] : memref<2x10x10x64xf32, #tpu.memory_space<vmem>>, vector<2x10x10x64xf32>
    tpu.vector_store %arg25[%c0_4, %c0_5, %c0_6, %c0_7], %2 {strides = array<i32>} : memref<2x10x10x64xf32, #tpu.memory_space<vmem>>, vector<2x10x10x64xf32>,
    %cst_8 = arith.constant 0.000000e+00 : f32
    %4 = vector.broadcast %cst_8 : f32 to vector<128x32xf32>
    %c0_9 = arith.constant 0 : index
    %c0_10 = arith.constant 0 : index
    %c0_11 = arith.constant 0 : index
    %c0_12 = arith.constant 0 : index
    %5 = vector.load %arg0[%c0_9, %c0_10, %c0_11, %c0_12] : memref<2x11x11x16xf32, #tpu.memory_space<vmem>>, vector<2x8x8x16xf32>
    %6 = vector.shape_cast %5 : vector<2x8x8x16xf32> to vector<128x16xf32>
    %c0_13 = arith.constant 0 : index
    %c0_14 = arith.constant 0 : index
    %c0_15 = arith.constant 0 : index
    %c0_16 = arith.constant 0 : index
    %7 = vector.load %arg1[%c0_13, %c0_14, %c0_15, %c0_16] : memref<4x4x16x32xf32, #tpu.memory_space<vmem>>, vector<1x1x16x32xf32>
    %8 = vector.shape_cast %7 : vector<1x1x16x32xf32> to vector<16x32xf32>
    %cst_17 = arith.constant dense<0.000000e+00> : vector<128x32xf32>
    %9 = tpu.matmul %6, %8, %cst_17 {dimension_numbers = #tpu.dot_dimension_numbers<[1], [0], [0], [1], [0, 0, 1, 1], [], []>} : vector<128x16xf32>, vector<16x32xf32>, vector<128x32xf32> -> vector<128x32xf32>
    %10 = arith.addf %4, %9 : vector<128x32xf32>
    %c0_18 = arith.constant 0 : index
    %c0_19 = arith.constant 0 : index
    %c1 = arith.constant 1 : index
    %c0_20 = arith.constant 0 : index
    %11 = vector.load %arg0[%c0_18, %c0_19, %c1, %c0_20] : memref<2x11x11x16xf32, #tpu.memory_space<vmem>>, vector<2x8x8x16xf32>
    %12 = vector.shape_cast %11 : vector<2x8x8x16xf32> to vector<128x16xf32>
    %c0_21 = arith.constant 0 : index
    %c1_22 = arith.constant 1 : index
    %c0_23 = arith.constant 0 : index
    %c0_24 = arith.constant 0 : index
    %13 = vector.load %arg1[%c0_21, %c1_22, %c0_23, %c0_24] : memref<4x4x16x32xf32, #tpu.memory_space<vmem>>, vector<1x1x16x32xf32>
    %14 = vector.shape_cast %13 : vector<1x1x16x32xf32> to vector<16x32xf32>
    %cst_25 = arith.constant dense<0.000000e+00> : vector<128x32xf32>
    %15 = tpu.matmul %12, %14, %cst_25 {dimension_numbers = #tpu.dot_dimension_numbers<[1], [0], [0], [1], [0, 0, 1, 1], [], []>} : vector<128x16xf32>, vector<16x32xf32>, vector<128x32xf32> -> vector<128x32xf32>
    %16 = arith.addf %10, %15 : vector<128x32xf32>
    %c0_26 = arith.constant 0 : index
    %c0_27 = arith.constant 0 : index
    %c2 = arith.constant 2 : index
    %c0_28 = arith.constant 0 : index
    %17 = vector.load %arg0[%c0_26, %c0_27, %c2, %c0_28] : memref<2x11x11x16xf32, #tpu.memory_space<vmem>>, vector<2x8x8x16xf32>
    %18 = vector.shape_cast %17 : vector<2x8x8x16xf32> to vector<128x16xf32>
    %c0_29 = arith.constant 0 : index
    %c2_30 = arith.constant 2 : index
    %c0_31 = arith.constant 0 : index
    %c0_32 = arith.constant 0 : index
    %19 = vector.load %arg1[%c0_29, %c2_30, %c0_31, %c0_32] : memref<4x4x16x32xf32, #tpu.memory_space<vmem>>, vector<1x1x16x32xf32>
    %20 = vector.shape_cast %19 : vector<1x1x16x32xf32> to vector<16x32xf32>
    %cst_33 = arith.constant dense<0.000000e+00> : vector<128x32xf32>
    %21 = tpu.matmul %18, %20, %cst_33 {dimension_numbers = #tpu.dot_dimension_numbers<[1], [0], [0], [1], [0, 0, 1, 1], [], []>} : vector<128x16xf32>, vector<16x32xf32>, vector<128x32xf32> -> vector<128x32xf32>
    %22 = arith.addf %16, %21 : vector<128x32xf32>
    %c0_34 = arith.constant 0 : index
    %c0_35 = arith.constant 0 : index
    %c3 = arith.constant 3 : index
    %c0_36 = arith.constant 0 : index
    %23 = vector.load %arg0[%c0_34, %c0_35, %c3, %c0_36] : memref<2x11x11x16xf32, #tpu.memory_space<vmem>>, vector<2x8x8x16xf32>
    %24 = vector.shape_cast %23 : vector<2x8x8x16xf32> to vector<128x16xf32>
    %c0_37 = arith.constant 0 : index
    %c3_38 = arith.constant 3 : index
    %c0_39 = arith.constant 0 : index
    %c0_40 = arith.constant 0 : index
    %25 = vector.load %arg1[%c0_37, %c3_38, %c0_39, %c0_40] : memref<4x4x16x32xf32, #tpu.memory_space<vmem>>, vector<1x1x16x32xf32>
    %26 = vector.shape_cast %25 : vector<1x1x16x32xf32> to vector<16x32xf32>
    %cst_41 = arith.constant dense<0.000000e+00> : vector<128x32xf32>
    %27 = tpu.matmul %24, %26, %cst_41 {dimension_numbers = #tpu.dot_dimension_numbers<[1], [0], [0], [1], [0, 0, 1, 1], [], []>} : vector<128x16xf32>, vector<16x32xf32>, vector<128x32xf32> -> vector<128x32xf32>
    %28 = arith.addf %22, %27 : vector<128x32xf32>
    %c0_42 = arith.constant 0 : index
    %c1_43 = arith.constant 1 : index
    %c0_44 = arith.constant 0 : index
    %c0_45 = arith.constant 0 : index
    %29 = vector.load %arg0[%c0_42, %c1_43, %c0_44, %c0_45] : memref<2x11x11x16xf32, #tpu.memory_space<vmem>>, vector<2x8x8x16xf32>
    %30 = vector.shape_cast %29 : vector<2x8x8x16xf32> to vector<128x16xf32>
    %c1_46 = arith.constant 1 : index
    %c0_47 = arith.constant 0 : index
    %c0_48 = arith.constant 0 : index
    %c0_49 = arith.constant 0 : index
    %31 = vector.load %arg1[%c1_46, %c0_47, %c0_48, %c0_49] : memref<4x4x16x32xf32, #tpu.memory_space<vmem>>, vector<1x1x16x32xf32>
    %32 = vector.shape_cast %31 : vector<1x1x16x32xf32> to vector<16x32xf32>
    %cst_50 = arith.constant dense<0.000000e+00> : vector<128x32xf32>
    %33 = tpu.matmul %30, %32, %cst_50 {dimension_numbers = #tpu.dot_dimension_numbers<[1], [0], [0], [1], [0, 0, 1, 1], [], []>} : vector<128x16xf32>, vector<16x32xf32>, vector<128x32xf32> -> vector<128x32xf32>
    %34 = arith.addf %28, %33 : vector<128x32xf32>
    %c0_51 = arith.constant 0 : index
    %c1_52 = arith.constant 1 : index
    %c1_53 = arith.constant 1 : index
    %c0_54 = arith.constant 0 : index
    %35 = vector.load %arg0[%c0_51, %c1_52, %c1_53, %c0_54] : memref<2x11x11x16xf32, #tpu.memory_space<vmem>>, vector<2x8x8x16xf32>
    %36 = vector.shape_cast %35 : vector<2x8x8x16xf32> to vector<128x16xf32>
    %c1_55 = arith.constant 1 : index
    %c1_56 = arith.constant 1 : index
    %c0_57 = arith.constant 0 : index
    %c0_58 = arith.constant 0 : index
    %37 = vector.load %arg1[%c1_55, %c1_56, %c0_57, %c0_58] : memref<4x4x16x32xf32, #tpu.memory_space<vmem>>, vector<1x1x16x32xf32>
    %38 = vector.shape_cast %37 : vector<1x1x16x32xf32> to vector<16x32xf32>
    %cst_59 = arith.constant dense<0.000000e+00> : vector<128x32xf32>
    %39 = tpu.matmul %36, %38, %cst_59 {dimension_numbers = #tpu.dot_dimension_numbers<[1], [0], [0], [1], [0, 0, 1, 1], [], []>} : vector<128x16xf32>, vector<16x32xf32>, vector<128x32xf32> -> vector<128x32xf32>
    %40 = arith.addf %34, %39 : vector<128x32xf32>
    %c0_60 = arith.constant 0 : index
    %c1_61 = arith.constant 1 : index
    %c2_62 = arith.constant 2 : index
    %c0_63 = arith.constant 0 : index
    %41 = vector.load %arg0[%c0_60, %c1_61, %c2_62, %c0_63] : memref<2x11x11x16xf32, #tpu.memory_space<vmem>>, vector<2x8x8x16xf32>
    %42 = vector.shape_cast %41 : vector<2x8x8x16xf32> to vector<128x16xf32>
    %c1_64 = arith.constant 1 : index
    %c2_65 = arith.constant 2 : index
    %c0_66 = arith.constant 0 : index
    %c0_67 = arith.constant 0 : index
    %43 = vector.load %arg1[%c1_64, %c2_65, %c0_66, %c0_67] : memref<4x4x16x32xf32, #tpu.memory_space<vmem>>, vector<1x1x16x32xf32>
    %44 = vector.shape_cast %43 : vector<1x1x16x32xf32> to vector<16x32xf32>
    %cst_68 = arith.constant dense<0.000000e+00> : vector<128x32xf32>
    %45 = tpu.matmul %42, %44, %cst_68 {dimension_numbers = #tpu.dot_dimension_numbers<[1], [0], [0], [1], [0, 0, 1, 1], [], []>} : vector<128x16xf32>, vector<16x32xf32>, vector<128x32xf32> -> vector<128x32xf32>
    %46 = arith.addf %40, %45 : vector<128x32xf32>
    %c0_69 = arith.constant 0 : index
    %c1_70 = arith.constant 1 : index
    %c3_71 = arith.constant 3 : index
    %c0_72 = arith.constant 0 : index
    %47 = vector.load %arg0[%c0_69, %c1_70, %c3_71, %c0_72] : memref<2x11x11x16xf32, #tpu.memory_space<vmem>>, vector<2x8x8x16xf32>
    %48 = vector.shape_cast %47 : vector<2x8x8x16xf32> to vector<128x16xf32>
    %c1_73 = arith.constant 1 : index
    %c3_74 = arith.constant 3 : index
    %c0_75 = arith.constant 0 : index
    %c0_76 = arith.constant 0 : index
    %49 = vector.load %arg1[%c1_73, %c3_74, %c0_75, %c0_76] : memref<4x4x16x32xf32, #tpu.memory_space<vmem>>, vector<1x1x16x32xf32>
    %50 = vector.shape_cast %49 : vector<1x1x16x32xf32> to vector<16x32xf32>
    %cst_77 = arith.constant dense<0.000000e+00> : vector<128x32xf32>
    %51 = tpu.matmul %48, %50, %cst_77 {dimension_numbers = #tpu.dot_dimension_numbers<[1], [0], [0], [1], [0, 0, 1, 1], [], []>} : vector<128x16xf32>, vector<16x32xf32>, vector<128x32xf32> -> vector<128x32xf32>
    %52 = arith.addf %46, %51 : vector<128x32xf32>
    %c0_78 = arith.constant 0 : index
    %c2_79 = arith.constant 2 : index
    %c0_80 = arith.constant 0 : index
    %c0_81 = arith.constant 0 : index
    %53 = vector.load %arg0[%c0_78, %c2_79, %c0_80, %c0_81] : memref<2x11x11x16xf32, #tpu.memory_space<vmem>>, vector<2x8x8x16xf32>
    %54 = vector.shape_cast %53 : vector<2x8x8x16xf32> to vector<128x16xf32>
    %c2_82 = arith.constant 2 : index
    %c0_83 = arith.constant 0 : index
    %c0_84 = arith.constant 0 : index
    %c0_85 = arith.constant 0 : index
    %55 = vector.load %arg1[%c2_82, %c0_83, %c0_84, %c0_85] : memref<4x4x16x32xf32, #tpu.memory_space<vmem>>, vector<1x1x16x32xf32>
    %56 = vector.shape_cast %55 : vector<1x1x16x32xf32> to vector<16x32xf32>
    %cst_86 = arith.constant dense<0.000000e+00> : vector<128x32xf32>
    %57 = tpu.matmul %54, %56, %cst_86 {dimension_numbers = #tpu.dot_dimension_numbers<[1], [0], [0], [1], [0, 0, 1, 1], [], []>} : vector<128x16xf32>, vector<16x32xf32>, vector<128x32xf32> -> vector<128x32xf32>
    %58 = arith.addf %52, %57 : vector<128x32xf32>
    %c0_87 = arith.constant 0 : index
    %c2_88 = arith.constant 2 : index
    %c1_89 = arith.constant 1 : index
    %c0_90 = arith.constant 0 : index
    %59 = vector.load %arg0[%c0_87, %c2_88, %c1_89, %c0_90] : memref<2x11x11x16xf32, #tpu.memory_space<vmem>>, vector<2x8x8x16xf32>
    %60 = vector.shape_cast %59 : vector<2x8x8x16xf32> to vector<128x16xf32>
    %c2_91 = arith.constant 2 : index
    %c1_92 = arith.constant 1 : index
    %c0_93 = arith.constant 0 : index
    %c0_94 = arith.constant 0 : index
    %61 = vector.load %arg1[%c2_91, %c1_92, %c0_93, %c0_94] : memref<4x4x16x32xf32, #tpu.memory_space<vmem>>, vector<1x1x16x32xf32>
    %62 = vector.shape_cast %61 : vector<1x1x16x32xf32> to vector<16x32xf32>
    %cst_95 = arith.constant dense<0.000000e+00> : vector<128x32xf32>
    %63 = tpu.matmul %60, %62, %cst_95 {dimension_numbers = #tpu.dot_dimension_numbers<[1], [0], [0], [1], [0, 0, 1, 1], [], []>} : vector<128x16xf32>, vector<16x32xf32>, vector<128x32xf32> -> vector<128x32xf32>
    %64 = arith.addf %58, %63 : vector<128x32xf32>
    %c0_96 = arith.constant 0 : index
    %c2_97 = arith.constant 2 : index
    %c2_98 = arith.constant 2 : index
    %c0_99 = arith.constant 0 : index
    %65 = vector.load %arg0[%c0_96, %c2_97, %c2_98, %c0_99] : memref<2x11x11x16xf32, #tpu.memory_space<vmem>>, vector<2x8x8x16xf32>
    %66 = vector.shape_cast %65 : vector<2x8x8x16xf32> to vector<128x16xf32>
    %c2_100 = arith.constant 2 : index
    %c2_101 = arith.constant 2 : index
    %c0_102 = arith.constant 0 : index
    %c0_103 = arith.constant 0 : index
    %67 = vector.load %arg1[%c2_100, %c2_101, %c0_102, %c0_103] : memref<4x4x16x32xf32, #tpu.memory_space<vmem>>, vector<1x1x16x32xf32>
    %68 = vector.shape_cast %67 : vector<1x1x16x32xf32> to vector<16x32xf32>
    %cst_104 = arith.constant dense<0.000000e+00> : vector<128x32xf32>
    %69 = tpu.matmul %66, %68, %cst_104 {dimension_numbers = #tpu.dot_dimension_numbers<[1], [0], [0], [1], [0, 0, 1, 1], [], []>} : vector<128x16xf32>, vector<16x32xf32>, vector<128x32xf32> -> vector<128x32xf32>
    %70 = arith.addf %64, %69 : vector<128x32xf32>
    %c0_105 = arith.constant 0 : index
    %c2_106 = arith.constant 2 : index
    %c3_107 = arith.constant 3 : index
    %c0_108 = arith.constant 0 : index
    %71 = vector.load %arg0[%c0_105, %c2_106, %c3_107, %c0_108] : memref<2x11x11x16xf32, #tpu.memory_space<vmem>>, vector<2x8x8x16xf32>
    %72 = vector.shape_cast %71 : vector<2x8x8x16xf32> to vector<128x16xf32>
    %c2_109 = arith.constant 2 : index
    %c3_110 = arith.constant 3 : index
    %c0_111 = arith.constant 0 : index
    %c0_112 = arith.constant 0 : index
    %73 = vector.load %arg1[%c2_109, %c3_110, %c0_111, %c0_112] : memref<4x4x16x32xf32, #tpu.memory_space<vmem>>, vector<1x1x16x32xf32>
    %74 = vector.shape_cast %73 : vector<1x1x16x32xf32> to vector<16x32xf32>
    %cst_113 = arith.constant dense<0.000000e+00> : vector<128x32xf32>
    %75 = tpu.matmul %72, %74, %cst_113 {dimension_numbers = #tpu.dot_dimension_numbers<[1], [0], [0], [1], [0, 0, 1, 1], [], []>} : vector<128x16xf32>, vector<16x32xf32>, vector<128x32xf32> -> vector<128x32xf32>
    %76 = arith.addf %70, %75 : vector<128x32xf32>
    %c0_114 = arith.constant 0 : index
    %c3_115 = arith.constant 3 : index
    %c0_116 = arith.constant 0 : index
    %c0_117 = arith.constant 0 : index
    %77 = vector.load %arg0[%c0_114, %c3_115, %c0_116, %c0_117] : memref<2x11x11x16xf32, #tpu.memory_space<vmem>>, vector<2x8x8x16xf32>
    %78 = vector.shape_cast %77 : vector<2x8x8x16xf32> to vector<128x16xf32>
    %c3_118 = arith.constant 3 : index
    %c0_119 = arith.constant 0 : index
    %c0_120 = arith.constant 0 : index
    %c0_121 = arith.constant 0 : index
    %79 = vector.load %arg1[%c3_118, %c0_119, %c0_120, %c0_121] : memref<4x4x16x32xf32, #tpu.memory_space<vmem>>, vector<1x1x16x32xf32>
    %80 = vector.shape_cast %79 : vector<1x1x16x32xf32> to vector<16x32xf32>
    %cst_122 = arith.constant dense<0.000000e+00> : vector<128x32xf32>
    %81 = tpu.matmul %78, %80, %cst_122 {dimension_numbers = #tpu.dot_dimension_numbers<[1], [0], [0], [1], [0, 0, 1, 1], [], []>} : vector<128x16xf32>, vector<16x32xf32>, vector<128x32xf32> -> vector<128x32xf32>
    %82 = arith.addf %76, %81 : vector<128x32xf32>
    %c0_123 = arith.constant 0 : index
    %c3_124 = arith.constant 3 : index
    %c1_125 = arith.constant 1 : index
    %c0_126 = arith.constant 0 : index
    %83 = vector.load %arg0[%c0_123, %c3_124, %c1_125, %c0_126] : memref<2x11x11x16xf32, #tpu.memory_space<vmem>>, vector<2x8x8x16xf32>
    %84 = vector.shape_cast %83 : vector<2x8x8x16xf32> to vector<128x16xf32>
    %c3_127 = arith.constant 3 : index
    %c1_128 = arith.constant 1 : index
    %c0_129 = arith.constant 0 : index
    %c0_130 = arith.constant 0 : index
    %85 = vector.load %arg1[%c3_127, %c1_128, %c0_129, %c0_130] : memref<4x4x16x32xf32, #tpu.memory_space<vmem>>, vector<1x1x16x32xf32>
    %86 = vector.shape_cast %85 : vector<1x1x16x32xf32> to vector<16x32xf32>
    %cst_131 = arith.constant dense<0.000000e+00> : vector<128x32xf32>
    %87 = tpu.matmul %84, %86, %cst_131 {dimension_numbers = #tpu.dot_dimension_numbers<[1], [0], [0], [1], [0, 0, 1, 1], [], []>} : vector<128x16xf32>, vector<16x32xf32>, vector<128x32xf32> -> vector<128x32xf32>
    %88 = arith.addf %82, %87 : vector<128x32xf32>
    %c0_132 = arith.constant 0 : index
    %c3_133 = arith.constant 3 : index
    %c2_134 = arith.constant 2 : index
    %c0_135 = arith.constant 0 : index
    %89 = vector.load %arg0[%c0_132, %c3_133, %c2_134, %c0_135] : memref<2x11x11x16xf32, #tpu.memory_space<vmem>>, vector<2x8x8x16xf32>
    %90 = vector.shape_cast %89 : vector<2x8x8x16xf32> to vector<128x16xf32>
    %c3_136 = arith.constant 3 : index
    %c2_137 = arith.constant 2 : index
    %c0_138 = arith.constant 0 : index
    %c0_139 = arith.constant 0 : index
    %91 = vector.load %arg1[%c3_136, %c2_137, %c0_138, %c0_139] : memref<4x4x16x32xf32, #tpu.memory_space<vmem>>, vector<1x1x16x32xf32>
    %92 = vector.shape_cast %91 : vector<1x1x16x32xf32> to vector<16x32xf32>
    %cst_140 = arith.constant dense<0.000000e+00> : vector<128x32xf32>
    %93 = tpu.matmul %90, %92, %cst_140 {dimension_numbers = #tpu.dot_dimension_numbers<[1], [0], [0], [1], [0, 0, 1, 1], [], []>} : vector<128x16xf32>, vector<16x32xf32>, vector<128x32xf32> -> vector<128x32xf32>
    %94 = arith.addf %88, %93 : vector<128x32xf32>
    %c0_141 = arith.constant 0 : index
    %c3_142 = arith.constant 3 : index
    %c3_143 = arith.constant 3 : index
    %c0_144 = arith.constant 0 : index
    %95 = vector.load %arg0[%c0_141, %c3_142, %c3_143, %c0_144] : memref<2x11x11x16xf32, #tpu.memory_space<vmem>>, vector<2x8x8x16xf32>
    %96 = vector.shape_cast %95 : vector<2x8x8x16xf32> to vector<128x16xf32>
    %c3_145 = arith.constant 3 : index
    %c3_146 = arith.constant 3 : index
    %c0_147 = arith.constant 0 : index
    %c0_148 = arith.constant 0 : index
    %97 = vector.load %arg1[%c3_145, %c3_146, %c0_147, %c0_148] : memref<4x4x16x32xf32, #tpu.memory_space<vmem>>, vector<1x1x16x32xf32>
    %98 = vector.shape_cast %97 : vector<1x1x16x32xf32> to vector<16x32xf32>
    %cst_149 = arith.constant dense<0.000000e+00> : vector<128x32xf32>
    %99 = tpu.matmul %96, %98, %cst_149 {dimension_numbers = #tpu.dot_dimension_numbers<[1], [0], [0], [1], [0, 0, 1, 1], [], []>} : vector<128x16xf32>, vector<16x32xf32>, vector<128x32xf32> -> vector<128x32xf32>
    %100 = arith.addf %94, %99 : vector<128x32xf32>
    %c0_150 = arith.constant 0 : index
    %c0_151 = arith.constant 0 : index
    %101 = vector.load %arg2[%c0_150, %c0_151] : memref<1x32xf32, #tpu.memory_space<vmem>>, vector<1x32xf32>
    %102 = vector.broadcast %101 : vector<1x32xf32> to vector<128x32xf32>
    %103 = arith.addf %100, %102 : vector<128x32xf32>
    %cst_152 = arith.constant 0.000000e+00 : f32
    %104 = vector.broadcast %cst_152 : f32 to vector<128x32xf32>
    %105 = arith.maximumf %103, %104 : vector<128x32xf32>
    %106 = vector.shape_cast %105 : vector<128x32xf32> to vector<2x8x8x32xf32>
    %c0_153 = arith.constant 0 : index
    %c1_154 = arith.constant 1 : index
    %c1_155 = arith.constant 1 : index
    %c0_156 = arith.constant 0 : index
    %107 = vector.load %arg24[%c0_153, %c1_154, %c1_155, %c0_156] : memref<2x10x10x32xf32, #tpu.memory_space<vmem>>, vector<2x8x8x32xf32>
    tpu.vector_store %arg24[%c0_153, %c1_154, %c1_155, %c0_156], %106 {strides = array<i32>} : memref<2x10x10x32xf32, #tpu.memory_space<vmem>>, vector<2x8x8x32xf32>,
    %cst_157 = arith.constant 0.000000e+00 : f32
    %108 = vector.broadcast %cst_157 : f32 to vector<128x32xf32>
    %c0_158 = arith.constant 0 : index
    %c0_159 = arith.constant 0 : index
    %c0_160 = arith.constant 0 : index
    %c0_161 = arith.constant 0 : index
    %109 = vector.load %arg24[%c0_158, %c0_159, %c0_160, %c0_161] : memref<2x10x10x32xf32, #tpu.memory_space<vmem>>, vector<2x8x8x32xf32>
    %110 = vector.shape_cast %109 : vector<2x8x8x32xf32> to vector<128x32xf32>
    %c0_162 = arith.constant 0 : index
    %c0_163 = arith.constant 0 : index
    %c0_164 = arith.constant 0 : index
    %c0_165 = arith.constant 0 : index
    %111 = vector.load %arg3[%c0_162, %c0_163, %c0_164, %c0_165] : memref<3x3x32x32xf32, #tpu.memory_space<vmem>>, vector<1x1x32x32xf32>
    %112 = vector.shape_cast %111 : vector<1x1x32x32xf32> to vector<32x32xf32>
    %cst_166 = arith.constant dense<0.000000e+00> : vector<128x32xf32>
    %113 = tpu.matmul %110, %112, %cst_166 {dimension_numbers = #tpu.dot_dimension_numbers<[1], [0], [0], [1], [0, 0, 1, 1], [], []>} : vector<128x32xf32>, vector<32x32xf32>, vector<128x32xf32> -> vector<128x32xf32>
    %114 = arith.addf %108, %113 : vector<128x32xf32>
    %c0_167 = arith.constant 0 : index
    %c0_168 = arith.constant 0 : index
    %c1_169 = arith.constant 1 : index
    %c0_170 = arith.constant 0 : index
    %115 = vector.load %arg24[%c0_167, %c0_168, %c1_169, %c0_170] : memref<2x10x10x32xf32, #tpu.memory_space<vmem>>, vector<2x8x8x32xf32>
    %116 = vector.shape_cast %115 : vector<2x8x8x32xf32> to vector<128x32xf32>
    %c0_171 = arith.constant 0 : index
    %c1_172 = arith.constant 1 : index
    %c0_173 = arith.constant 0 : index
    %c0_174 = arith.constant 0 : index
    %117 = vector.load %arg3[%c0_171, %c1_172, %c0_173, %c0_174] : memref<3x3x32x32xf32, #tpu.memory_space<vmem>>, vector<1x1x32x32xf32>
    %118 = vector.shape_cast %117 : vector<1x1x32x32xf32> to vector<32x32xf32>
    %cst_175 = arith.constant dense<0.000000e+00> : vector<128x32xf32>
    %119 = tpu.matmul %116, %118, %cst_175 {dimension_numbers = #tpu.dot_dimension_numbers<[1], [0], [0], [1], [0, 0, 1, 1], [], []>} : vector<128x32xf32>, vector<32x32xf32>, vector<128x32xf32> -> vector<128x32xf32>
    %120 = arith.addf %114, %119 : vector<128x32xf32>
    %c0_176 = arith.constant 0 : index
    %c0_177 = arith.constant 0 : index
    %c2_178 = arith.constant 2 : index
    %c0_179 = arith.constant 0 : index
    %121 = vector.load %arg24[%c0_176, %c0_177, %c2_178, %c0_179] : memref<2x10x10x32xf32, #tpu.memory_space<vmem>>, vector<2x8x8x32xf32>
    %122 = vector.shape_cast %121 : vector<2x8x8x32xf32> to vector<128x32xf32>
    %c0_180 = arith.constant 0 : index
    %c2_181 = arith.constant 2 : index
    %c0_182 = arith.constant 0 : index
    %c0_183 = arith.constant 0 : index
    %123 = vector.load %arg3[%c0_180, %c2_181, %c0_182, %c0_183] : memref<3x3x32x32xf32, #tpu.memory_space<vmem>>, vector<1x1x32x32xf32>
    %124 = vector.shape_cast %123 : vector<1x1x32x32xf32> to vector<32x32xf32>
    %cst_184 = arith.constant dense<0.000000e+00> : vector<128x32xf32>
    %125 = tpu.matmul %122, %124, %cst_184 {dimension_numbers = #tpu.dot_dimension_numbers<[1], [0], [0], [1], [0, 0, 1, 1], [], []>} : vector<128x32xf32>, vector<32x32xf32>, vector<128x32xf32> -> vector<128x32xf32>
    %126 = arith.addf %120, %125 : vector<128x32xf32>
    %c0_185 = arith.constant 0 : index
    %c1_186 = arith.constant 1 : index
    %c0_187 = arith.constant 0 : index
    %c0_188 = arith.constant 0 : index
    %127 = vector.load %arg24[%c0_185, %c1_186, %c0_187, %c0_188] : memref<2x10x10x32xf32, #tpu.memory_space<vmem>>, vector<2x8x8x32xf32>
    %128 = vector.shape_cast %127 : vector<2x8x8x32xf32> to vector<128x32xf32>
    %c1_189 = arith.constant 1 : index
    %c0_190 = arith.constant 0 : index
    %c0_191 = arith.constant 0 : index
    %c0_192 = arith.constant 0 : index
    %129 = vector.load %arg3[%c1_189, %c0_190, %c0_191, %c0_192] : memref<3x3x32x32xf32, #tpu.memory_space<vmem>>, vector<1x1x32x32xf32>
    %130 = vector.shape_cast %129 : vector<1x1x32x32xf32> to vector<32x32xf32>
    %cst_193 = arith.constant dense<0.000000e+00> : vector<128x32xf32>
    %131 = tpu.matmul %128, %130, %cst_193 {dimension_numbers = #tpu.dot_dimension_numbers<[1], [0], [0], [1], [0, 0, 1, 1], [], []>} : vector<128x32xf32>, vector<32x32xf32>, vector<128x32xf32> -> vector<128x32xf32>
    %132 = arith.addf %126, %131 : vector<128x32xf32>
    %c0_194 = arith.constant 0 : index
    %c1_195 = arith.constant 1 : index
    %c1_196 = arith.constant 1 : index
    %c0_197 = arith.constant 0 : index
    %133 = vector.load %arg24[%c0_194, %c1_195, %c1_196, %c0_197] : memref<2x10x10x32xf32, #tpu.memory_space<vmem>>, vector<2x8x8x32xf32>
    %134 = vector.shape_cast %133 : vector<2x8x8x32xf32> to vector<128x32xf32>
    %c1_198 = arith.constant 1 : index
    %c1_199 = arith.constant 1 : index
    %c0_200 = arith.constant 0 : index
    %c0_201 = arith.constant 0 : index
    %135 = vector.load %arg3[%c1_198, %c1_199, %c0_200, %c0_201] : memref<3x3x32x32xf32, #tpu.memory_space<vmem>>, vector<1x1x32x32xf32>
    %136 = vector.shape_cast %135 : vector<1x1x32x32xf32> to vector<32x32xf32>
    %cst_202 = arith.constant dense<0.000000e+00> : vector<128x32xf32>
    %137 = tpu.matmul %134, %136, %cst_202 {dimension_numbers = #tpu.dot_dimension_numbers<[1], [0], [0], [1], [0, 0, 1, 1], [], []>} : vector<128x32xf32>, vector<32x32xf32>, vector<128x32xf32> -> vector<128x32xf32>
    %138 = arith.addf %132, %137 : vector<128x32xf32>
    %c0_203 = arith.constant 0 : index
    %c1_204 = arith.constant 1 : index
    %c2_205 = arith.constant 2 : index
    %c0_206 = arith.constant 0 : index
    %139 = vector.load %arg24[%c0_203, %c1_204, %c2_205, %c0_206] : memref<2x10x10x32xf32, #tpu.memory_space<vmem>>, vector<2x8x8x32xf32>
    %140 = vector.shape_cast %139 : vector<2x8x8x32xf32> to vector<128x32xf32>
    %c1_207 = arith.constant 1 : index
    %c2_208 = arith.constant 2 : index
    %c0_209 = arith.constant 0 : index
    %c0_210 = arith.constant 0 : index
    %141 = vector.load %arg3[%c1_207, %c2_208, %c0_209, %c0_210] : memref<3x3x32x32xf32, #tpu.memory_space<vmem>>, vector<1x1x32x32xf32>
    %142 = vector.shape_cast %141 : vector<1x1x32x32xf32> to vector<32x32xf32>
    %cst_211 = arith.constant dense<0.000000e+00> : vector<128x32xf32>
    %143 = tpu.matmul %140, %142, %cst_211 {dimension_numbers = #tpu.dot_dimension_numbers<[1], [0], [0], [1], [0, 0, 1, 1], [], []>} : vector<128x32xf32>, vector<32x32xf32>, vector<128x32xf32> -> vector<128x32xf32>
    %144 = arith.addf %138, %143 : vector<128x32xf32>
    %c0_212 = arith.constant 0 : index
    %c2_213 = arith.constant 2 : index
    %c0_214 = arith.constant 0 : index
    %c0_215 = arith.constant 0 : index
    %145 = vector.load %arg24[%c0_212, %c2_213, %c0_214, %c0_215] : memref<2x10x10x32xf32, #tpu.memory_space<vmem>>, vector<2x8x8x32xf32>
    %146 = vector.shape_cast %145 : vector<2x8x8x32xf32> to vector<128x32xf32>
    %c2_216 = arith.constant 2 : index
    %c0_217 = arith.constant 0 : index
    %c0_218 = arith.constant 0 : index
    %c0_219 = arith.constant 0 : index
    %147 = vector.load %arg3[%c2_216, %c0_217, %c0_218, %c0_219] : memref<3x3x32x32xf32, #tpu.memory_space<vmem>>, vector<1x1x32x32xf32>
    %148 = vector.shape_cast %147 : vector<1x1x32x32xf32> to vector<32x32xf32>
    %cst_220 = arith.constant dense<0.000000e+00> : vector<128x32xf32>
    %149 = tpu.matmul %146, %148, %cst_220 {dimension_numbers = #tpu.dot_dimension_numbers<[1], [0], [0], [1], [0, 0, 1, 1], [], []>} : vector<128x32xf32>, vector<32x32xf32>, vector<128x32xf32> -> vector<128x32xf32>
    %150 = arith.addf %144, %149 : vector<128x32xf32>
    %c0_221 = arith.constant 0 : index
    %c2_222 = arith.constant 2 : index
    %c1_223 = arith.constant 1 : index
    %c0_224 = arith.constant 0 : index
    %151 = vector.load %arg24[%c0_221, %c2_222, %c1_223, %c0_224] : memref<2x10x10x32xf32, #tpu.memory_space<vmem>>, vector<2x8x8x32xf32>
    %152 = vector.shape_cast %151 : vector<2x8x8x32xf32> to vector<128x32xf32>
    %c2_225 = arith.constant 2 : index
    %c1_226 = arith.constant 1 : index
    %c0_227 = arith.constant 0 : index
    %c0_228 = arith.constant 0 : index
    %153 = vector.load %arg3[%c2_225, %c1_226, %c0_227, %c0_228] : memref<3x3x32x32xf32, #tpu.memory_space<vmem>>, vector<1x1x32x32xf32>
    %154 = vector.shape_cast %153 : vector<1x1x32x32xf32> to vector<32x32xf32>
    %cst_229 = arith.constant dense<0.000000e+00> : vector<128x32xf32>
    %155 = tpu.matmul %152, %154, %cst_229 {dimension_numbers = #tpu.dot_dimension_numbers<[1], [0], [0], [1], [0, 0, 1, 1], [], []>} : vector<128x32xf32>, vector<32x32xf32>, vector<128x32xf32> -> vector<128x32xf32>
    %156 = arith.addf %150, %155 : vector<128x32xf32>
    %c0_230 = arith.constant 0 : index
    %c2_231 = arith.constant 2 : index
    %c2_232 = arith.constant 2 : index
    %c0_233 = arith.constant 0 : index
    %157 = vector.load %arg24[%c0_230, %c2_231, %c2_232, %c0_233] : memref<2x10x10x32xf32, #tpu.memory_space<vmem>>, vector<2x8x8x32xf32>
    %158 = vector.shape_cast %157 : vector<2x8x8x32xf32> to vector<128x32xf32>
    %c2_234 = arith.constant 2 : index
    %c2_235 = arith.constant 2 : index
    %c0_236 = arith.constant 0 : index
    %c0_237 = arith.constant 0 : index
    %159 = vector.load %arg3[%c2_234, %c2_235, %c0_236, %c0_237] : memref<3x3x32x32xf32, #tpu.memory_space<vmem>>, vector<1x1x32x32xf32>
    %160 = vector.shape_cast %159 : vector<1x1x32x32xf32> to vector<32x32xf32>
    %cst_238 = arith.constant dense<0.000000e+00> : vector<128x32xf32>
    %161 = tpu.matmul %158, %160, %cst_238 {dimension_numbers = #tpu.dot_dimension_numbers<[1], [0], [0], [1], [0, 0, 1, 1], [], []>} : vector<128x32xf32>, vector<32x32xf32>, vector<128x32xf32> -> vector<128x32xf32>
    %162 = arith.addf %156, %161 : vector<128x32xf32>
    %c0_239 = arith.constant 0 : index
    %c0_240 = arith.constant 0 : index
    %163 = vector.load %arg4[%c0_239, %c0_240] : memref<1x32xf32, #tpu.memory_space<vmem>>, vector<1x32xf32>
    %164 = vector.broadcast %163 : vector<1x32xf32> to vector<128x32xf32>
    %165 = arith.addf %162, %164 : vector<128x32xf32>
    %cst_241 = arith.constant 0.000000e+00 : f32
    %166 = vector.broadcast %cst_241 : f32 to vector<128x32xf32>
    %167 = arith.maximumf %165, %166 : vector<128x32xf32>
    %168 = vector.shape_cast %167 : vector<128x32xf32> to vector<2x8x8x32xf32>
    %c0_242 = arith.constant 0 : index
    %c1_243 = arith.constant 1 : index
    %c1_244 = arith.constant 1 : index
    %c0_245 = arith.constant 0 : index
    %169 = vector.load %arg24[%c0_242, %c1_243, %c1_244, %c0_245] : memref<2x10x10x32xf32, #tpu.memory_space<vmem>>, vector<2x8x8x32xf32>
    tpu.vector_store %arg24[%c0_242, %c1_243, %c1_244, %c0_245], %168 {strides = array<i32>} : memref<2x10x10x32xf32, #tpu.memory_space<vmem>>, vector<2x8x8x32xf32>,
    %cst_246 = arith.constant 0.000000e+00 : f32
    %170 = vector.broadcast %cst_246 : f32 to vector<128x32xf32>
    %c0_247 = arith.constant 0 : index
    %c0_248 = arith.constant 0 : index
    %c0_249 = arith.constant 0 : index
    %c0_250 = arith.constant 0 : index
    %171 = vector.load %arg24[%c0_247, %c0_248, %c0_249, %c0_250] : memref<2x10x10x32xf32, #tpu.memory_space<vmem>>, vector<2x8x8x32xf32>
    %172 = vector.shape_cast %171 : vector<2x8x8x32xf32> to vector<128x32xf32>
    %c0_251 = arith.constant 0 : index
    %c0_252 = arith.constant 0 : index
    %c0_253 = arith.constant 0 : index
    %c0_254 = arith.constant 0 : index
    %173 = vector.load %arg5[%c0_251, %c0_252, %c0_253, %c0_254] : memref<3x3x32x32xf32, #tpu.memory_space<vmem>>, vector<1x1x32x32xf32>
    %174 = vector.shape_cast %173 : vector<1x1x32x32xf32> to vector<32x32xf32>
    %cst_255 = arith.constant dense<0.000000e+00> : vector<128x32xf32>
    %175 = tpu.matmul %172, %174, %cst_255 {dimension_numbers = #tpu.dot_dimension_numbers<[1], [0], [0], [1], [0, 0, 1, 1], [], []>} : vector<128x32xf32>, vector<32x32xf32>, vector<128x32xf32> -> vector<128x32xf32>
    %176 = arith.addf %170, %175 : vector<128x32xf32>
    %c0_256 = arith.constant 0 : index
    %c0_257 = arith.constant 0 : index
    %c1_258 = arith.constant 1 : index
    %c0_259 = arith.constant 0 : index
    %177 = vector.load %arg24[%c0_256, %c0_257, %c1_258, %c0_259] : memref<2x10x10x32xf32, #tpu.memory_space<vmem>>, vector<2x8x8x32xf32>
    %178 = vector.shape_cast %177 : vector<2x8x8x32xf32> to vector<128x32xf32>
    %c0_260 = arith.constant 0 : index
    %c1_261 = arith.constant 1 : index
    %c0_262 = arith.constant 0 : index
    %c0_263 = arith.constant 0 : index
    %179 = vector.load %arg5[%c0_260, %c1_261, %c0_262, %c0_263] : memref<3x3x32x32xf32, #tpu.memory_space<vmem>>, vector<1x1x32x32xf32>
    %180 = vector.shape_cast %179 : vector<1x1x32x32xf32> to vector<32x32xf32>
    %cst_264 = arith.constant dense<0.000000e+00> : vector<128x32xf32>
    %181 = tpu.matmul %178, %180, %cst_264 {dimension_numbers = #tpu.dot_dimension_numbers<[1], [0], [0], [1], [0, 0, 1, 1], [], []>} : vector<128x32xf32>, vector<32x32xf32>, vector<128x32xf32> -> vector<128x32xf32>
    %182 = arith.addf %176, %181 : vector<128x32xf32>
    %c0_265 = arith.constant 0 : index
    %c0_266 = arith.constant 0 : index
    %c2_267 = arith.constant 2 : index
    %c0_268 = arith.constant 0 : index
    %183 = vector.load %arg24[%c0_265, %c0_266, %c2_267, %c0_268] : memref<2x10x10x32xf32, #tpu.memory_space<vmem>>, vector<2x8x8x32xf32>
    %184 = vector.shape_cast %183 : vector<2x8x8x32xf32> to vector<128x32xf32>
    %c0_269 = arith.constant 0 : index
    %c2_270 = arith.constant 2 : index
    %c0_271 = arith.constant 0 : index
    %c0_272 = arith.constant 0 : index
    %185 = vector.load %arg5[%c0_269, %c2_270, %c0_271, %c0_272] : memref<3x3x32x32xf32, #tpu.memory_space<vmem>>, vector<1x1x32x32xf32>
    %186 = vector.shape_cast %185 : vector<1x1x32x32xf32> to vector<32x32xf32>
    %cst_273 = arith.constant dense<0.000000e+00> : vector<128x32xf32>
    %187 = tpu.matmul %184, %186, %cst_273 {dimension_numbers = #tpu.dot_dimension_numbers<[1], [0], [0], [1], [0, 0, 1, 1], [], []>} : vector<128x32xf32>, vector<32x32xf32>, vector<128x32xf32> -> vector<128x32xf32>
    %188 = arith.addf %182, %187 : vector<128x32xf32>
    %c0_274 = arith.constant 0 : index
    %c1_275 = arith.constant 1 : index
    %c0_276 = arith.constant 0 : index
    %c0_277 = arith.constant 0 : index
    %189 = vector.load %arg24[%c0_274, %c1_275, %c0_276, %c0_277] : memref<2x10x10x32xf32, #tpu.memory_space<vmem>>, vector<2x8x8x32xf32>
    %190 = vector.shape_cast %189 : vector<2x8x8x32xf32> to vector<128x32xf32>
    %c1_278 = arith.constant 1 : index
    %c0_279 = arith.constant 0 : index
    %c0_280 = arith.constant 0 : index
    %c0_281 = arith.constant 0 : index
    %191 = vector.load %arg5[%c1_278, %c0_279, %c0_280, %c0_281] : memref<3x3x32x32xf32, #tpu.memory_space<vmem>>, vector<1x1x32x32xf32>
    %192 = vector.shape_cast %191 : vector<1x1x32x32xf32> to vector<32x32xf32>
    %cst_282 = arith.constant dense<0.000000e+00> : vector<128x32xf32>
    %193 = tpu.matmul %190, %192, %cst_282 {dimension_numbers = #tpu.dot_dimension_numbers<[1], [0], [0], [1], [0, 0, 1, 1], [], []>} : vector<128x32xf32>, vector<32x32xf32>, vector<128x32xf32> -> vector<128x32xf32>
    %194 = arith.addf %188, %193 : vector<128x32xf32>
    %c0_283 = arith.constant 0 : index
    %c1_284 = arith.constant 1 : index
    %c1_285 = arith.constant 1 : index
    %c0_286 = arith.constant 0 : index
    %195 = vector.load %arg24[%c0_283, %c1_284, %c1_285, %c0_286] : memref<2x10x10x32xf32, #tpu.memory_space<vmem>>, vector<2x8x8x32xf32>
    %196 = vector.shape_cast %195 : vector<2x8x8x32xf32> to vector<128x32xf32>
    %c1_287 = arith.constant 1 : index
    %c1_288 = arith.constant 1 : index
    %c0_289 = arith.constant 0 : index
    %c0_290 = arith.constant 0 : index
    %197 = vector.load %arg5[%c1_287, %c1_288, %c0_289, %c0_290] : memref<3x3x32x32xf32, #tpu.memory_space<vmem>>, vector<1x1x32x32xf32>
    %198 = vector.shape_cast %197 : vector<1x1x32x32xf32> to vector<32x32xf32>
    %cst_291 = arith.constant dense<0.000000e+00> : vector<128x32xf32>
    %199 = tpu.matmul %196, %198, %cst_291 {dimension_numbers = #tpu.dot_dimension_numbers<[1], [0], [0], [1], [0, 0, 1, 1], [], []>} : vector<128x32xf32>, vector<32x32xf32>, vector<128x32xf32> -> vector<128x32xf32>
    %200 = arith.addf %194, %199 : vector<128x32xf32>
    %c0_292 = arith.constant 0 : index
    %c1_293 = arith.constant 1 : index
    %c2_294 = arith.constant 2 : index
    %c0_295 = arith.constant 0 : index
    %201 = vector.load %arg24[%c0_292, %c1_293, %c2_294, %c0_295] : memref<2x10x10x32xf32, #tpu.memory_space<vmem>>, vector<2x8x8x32xf32>
    %202 = vector.shape_cast %201 : vector<2x8x8x32xf32> to vector<128x32xf32>
    %c1_296 = arith.constant 1 : index
    %c2_297 = arith.constant 2 : index
    %c0_298 = arith.constant 0 : index
    %c0_299 = arith.constant 0 : index
    %203 = vector.load %arg5[%c1_296, %c2_297, %c0_298, %c0_299] : memref<3x3x32x32xf32, #tpu.memory_space<vmem>>, vector<1x1x32x32xf32>
    %204 = vector.shape_cast %203 : vector<1x1x32x32xf32> to vector<32x32xf32>
    %cst_300 = arith.constant dense<0.000000e+00> : vector<128x32xf32>
    %205 = tpu.matmul %202, %204, %cst_300 {dimension_numbers = #tpu.dot_dimension_numbers<[1], [0], [0], [1], [0, 0, 1, 1], [], []>} : vector<128x32xf32>, vector<32x32xf32>, vector<128x32xf32> -> vector<128x32xf32>
    %206 = arith.addf %200, %205 : vector<128x32xf32>
    %c0_301 = arith.constant 0 : index
    %c2_302 = arith.constant 2 : index
    %c0_303 = arith.constant 0 : index
    %c0_304 = arith.constant 0 : index
    %207 = vector.load %arg24[%c0_301, %c2_302, %c0_303, %c0_304] : memref<2x10x10x32xf32, #tpu.memory_space<vmem>>, vector<2x8x8x32xf32>
    %208 = vector.shape_cast %207 : vector<2x8x8x32xf32> to vector<128x32xf32>
    %c2_305 = arith.constant 2 : index
    %c0_306 = arith.constant 0 : index
    %c0_307 = arith.constant 0 : index
    %c0_308 = arith.constant 0 : index
    %209 = vector.load %arg5[%c2_305, %c0_306, %c0_307, %c0_308] : memref<3x3x32x32xf32, #tpu.memory_space<vmem>>, vector<1x1x32x32xf32>
    %210 = vector.shape_cast %209 : vector<1x1x32x32xf32> to vector<32x32xf32>
    %cst_309 = arith.constant dense<0.000000e+00> : vector<128x32xf32>
    %211 = tpu.matmul %208, %210, %cst_309 {dimension_numbers = #tpu.dot_dimension_numbers<[1], [0], [0], [1], [0, 0, 1, 1], [], []>} : vector<128x32xf32>, vector<32x32xf32>, vector<128x32xf32> -> vector<128x32xf32>
    %212 = arith.addf %206, %211 : vector<128x32xf32>
    %c0_310 = arith.constant 0 : index
    %c2_311 = arith.constant 2 : index
    %c1_312 = arith.constant 1 : index
    %c0_313 = arith.constant 0 : index
    %213 = vector.load %arg24[%c0_310, %c2_311, %c1_312, %c0_313] : memref<2x10x10x32xf32, #tpu.memory_space<vmem>>, vector<2x8x8x32xf32>
    %214 = vector.shape_cast %213 : vector<2x8x8x32xf32> to vector<128x32xf32>
    %c2_314 = arith.constant 2 : index
    %c1_315 = arith.constant 1 : index
    %c0_316 = arith.constant 0 : index
    %c0_317 = arith.constant 0 : index
    %215 = vector.load %arg5[%c2_314, %c1_315, %c0_316, %c0_317] : memref<3x3x32x32xf32, #tpu.memory_space<vmem>>, vector<1x1x32x32xf32>
    %216 = vector.shape_cast %215 : vector<1x1x32x32xf32> to vector<32x32xf32>
    %cst_318 = arith.constant dense<0.000000e+00> : vector<128x32xf32>
    %217 = tpu.matmul %214, %216, %cst_318 {dimension_numbers = #tpu.dot_dimension_numbers<[1], [0], [0], [1], [0, 0, 1, 1], [], []>} : vector<128x32xf32>, vector<32x32xf32>, vector<128x32xf32> -> vector<128x32xf32>
    %218 = arith.addf %212, %217 : vector<128x32xf32>
    %c0_319 = arith.constant 0 : index
    %c2_320 = arith.constant 2 : index
    %c2_321 = arith.constant 2 : index
    %c0_322 = arith.constant 0 : index
    %219 = vector.load %arg24[%c0_319, %c2_320, %c2_321, %c0_322] : memref<2x10x10x32xf32, #tpu.memory_space<vmem>>, vector<2x8x8x32xf32>
    %220 = vector.shape_cast %219 : vector<2x8x8x32xf32> to vector<128x32xf32>
    %c2_323 = arith.constant 2 : index
    %c2_324 = arith.constant 2 : index
    %c0_325 = arith.constant 0 : index
    %c0_326 = arith.constant 0 : index
    %221 = vector.load %arg5[%c2_323, %c2_324, %c0_325, %c0_326] : memref<3x3x32x32xf32, #tpu.memory_space<vmem>>, vector<1x1x32x32xf32>
    %222 = vector.shape_cast %221 : vector<1x1x32x32xf32> to vector<32x32xf32>
    %cst_327 = arith.constant dense<0.000000e+00> : vector<128x32xf32>
    %223 = tpu.matmul %220, %222, %cst_327 {dimension_numbers = #tpu.dot_dimension_numbers<[1], [0], [0], [1], [0, 0, 1, 1], [], []>} : vector<128x32xf32>, vector<32x32xf32>, vector<128x32xf32> -> vector<128x32xf32>
    %224 = arith.addf %218, %223 : vector<128x32xf32>
    %c0_328 = arith.constant 0 : index
    %c0_329 = arith.constant 0 : index
    %225 = vector.load %arg6[%c0_328, %c0_329] : memref<1x32xf32, #tpu.memory_space<vmem>>, vector<1x32xf32>
    %226 = vector.broadcast %225 : vector<1x32xf32> to vector<128x32xf32>
    %227 = arith.addf %224, %226 : vector<128x32xf32>
    %228 = arith.addf %227, %105 : vector<128x32xf32>
    %cst_330 = arith.constant 0.000000e+00 : f32
    %229 = vector.broadcast %cst_330 : f32 to vector<128x32xf32>
    %230 = arith.maximumf %228, %229 : vector<128x32xf32>
    %231 = vector.shape_cast %230 : vector<128x32xf32> to vector<2x8x8x32xf32>
    %c0_331 = arith.constant 0 : index
    %c1_332 = arith.constant 1 : index
    %c1_333 = arith.constant 1 : index
    %c0_334 = arith.constant 0 : index
    %232 = vector.load %arg24[%c0_331, %c1_332, %c1_333, %c0_334] : memref<2x10x10x32xf32, #tpu.memory_space<vmem>>, vector<2x8x8x32xf32>
    tpu.vector_store %arg24[%c0_331, %c1_332, %c1_333, %c0_334], %231 {strides = array<i32>} : memref<2x10x10x32xf32, #tpu.memory_space<vmem>>, vector<2x8x8x32xf32>,
    %cst_335 = arith.constant 0.000000e+00 : f32
    %233 = vector.broadcast %cst_335 : f32 to vector<128x32xf32>
    %c0_336 = arith.constant 0 : index
    %c0_337 = arith.constant 0 : index
    %c0_338 = arith.constant 0 : index
    %c0_339 = arith.constant 0 : index
    %234 = vector.load %arg24[%c0_336, %c0_337, %c0_338, %c0_339] : memref<2x10x10x32xf32, #tpu.memory_space<vmem>>, vector<2x8x8x32xf32>
    %235 = vector.shape_cast %234 : vector<2x8x8x32xf32> to vector<128x32xf32>
    %c0_340 = arith.constant 0 : index
    %c0_341 = arith.constant 0 : index
    %c0_342 = arith.constant 0 : index
    %c0_343 = arith.constant 0 : index
    %236 = vector.load %arg7[%c0_340, %c0_341, %c0_342, %c0_343] : memref<3x3x32x32xf32, #tpu.memory_space<vmem>>, vector<1x1x32x32xf32>
    %237 = vector.shape_cast %236 : vector<1x1x32x32xf32> to vector<32x32xf32>
    %cst_344 = arith.constant dense<0.000000e+00> : vector<128x32xf32>
    %238 = tpu.matmul %235, %237, %cst_344 {dimension_numbers = #tpu.dot_dimension_numbers<[1], [0], [0], [1], [0, 0, 1, 1], [], []>} : vector<128x32xf32>, vector<32x32xf32>, vector<128x32xf32> -> vector<128x32xf32>
    %239 = arith.addf %233, %238 : vector<128x32xf32>
    %c0_345 = arith.constant 0 : index
    %c0_346 = arith.constant 0 : index
    %c1_347 = arith.constant 1 : index
    %c0_348 = arith.constant 0 : index
    %240 = vector.load %arg24[%c0_345, %c0_346, %c1_347, %c0_348] : memref<2x10x10x32xf32, #tpu.memory_space<vmem>>, vector<2x8x8x32xf32>
    %241 = vector.shape_cast %240 : vector<2x8x8x32xf32> to vector<128x32xf32>
    %c0_349 = arith.constant 0 : index
    %c1_350 = arith.constant 1 : index
    %c0_351 = arith.constant 0 : index
    %c0_352 = arith.constant 0 : index
    %242 = vector.load %arg7[%c0_349, %c1_350, %c0_351, %c0_352] : memref<3x3x32x32xf32, #tpu.memory_space<vmem>>, vector<1x1x32x32xf32>
    %243 = vector.shape_cast %242 : vector<1x1x32x32xf32> to vector<32x32xf32>
    %cst_353 = arith.constant dense<0.000000e+00> : vector<128x32xf32>
    %244 = tpu.matmul %241, %243, %cst_353 {dimension_numbers = #tpu.dot_dimension_numbers<[1], [0], [0], [1], [0, 0, 1, 1], [], []>} : vector<128x32xf32>, vector<32x32xf32>, vector<128x32xf32> -> vector<128x32xf32>
    %245 = arith.addf %239, %244 : vector<128x32xf32>
    %c0_354 = arith.constant 0 : index
    %c0_355 = arith.constant 0 : index
    %c2_356 = arith.constant 2 : index
    %c0_357 = arith.constant 0 : index
    %246 = vector.load %arg24[%c0_354, %c0_355, %c2_356, %c0_357] : memref<2x10x10x32xf32, #tpu.memory_space<vmem>>, vector<2x8x8x32xf32>
    %247 = vector.shape_cast %246 : vector<2x8x8x32xf32> to vector<128x32xf32>
    %c0_358 = arith.constant 0 : index
    %c2_359 = arith.constant 2 : index
    %c0_360 = arith.constant 0 : index
    %c0_361 = arith.constant 0 : index
    %248 = vector.load %arg7[%c0_358, %c2_359, %c0_360, %c0_361] : memref<3x3x32x32xf32, #tpu.memory_space<vmem>>, vector<1x1x32x32xf32>
    %249 = vector.shape_cast %248 : vector<1x1x32x32xf32> to vector<32x32xf32>
    %cst_362 = arith.constant dense<0.000000e+00> : vector<128x32xf32>
    %250 = tpu.matmul %247, %249, %cst_362 {dimension_numbers = #tpu.dot_dimension_numbers<[1], [0], [0], [1], [0, 0, 1, 1], [], []>} : vector<128x32xf32>, vector<32x32xf32>, vector<128x32xf32> -> vector<128x32xf32>
    %251 = arith.addf %245, %250 : vector<128x32xf32>
    %c0_363 = arith.constant 0 : index
    %c1_364 = arith.constant 1 : index
    %c0_365 = arith.constant 0 : index
    %c0_366 = arith.constant 0 : index
    %252 = vector.load %arg24[%c0_363, %c1_364, %c0_365, %c0_366] : memref<2x10x10x32xf32, #tpu.memory_space<vmem>>, vector<2x8x8x32xf32>
    %253 = vector.shape_cast %252 : vector<2x8x8x32xf32> to vector<128x32xf32>
    %c1_367 = arith.constant 1 : index
    %c0_368 = arith.constant 0 : index
    %c0_369 = arith.constant 0 : index
    %c0_370 = arith.constant 0 : index
    %254 = vector.load %arg7[%c1_367, %c0_368, %c0_369, %c0_370] : memref<3x3x32x32xf32, #tpu.memory_space<vmem>>, vector<1x1x32x32xf32>
    %255 = vector.shape_cast %254 : vector<1x1x32x32xf32> to vector<32x32xf32>
    %cst_371 = arith.constant dense<0.000000e+00> : vector<128x32xf32>
    %256 = tpu.matmul %253, %255, %cst_371 {dimension_numbers = #tpu.dot_dimension_numbers<[1], [0], [0], [1], [0, 0, 1, 1], [], []>} : vector<128x32xf32>, vector<32x32xf32>, vector<128x32xf32> -> vector<128x32xf32>
    %257 = arith.addf %251, %256 : vector<128x32xf32>
    %c0_372 = arith.constant 0 : index
    %c1_373 = arith.constant 1 : index
    %c1_374 = arith.constant 1 : index
    %c0_375 = arith.constant 0 : index
    %258 = vector.load %arg24[%c0_372, %c1_373, %c1_374, %c0_375] : memref<2x10x10x32xf32, #tpu.memory_space<vmem>>, vector<2x8x8x32xf32>
    %259 = vector.shape_cast %258 : vector<2x8x8x32xf32> to vector<128x32xf32>
    %c1_376 = arith.constant 1 : index
    %c1_377 = arith.constant 1 : index
    %c0_378 = arith.constant 0 : index
    %c0_379 = arith.constant 0 : index
    %260 = vector.load %arg7[%c1_376, %c1_377, %c0_378, %c0_379] : memref<3x3x32x32xf32, #tpu.memory_space<vmem>>, vector<1x1x32x32xf32>
    %261 = vector.shape_cast %260 : vector<1x1x32x32xf32> to vector<32x32xf32>
    %cst_380 = arith.constant dense<0.000000e+00> : vector<128x32xf32>
    %262 = tpu.matmul %259, %261, %cst_380 {dimension_numbers = #tpu.dot_dimension_numbers<[1], [0], [0], [1], [0, 0, 1, 1], [], []>} : vector<128x32xf32>, vector<32x32xf32>, vector<128x32xf32> -> vector<128x32xf32>
    %263 = arith.addf %257, %262 : vector<128x32xf32>
    %c0_381 = arith.constant 0 : index
    %c1_382 = arith.constant 1 : index
    %c2_383 = arith.constant 2 : index
    %c0_384 = arith.constant 0 : index
    %264 = vector.load %arg24[%c0_381, %c1_382, %c2_383, %c0_384] : memref<2x10x10x32xf32, #tpu.memory_space<vmem>>, vector<2x8x8x32xf32>
    %265 = vector.shape_cast %264 : vector<2x8x8x32xf32> to vector<128x32xf32>
    %c1_385 = arith.constant 1 : index
    %c2_386 = arith.constant 2 : index
    %c0_387 = arith.constant 0 : index
    %c0_388 = arith.constant 0 : index
    %266 = vector.load %arg7[%c1_385, %c2_386, %c0_387, %c0_388] : memref<3x3x32x32xf32, #tpu.memory_space<vmem>>, vector<1x1x32x32xf32>
    %267 = vector.shape_cast %266 : vector<1x1x32x32xf32> to vector<32x32xf32>
    %cst_389 = arith.constant dense<0.000000e+00> : vector<128x32xf32>
    %268 = tpu.matmul %265, %267, %cst_389 {dimension_numbers = #tpu.dot_dimension_numbers<[1], [0], [0], [1], [0, 0, 1, 1], [], []>} : vector<128x32xf32>, vector<32x32xf32>, vector<128x32xf32> -> vector<128x32xf32>
    %269 = arith.addf %263, %268 : vector<128x32xf32>
    %c0_390 = arith.constant 0 : index
    %c2_391 = arith.constant 2 : index
    %c0_392 = arith.constant 0 : index
    %c0_393 = arith.constant 0 : index
    %270 = vector.load %arg24[%c0_390, %c2_391, %c0_392, %c0_393] : memref<2x10x10x32xf32, #tpu.memory_space<vmem>>, vector<2x8x8x32xf32>
    %271 = vector.shape_cast %270 : vector<2x8x8x32xf32> to vector<128x32xf32>
    %c2_394 = arith.constant 2 : index
    %c0_395 = arith.constant 0 : index
    %c0_396 = arith.constant 0 : index
    %c0_397 = arith.constant 0 : index
    %272 = vector.load %arg7[%c2_394, %c0_395, %c0_396, %c0_397] : memref<3x3x32x32xf32, #tpu.memory_space<vmem>>, vector<1x1x32x32xf32>
    %273 = vector.shape_cast %272 : vector<1x1x32x32xf32> to vector<32x32xf32>
    %cst_398 = arith.constant dense<0.000000e+00> : vector<128x32xf32>
    %274 = tpu.matmul %271, %273, %cst_398 {dimension_numbers = #tpu.dot_dimension_numbers<[1], [0], [0], [1], [0, 0, 1, 1], [], []>} : vector<128x32xf32>, vector<32x32xf32>, vector<128x32xf32> -> vector<128x32xf32>
    %275 = arith.addf %269, %274 : vector<128x32xf32>
    %c0_399 = arith.constant 0 : index
    %c2_400 = arith.constant 2 : index
    %c1_401 = arith.constant 1 : index
    %c0_402 = arith.constant 0 : index
    %276 = vector.load %arg24[%c0_399, %c2_400, %c1_401, %c0_402] : memref<2x10x10x32xf32, #tpu.memory_space<vmem>>, vector<2x8x8x32xf32>
    %277 = vector.shape_cast %276 : vector<2x8x8x32xf32> to vector<128x32xf32>
    %c2_403 = arith.constant 2 : index
    %c1_404 = arith.constant 1 : index
    %c0_405 = arith.constant 0 : index
    %c0_406 = arith.constant 0 : index
    %278 = vector.load %arg7[%c2_403, %c1_404, %c0_405, %c0_406] : memref<3x3x32x32xf32, #tpu.memory_space<vmem>>, vector<1x1x32x32xf32>
    %279 = vector.shape_cast %278 : vector<1x1x32x32xf32> to vector<32x32xf32>
    %cst_407 = arith.constant dense<0.000000e+00> : vector<128x32xf32>
    %280 = tpu.matmul %277, %279, %cst_407 {dimension_numbers = #tpu.dot_dimension_numbers<[1], [0], [0], [1], [0, 0, 1, 1], [], []>} : vector<128x32xf32>, vector<32x32xf32>, vector<128x32xf32> -> vector<128x32xf32>
    %281 = arith.addf %275, %280 : vector<128x32xf32>
    %c0_408 = arith.constant 0 : index
    %c2_409 = arith.constant 2 : index
    %c2_410 = arith.constant 2 : index
    %c0_411 = arith.constant 0 : index
    %282 = vector.load %arg24[%c0_408, %c2_409, %c2_410, %c0_411] : memref<2x10x10x32xf32, #tpu.memory_space<vmem>>, vector<2x8x8x32xf32>
    %283 = vector.shape_cast %282 : vector<2x8x8x32xf32> to vector<128x32xf32>
    %c2_412 = arith.constant 2 : index
    %c2_413 = arith.constant 2 : index
    %c0_414 = arith.constant 0 : index
    %c0_415 = arith.constant 0 : index
    %284 = vector.load %arg7[%c2_412, %c2_413, %c0_414, %c0_415] : memref<3x3x32x32xf32, #tpu.memory_space<vmem>>, vector<1x1x32x32xf32>
    %285 = vector.shape_cast %284 : vector<1x1x32x32xf32> to vector<32x32xf32>
    %cst_416 = arith.constant dense<0.000000e+00> : vector<128x32xf32>
    %286 = tpu.matmul %283, %285, %cst_416 {dimension_numbers = #tpu.dot_dimension_numbers<[1], [0], [0], [1], [0, 0, 1, 1], [], []>} : vector<128x32xf32>, vector<32x32xf32>, vector<128x32xf32> -> vector<128x32xf32>
    %287 = arith.addf %281, %286 : vector<128x32xf32>
    %c0_417 = arith.constant 0 : index
    %c0_418 = arith.constant 0 : index
    %288 = vector.load %arg8[%c0_417, %c0_418] : memref<1x32xf32, #tpu.memory_space<vmem>>, vector<1x32xf32>
    %289 = vector.broadcast %288 : vector<1x32xf32> to vector<128x32xf32>
    %290 = arith.addf %287, %289 : vector<128x32xf32>
    %cst_419 = arith.constant 0.000000e+00 : f32
    %291 = vector.broadcast %cst_419 : f32 to vector<128x32xf32>
    %292 = arith.maximumf %290, %291 : vector<128x32xf32>
    %293 = vector.shape_cast %292 : vector<128x32xf32> to vector<2x8x8x32xf32>
    %c0_420 = arith.constant 0 : index
    %c1_421 = arith.constant 1 : index
    %c1_422 = arith.constant 1 : index
    %c0_423 = arith.constant 0 : index
    %294 = vector.load %arg24[%c0_420, %c1_421, %c1_422, %c0_423] : memref<2x10x10x32xf32, #tpu.memory_space<vmem>>, vector<2x8x8x32xf32>
    tpu.vector_store %arg24[%c0_420, %c1_421, %c1_422, %c0_423], %293 {strides = array<i32>} : memref<2x10x10x32xf32, #tpu.memory_space<vmem>>, vector<2x8x8x32xf32>,
    %cst_424 = arith.constant 0.000000e+00 : f32
    %295 = vector.broadcast %cst_424 : f32 to vector<128x32xf32>
    %c0_425 = arith.constant 0 : index
    %c0_426 = arith.constant 0 : index
    %c0_427 = arith.constant 0 : index
    %c0_428 = arith.constant 0 : index
    %296 = vector.load %arg24[%c0_425, %c0_426, %c0_427, %c0_428] : memref<2x10x10x32xf32, #tpu.memory_space<vmem>>, vector<2x8x8x32xf32>
    %297 = vector.shape_cast %296 : vector<2x8x8x32xf32> to vector<128x32xf32>
    %c0_429 = arith.constant 0 : index
    %c0_430 = arith.constant 0 : index
    %c0_431 = arith.constant 0 : index
    %c0_432 = arith.constant 0 : index
    %298 = vector.load %arg9[%c0_429, %c0_430, %c0_431, %c0_432] : memref<3x3x32x32xf32, #tpu.memory_space<vmem>>, vector<1x1x32x32xf32>
    %299 = vector.shape_cast %298 : vector<1x1x32x32xf32> to vector<32x32xf32>
    %cst_433 = arith.constant dense<0.000000e+00> : vector<128x32xf32>
    %300 = tpu.matmul %297, %299, %cst_433 {dimension_numbers = #tpu.dot_dimension_numbers<[1], [0], [0], [1], [0, 0, 1, 1], [], []>} : vector<128x32xf32>, vector<32x32xf32>, vector<128x32xf32> -> vector<128x32xf32>
    %301 = arith.addf %295, %300 : vector<128x32xf32>
    %c0_434 = arith.constant 0 : index
    %c0_435 = arith.constant 0 : index
    %c1_436 = arith.constant 1 : index
    %c0_437 = arith.constant 0 : index
    %302 = vector.load %arg24[%c0_434, %c0_435, %c1_436, %c0_437] : memref<2x10x10x32xf32, #tpu.memory_space<vmem>>, vector<2x8x8x32xf32>
    %303 = vector.shape_cast %302 : vector<2x8x8x32xf32> to vector<128x32xf32>
    %c0_438 = arith.constant 0 : index
    %c1_439 = arith.constant 1 : index
    %c0_440 = arith.constant 0 : index
    %c0_441 = arith.constant 0 : index
    %304 = vector.load %arg9[%c0_438, %c1_439, %c0_440, %c0_441] : memref<3x3x32x32xf32, #tpu.memory_space<vmem>>, vector<1x1x32x32xf32>
    %305 = vector.shape_cast %304 : vector<1x1x32x32xf32> to vector<32x32xf32>
    %cst_442 = arith.constant dense<0.000000e+00> : vector<128x32xf32>
    %306 = tpu.matmul %303, %305, %cst_442 {dimension_numbers = #tpu.dot_dimension_numbers<[1], [0], [0], [1], [0, 0, 1, 1], [], []>} : vector<128x32xf32>, vector<32x32xf32>, vector<128x32xf32> -> vector<128x32xf32>
    %307 = arith.addf %301, %306 : vector<128x32xf32>
    %c0_443 = arith.constant 0 : index
    %c0_444 = arith.constant 0 : index
    %c2_445 = arith.constant 2 : index
    %c0_446 = arith.constant 0 : index
    %308 = vector.load %arg24[%c0_443, %c0_444, %c2_445, %c0_446] : memref<2x10x10x32xf32, #tpu.memory_space<vmem>>, vector<2x8x8x32xf32>
    %309 = vector.shape_cast %308 : vector<2x8x8x32xf32> to vector<128x32xf32>
    %c0_447 = arith.constant 0 : index
    %c2_448 = arith.constant 2 : index
    %c0_449 = arith.constant 0 : index
    %c0_450 = arith.constant 0 : index
    %310 = vector.load %arg9[%c0_447, %c2_448, %c0_449, %c0_450] : memref<3x3x32x32xf32, #tpu.memory_space<vmem>>, vector<1x1x32x32xf32>
    %311 = vector.shape_cast %310 : vector<1x1x32x32xf32> to vector<32x32xf32>
    %cst_451 = arith.constant dense<0.000000e+00> : vector<128x32xf32>
    %312 = tpu.matmul %309, %311, %cst_451 {dimension_numbers = #tpu.dot_dimension_numbers<[1], [0], [0], [1], [0, 0, 1, 1], [], []>} : vector<128x32xf32>, vector<32x32xf32>, vector<128x32xf32> -> vector<128x32xf32>
    %313 = arith.addf %307, %312 : vector<128x32xf32>
    %c0_452 = arith.constant 0 : index
    %c1_453 = arith.constant 1 : index
    %c0_454 = arith.constant 0 : index
    %c0_455 = arith.constant 0 : index
    %314 = vector.load %arg24[%c0_452, %c1_453, %c0_454, %c0_455] : memref<2x10x10x32xf32, #tpu.memory_space<vmem>>, vector<2x8x8x32xf32>
    %315 = vector.shape_cast %314 : vector<2x8x8x32xf32> to vector<128x32xf32>
    %c1_456 = arith.constant 1 : index
    %c0_457 = arith.constant 0 : index
    %c0_458 = arith.constant 0 : index
    %c0_459 = arith.constant 0 : index
    %316 = vector.load %arg9[%c1_456, %c0_457, %c0_458, %c0_459] : memref<3x3x32x32xf32, #tpu.memory_space<vmem>>, vector<1x1x32x32xf32>
    %317 = vector.shape_cast %316 : vector<1x1x32x32xf32> to vector<32x32xf32>
    %cst_460 = arith.constant dense<0.000000e+00> : vector<128x32xf32>
    %318 = tpu.matmul %315, %317, %cst_460 {dimension_numbers = #tpu.dot_dimension_numbers<[1], [0], [0], [1], [0, 0, 1, 1], [], []>} : vector<128x32xf32>, vector<32x32xf32>, vector<128x32xf32> -> vector<128x32xf32>
    %319 = arith.addf %313, %318 : vector<128x32xf32>
    %c0_461 = arith.constant 0 : index
    %c1_462 = arith.constant 1 : index
    %c1_463 = arith.constant 1 : index
    %c0_464 = arith.constant 0 : index
    %320 = vector.load %arg24[%c0_461, %c1_462, %c1_463, %c0_464] : memref<2x10x10x32xf32, #tpu.memory_space<vmem>>, vector<2x8x8x32xf32>
    %321 = vector.shape_cast %320 : vector<2x8x8x32xf32> to vector<128x32xf32>
    %c1_465 = arith.constant 1 : index
    %c1_466 = arith.constant 1 : index
    %c0_467 = arith.constant 0 : index
    %c0_468 = arith.constant 0 : index
    %322 = vector.load %arg9[%c1_465, %c1_466, %c0_467, %c0_468] : memref<3x3x32x32xf32, #tpu.memory_space<vmem>>, vector<1x1x32x32xf32>
    %323 = vector.shape_cast %322 : vector<1x1x32x32xf32> to vector<32x32xf32>
    %cst_469 = arith.constant dense<0.000000e+00> : vector<128x32xf32>
    %324 = tpu.matmul %321, %323, %cst_469 {dimension_numbers = #tpu.dot_dimension_numbers<[1], [0], [0], [1], [0, 0, 1, 1], [], []>} : vector<128x32xf32>, vector<32x32xf32>, vector<128x32xf32> -> vector<128x32xf32>
    %325 = arith.addf %319, %324 : vector<128x32xf32>
    %c0_470 = arith.constant 0 : index
    %c1_471 = arith.constant 1 : index
    %c2_472 = arith.constant 2 : index
    %c0_473 = arith.constant 0 : index
    %326 = vector.load %arg24[%c0_470, %c1_471, %c2_472, %c0_473] : memref<2x10x10x32xf32, #tpu.memory_space<vmem>>, vector<2x8x8x32xf32>
    %327 = vector.shape_cast %326 : vector<2x8x8x32xf32> to vector<128x32xf32>
    %c1_474 = arith.constant 1 : index
    %c2_475 = arith.constant 2 : index
    %c0_476 = arith.constant 0 : index
    %c0_477 = arith.constant 0 : index
    %328 = vector.load %arg9[%c1_474, %c2_475, %c0_476, %c0_477] : memref<3x3x32x32xf32, #tpu.memory_space<vmem>>, vector<1x1x32x32xf32>
    %329 = vector.shape_cast %328 : vector<1x1x32x32xf32> to vector<32x32xf32>
    %cst_478 = arith.constant dense<0.000000e+00> : vector<128x32xf32>
    %330 = tpu.matmul %327, %329, %cst_478 {dimension_numbers = #tpu.dot_dimension_numbers<[1], [0], [0], [1], [0, 0, 1, 1], [], []>} : vector<128x32xf32>, vector<32x32xf32>, vector<128x32xf32> -> vector<128x32xf32>
    %331 = arith.addf %325, %330 : vector<128x32xf32>
    %c0_479 = arith.constant 0 : index
    %c2_480 = arith.constant 2 : index
    %c0_481 = arith.constant 0 : index
    %c0_482 = arith.constant 0 : index
    %332 = vector.load %arg24[%c0_479, %c2_480, %c0_481, %c0_482] : memref<2x10x10x32xf32, #tpu.memory_space<vmem>>, vector<2x8x8x32xf32>
    %333 = vector.shape_cast %332 : vector<2x8x8x32xf32> to vector<128x32xf32>
    %c2_483 = arith.constant 2 : index
    %c0_484 = arith.constant 0 : index
    %c0_485 = arith.constant 0 : index
    %c0_486 = arith.constant 0 : index
    %334 = vector.load %arg9[%c2_483, %c0_484, %c0_485, %c0_486] : memref<3x3x32x32xf32, #tpu.memory_space<vmem>>, vector<1x1x32x32xf32>
    %335 = vector.shape_cast %334 : vector<1x1x32x32xf32> to vector<32x32xf32>
    %cst_487 = arith.constant dense<0.000000e+00> : vector<128x32xf32>
    %336 = tpu.matmul %333, %335, %cst_487 {dimension_numbers = #tpu.dot_dimension_numbers<[1], [0], [0], [1], [0, 0, 1, 1], [], []>} : vector<128x32xf32>, vector<32x32xf32>, vector<128x32xf32> -> vector<128x32xf32>
    %337 = arith.addf %331, %336 : vector<128x32xf32>
    %c0_488 = arith.constant 0 : index
    %c2_489 = arith.constant 2 : index
    %c1_490 = arith.constant 1 : index
    %c0_491 = arith.constant 0 : index
    %338 = vector.load %arg24[%c0_488, %c2_489, %c1_490, %c0_491] : memref<2x10x10x32xf32, #tpu.memory_space<vmem>>, vector<2x8x8x32xf32>
    %339 = vector.shape_cast %338 : vector<2x8x8x32xf32> to vector<128x32xf32>
    %c2_492 = arith.constant 2 : index
    %c1_493 = arith.constant 1 : index
    %c0_494 = arith.constant 0 : index
    %c0_495 = arith.constant 0 : index
    %340 = vector.load %arg9[%c2_492, %c1_493, %c0_494, %c0_495] : memref<3x3x32x32xf32, #tpu.memory_space<vmem>>, vector<1x1x32x32xf32>
    %341 = vector.shape_cast %340 : vector<1x1x32x32xf32> to vector<32x32xf32>
    %cst_496 = arith.constant dense<0.000000e+00> : vector<128x32xf32>
    %342 = tpu.matmul %339, %341, %cst_496 {dimension_numbers = #tpu.dot_dimension_numbers<[1], [0], [0], [1], [0, 0, 1, 1], [], []>} : vector<128x32xf32>, vector<32x32xf32>, vector<128x32xf32> -> vector<128x32xf32>
    %343 = arith.addf %337, %342 : vector<128x32xf32>
    %c0_497 = arith.constant 0 : index
    %c2_498 = arith.constant 2 : index
    %c2_499 = arith.constant 2 : index
    %c0_500 = arith.constant 0 : index
    %344 = vector.load %arg24[%c0_497, %c2_498, %c2_499, %c0_500] : memref<2x10x10x32xf32, #tpu.memory_space<vmem>>, vector<2x8x8x32xf32>
    %345 = vector.shape_cast %344 : vector<2x8x8x32xf32> to vector<128x32xf32>
    %c2_501 = arith.constant 2 : index
    %c2_502 = arith.constant 2 : index
    %c0_503 = arith.constant 0 : index
    %c0_504 = arith.constant 0 : index
    %346 = vector.load %arg9[%c2_501, %c2_502, %c0_503, %c0_504] : memref<3x3x32x32xf32, #tpu.memory_space<vmem>>, vector<1x1x32x32xf32>
    %347 = vector.shape_cast %346 : vector<1x1x32x32xf32> to vector<32x32xf32>
    %cst_505 = arith.constant dense<0.000000e+00> : vector<128x32xf32>
    %348 = tpu.matmul %345, %347, %cst_505 {dimension_numbers = #tpu.dot_dimension_numbers<[1], [0], [0], [1], [0, 0, 1, 1], [], []>} : vector<128x32xf32>, vector<32x32xf32>, vector<128x32xf32> -> vector<128x32xf32>
    %349 = arith.addf %343, %348 : vector<128x32xf32>
    %c0_506 = arith.constant 0 : index
    %c0_507 = arith.constant 0 : index
    %350 = vector.load %arg10[%c0_506, %c0_507] : memref<1x32xf32, #tpu.memory_space<vmem>>, vector<1x32xf32>
    %351 = vector.broadcast %350 : vector<1x32xf32> to vector<128x32xf32>
    %352 = arith.addf %349, %351 : vector<128x32xf32>
    %353 = arith.addf %352, %230 : vector<128x32xf32>
    %cst_508 = arith.constant 0.000000e+00 : f32
    %354 = vector.broadcast %cst_508 : f32 to vector<128x32xf32>
    %355 = arith.maximumf %353, %354 : vector<128x32xf32>
    %356 = vector.shape_cast %355 : vector<128x32xf32> to vector<2x8x8x32xf32>
    %c0_509 = arith.constant 0 : index
    %c1_510 = arith.constant 1 : index
    %c1_511 = arith.constant 1 : index
    %c0_512 = arith.constant 0 : index
    %357 = vector.load %arg24[%c0_509, %c1_510, %c1_511, %c0_512] : memref<2x10x10x32xf32, #tpu.memory_space<vmem>>, vector<2x8x8x32xf32>
    tpu.vector_store %arg24[%c0_509, %c1_510, %c1_511, %c0_512], %356 {strides = array<i32>} : memref<2x10x10x32xf32, #tpu.memory_space<vmem>>, vector<2x8x8x32xf32>,
    %cst_513 = arith.constant 0.000000e+00 : f32
    %358 = vector.broadcast %cst_513 : f32 to vector<128x64xf32>
    %c0_514 = arith.constant 0 : index
    %c0_515 = arith.constant 0 : index
    %c0_516 = arith.constant 0 : index
    %c0_517 = arith.constant 0 : index
    %359 = vector.load %arg24[%c0_514, %c0_515, %c0_516, %c0_517] : memref<2x10x10x32xf32, #tpu.memory_space<vmem>>, vector<2x8x8x32xf32>
    %360 = vector.shape_cast %359 : vector<2x8x8x32xf32> to vector<128x32xf32>
    %c0_518 = arith.constant 0 : index
    %c0_519 = arith.constant 0 : index
    %c0_520 = arith.constant 0 : index
    %c0_521 = arith.constant 0 : index
    %361 = vector.load %arg11[%c0_518, %c0_519, %c0_520, %c0_521] : memref<3x3x32x64xf32, #tpu.memory_space<vmem>>, vector<1x1x32x64xf32>
    %362 = vector.shape_cast %361 : vector<1x1x32x64xf32> to vector<32x64xf32>
    %cst_522 = arith.constant dense<0.000000e+00> : vector<128x64xf32>
    %363 = tpu.matmul %360, %362, %cst_522 {dimension_numbers = #tpu.dot_dimension_numbers<[1], [0], [0], [1], [0, 0, 1, 1], [], []>} : vector<128x32xf32>, vector<32x64xf32>, vector<128x64xf32> -> vector<128x64xf32>
    %364 = arith.addf %358, %363 : vector<128x64xf32>
    %c0_523 = arith.constant 0 : index
    %c0_524 = arith.constant 0 : index
    %c1_525 = arith.constant 1 : index
    %c0_526 = arith.constant 0 : index
    %365 = vector.load %arg24[%c0_523, %c0_524, %c1_525, %c0_526] : memref<2x10x10x32xf32, #tpu.memory_space<vmem>>, vector<2x8x8x32xf32>
    %366 = vector.shape_cast %365 : vector<2x8x8x32xf32> to vector<128x32xf32>
    %c0_527 = arith.constant 0 : index
    %c1_528 = arith.constant 1 : index
    %c0_529 = arith.constant 0 : index
    %c0_530 = arith.constant 0 : index
    %367 = vector.load %arg11[%c0_527, %c1_528, %c0_529, %c0_530] : memref<3x3x32x64xf32, #tpu.memory_space<vmem>>, vector<1x1x32x64xf32>
    %368 = vector.shape_cast %367 : vector<1x1x32x64xf32> to vector<32x64xf32>
    %cst_531 = arith.constant dense<0.000000e+00> : vector<128x64xf32>
    %369 = tpu.matmul %366, %368, %cst_531 {dimension_numbers = #tpu.dot_dimension_numbers<[1], [0], [0], [1], [0, 0, 1, 1], [], []>} : vector<128x32xf32>, vector<32x64xf32>, vector<128x64xf32> -> vector<128x64xf32>
    %370 = arith.addf %364, %369 : vector<128x64xf32>
    %c0_532 = arith.constant 0 : index
    %c0_533 = arith.constant 0 : index
    %c2_534 = arith.constant 2 : index
    %c0_535 = arith.constant 0 : index
    %371 = vector.load %arg24[%c0_532, %c0_533, %c2_534, %c0_535] : memref<2x10x10x32xf32, #tpu.memory_space<vmem>>, vector<2x8x8x32xf32>
    %372 = vector.shape_cast %371 : vector<2x8x8x32xf32> to vector<128x32xf32>
    %c0_536 = arith.constant 0 : index
    %c2_537 = arith.constant 2 : index
    %c0_538 = arith.constant 0 : index
    %c0_539 = arith.constant 0 : index
    %373 = vector.load %arg11[%c0_536, %c2_537, %c0_538, %c0_539] : memref<3x3x32x64xf32, #tpu.memory_space<vmem>>, vector<1x1x32x64xf32>
    %374 = vector.shape_cast %373 : vector<1x1x32x64xf32> to vector<32x64xf32>
    %cst_540 = arith.constant dense<0.000000e+00> : vector<128x64xf32>
    %375 = tpu.matmul %372, %374, %cst_540 {dimension_numbers = #tpu.dot_dimension_numbers<[1], [0], [0], [1], [0, 0, 1, 1], [], []>} : vector<128x32xf32>, vector<32x64xf32>, vector<128x64xf32> -> vector<128x64xf32>
    %376 = arith.addf %370, %375 : vector<128x64xf32>
    %c0_541 = arith.constant 0 : index
    %c1_542 = arith.constant 1 : index
    %c0_543 = arith.constant 0 : index
    %c0_544 = arith.constant 0 : index
    %377 = vector.load %arg24[%c0_541, %c1_542, %c0_543, %c0_544] : memref<2x10x10x32xf32, #tpu.memory_space<vmem>>, vector<2x8x8x32xf32>
    %378 = vector.shape_cast %377 : vector<2x8x8x32xf32> to vector<128x32xf32>
    %c1_545 = arith.constant 1 : index
    %c0_546 = arith.constant 0 : index
    %c0_547 = arith.constant 0 : index
    %c0_548 = arith.constant 0 : index
    %379 = vector.load %arg11[%c1_545, %c0_546, %c0_547, %c0_548] : memref<3x3x32x64xf32, #tpu.memory_space<vmem>>, vector<1x1x32x64xf32>
    %380 = vector.shape_cast %379 : vector<1x1x32x64xf32> to vector<32x64xf32>
    %cst_549 = arith.constant dense<0.000000e+00> : vector<128x64xf32>
    %381 = tpu.matmul %378, %380, %cst_549 {dimension_numbers = #tpu.dot_dimension_numbers<[1], [0], [0], [1], [0, 0, 1, 1], [], []>} : vector<128x32xf32>, vector<32x64xf32>, vector<128x64xf32> -> vector<128x64xf32>
    %382 = arith.addf %376, %381 : vector<128x64xf32>
    %c0_550 = arith.constant 0 : index
    %c1_551 = arith.constant 1 : index
    %c1_552 = arith.constant 1 : index
    %c0_553 = arith.constant 0 : index
    %383 = vector.load %arg24[%c0_550, %c1_551, %c1_552, %c0_553] : memref<2x10x10x32xf32, #tpu.memory_space<vmem>>, vector<2x8x8x32xf32>
    %384 = vector.shape_cast %383 : vector<2x8x8x32xf32> to vector<128x32xf32>
    %c1_554 = arith.constant 1 : index
    %c1_555 = arith.constant 1 : index
    %c0_556 = arith.constant 0 : index
    %c0_557 = arith.constant 0 : index
    %385 = vector.load %arg11[%c1_554, %c1_555, %c0_556, %c0_557] : memref<3x3x32x64xf32, #tpu.memory_space<vmem>>, vector<1x1x32x64xf32>
    %386 = vector.shape_cast %385 : vector<1x1x32x64xf32> to vector<32x64xf32>
    %cst_558 = arith.constant dense<0.000000e+00> : vector<128x64xf32>
    %387 = tpu.matmul %384, %386, %cst_558 {dimension_numbers = #tpu.dot_dimension_numbers<[1], [0], [0], [1], [0, 0, 1, 1], [], []>} : vector<128x32xf32>, vector<32x64xf32>, vector<128x64xf32> -> vector<128x64xf32>
    %388 = arith.addf %382, %387 : vector<128x64xf32>
    %c0_559 = arith.constant 0 : index
    %c1_560 = arith.constant 1 : index
    %c2_561 = arith.constant 2 : index
    %c0_562 = arith.constant 0 : index
    %389 = vector.load %arg24[%c0_559, %c1_560, %c2_561, %c0_562] : memref<2x10x10x32xf32, #tpu.memory_space<vmem>>, vector<2x8x8x32xf32>
    %390 = vector.shape_cast %389 : vector<2x8x8x32xf32> to vector<128x32xf32>
    %c1_563 = arith.constant 1 : index
    %c2_564 = arith.constant 2 : index
    %c0_565 = arith.constant 0 : index
    %c0_566 = arith.constant 0 : index
    %391 = vector.load %arg11[%c1_563, %c2_564, %c0_565, %c0_566] : memref<3x3x32x64xf32, #tpu.memory_space<vmem>>, vector<1x1x32x64xf32>
    %392 = vector.shape_cast %391 : vector<1x1x32x64xf32> to vector<32x64xf32>
    %cst_567 = arith.constant dense<0.000000e+00> : vector<128x64xf32>
    %393 = tpu.matmul %390, %392, %cst_567 {dimension_numbers = #tpu.dot_dimension_numbers<[1], [0], [0], [1], [0, 0, 1, 1], [], []>} : vector<128x32xf32>, vector<32x64xf32>, vector<128x64xf32> -> vector<128x64xf32>
    %394 = arith.addf %388, %393 : vector<128x64xf32>
    %c0_568 = arith.constant 0 : index
    %c2_569 = arith.constant 2 : index
    %c0_570 = arith.constant 0 : index
    %c0_571 = arith.constant 0 : index
    %395 = vector.load %arg24[%c0_568, %c2_569, %c0_570, %c0_571] : memref<2x10x10x32xf32, #tpu.memory_space<vmem>>, vector<2x8x8x32xf32>
    %396 = vector.shape_cast %395 : vector<2x8x8x32xf32> to vector<128x32xf32>
    %c2_572 = arith.constant 2 : index
    %c0_573 = arith.constant 0 : index
    %c0_574 = arith.constant 0 : index
    %c0_575 = arith.constant 0 : index
    %397 = vector.load %arg11[%c2_572, %c0_573, %c0_574, %c0_575] : memref<3x3x32x64xf32, #tpu.memory_space<vmem>>, vector<1x1x32x64xf32>
    %398 = vector.shape_cast %397 : vector<1x1x32x64xf32> to vector<32x64xf32>
    %cst_576 = arith.constant dense<0.000000e+00> : vector<128x64xf32>
    %399 = tpu.matmul %396, %398, %cst_576 {dimension_numbers = #tpu.dot_dimension_numbers<[1], [0], [0], [1], [0, 0, 1, 1], [], []>} : vector<128x32xf32>, vector<32x64xf32>, vector<128x64xf32> -> vector<128x64xf32>
    %400 = arith.addf %394, %399 : vector<128x64xf32>
    %c0_577 = arith.constant 0 : index
    %c2_578 = arith.constant 2 : index
    %c1_579 = arith.constant 1 : index
    %c0_580 = arith.constant 0 : index
    %401 = vector.load %arg24[%c0_577, %c2_578, %c1_579, %c0_580] : memref<2x10x10x32xf32, #tpu.memory_space<vmem>>, vector<2x8x8x32xf32>
    %402 = vector.shape_cast %401 : vector<2x8x8x32xf32> to vector<128x32xf32>
    %c2_581 = arith.constant 2 : index
    %c1_582 = arith.constant 1 : index
    %c0_583 = arith.constant 0 : index
    %c0_584 = arith.constant 0 : index
    %403 = vector.load %arg11[%c2_581, %c1_582, %c0_583, %c0_584] : memref<3x3x32x64xf32, #tpu.memory_space<vmem>>, vector<1x1x32x64xf32>
    %404 = vector.shape_cast %403 : vector<1x1x32x64xf32> to vector<32x64xf32>
    %cst_585 = arith.constant dense<0.000000e+00> : vector<128x64xf32>
    %405 = tpu.matmul %402, %404, %cst_585 {dimension_numbers = #tpu.dot_dimension_numbers<[1], [0], [0], [1], [0, 0, 1, 1], [], []>} : vector<128x32xf32>, vector<32x64xf32>, vector<128x64xf32> -> vector<128x64xf32>
    %406 = arith.addf %400, %405 : vector<128x64xf32>
    %c0_586 = arith.constant 0 : index
    %c2_587 = arith.constant 2 : index
    %c2_588 = arith.constant 2 : index
    %c0_589 = arith.constant 0 : index
    %407 = vector.load %arg24[%c0_586, %c2_587, %c2_588, %c0_589] : memref<2x10x10x32xf32, #tpu.memory_space<vmem>>, vector<2x8x8x32xf32>
    %408 = vector.shape_cast %407 : vector<2x8x8x32xf32> to vector<128x32xf32>
    %c2_590 = arith.constant 2 : index
    %c2_591 = arith.constant 2 : index
    %c0_592 = arith.constant 0 : index
    %c0_593 = arith.constant 0 : index
    %409 = vector.load %arg11[%c2_590, %c2_591, %c0_592, %c0_593] : memref<3x3x32x64xf32, #tpu.memory_space<vmem>>, vector<1x1x32x64xf32>
    %410 = vector.shape_cast %409 : vector<1x1x32x64xf32> to vector<32x64xf32>
    %cst_594 = arith.constant dense<0.000000e+00> : vector<128x64xf32>
    %411 = tpu.matmul %408, %410, %cst_594 {dimension_numbers = #tpu.dot_dimension_numbers<[1], [0], [0], [1], [0, 0, 1, 1], [], []>} : vector<128x32xf32>, vector<32x64xf32>, vector<128x64xf32> -> vector<128x64xf32>
    %412 = arith.addf %406, %411 : vector<128x64xf32>
    %c0_595 = arith.constant 0 : index
    %c0_596 = arith.constant 0 : index
    %413 = vector.load %arg12[%c0_595, %c0_596] : memref<1x64xf32, #tpu.memory_space<vmem>>, vector<1x64xf32>
    %414 = vector.broadcast %413 : vector<1x64xf32> to vector<128x64xf32>
    %415 = arith.addf %412, %414 : vector<128x64xf32>
    %cst_597 = arith.constant 0.000000e+00 : f32
    %416 = vector.broadcast %cst_597 : f32 to vector<128x64xf32>
    %417 = arith.maximumf %415, %416 : vector<128x64xf32>
    %418 = vector.shape_cast %417 : vector<128x64xf32> to vector<2x8x8x64xf32>
    %c0_598 = arith.constant 0 : index
    %c1_599 = arith.constant 1 : index
    %c1_600 = arith.constant 1 : index
    %c0_601 = arith.constant 0 : index
    %419 = vector.load %arg25[%c0_598, %c1_599, %c1_600, %c0_601] : memref<2x10x10x64xf32, #tpu.memory_space<vmem>>, vector<2x8x8x64xf32>
    tpu.vector_store %arg25[%c0_598, %c1_599, %c1_600, %c0_601], %418 {strides = array<i32>} : memref<2x10x10x64xf32, #tpu.memory_space<vmem>>, vector<2x8x8x64xf32>,
    %cst_602 = arith.constant 0.000000e+00 : f32
    %420 = vector.broadcast %cst_602 : f32 to vector<128x64xf32>
    %c0_603 = arith.constant 0 : index
    %c0_604 = arith.constant 0 : index
    %c0_605 = arith.constant 0 : index
    %c0_606 = arith.constant 0 : index
    %421 = vector.load %arg25[%c0_603, %c0_604, %c0_605, %c0_606] : memref<2x10x10x64xf32, #tpu.memory_space<vmem>>, vector<2x8x8x64xf32>
    %422 = vector.shape_cast %421 : vector<2x8x8x64xf32> to vector<128x64xf32>
    %c0_607 = arith.constant 0 : index
    %c0_608 = arith.constant 0 : index
    %c0_609 = arith.constant 0 : index
    %c0_610 = arith.constant 0 : index
    %423 = vector.load %arg13[%c0_607, %c0_608, %c0_609, %c0_610] : memref<3x3x64x64xf32, #tpu.memory_space<vmem>>, vector<1x1x64x64xf32>
    %424 = vector.shape_cast %423 : vector<1x1x64x64xf32> to vector<64x64xf32>
    %cst_611 = arith.constant dense<0.000000e+00> : vector<128x64xf32>
    %425 = tpu.matmul %422, %424, %cst_611 {dimension_numbers = #tpu.dot_dimension_numbers<[1], [0], [0], [1], [0, 0, 1, 1], [], []>} : vector<128x64xf32>, vector<64x64xf32>, vector<128x64xf32> -> vector<128x64xf32>
    %426 = arith.addf %420, %425 : vector<128x64xf32>
    %c0_612 = arith.constant 0 : index
    %c0_613 = arith.constant 0 : index
    %c1_614 = arith.constant 1 : index
    %c0_615 = arith.constant 0 : index
    %427 = vector.load %arg25[%c0_612, %c0_613, %c1_614, %c0_615] : memref<2x10x10x64xf32, #tpu.memory_space<vmem>>, vector<2x8x8x64xf32>
    %428 = vector.shape_cast %427 : vector<2x8x8x64xf32> to vector<128x64xf32>
    %c0_616 = arith.constant 0 : index
    %c1_617 = arith.constant 1 : index
    %c0_618 = arith.constant 0 : index
    %c0_619 = arith.constant 0 : index
    %429 = vector.load %arg13[%c0_616, %c1_617, %c0_618, %c0_619] : memref<3x3x64x64xf32, #tpu.memory_space<vmem>>, vector<1x1x64x64xf32>
    %430 = vector.shape_cast %429 : vector<1x1x64x64xf32> to vector<64x64xf32>
    %cst_620 = arith.constant dense<0.000000e+00> : vector<128x64xf32>
    %431 = tpu.matmul %428, %430, %cst_620 {dimension_numbers = #tpu.dot_dimension_numbers<[1], [0], [0], [1], [0, 0, 1, 1], [], []>} : vector<128x64xf32>, vector<64x64xf32>, vector<128x64xf32> -> vector<128x64xf32>
    %432 = arith.addf %426, %431 : vector<128x64xf32>
    %c0_621 = arith.constant 0 : index
    %c0_622 = arith.constant 0 : index
    %c2_623 = arith.constant 2 : index
    %c0_624 = arith.constant 0 : index
    %433 = vector.load %arg25[%c0_621, %c0_622, %c2_623, %c0_624] : memref<2x10x10x64xf32, #tpu.memory_space<vmem>>, vector<2x8x8x64xf32>
    %434 = vector.shape_cast %433 : vector<2x8x8x64xf32> to vector<128x64xf32>
    %c0_625 = arith.constant 0 : index
    %c2_626 = arith.constant 2 : index
    %c0_627 = arith.constant 0 : index
    %c0_628 = arith.constant 0 : index
    %435 = vector.load %arg13[%c0_625, %c2_626, %c0_627, %c0_628] : memref<3x3x64x64xf32, #tpu.memory_space<vmem>>, vector<1x1x64x64xf32>
    %436 = vector.shape_cast %435 : vector<1x1x64x64xf32> to vector<64x64xf32>
    %cst_629 = arith.constant dense<0.000000e+00> : vector<128x64xf32>
    %437 = tpu.matmul %434, %436, %cst_629 {dimension_numbers = #tpu.dot_dimension_numbers<[1], [0], [0], [1], [0, 0, 1, 1], [], []>} : vector<128x64xf32>, vector<64x64xf32>, vector<128x64xf32> -> vector<128x64xf32>
    %438 = arith.addf %432, %437 : vector<128x64xf32>
    %c0_630 = arith.constant 0 : index
    %c1_631 = arith.constant 1 : index
    %c0_632 = arith.constant 0 : index
    %c0_633 = arith.constant 0 : index
    %439 = vector.load %arg25[%c0_630, %c1_631, %c0_632, %c0_633] : memref<2x10x10x64xf32, #tpu.memory_space<vmem>>, vector<2x8x8x64xf32>
    %440 = vector.shape_cast %439 : vector<2x8x8x64xf32> to vector<128x64xf32>
    %c1_634 = arith.constant 1 : index
    %c0_635 = arith.constant 0 : index
    %c0_636 = arith.constant 0 : index
    %c0_637 = arith.constant 0 : index
    %441 = vector.load %arg13[%c1_634, %c0_635, %c0_636, %c0_637] : memref<3x3x64x64xf32, #tpu.memory_space<vmem>>, vector<1x1x64x64xf32>
    %442 = vector.shape_cast %441 : vector<1x1x64x64xf32> to vector<64x64xf32>
    %cst_638 = arith.constant dense<0.000000e+00> : vector<128x64xf32>
    %443 = tpu.matmul %440, %442, %cst_638 {dimension_numbers = #tpu.dot_dimension_numbers<[1], [0], [0], [1], [0, 0, 1, 1], [], []>} : vector<128x64xf32>, vector<64x64xf32>, vector<128x64xf32> -> vector<128x64xf32>
    %444 = arith.addf %438, %443 : vector<128x64xf32>
    %c0_639 = arith.constant 0 : index
    %c1_640 = arith.constant 1 : index
    %c1_641 = arith.constant 1 : index
    %c0_642 = arith.constant 0 : index
    %445 = vector.load %arg25[%c0_639, %c1_640, %c1_641, %c0_642] : memref<2x10x10x64xf32, #tpu.memory_space<vmem>>, vector<2x8x8x64xf32>
    %446 = vector.shape_cast %445 : vector<2x8x8x64xf32> to vector<128x64xf32>
    %c1_643 = arith.constant 1 : index
    %c1_644 = arith.constant 1 : index
    %c0_645 = arith.constant 0 : index
    %c0_646 = arith.constant 0 : index
    %447 = vector.load %arg13[%c1_643, %c1_644, %c0_645, %c0_646] : memref<3x3x64x64xf32, #tpu.memory_space<vmem>>, vector<1x1x64x64xf32>
    %448 = vector.shape_cast %447 : vector<1x1x64x64xf32> to vector<64x64xf32>
    %cst_647 = arith.constant dense<0.000000e+00> : vector<128x64xf32>
    %449 = tpu.matmul %446, %448, %cst_647 {dimension_numbers = #tpu.dot_dimension_numbers<[1], [0], [0], [1], [0, 0, 1, 1], [], []>} : vector<128x64xf32>, vector<64x64xf32>, vector<128x64xf32> -> vector<128x64xf32>
    %450 = arith.addf %444, %449 : vector<128x64xf32>
    %c0_648 = arith.constant 0 : index
    %c1_649 = arith.constant 1 : index
    %c2_650 = arith.constant 2 : index
    %c0_651 = arith.constant 0 : index
    %451 = vector.load %arg25[%c0_648, %c1_649, %c2_650, %c0_651] : memref<2x10x10x64xf32, #tpu.memory_space<vmem>>, vector<2x8x8x64xf32>
    %452 = vector.shape_cast %451 : vector<2x8x8x64xf32> to vector<128x64xf32>
    %c1_652 = arith.constant 1 : index
    %c2_653 = arith.constant 2 : index
    %c0_654 = arith.constant 0 : index
    %c0_655 = arith.constant 0 : index
    %453 = vector.load %arg13[%c1_652, %c2_653, %c0_654, %c0_655] : memref<3x3x64x64xf32, #tpu.memory_space<vmem>>, vector<1x1x64x64xf32>
    %454 = vector.shape_cast %453 : vector<1x1x64x64xf32> to vector<64x64xf32>
    %cst_656 = arith.constant dense<0.000000e+00> : vector<128x64xf32>
    %455 = tpu.matmul %452, %454, %cst_656 {dimension_numbers = #tpu.dot_dimension_numbers<[1], [0], [0], [1], [0, 0, 1, 1], [], []>} : vector<128x64xf32>, vector<64x64xf32>, vector<128x64xf32> -> vector<128x64xf32>
    %456 = arith.addf %450, %455 : vector<128x64xf32>
    %c0_657 = arith.constant 0 : index
    %c2_658 = arith.constant 2 : index
    %c0_659 = arith.constant 0 : index
    %c0_660 = arith.constant 0 : index
    %457 = vector.load %arg25[%c0_657, %c2_658, %c0_659, %c0_660] : memref<2x10x10x64xf32, #tpu.memory_space<vmem>>, vector<2x8x8x64xf32>
    %458 = vector.shape_cast %457 : vector<2x8x8x64xf32> to vector<128x64xf32>
    %c2_661 = arith.constant 2 : index
    %c0_662 = arith.constant 0 : index
    %c0_663 = arith.constant 0 : index
    %c0_664 = arith.constant 0 : index
    %459 = vector.load %arg13[%c2_661, %c0_662, %c0_663, %c0_664] : memref<3x3x64x64xf32, #tpu.memory_space<vmem>>, vector<1x1x64x64xf32>
    %460 = vector.shape_cast %459 : vector<1x1x64x64xf32> to vector<64x64xf32>
    %cst_665 = arith.constant dense<0.000000e+00> : vector<128x64xf32>
    %461 = tpu.matmul %458, %460, %cst_665 {dimension_numbers = #tpu.dot_dimension_numbers<[1], [0], [0], [1], [0, 0, 1, 1], [], []>} : vector<128x64xf32>, vector<64x64xf32>, vector<128x64xf32> -> vector<128x64xf32>
    %462 = arith.addf %456, %461 : vector<128x64xf32>
    %c0_666 = arith.constant 0 : index
    %c2_667 = arith.constant 2 : index
    %c1_668 = arith.constant 1 : index
    %c0_669 = arith.constant 0 : index
    %463 = vector.load %arg25[%c0_666, %c2_667, %c1_668, %c0_669] : memref<2x10x10x64xf32, #tpu.memory_space<vmem>>, vector<2x8x8x64xf32>
    %464 = vector.shape_cast %463 : vector<2x8x8x64xf32> to vector<128x64xf32>
    %c2_670 = arith.constant 2 : index
    %c1_671 = arith.constant 1 : index
    %c0_672 = arith.constant 0 : index
    %c0_673 = arith.constant 0 : index
    %465 = vector.load %arg13[%c2_670, %c1_671, %c0_672, %c0_673] : memref<3x3x64x64xf32, #tpu.memory_space<vmem>>, vector<1x1x64x64xf32>
    %466 = vector.shape_cast %465 : vector<1x1x64x64xf32> to vector<64x64xf32>
    %cst_674 = arith.constant dense<0.000000e+00> : vector<128x64xf32>
    %467 = tpu.matmul %464, %466, %cst_674 {dimension_numbers = #tpu.dot_dimension_numbers<[1], [0], [0], [1], [0, 0, 1, 1], [], []>} : vector<128x64xf32>, vector<64x64xf32>, vector<128x64xf32> -> vector<128x64xf32>
    %468 = arith.addf %462, %467 : vector<128x64xf32>
    %c0_675 = arith.constant 0 : index
    %c2_676 = arith.constant 2 : index
    %c2_677 = arith.constant 2 : index
    %c0_678 = arith.constant 0 : index
    %469 = vector.load %arg25[%c0_675, %c2_676, %c2_677, %c0_678] : memref<2x10x10x64xf32, #tpu.memory_space<vmem>>, vector<2x8x8x64xf32>
    %470 = vector.shape_cast %469 : vector<2x8x8x64xf32> to vector<128x64xf32>
    %c2_679 = arith.constant 2 : index
    %c2_680 = arith.constant 2 : index
    %c0_681 = arith.constant 0 : index
    %c0_682 = arith.constant 0 : index
    %471 = vector.load %arg13[%c2_679, %c2_680, %c0_681, %c0_682] : memref<3x3x64x64xf32, #tpu.memory_space<vmem>>, vector<1x1x64x64xf32>
    %472 = vector.shape_cast %471 : vector<1x1x64x64xf32> to vector<64x64xf32>
    %cst_683 = arith.constant dense<0.000000e+00> : vector<128x64xf32>
    %473 = tpu.matmul %470, %472, %cst_683 {dimension_numbers = #tpu.dot_dimension_numbers<[1], [0], [0], [1], [0, 0, 1, 1], [], []>} : vector<128x64xf32>, vector<64x64xf32>, vector<128x64xf32> -> vector<128x64xf32>
    %474 = arith.addf %468, %473 : vector<128x64xf32>
    %c0_684 = arith.constant 0 : index
    %c0_685 = arith.constant 0 : index
    %475 = vector.load %arg14[%c0_684, %c0_685] : memref<1x64xf32, #tpu.memory_space<vmem>>, vector<1x64xf32>
    %476 = vector.broadcast %475 : vector<1x64xf32> to vector<128x64xf32>
    %477 = arith.addf %474, %476 : vector<128x64xf32>
    %c0_686 = arith.constant 0 : index
    %c0_687 = arith.constant 0 : index
    %478 = vector.load %arg15[%c0_686, %c0_687] : memref<32x64xf32, #tpu.memory_space<vmem>>, vector<32x64xf32>
    %cst_688 = arith.constant dense<0.000000e+00> : vector<128x64xf32>
    %479 = tpu.matmul %355, %478, %cst_688 {dimension_numbers = #tpu.dot_dimension_numbers<[1], [0], [0], [1], [0, 0, 1, 1], [], []>} : vector<128x32xf32>, vector<32x64xf32>, vector<128x64xf32> -> vector<128x64xf32>
    %c0_689 = arith.constant 0 : index
    %c0_690 = arith.constant 0 : index
    %480 = vector.load %arg16[%c0_689, %c0_690] : memref<1x64xf32, #tpu.memory_space<vmem>>, vector<1x64xf32>
    %481 = vector.broadcast %480 : vector<1x64xf32> to vector<128x64xf32>
    %482 = arith.addf %479, %481 : vector<128x64xf32>
    %483 = arith.addf %477, %482 : vector<128x64xf32>
    %cst_691 = arith.constant 0.000000e+00 : f32
    %484 = vector.broadcast %cst_691 : f32 to vector<128x64xf32>
    %485 = arith.maximumf %483, %484 : vector<128x64xf32>
    %486 = vector.shape_cast %485 : vector<128x64xf32> to vector<2x8x8x64xf32>
    %c0_692 = arith.constant 0 : index
    %c1_693 = arith.constant 1 : index
    %c1_694 = arith.constant 1 : index
    %c0_695 = arith.constant 0 : index
    %487 = vector.load %arg25[%c0_692, %c1_693, %c1_694, %c0_695] : memref<2x10x10x64xf32, #tpu.memory_space<vmem>>, vector<2x8x8x64xf32>
    tpu.vector_store %arg25[%c0_692, %c1_693, %c1_694, %c0_695], %486 {strides = array<i32>} : memref<2x10x10x64xf32, #tpu.memory_space<vmem>>, vector<2x8x8x64xf32>,
    %cst_696 = arith.constant 0.000000e+00 : f32
    %488 = vector.broadcast %cst_696 : f32 to vector<128x64xf32>
    %c0_697 = arith.constant 0 : index
    %c0_698 = arith.constant 0 : index
    %c0_699 = arith.constant 0 : index
    %c0_700 = arith.constant 0 : index
    %489 = vector.load %arg25[%c0_697, %c0_698, %c0_699, %c0_700] : memref<2x10x10x64xf32, #tpu.memory_space<vmem>>, vector<2x8x8x64xf32>
    %490 = vector.shape_cast %489 : vector<2x8x8x64xf32> to vector<128x64xf32>
    %c0_701 = arith.constant 0 : index
    %c0_702 = arith.constant 0 : index
    %c0_703 = arith.constant 0 : index
    %c0_704 = arith.constant 0 : index
    %491 = vector.load %arg17[%c0_701, %c0_702, %c0_703, %c0_704] : memref<3x3x64x64xf32, #tpu.memory_space<vmem>>, vector<1x1x64x64xf32>
    %492 = vector.shape_cast %491 : vector<1x1x64x64xf32> to vector<64x64xf32>
    %cst_705 = arith.constant dense<0.000000e+00> : vector<128x64xf32>
    %493 = tpu.matmul %490, %492, %cst_705 {dimension_numbers = #tpu.dot_dimension_numbers<[1], [0], [0], [1], [0, 0, 1, 1], [], []>} : vector<128x64xf32>, vector<64x64xf32>, vector<128x64xf32> -> vector<128x64xf32>
    %494 = arith.addf %488, %493 : vector<128x64xf32>
    %c0_706 = arith.constant 0 : index
    %c0_707 = arith.constant 0 : index
    %c1_708 = arith.constant 1 : index
    %c0_709 = arith.constant 0 : index
    %495 = vector.load %arg25[%c0_706, %c0_707, %c1_708, %c0_709] : memref<2x10x10x64xf32, #tpu.memory_space<vmem>>, vector<2x8x8x64xf32>
    %496 = vector.shape_cast %495 : vector<2x8x8x64xf32> to vector<128x64xf32>
    %c0_710 = arith.constant 0 : index
    %c1_711 = arith.constant 1 : index
    %c0_712 = arith.constant 0 : index
    %c0_713 = arith.constant 0 : index
    %497 = vector.load %arg17[%c0_710, %c1_711, %c0_712, %c0_713] : memref<3x3x64x64xf32, #tpu.memory_space<vmem>>, vector<1x1x64x64xf32>
    %498 = vector.shape_cast %497 : vector<1x1x64x64xf32> to vector<64x64xf32>
    %cst_714 = arith.constant dense<0.000000e+00> : vector<128x64xf32>
    %499 = tpu.matmul %496, %498, %cst_714 {dimension_numbers = #tpu.dot_dimension_numbers<[1], [0], [0], [1], [0, 0, 1, 1], [], []>} : vector<128x64xf32>, vector<64x64xf32>, vector<128x64xf32> -> vector<128x64xf32>
    %500 = arith.addf %494, %499 : vector<128x64xf32>
    %c0_715 = arith.constant 0 : index
    %c0_716 = arith.constant 0 : index
    %c2_717 = arith.constant 2 : index
    %c0_718 = arith.constant 0 : index
    %501 = vector.load %arg25[%c0_715, %c0_716, %c2_717, %c0_718] : memref<2x10x10x64xf32, #tpu.memory_space<vmem>>, vector<2x8x8x64xf32>
    %502 = vector.shape_cast %501 : vector<2x8x8x64xf32> to vector<128x64xf32>
    %c0_719 = arith.constant 0 : index
    %c2_720 = arith.constant 2 : index
    %c0_721 = arith.constant 0 : index
    %c0_722 = arith.constant 0 : index
    %503 = vector.load %arg17[%c0_719, %c2_720, %c0_721, %c0_722] : memref<3x3x64x64xf32, #tpu.memory_space<vmem>>, vector<1x1x64x64xf32>
    %504 = vector.shape_cast %503 : vector<1x1x64x64xf32> to vector<64x64xf32>
    %cst_723 = arith.constant dense<0.000000e+00> : vector<128x64xf32>
    %505 = tpu.matmul %502, %504, %cst_723 {dimension_numbers = #tpu.dot_dimension_numbers<[1], [0], [0], [1], [0, 0, 1, 1], [], []>} : vector<128x64xf32>, vector<64x64xf32>, vector<128x64xf32> -> vector<128x64xf32>
    %506 = arith.addf %500, %505 : vector<128x64xf32>
    %c0_724 = arith.constant 0 : index
    %c1_725 = arith.constant 1 : index
    %c0_726 = arith.constant 0 : index
    %c0_727 = arith.constant 0 : index
    %507 = vector.load %arg25[%c0_724, %c1_725, %c0_726, %c0_727] : memref<2x10x10x64xf32, #tpu.memory_space<vmem>>, vector<2x8x8x64xf32>
    %508 = vector.shape_cast %507 : vector<2x8x8x64xf32> to vector<128x64xf32>
    %c1_728 = arith.constant 1 : index
    %c0_729 = arith.constant 0 : index
    %c0_730 = arith.constant 0 : index
    %c0_731 = arith.constant 0 : index
    %509 = vector.load %arg17[%c1_728, %c0_729, %c0_730, %c0_731] : memref<3x3x64x64xf32, #tpu.memory_space<vmem>>, vector<1x1x64x64xf32>
    %510 = vector.shape_cast %509 : vector<1x1x64x64xf32> to vector<64x64xf32>
    %cst_732 = arith.constant dense<0.000000e+00> : vector<128x64xf32>
    %511 = tpu.matmul %508, %510, %cst_732 {dimension_numbers = #tpu.dot_dimension_numbers<[1], [0], [0], [1], [0, 0, 1, 1], [], []>} : vector<128x64xf32>, vector<64x64xf32>, vector<128x64xf32> -> vector<128x64xf32>
    %512 = arith.addf %506, %511 : vector<128x64xf32>
    %c0_733 = arith.constant 0 : index
    %c1_734 = arith.constant 1 : index
    %c1_735 = arith.constant 1 : index
    %c0_736 = arith.constant 0 : index
    %513 = vector.load %arg25[%c0_733, %c1_734, %c1_735, %c0_736] : memref<2x10x10x64xf32, #tpu.memory_space<vmem>>, vector<2x8x8x64xf32>
    %514 = vector.shape_cast %513 : vector<2x8x8x64xf32> to vector<128x64xf32>
    %c1_737 = arith.constant 1 : index
    %c1_738 = arith.constant 1 : index
    %c0_739 = arith.constant 0 : index
    %c0_740 = arith.constant 0 : index
    %515 = vector.load %arg17[%c1_737, %c1_738, %c0_739, %c0_740] : memref<3x3x64x64xf32, #tpu.memory_space<vmem>>, vector<1x1x64x64xf32>
    %516 = vector.shape_cast %515 : vector<1x1x64x64xf32> to vector<64x64xf32>
    %cst_741 = arith.constant dense<0.000000e+00> : vector<128x64xf32>
    %517 = tpu.matmul %514, %516, %cst_741 {dimension_numbers = #tpu.dot_dimension_numbers<[1], [0], [0], [1], [0, 0, 1, 1], [], []>} : vector<128x64xf32>, vector<64x64xf32>, vector<128x64xf32> -> vector<128x64xf32>
    %518 = arith.addf %512, %517 : vector<128x64xf32>
    %c0_742 = arith.constant 0 : index
    %c1_743 = arith.constant 1 : index
    %c2_744 = arith.constant 2 : index
    %c0_745 = arith.constant 0 : index
    %519 = vector.load %arg25[%c0_742, %c1_743, %c2_744, %c0_745] : memref<2x10x10x64xf32, #tpu.memory_space<vmem>>, vector<2x8x8x64xf32>
    %520 = vector.shape_cast %519 : vector<2x8x8x64xf32> to vector<128x64xf32>
    %c1_746 = arith.constant 1 : index
    %c2_747 = arith.constant 2 : index
    %c0_748 = arith.constant 0 : index
    %c0_749 = arith.constant 0 : index
    %521 = vector.load %arg17[%c1_746, %c2_747, %c0_748, %c0_749] : memref<3x3x64x64xf32, #tpu.memory_space<vmem>>, vector<1x1x64x64xf32>
    %522 = vector.shape_cast %521 : vector<1x1x64x64xf32> to vector<64x64xf32>
    %cst_750 = arith.constant dense<0.000000e+00> : vector<128x64xf32>
    %523 = tpu.matmul %520, %522, %cst_750 {dimension_numbers = #tpu.dot_dimension_numbers<[1], [0], [0], [1], [0, 0, 1, 1], [], []>} : vector<128x64xf32>, vector<64x64xf32>, vector<128x64xf32> -> vector<128x64xf32>
    %524 = arith.addf %518, %523 : vector<128x64xf32>
    %c0_751 = arith.constant 0 : index
    %c2_752 = arith.constant 2 : index
    %c0_753 = arith.constant 0 : index
    %c0_754 = arith.constant 0 : index
    %525 = vector.load %arg25[%c0_751, %c2_752, %c0_753, %c0_754] : memref<2x10x10x64xf32, #tpu.memory_space<vmem>>, vector<2x8x8x64xf32>
    %526 = vector.shape_cast %525 : vector<2x8x8x64xf32> to vector<128x64xf32>
    %c2_755 = arith.constant 2 : index
    %c0_756 = arith.constant 0 : index
    %c0_757 = arith.constant 0 : index
    %c0_758 = arith.constant 0 : index
    %527 = vector.load %arg17[%c2_755, %c0_756, %c0_757, %c0_758] : memref<3x3x64x64xf32, #tpu.memory_space<vmem>>, vector<1x1x64x64xf32>
    %528 = vector.shape_cast %527 : vector<1x1x64x64xf32> to vector<64x64xf32>
    %cst_759 = arith.constant dense<0.000000e+00> : vector<128x64xf32>
    %529 = tpu.matmul %526, %528, %cst_759 {dimension_numbers = #tpu.dot_dimension_numbers<[1], [0], [0], [1], [0, 0, 1, 1], [], []>} : vector<128x64xf32>, vector<64x64xf32>, vector<128x64xf32> -> vector<128x64xf32>
    %530 = arith.addf %524, %529 : vector<128x64xf32>
    %c0_760 = arith.constant 0 : index
    %c2_761 = arith.constant 2 : index
    %c1_762 = arith.constant 1 : index
    %c0_763 = arith.constant 0 : index
    %531 = vector.load %arg25[%c0_760, %c2_761, %c1_762, %c0_763] : memref<2x10x10x64xf32, #tpu.memory_space<vmem>>, vector<2x8x8x64xf32>
    %532 = vector.shape_cast %531 : vector<2x8x8x64xf32> to vector<128x64xf32>
    %c2_764 = arith.constant 2 : index
    %c1_765 = arith.constant 1 : index
    %c0_766 = arith.constant 0 : index
    %c0_767 = arith.constant 0 : index
    %533 = vector.load %arg17[%c2_764, %c1_765, %c0_766, %c0_767] : memref<3x3x64x64xf32, #tpu.memory_space<vmem>>, vector<1x1x64x64xf32>
    %534 = vector.shape_cast %533 : vector<1x1x64x64xf32> to vector<64x64xf32>
    %cst_768 = arith.constant dense<0.000000e+00> : vector<128x64xf32>
    %535 = tpu.matmul %532, %534, %cst_768 {dimension_numbers = #tpu.dot_dimension_numbers<[1], [0], [0], [1], [0, 0, 1, 1], [], []>} : vector<128x64xf32>, vector<64x64xf32>, vector<128x64xf32> -> vector<128x64xf32>
    %536 = arith.addf %530, %535 : vector<128x64xf32>
    %c0_769 = arith.constant 0 : index
    %c2_770 = arith.constant 2 : index
    %c2_771 = arith.constant 2 : index
    %c0_772 = arith.constant 0 : index
    %537 = vector.load %arg25[%c0_769, %c2_770, %c2_771, %c0_772] : memref<2x10x10x64xf32, #tpu.memory_space<vmem>>, vector<2x8x8x64xf32>
    %538 = vector.shape_cast %537 : vector<2x8x8x64xf32> to vector<128x64xf32>
    %c2_773 = arith.constant 2 : index
    %c2_774 = arith.constant 2 : index
    %c0_775 = arith.constant 0 : index
    %c0_776 = arith.constant 0 : index
    %539 = vector.load %arg17[%c2_773, %c2_774, %c0_775, %c0_776] : memref<3x3x64x64xf32, #tpu.memory_space<vmem>>, vector<1x1x64x64xf32>
    %540 = vector.shape_cast %539 : vector<1x1x64x64xf32> to vector<64x64xf32>
    %cst_777 = arith.constant dense<0.000000e+00> : vector<128x64xf32>
    %541 = tpu.matmul %538, %540, %cst_777 {dimension_numbers = #tpu.dot_dimension_numbers<[1], [0], [0], [1], [0, 0, 1, 1], [], []>} : vector<128x64xf32>, vector<64x64xf32>, vector<128x64xf32> -> vector<128x64xf32>
    %542 = arith.addf %536, %541 : vector<128x64xf32>
    %c0_778 = arith.constant 0 : index
    %c0_779 = arith.constant 0 : index
    %543 = vector.load %arg18[%c0_778, %c0_779] : memref<1x64xf32, #tpu.memory_space<vmem>>, vector<1x64xf32>
    %544 = vector.broadcast %543 : vector<1x64xf32> to vector<128x64xf32>
    %545 = arith.addf %542, %544 : vector<128x64xf32>
    %cst_780 = arith.constant 0.000000e+00 : f32
    %546 = vector.broadcast %cst_780 : f32 to vector<128x64xf32>
    %547 = arith.maximumf %545, %546 : vector<128x64xf32>
    %548 = vector.shape_cast %547 : vector<128x64xf32> to vector<2x8x8x64xf32>
    %c0_781 = arith.constant 0 : index
    %c1_782 = arith.constant 1 : index
    %c1_783 = arith.constant 1 : index
    %c0_784 = arith.constant 0 : index
    %549 = vector.load %arg25[%c0_781, %c1_782, %c1_783, %c0_784] : memref<2x10x10x64xf32, #tpu.memory_space<vmem>>, vector<2x8x8x64xf32>
    tpu.vector_store %arg25[%c0_781, %c1_782, %c1_783, %c0_784], %548 {strides = array<i32>} : memref<2x10x10x64xf32, #tpu.memory_space<vmem>>, vector<2x8x8x64xf32>,
    %cst_785 = arith.constant 0.000000e+00 : f32
    %550 = vector.broadcast %cst_785 : f32 to vector<128x64xf32>
    %c0_786 = arith.constant 0 : index
    %c0_787 = arith.constant 0 : index
    %c0_788 = arith.constant 0 : index
    %c0_789 = arith.constant 0 : index
    %551 = vector.load %arg25[%c0_786, %c0_787, %c0_788, %c0_789] : memref<2x10x10x64xf32, #tpu.memory_space<vmem>>, vector<2x8x8x64xf32>
    %552 = vector.shape_cast %551 : vector<2x8x8x64xf32> to vector<128x64xf32>
    %c0_790 = arith.constant 0 : index
    %c0_791 = arith.constant 0 : index
    %c0_792 = arith.constant 0 : index
    %c0_793 = arith.constant 0 : index
    %553 = vector.load %arg19[%c0_790, %c0_791, %c0_792, %c0_793] : memref<3x3x64x64xf32, #tpu.memory_space<vmem>>, vector<1x1x64x64xf32>
    %554 = vector.shape_cast %553 : vector<1x1x64x64xf32> to vector<64x64xf32>
    %cst_794 = arith.constant dense<0.000000e+00> : vector<128x64xf32>
    %555 = tpu.matmul %552, %554, %cst_794 {dimension_numbers = #tpu.dot_dimension_numbers<[1], [0], [0], [1], [0, 0, 1, 1], [], []>} : vector<128x64xf32>, vector<64x64xf32>, vector<128x64xf32> -> vector<128x64xf32>
    %556 = arith.addf %550, %555 : vector<128x64xf32>
    %c0_795 = arith.constant 0 : index
    %c0_796 = arith.constant 0 : index
    %c1_797 = arith.constant 1 : index
    %c0_798 = arith.constant 0 : index
    %557 = vector.load %arg25[%c0_795, %c0_796, %c1_797, %c0_798] : memref<2x10x10x64xf32, #tpu.memory_space<vmem>>, vector<2x8x8x64xf32>
    %558 = vector.shape_cast %557 : vector<2x8x8x64xf32> to vector<128x64xf32>
    %c0_799 = arith.constant 0 : index
    %c1_800 = arith.constant 1 : index
    %c0_801 = arith.constant 0 : index
    %c0_802 = arith.constant 0 : index
    %559 = vector.load %arg19[%c0_799, %c1_800, %c0_801, %c0_802] : memref<3x3x64x64xf32, #tpu.memory_space<vmem>>, vector<1x1x64x64xf32>
    %560 = vector.shape_cast %559 : vector<1x1x64x64xf32> to vector<64x64xf32>
    %cst_803 = arith.constant dense<0.000000e+00> : vector<128x64xf32>
    %561 = tpu.matmul %558, %560, %cst_803 {dimension_numbers = #tpu.dot_dimension_numbers<[1], [0], [0], [1], [0, 0, 1, 1], [], []>} : vector<128x64xf32>, vector<64x64xf32>, vector<128x64xf32> -> vector<128x64xf32>
    %562 = arith.addf %556, %561 : vector<128x64xf32>
    %c0_804 = arith.constant 0 : index
    %c0_805 = arith.constant 0 : index
    %c2_806 = arith.constant 2 : index
    %c0_807 = arith.constant 0 : index
    %563 = vector.load %arg25[%c0_804, %c0_805, %c2_806, %c0_807] : memref<2x10x10x64xf32, #tpu.memory_space<vmem>>, vector<2x8x8x64xf32>
    %564 = vector.shape_cast %563 : vector<2x8x8x64xf32> to vector<128x64xf32>
    %c0_808 = arith.constant 0 : index
    %c2_809 = arith.constant 2 : index
    %c0_810 = arith.constant 0 : index
    %c0_811 = arith.constant 0 : index
    %565 = vector.load %arg19[%c0_808, %c2_809, %c0_810, %c0_811] : memref<3x3x64x64xf32, #tpu.memory_space<vmem>>, vector<1x1x64x64xf32>
    %566 = vector.shape_cast %565 : vector<1x1x64x64xf32> to vector<64x64xf32>
    %cst_812 = arith.constant dense<0.000000e+00> : vector<128x64xf32>
    %567 = tpu.matmul %564, %566, %cst_812 {dimension_numbers = #tpu.dot_dimension_numbers<[1], [0], [0], [1], [0, 0, 1, 1], [], []>} : vector<128x64xf32>, vector<64x64xf32>, vector<128x64xf32> -> vector<128x64xf32>
    %568 = arith.addf %562, %567 : vector<128x64xf32>
    %c0_813 = arith.constant 0 : index
    %c1_814 = arith.constant 1 : index
    %c0_815 = arith.constant 0 : index
    %c0_816 = arith.constant 0 : index
    %569 = vector.load %arg25[%c0_813, %c1_814, %c0_815, %c0_816] : memref<2x10x10x64xf32, #tpu.memory_space<vmem>>, vector<2x8x8x64xf32>
    %570 = vector.shape_cast %569 : vector<2x8x8x64xf32> to vector<128x64xf32>
    %c1_817 = arith.constant 1 : index
    %c0_818 = arith.constant 0 : index
    %c0_819 = arith.constant 0 : index
    %c0_820 = arith.constant 0 : index
    %571 = vector.load %arg19[%c1_817, %c0_818, %c0_819, %c0_820] : memref<3x3x64x64xf32, #tpu.memory_space<vmem>>, vector<1x1x64x64xf32>
    %572 = vector.shape_cast %571 : vector<1x1x64x64xf32> to vector<64x64xf32>
    %cst_821 = arith.constant dense<0.000000e+00> : vector<128x64xf32>
    %573 = tpu.matmul %570, %572, %cst_821 {dimension_numbers = #tpu.dot_dimension_numbers<[1], [0], [0], [1], [0, 0, 1, 1], [], []>} : vector<128x64xf32>, vector<64x64xf32>, vector<128x64xf32> -> vector<128x64xf32>
    %574 = arith.addf %568, %573 : vector<128x64xf32>
    %c0_822 = arith.constant 0 : index
    %c1_823 = arith.constant 1 : index
    %c1_824 = arith.constant 1 : index
    %c0_825 = arith.constant 0 : index
    %575 = vector.load %arg25[%c0_822, %c1_823, %c1_824, %c0_825] : memref<2x10x10x64xf32, #tpu.memory_space<vmem>>, vector<2x8x8x64xf32>
    %576 = vector.shape_cast %575 : vector<2x8x8x64xf32> to vector<128x64xf32>
    %c1_826 = arith.constant 1 : index
    %c1_827 = arith.constant 1 : index
    %c0_828 = arith.constant 0 : index
    %c0_829 = arith.constant 0 : index
    %577 = vector.load %arg19[%c1_826, %c1_827, %c0_828, %c0_829] : memref<3x3x64x64xf32, #tpu.memory_space<vmem>>, vector<1x1x64x64xf32>
    %578 = vector.shape_cast %577 : vector<1x1x64x64xf32> to vector<64x64xf32>
    %cst_830 = arith.constant dense<0.000000e+00> : vector<128x64xf32>
    %579 = tpu.matmul %576, %578, %cst_830 {dimension_numbers = #tpu.dot_dimension_numbers<[1], [0], [0], [1], [0, 0, 1, 1], [], []>} : vector<128x64xf32>, vector<64x64xf32>, vector<128x64xf32> -> vector<128x64xf32>
    %580 = arith.addf %574, %579 : vector<128x64xf32>
    %c0_831 = arith.constant 0 : index
    %c1_832 = arith.constant 1 : index
    %c2_833 = arith.constant 2 : index
    %c0_834 = arith.constant 0 : index
    %581 = vector.load %arg25[%c0_831, %c1_832, %c2_833, %c0_834] : memref<2x10x10x64xf32, #tpu.memory_space<vmem>>, vector<2x8x8x64xf32>
    %582 = vector.shape_cast %581 : vector<2x8x8x64xf32> to vector<128x64xf32>
    %c1_835 = arith.constant 1 : index
    %c2_836 = arith.constant 2 : index
    %c0_837 = arith.constant 0 : index
    %c0_838 = arith.constant 0 : index
    %583 = vector.load %arg19[%c1_835, %c2_836, %c0_837, %c0_838] : memref<3x3x64x64xf32, #tpu.memory_space<vmem>>, vector<1x1x64x64xf32>
    %584 = vector.shape_cast %583 : vector<1x1x64x64xf32> to vector<64x64xf32>
    %cst_839 = arith.constant dense<0.000000e+00> : vector<128x64xf32>
    %585 = tpu.matmul %582, %584, %cst_839 {dimension_numbers = #tpu.dot_dimension_numbers<[1], [0], [0], [1], [0, 0, 1, 1], [], []>} : vector<128x64xf32>, vector<64x64xf32>, vector<128x64xf32> -> vector<128x64xf32>
    %586 = arith.addf %580, %585 : vector<128x64xf32>
    %c0_840 = arith.constant 0 : index
    %c2_841 = arith.constant 2 : index
    %c0_842 = arith.constant 0 : index
    %c0_843 = arith.constant 0 : index
    %587 = vector.load %arg25[%c0_840, %c2_841, %c0_842, %c0_843] : memref<2x10x10x64xf32, #tpu.memory_space<vmem>>, vector<2x8x8x64xf32>
    %588 = vector.shape_cast %587 : vector<2x8x8x64xf32> to vector<128x64xf32>
    %c2_844 = arith.constant 2 : index
    %c0_845 = arith.constant 0 : index
    %c0_846 = arith.constant 0 : index
    %c0_847 = arith.constant 0 : index
    %589 = vector.load %arg19[%c2_844, %c0_845, %c0_846, %c0_847] : memref<3x3x64x64xf32, #tpu.memory_space<vmem>>, vector<1x1x64x64xf32>
    %590 = vector.shape_cast %589 : vector<1x1x64x64xf32> to vector<64x64xf32>
    %cst_848 = arith.constant dense<0.000000e+00> : vector<128x64xf32>
    %591 = tpu.matmul %588, %590, %cst_848 {dimension_numbers = #tpu.dot_dimension_numbers<[1], [0], [0], [1], [0, 0, 1, 1], [], []>} : vector<128x64xf32>, vector<64x64xf32>, vector<128x64xf32> -> vector<128x64xf32>
    %592 = arith.addf %586, %591 : vector<128x64xf32>
    %c0_849 = arith.constant 0 : index
    %c2_850 = arith.constant 2 : index
    %c1_851 = arith.constant 1 : index
    %c0_852 = arith.constant 0 : index
    %593 = vector.load %arg25[%c0_849, %c2_850, %c1_851, %c0_852] : memref<2x10x10x64xf32, #tpu.memory_space<vmem>>, vector<2x8x8x64xf32>
    %594 = vector.shape_cast %593 : vector<2x8x8x64xf32> to vector<128x64xf32>
    %c2_853 = arith.constant 2 : index
    %c1_854 = arith.constant 1 : index
    %c0_855 = arith.constant 0 : index
    %c0_856 = arith.constant 0 : index
    %595 = vector.load %arg19[%c2_853, %c1_854, %c0_855, %c0_856] : memref<3x3x64x64xf32, #tpu.memory_space<vmem>>, vector<1x1x64x64xf32>
    %596 = vector.shape_cast %595 : vector<1x1x64x64xf32> to vector<64x64xf32>
    %cst_857 = arith.constant dense<0.000000e+00> : vector<128x64xf32>
    %597 = tpu.matmul %594, %596, %cst_857 {dimension_numbers = #tpu.dot_dimension_numbers<[1], [0], [0], [1], [0, 0, 1, 1], [], []>} : vector<128x64xf32>, vector<64x64xf32>, vector<128x64xf32> -> vector<128x64xf32>
    %598 = arith.addf %592, %597 : vector<128x64xf32>
    %c0_858 = arith.constant 0 : index
    %c2_859 = arith.constant 2 : index
    %c2_860 = arith.constant 2 : index
    %c0_861 = arith.constant 0 : index
    %599 = vector.load %arg25[%c0_858, %c2_859, %c2_860, %c0_861] : memref<2x10x10x64xf32, #tpu.memory_space<vmem>>, vector<2x8x8x64xf32>
    %600 = vector.shape_cast %599 : vector<2x8x8x64xf32> to vector<128x64xf32>
    %c2_862 = arith.constant 2 : index
    %c2_863 = arith.constant 2 : index
    %c0_864 = arith.constant 0 : index
    %c0_865 = arith.constant 0 : index
    %601 = vector.load %arg19[%c2_862, %c2_863, %c0_864, %c0_865] : memref<3x3x64x64xf32, #tpu.memory_space<vmem>>, vector<1x1x64x64xf32>
    %602 = vector.shape_cast %601 : vector<1x1x64x64xf32> to vector<64x64xf32>
    %cst_866 = arith.constant dense<0.000000e+00> : vector<128x64xf32>
    %603 = tpu.matmul %600, %602, %cst_866 {dimension_numbers = #tpu.dot_dimension_numbers<[1], [0], [0], [1], [0, 0, 1, 1], [], []>} : vector<128x64xf32>, vector<64x64xf32>, vector<128x64xf32> -> vector<128x64xf32>
    %604 = arith.addf %598, %603 : vector<128x64xf32>
    %c0_867 = arith.constant 0 : index
    %c0_868 = arith.constant 0 : index
    %605 = vector.load %arg20[%c0_867, %c0_868] : memref<1x64xf32, #tpu.memory_space<vmem>>, vector<1x64xf32>
    %606 = vector.broadcast %605 : vector<1x64xf32> to vector<128x64xf32>
    %607 = arith.addf %604, %606 : vector<128x64xf32>
    %608 = arith.addf %607, %485 : vector<128x64xf32>
    %cst_869 = arith.constant 0.000000e+00 : f32
    %609 = vector.broadcast %cst_869 : f32 to vector<128x64xf32>
    %610 = arith.maximumf %608, %609 : vector<128x64xf32>
    %611 = vector.shape_cast %610 : vector<128x64xf32> to vector<2x64x64xf32>
    %cst_870 = arith.constant dense<0.000000e+00> : vector<2x64xf32>
    %612 = vector.multi_reduction <add>, %611, %cst_870 [1] : vector<2x64x64xf32> to vector<2x64xf32>
    %cst_871 = arith.constant 6.400000e+01 : f32
    %613 = vector.broadcast %cst_871 : f32 to vector<2x64xf32>
    %614 = arith.divf %612, %613 : vector<2x64xf32>
    %c0_872 = arith.constant 0 : index
    %c0_873 = arith.constant 0 : index
    %615 = vector.load %arg21[%c0_872, %c0_873] : memref<64x512xf32, #tpu.memory_space<vmem>>, vector<64x512xf32>
    %cst_874 = arith.constant dense<0.000000e+00> : vector<2x512xf32>
    %616 = tpu.matmul %614, %615, %cst_874 {dimension_numbers = #tpu.dot_dimension_numbers<[1], [0], [0], [1], [0, 0, 1, 1], [], []>} : vector<2x64xf32>, vector<64x512xf32>, vector<2x512xf32> -> vector<2x512xf32>
    %c0_875 = arith.constant 0 : index
    %c0_876 = arith.constant 0 : index
    %617 = vector.load %arg22[%c0_875, %c0_876] : memref<1x512xf32, #tpu.memory_space<vmem>>, vector<1x512xf32>
    %618 = vector.broadcast %617 : vector<1x512xf32> to vector<2x512xf32>
    %619 = arith.addf %616, %618 : vector<2x512xf32>
    %620 = arith.mulf %619, %619 : vector<2x512xf32>
    %cst_877 = arith.constant dense<0.000000e+00> : vector<2xf32>
    %621 = vector.multi_reduction <add>, %620, %cst_877 [1] : vector<2x512xf32> to vector<2xf32>
    %622 = vector.shape_cast %621 : vector<2xf32> to vector<2x1xf32>
    %cst_878 = arith.constant 1.000000e-24 : f32
    %623 = vector.broadcast %cst_878 : f32 to vector<2x1xf32>
    %624 = arith.maximumf %622, %623 : vector<2x1xf32>
    %625 = math.rsqrt %624 : vector<2x1xf32>
    %626 = vector.broadcast %625 : vector<2x1xf32> to vector<2x512xf32>
    %627 = arith.mulf %619, %626 : vector<2x512xf32>
    %c0_879 = arith.constant 0 : index
    %c0_880 = arith.constant 0 : index
    %628 = vector.load %arg23[%c0_879, %c0_880] : memref<2x512xf32, #tpu.memory_space<vmem>>, vector<2x512xf32>
    tpu.vector_store %arg23[%c0_879, %c0_880], %627 {strides = array<i32>} : memref<2x512xf32, #tpu.memory_space<vmem>>, vector<2x512xf32>,
    return
  }
}

</mosaic_0001>

<bundles_post_ra>
// kernel: feature_extractor.1
= control target key start
LH: loop header
LB: loop body
LE: loop exit
PB: predicated region body
PF: predicated region fallthrough
CT: control target
= control target key end

     0   :  { %s36872_s0 = inlined_call_operand.vmem [shape: f32[2,11,11,16], index: 0, kind: input, shape index: {}]   ;;  %s36873_s1 = inlined_call_operand.vmem [shape: f32[4,4,16,32], index: 1, kind: input, shape index: {}]   ;;  %s36874_s2 = inlined_call_operand.vmem [shape: f32[1,32], index: 2, kind: input, shape index: {}]   ;;  %s36875_s3 = inlined_call_operand.vmem [shape: f32[3,3,32,32], index: 3, kind: input, shape index: {}]   ;;  %s36876_s4 = inlined_call_operand.vmem [shape: f32[1,32], index: 4, kind: input, shape index: {}]   ;;  %s36877_s5 = inlined_call_operand.vmem [shape: f32[3,3,32,32], index: 5, kind: input, shape index: {}]   ;;  %s36878_s6 = inlined_call_operand.vmem [shape: f32[1,32], index: 6, kind: input, shape index: {}]   ;;  %s36879_s7 = inlined_call_operand.vmem [shape: f32[3,3,32,32], index: 7, kind: input, shape index: {}]   ;;  %s36880_s8 = inlined_call_operand.vmem [shape: f32[1,32], index: 8, kind: input, shape index: {}]   ;;  %s36881_s9 = inlined_call_operand.vmem [shape: f32[3,3,32,32], index: 9, kind: input, shape index: {}]   ;;  %s36882_s10 = inlined_call_operand.vmem [shape: f32[1,32], index: 10, kind: input, shape index: {}]   ;;  %s36883_s11 = inlined_call_operand.vmem [shape: f32[3,3,32,64], index: 11, kind: input, shape index: {}]   ;;  %s36884_s12 = inlined_call_operand.vmem [shape: f32[1,64], index: 12, kind: input, shape index: {}]   ;;  %s36885_s13 = inlined_call_operand.vmem [shape: f32[3,3,64,64], index: 13, kind: input, shape index: {}]   ;;  %s36886_s14 = inlined_call_operand.vmem [shape: f32[1,64], index: 14, kind: input, shape index: {}]   ;;  %s36887_s15 = inlined_call_operand.vmem [shape: f32[32,64], index: 15, kind: input, shape index: {}]   ;;  %s36888_s16 = inlined_call_operand.vmem [shape: f32[1,64], index: 16, kind: input, shape index: {}]   ;;  %s36889_s17 = inlined_call_operand.vmem [shape: f32[3,3,64,64], index: 17, kind: input, shape index: {}]   ;;  %s36890_s18 = inlined_call_operand.vmem [shape: f32[1,64], index: 18, kind: input, shape index: {}]   ;;  %s36891_s19 = inlined_call_operand.vmem [shape: f32[3,3,64,64], index: 19, kind: input, shape index: {}]   ;;  %s36892_s20 = inlined_call_operand.vmem [shape: f32[1,64], index: 20, kind: input, shape index: {}]   ;;  %s36893_s21 = inlined_call_operand.vmem [shape: f32[64,512], index: 21, kind: input, shape index: {}]   ;;  %s36894_s22 = inlined_call_operand.vmem [shape: f32[1,512], index: 22, kind: input, shape index: {}]   ;;  %s36895_s23 = inlined_call_operand.hbm [shape: f32[2,512], index: 23, kind: output, shape index: {}]  }
   0x1   :  { %36998 = sst [smem:[#allocation18_spill]] %s36872_s0 }
   0x2   :  { %36999 = sst [smem:[#allocation19_spill]] %s36873_s1 }
   0x3   :  { %37000 = sst [smem:[#allocation20_spill]] %s36874_s2 }
   0x4   :  { %37001 = sst [smem:[#allocation21_spill]] %s36875_s3 }
   0x5   :  { %37002 = sst [smem:[#allocation22_spill]] %s36876_s4 }
   0x6   :  { %37003 = sst [smem:[#allocation23_spill]] %s36877_s5 }
   0x7   :  { %37004 = sst [smem:[#allocation24_spill]] %s36878_s6 }
   0x8   :  { %37005 = sst [smem:[#allocation25_spill]] %s36879_s7 }
   0x9   :  { %s37006_s24 = sld [smem:[#allocation19_spill]]  ;;  %s37007_s2 = sld [smem:[#allocation18_spill]]  ;;  %vm196_vm0 = vcmask 130048  }
   0xf   :  { %v21237_v0 = vld [vmem:[%s37006_s24 + $0x10] sm:$0xff]  ;;  %v21238_v1 = vld [vmem:[%s37006_s24 + $0x18] sm:$0xff]  ;;  %v177_v2 = vld [vmem:[%s37007_s2 + $0x1] sm:$0xff] }
  0x10   :  { %v28103_v3 = vpack.c.bf16 %v21238_v1, %v21237_v0  ;;  %25107 = vmatprep.mubr.msk.f32.mxu0 %vm196_vm0, %v177_v2  ;;  %v175_v4 = vld [vmem:[%s37006_s24] sm:$0xff]  ;;  %v176_v5 = vld [vmem:[%s37006_s24 + $0x8] sm:$0xff]  ;;  %v30486_v7 = vld [vmem:[%s37007_s2 + $0x11] sm:$0xff] }
  0x11   :  { %v28107_v6 = vpack.c.bf16 %v176_v5, %v175_v4  ;;  %v30491_v8 = vld [vmem:[%s37007_s2 + $0x21] sm:$0xff]  ;;  %v30506_v11 = vld [vmem:[%s37007_s2 + $0x31] sm:$0xff] }
  0x12   :  { %28104 = vmatprep.subr.bf16.mxu0 %v28103_v3  ;;  %v21271_v9 = vld [vmem:[%s37006_s24 + $0x20] sm:$0xff]  ;;  %v21272_v10 = vld [vmem:[%s37006_s24 + $0x28] sm:$0xff]  ;;  %v30520_v14 = vld [vmem:[%s37007_s2 + $0x51] sm:$0xff] }
  0x13   :  { %28106 = vmatpush3.bf16.msra.mxu0 %v28103_v3  ;;  %v28111_v12 = vpack.c.bf16 %v21272_v10, %v21271_v9  ;;  %v30511_v13 = vld [vmem:[%s37007_s2 + $0x41] sm:$0xff]  ;;  %v30534_v16 = vld [vmem:[%s37007_s2 + $0x71] sm:$0xff] }
  0x14   :  { %28108 = vmatprep.subr.bf16.mxu0 %v28107_v6  ;;  %v30525_v15 = vld [vmem:[%s37007_s2 + $0x61] sm:$0xff]  ;;  %v185_v17 = vld [vmem:[%s37007_s2 + $0xb1] sm:$0xff] }
  0x15   :  { %v30545_v18 = vld [vmem:[%s37007_s2 + $0xc1] sm:$0xff]  ;;  %v30550_v19 = vld [vmem:[%s37007_s2 + $0xd1] sm:$0xff] }
  0x16   :  { %25108 = vmatmul.mubr.msk.f32.vlgmr.msra.gmra.mrb[0].mxu0 %vm196_vm0, %v30486_v7  ;;  %v30559_v20 = vld [vmem:[%s37007_s2 + $0xe1] sm:$0xff]  ;;  %v30564_v21 = vld [vmem:[%s37007_s2 + $0xf1] sm:$0xff] }
  0x17   :  { %28110 = vmatpush3.bf16.msra.mxu0 %v28107_v6  ;;  %25110 = vmatprep.mubr.msk.f32.mxu0 %vm196_vm0, %v30491_v8 }
  0x18   :  { %28112 = vmatprep.subr.bf16.mxu0 %v28111_v12 }
  0x1a   :  { %25111 = vmatmul.mubr.msk.f32.gmra.mrb[2].mxu0 %vm196_vm0, %v30506_v11 }
  0x1b   :  { %25113 = vmatprep.mubr.msk.f32.mxu0 %vm196_vm0, %v30511_v13 }
  0x1e   :  { %25114 = vmatmul.mubr.msk.f32.gmra.mrb[4].mxu0 %vm196_vm0, %v30520_v14 }
  0x1f   :  { %25116 = vmatprep.mubr.msk.f32.mxu0 %vm196_vm0, %v30525_v15 }
  0x22   :  { %25117 = vmatmul.mubr.msk.f32.gmra.mrb[6].mxu0 %vm196_vm0, %v30534_v16 }
  0x23   :  { %25119 = vmatprep.mubr.msk.f32.mxu0 %vm196_vm0, %v185_v17 }
  0x26   :  { %25120 = vmatmul.mubr.msk.f32.gmra.mrb[8].mxu0 %vm196_vm0, %v30545_v18 }
  0x27   :  { %25122 = vmatprep.mubr.msk.f32.mxu0 %vm196_vm0, %v30550_v19 }
  0x28   :  { %28 = vsyncpa [#allocation5], 0  ;;  %v30573_v22 = vld [vmem:[%s37007_s2 + $0x101] sm:$0xff]  ;;  %v30578_v23 = vld [vmem:[%s37007_s2 + $0x111] sm:$0xff]  ;;  %vm75_vm1 = vcmask 261120   ;;  %vm77_vm2 = vcmask 254976  }
  0x29   :  { %v30587_v24 = vld [vmem:[%s37007_s2 + $0x121] sm:$0xff]  ;;  %v21289_v26 = vld [vmem:[%s37006_s24 + $0x30] sm:$0xff]  ;;  %v21290_v27 = vld [vmem:[%s37006_s24 + $0x38] sm:$0xff]  ;;  %s37017_s0 = sld [smem:[#allocation23_spill]]  ;;  %s37018_s29 = sld [smem:[#allocation22_spill]]  ;;  %vm117_vm3 = vcmask 523264  }
  0x2a   :  { %25123 = vmatmul.mubr.msk.f32.gmra.mrb[10].mxu0 %vm196_vm0, %v30559_v20  ;;  %v159_v25 = vld [vmem:[%s37007_s2] sm:$0xff]  ;;  %v30604_v28 = vld [vmem:[%s37007_s2 + $0x10] sm:$0xff]  ;;  %v28115_v30 = vpack.c.bf16 %v21290_v27, %v21289_v26  ;;  %v21324_v46 = vld [vmem:[%s37006_s24 + $0x48] sm:$0xff]  ;;  %s37019_s25 = sld [smem:[#allocation25_spill]]  ;;  %vm119_vm4 = vcmask 517120   ;;  %vm21034_vm5 = vcmask 1041409  }
  0x2b   :  { %25125 = vmatprep.mubr.msk.f32.mxu0 %vm196_vm0, %v30564_v21  ;;  %v30609_v29 = vld [vmem:[%s37007_s2 + $0x20] sm:$0xff]  ;;  %v30618_v31 = vld [vmem:[%s37007_s2 + $0x30] sm:$0xff]  ;;  %v21358_v1 = vld [vmem:[%s37006_s24 + $0x58] sm:$0xff]  ;;  %vm21184_vm6 = vcmask 1041408  }
  0x2c   :  { %v30623_v32 = vld [vmem:[%s37007_s2 + $0x40] sm:$0xff]  ;;  %v30632_v33 = vld [vmem:[%s37007_s2 + $0x50] sm:$0xff] }
  0x2d   :  { %v30637_v34 = vld [vmem:[%s37007_s2 + $0x60] sm:$0xff]  ;;  %v30646_v35 = vld [vmem:[%s37007_s2 + $0x70] sm:$0xff] }
  0x2e   :  { %25126 = vmatmul.mubr.msk.f32.gmra.mrb[12].mxu0 %vm196_vm0, %v30573_v22  ;;  %v167_v36 = vld [vmem:[%s37007_s2 + $0xb0] sm:$0xff]  ;;  %v30657_v37 = vld [vmem:[%s37007_s2 + $0xc0] sm:$0xff] }
  0x2f   :  { %25128 = vmatprep.mubr.msk.f32.mxu0 %vm196_vm0, %v30578_v23  ;;  %v30662_v38 = vld [vmem:[%s37007_s2 + $0xd0] sm:$0xff]  ;;  %v30671_v39 = vld [vmem:[%s37007_s2 + $0xe0] sm:$0xff] }
  0x30   :  { %v30676_v40 = vld [vmem:[%s37007_s2 + $0xf0] sm:$0xff]  ;;  %v30685_v41 = vld [vmem:[%s37007_s2 + $0x100] sm:$0xff] }
  0x31   :  { %v30690_v42 = vld [vmem:[%s37007_s2 + $0x110] sm:$0xff]  ;;  %v30699_v43 = vld [vmem:[%s37007_s2 + $0x120] sm:$0xff] }
  0x32   :  { %25129 = vmatmul.mubr.msk.f32.gmra.mrb[14].mxu0 %vm196_vm0, %v30587_v24  ;;  %v583_v44 = vld [vmem:[%s37007_s2 + $0x2] sm:$0xff]  ;;  %v30716_v47 = vld [vmem:[%s37007_s2 + $0x12] sm:$0xff] }
  0x33   :  { %25135 = vmatprep.mubr.msk.f32.mxu0 %vm196_vm0, %v159_v25  ;;  %v21323_v45 = vld [vmem:[%s37006_s24 + $0x40] sm:$0xff]  ;;  %v30730_v50 = vld [vmem:[%s37007_s2 + $0x32] sm:$0xff] }
  0x34   :  { %v30721_v48 = vld [vmem:[%s37007_s2 + $0x22] sm:$0xff]  ;;  %v28119_v49 = vpack.c.bf16 %v21324_v46, %v21323_v45  ;;  %v30744_v52 = vld [vmem:[%s37007_s2 + $0x52] sm:$0xff] }
  0x35   :  { %v30735_v51 = vld [vmem:[%s37007_s2 + $0x42] sm:$0xff]  ;;  %v30758_v54 = vld [vmem:[%s37007_s2 + $0x72] sm:$0xff] }
  0x36   :  { %25136 = vmatmul.mubr.msk.f32.vlgmr.msra.gmra.mrb[0].mxu0 %vm196_vm0, %v30604_v28  ;;  %v30749_v53 = vld [vmem:[%s37007_s2 + $0x62] sm:$0xff]  ;;  %v591_v55 = vld [vmem:[%s37007_s2 + $0xb2] sm:$0xff] }
  0x37   :  { %28114 = vmatpush3.bf16.msra.mxu0 %v28111_v12  ;;  %25138 = vmatprep.mubr.msk.f32.mxu0 %vm196_vm0, %v30609_v29  ;;  %v30769_v56 = vld [vmem:[%s37007_s2 + $0xc2] sm:$0xff]  ;;  %v30774_v57 = vld [vmem:[%s37007_s2 + $0xd2] sm:$0xff] }
  0x38   :  { %28116 = vmatprep.subr.bf16.mxu0 %v28115_v30  ;;  %v30783_v58 = vld [vmem:[%s37007_s2 + $0xe2] sm:$0xff]  ;;  %v30788_v59 = vld [vmem:[%s37007_s2 + $0xf2] sm:$0xff] }
  0x39   :  { %v30797_v60 = vld [vmem:[%s37007_s2 + $0x102] sm:$0xff]  ;;  %v30802_v61 = vld [vmem:[%s37007_s2 + $0x112] sm:$0xff] }
  0x3a   :  { %25139 = vmatmul.mubr.msk.f32.gmra.mrb[2].mxu0 %vm196_vm0, %v30618_v31  ;;  %v30811_v62 = vld [vmem:[%s37007_s2 + $0x122] sm:$0xff]  ;;  %v21357_v0 = vld [vmem:[%s37006_s24 + $0x50] sm:$0xff] }
  0x3b   :  { %25141 = vmatprep.mubr.msk.f32.mxu0 %vm196_vm0, %v30623_v32  ;;  %v811_v63 = vld [vmem:[%s37007_s2 + $0x3] sm:$0xff]  ;;  %v30828_v2 = vld [vmem:[%s37007_s2 + $0x13] sm:$0xff]  ;;  %v28123_v4 = vpack.c.bf16 %v21358_v1, %v21357_v0 }
  0x3c   :  { %v30833_v3 = vld [vmem:[%s37007_s2 + $0x23] sm:$0xff]  ;;  %v30842_v5 = vld [vmem:[%s37007_s2 + $0x33] sm:$0xff] }
  0x3d   :  { %v30847_v6 = vld [vmem:[%s37007_s2 + $0x43] sm:$0xff]  ;;  %v30856_v9 = vld [vmem:[%s37007_s2 + $0x53] sm:$0xff] }
  0x3e   :  { %25142 = vmatmul.mubr.msk.f32.gmra.mrb[4].mxu0 %vm196_vm0, %v30632_v33  ;;  %v30861_v10 = vld [vmem:[%s37007_s2 + $0x63] sm:$0xff]  ;;  %v30870_v12 = vld [vmem:[%s37007_s2 + $0x73] sm:$0xff] }
  0x3f   :  { %25144 = vmatprep.mubr.msk.f32.mxu0 %vm196_vm0, %v30637_v34  ;;  %v819_v17 = vld [vmem:[%s37007_s2 + $0xb3] sm:$0xff]  ;;  %v30881_v25 = vld [vmem:[%s37007_s2 + $0xc3] sm:$0xff] }
  0x40   :  { %v30886_v26 = vld [vmem:[%s37007_s2 + $0xd3] sm:$0xff]  ;;  %v30895_v27 = vld [vmem:[%s37007_s2 + $0xe3] sm:$0xff] }
  0x41   :  { %v30923_v45 = vld [vmem:[%s37007_s2 + $0x123] sm:$0xff]  ;;  %v21426_v0 = vld [vmem:[%s37006_s24 + $0x78] sm:$0xff] }
  0x42   :  { %25145 = vmatmul.mubr.msk.f32.gmra.mrb[6].mxu0 %vm196_vm0, %v30646_v35  ;;  %v21391_v46 = vld [vmem:[%s37006_s24 + $0x60] sm:$0xff] }
  0x43   :  { %25147 = vmatprep.mubr.msk.f32.mxu0 %vm196_vm0, %v167_v36  ;;  %v30909_v36 = vld [vmem:[%s37007_s2 + $0x103] sm:$0xff] }
  0x46   :  { %25148 = vmatmul.mubr.msk.f32.gmra.mrb[8].mxu0 %vm196_vm0, %v30657_v37 }
  0x47   :  { %25150 = vmatprep.mubr.msk.f32.mxu0 %vm196_vm0, %v30662_v38 }
  0x4a   :  { %25151 = vmatmul.mubr.msk.f32.gmra.mrb[10].mxu0 %vm196_vm0, %v30671_v39 }
  0x4b   :  { %25153 = vmatprep.mubr.msk.f32.mxu0 %vm196_vm0, %v30676_v40 }
  0x4e   :  { %25154 = vmatmul.mubr.msk.f32.gmra.mrb[12].mxu0 %vm196_vm0, %v30685_v41 }
  0x4f   :  { %25156 = vmatprep.mubr.msk.f32.mxu0 %vm196_vm0, %v30690_v42 }
  0x52   :  { %25157 = vmatmul.mubr.msk.f32.gmra.mrb[14].mxu0 %vm196_vm0, %v30699_v43 }
  0x53   :  { %25163 = vmatprep.mubr.msk.f32.mxu0 %vm196_vm0, %v583_v44  ;;  %v30914_v44 = vld [vmem:[%s37007_s2 + $0x113] sm:$0xff] }
  0x56   :  { %25164 = vmatmul.mubr.msk.f32.vlgmr.msra.gmra.mrb[0].mxu0 %vm196_vm0, %v30716_v47 }
  0x57   :  { %28118 = vmatpush3.bf16.msra.mxu0 %v28115_v30  ;;  %25166 = vmatprep.mubr.msk.f32.mxu0 %vm196_vm0, %v30721_v48  ;;  %v30900_v30 = vld [vmem:[%s37007_s2 + $0xf3] sm:$0xff] }
  0x58   :  { %28120 = vmatprep.subr.bf16.mxu0 %v28119_v49 }
  0x5a   :  { %25167 = vmatmul.mubr.msk.f32.gmra.mrb[2].mxu0 %vm196_vm0, %v30730_v50 }
  0x5b   :  { %25169 = vmatprep.mubr.msk.f32.mxu0 %vm196_vm0, %v30735_v51 }
  0x5e   :  { %25170 = vmatmul.mubr.msk.f32.gmra.mrb[4].mxu0 %vm196_vm0, %v30744_v52 }
  0x5f   :  { %25172 = vmatprep.mubr.msk.f32.mxu0 %vm196_vm0, %v30749_v53 }
  0x62   :  { %25173 = vmatmul.mubr.msk.f32.gmra.mrb[6].mxu0 %vm196_vm0, %v30758_v54 }
  0x63   :  { %25175 = vmatprep.mubr.msk.f32.mxu0 %vm196_vm0, %v591_v55 }
  0x66   :  { %25176 = vmatmul.mubr.msk.f32.gmra.mrb[8].mxu0 %vm196_vm0, %v30769_v56 }
  0x67   :  { %25178 = vmatprep.mubr.msk.f32.mxu0 %vm196_vm0, %v30774_v57 }
  0x6a   :  { %25179 = vmatmul.mubr.msk.f32.gmra.mrb[10].mxu0 %vm196_vm0, %v30783_v58 }
  0x6b   :  { %25181 = vmatprep.mubr.msk.f32.mxu0 %vm196_vm0, %v30788_v59 }
  0x6e   :  { %25182 = vmatmul.mubr.msk.f32.gmra.mrb[12].mxu0 %vm196_vm0, %v30797_v60 }
  0x6f   :  { %25184 = vmatprep.mubr.msk.f32.mxu0 %vm196_vm0, %v30802_v61 }
  0x72   :  { %25185 = vmatmul.mubr.msk.f32.gmra.mrb[14].mxu0 %vm196_vm0, %v30811_v62 }
  0x73   :  { %25191 = vmatprep.mubr.msk.f32.mxu0 %vm196_vm0, %v811_v63  ;;  %v21425_v63 = vld [vmem:[%s37006_s24 + $0x70] sm:$0xff] }
  0x74   :  { %v28131_v1 = vpack.c.bf16 %v21426_v0, %v21425_v63  ;;  %v21527_v0 = vld [vmem:[%s37006_s24 + $0xa0] sm:$0xff] }
  0x76   :  { %25192 = vmatmul.mubr.msk.f32.vlgmr.msra.gmra.mrb[0].mxu0 %vm196_vm0, %v30828_v2 }
  0x77   :  { %28122 = vmatpush3.bf16.msra.mxu0 %v28119_v49  ;;  %25194 = vmatprep.mubr.msk.f32.mxu0 %vm196_vm0, %v30833_v3  ;;  %v21392_v49 = vld [vmem:[%s37006_s24 + $0x68] sm:$0xff] }
  0x78   :  { %28124 = vmatprep.subr.bf16.mxu0 %v28123_v4  ;;  %v28127_v55 = vpack.c.bf16 %v21392_v49, %v21391_v46  ;;  %v21493_v49 = vld [vmem:[%s37006_s24 + $0x90] sm:$0xff] }
  0x7a   :  { %25195 = vmatmul.mubr.msk.f32.gmra.mrb[2].mxu0 %vm196_vm0, %v30842_v5 }
  0x7b   :  { %25197 = vmatprep.mubr.msk.f32.mxu0 %vm196_vm0, %v30847_v6 }
  0x7e   :  { %25198 = vmatmul.mubr.msk.f32.gmra.mrb[4].mxu0 %vm196_vm0, %v30856_v9 }
  0x7f   :  { %25200 = vmatprep.mubr.msk.f32.mxu0 %vm196_vm0, %v30861_v10 }
  0x82   :  { %25201 = vmatmul.mubr.msk.f32.gmra.mrb[6].mxu0 %vm196_vm0, %v30870_v12 }
  0x83   :  { %25203 = vmatprep.mubr.msk.f32.mxu0 %vm196_vm0, %v819_v17  ;;  %v21460_v17 = vld [vmem:[%s37006_s24 + $0x88] sm:$0xff] }
  0x86   :  { %25204 = vmatmul.mubr.msk.f32.gmra.mrb[8].mxu0 %vm196_vm0, %v30881_v25 }
  0x87   :  { %25206 = vmatprep.mubr.msk.f32.mxu0 %vm196_vm0, %v30886_v26 }
  0x8a   :  { %25207 = vmatmul.mubr.msk.f32.gmra.mrb[10].mxu0 %vm196_vm0, %v30895_v27 }
  0x8b   :  { %25209 = vmatprep.mubr.msk.f32.mxu0 %vm196_vm0, %v30900_v30 }
  0x8e   :  { %25210 = vmatmul.mubr.msk.f32.gmra.mrb[12].mxu0 %vm196_vm0, %v30909_v36 }
  0x8f   :  { %25212 = vmatprep.mubr.msk.f32.mxu0 %vm196_vm0, %v30914_v44 }
  0x92   :  { %25213 = vmatmul.mubr.msk.f32.gmra.mrb[14].mxu0 %vm196_vm0, %v30923_v45 }
  0x93   :  { %25219 = vmatprep.mubr.msk.f32.mxu0 %vm196_vm0, %v30604_v28  ;;  %v30950_v28 = vld [vmem:[%s37007_s2 + $0x80] sm:$0xff] }
  0x96   :  { %25220 = vmatmul.mubr.msk.f32.vlgmr.msra.gmra.mrb[0].mxu0 %vm196_vm0, %v30609_v29 }
  0x97   :  { %28126 = vmatpush3.bf16.msra.mxu0 %v28123_v4  ;;  %25222 = vmatprep.mubr.msk.f32.mxu0 %vm196_vm0, %v30618_v31  ;;  %v21459_v4 = vld [vmem:[%s37006_s24 + $0x80] sm:$0xff] }
  0x98   :  { %28128 = vmatprep.subr.bf16.mxu0 %v28127_v55  ;;  %v28135_v46 = vpack.c.bf16 %v21460_v17, %v21459_v4  ;;  %v21561_v17 = vld [vmem:[%s37006_s24 + $0xb0] sm:$0xff] }
  0x9a   :  { %25223 = vmatmul.mubr.msk.f32.gmra.mrb[2].mxu0 %vm196_vm0, %v30623_v32 }
  0x9b   :  { %25225 = vmatprep.mubr.msk.f32.mxu0 %vm196_vm0, %v30632_v33 }
  0x9e   :  { %25226 = vmatmul.mubr.msk.f32.gmra.mrb[4].mxu0 %vm196_vm0, %v30637_v34 }
  0x9f   :  { %25228 = vmatprep.mubr.msk.f32.mxu0 %vm196_vm0, %v30646_v35 }
  0xa2   :  { %25229 = vmatmul.mubr.msk.f32.gmra.mrb[6].mxu0 %vm196_vm0, %v30950_v28 }
  0xa3   :  { %25231 = vmatprep.mubr.msk.f32.mxu0 %vm196_vm0, %v30657_v37  ;;  %v30971_v37 = vld [vmem:[%s37007_s2 + $0x130] sm:$0xff] }
  0xa6   :  { %25232 = vmatmul.mubr.msk.f32.gmra.mrb[8].mxu0 %vm196_vm0, %v30662_v38 }
  0xa7   :  { %25234 = vmatprep.mubr.msk.f32.mxu0 %vm196_vm0, %v30671_v39 }
  0xaa   :  { %25235 = vmatmul.mubr.msk.f32.gmra.mrb[10].mxu0 %vm196_vm0, %v30676_v40 }
  0xab   :  { %25237 = vmatprep.mubr.msk.f32.mxu0 %vm196_vm0, %v30685_v41 }
  0xae   :  { %25238 = vmatmul.mubr.msk.f32.gmra.mrb[12].mxu0 %vm196_vm0, %v30690_v42 }
  0xaf   :  { %25240 = vmatprep.mubr.msk.f32.mxu0 %vm196_vm0, %v30699_v43 }
  0xb2   :  { %25241 = vmatmul.mubr.msk.f32.gmra.mrb[14].mxu0 %vm196_vm0, %v30971_v37 }
  0xb3   :  { %25247 = vmatprep.mubr.msk.f32.mxu0 %vm196_vm0, %v30486_v7  ;;  %v30998_v7 = vld [vmem:[%s37007_s2 + $0x81] sm:$0xff] }
  0xb6   :  { %25248 = vmatmul.mubr.msk.f32.vlgmr.msra.gmra.mrb[0].mxu0 %vm196_vm0, %v30491_v8 }
  0xb7   :  { %28130 = vmatpush3.bf16.msra.mxu0 %v28127_v55  ;;  %25250 = vmatprep.mubr.msk.f32.mxu0 %vm196_vm0, %v30506_v11  ;;  %v21494_v55 = vld [vmem:[%s37006_s24 + $0x98] sm:$0xff] }
  0xb8   :  { %28132 = vmatprep.subr.bf16.mxu0 %v28131_v1  ;;  %v28139_v63 = vpack.c.bf16 %v21494_v55, %v21493_v49  ;;  %v21595_v55 = vld [vmem:[%s37006_s24 + $0xc0] sm:$0xff] }
  0xba   :  { %25251 = vmatmul.mubr.msk.f32.gmra.mrb[2].mxu0 %vm196_vm0, %v30511_v13 }
  0xbb   :  { %25253 = vmatprep.mubr.msk.f32.mxu0 %vm196_vm0, %v30520_v14 }
  0xbe   :  { %25254 = vmatmul.mubr.msk.f32.gmra.mrb[4].mxu0 %vm196_vm0, %v30525_v15 }
  0xbf   :  { %25256 = vmatprep.mubr.msk.f32.mxu0 %vm196_vm0, %v30534_v16 }
  0xc2   :  { %25257 = vmatmul.mubr.msk.f32.gmra.mrb[6].mxu0 %vm196_vm0, %v30998_v7 }
  0xc3   :  { %25259 = vmatprep.mubr.msk.f32.mxu0 %vm196_vm0, %v30545_v18  ;;  %v31019_v18 = vld [vmem:[%s37007_s2 + $0x131] sm:$0xff] }
  0xc6   :  { %25260 = vmatmul.mubr.msk.f32.gmra.mrb[8].mxu0 %vm196_vm0, %v30550_v19 }
  0xc7   :  { %25262 = vmatprep.mubr.msk.f32.mxu0 %vm196_vm0, %v30559_v20 }
  0xca   :  { %25263 = vmatmul.mubr.msk.f32.gmra.mrb[10].mxu0 %vm196_vm0, %v30564_v21 }
  0xcb   :  { %25265 = vmatprep.mubr.msk.f32.mxu0 %vm196_vm0, %v30573_v22 }
  0xce   :  { %25266 = vmatmul.mubr.msk.f32.gmra.mrb[12].mxu0 %vm196_vm0, %v30578_v23 }
  0xcf   :  { %25268 = vmatprep.mubr.msk.f32.mxu0 %vm196_vm0, %v30587_v24 }
  0xd2   :  { %25269 = vmatmul.mubr.msk.f32.gmra.mrb[14].mxu0 %vm196_vm0, %v31019_v18 }
  0xd3   :  { %25275 = vmatprep.mubr.msk.f32.mxu0 %vm196_vm0, %v30716_v47  ;;  %v31046_v47 = vld [vmem:[%s37007_s2 + $0x82] sm:$0xff] }
  0xd6   :  { %25276 = vmatmul.mubr.msk.f32.vlgmr.msra.gmra.mrb[0].mxu0 %vm196_vm0, %v30721_v48 }
  0xd7   :  { %28134 = vmatpush3.bf16.msra.mxu0 %v28131_v1  ;;  %25278 = vmatprep.mubr.msk.f32.mxu0 %vm196_vm0, %v30730_v50  ;;  %v21528_v1 = vld [vmem:[%s37006_s24 + $0xa8] sm:$0xff] }
  0xd8   :  { %28136 = vmatprep.subr.bf16.mxu0 %v28135_v46  ;;  %v28143_v4 = vpack.c.bf16 %v21528_v1, %v21527_v0  ;;  %v21629_v1 = vld [vmem:[%s37006_s24 + $0xd0] sm:$0xff] }
  0xda   :  { %25279 = vmatmul.mubr.msk.f32.gmra.mrb[2].mxu0 %vm196_vm0, %v30735_v51 }
  0xdb   :  { %25281 = vmatprep.mubr.msk.f32.mxu0 %vm196_vm0, %v30744_v52 }
  0xde   :  { %25282 = vmatmul.mubr.msk.f32.gmra.mrb[4].mxu0 %vm196_vm0, %v30749_v53 }
  0xdf   :  { %25284 = vmatprep.mubr.msk.f32.mxu0 %vm196_vm0, %v30758_v54 }
  0xe2   :  { %25285 = vmatmul.mubr.msk.f32.gmra.mrb[6].mxu0 %vm196_vm0, %v31046_v47 }
  0xe3   :  { %25287 = vmatprep.mubr.msk.f32.mxu0 %vm196_vm0, %v30769_v56  ;;  %v31067_v56 = vld [vmem:[%s37007_s2 + $0x132] sm:$0xff] }
  0xe6   :  { %25288 = vmatmul.mubr.msk.f32.gmra.mrb[8].mxu0 %vm196_vm0, %v30774_v57 }
  0xe7   :  { %25290 = vmatprep.mubr.msk.f32.mxu0 %vm196_vm0, %v30783_v58 }
  0xea   :  { %25291 = vmatmul.mubr.msk.f32.gmra.mrb[10].mxu0 %vm196_vm0, %v30788_v59 }
  0xeb   :  { %25293 = vmatprep.mubr.msk.f32.mxu0 %vm196_vm0, %v30797_v60 }
  0xee   :  { %25294 = vmatmul.mubr.msk.f32.gmra.mrb[12].mxu0 %vm196_vm0, %v30802_v61 }
  0xef   :  { %25296 = vmatprep.mubr.msk.f32.mxu0 %vm196_vm0, %v30811_v62 }
  0xf2   :  { %25297 = vmatmul.mubr.msk.f32.gmra.mrb[14].mxu0 %vm196_vm0, %v31067_v56 }
  0xf3   :  { %25303 = vmatprep.mubr.msk.f32.mxu0 %vm196_vm0, %v30828_v2  ;;  %v31094_v2 = vld [vmem:[%s37007_s2 + $0x83] sm:$0xff] }
  0xf6   :  { %25304 = vmatmul.mubr.msk.f32.vlgmr.msra.gmra.mrb[0].mxu0 %vm196_vm0, %v30833_v3 }
  0xf7   :  { %28138 = vmatpush3.bf16.msra.mxu0 %v28135_v46  ;;  %25306 = vmatprep.mubr.msk.f32.mxu0 %vm196_vm0, %v30842_v5  ;;  %v21562_v46 = vld [vmem:[%s37006_s24 + $0xb8] sm:$0xff] }
  0xf8   :  { %28140 = vmatprep.subr.bf16.mxu0 %v28139_v63  ;;  %v28147_v49 = vpack.c.bf16 %v21562_v46, %v21561_v17  ;;  %v21663_v46 = vld [vmem:[%s37006_s24 + $0xe0] sm:$0xff] }
  0xfa   :  { %25307 = vmatmul.mubr.msk.f32.gmra.mrb[2].mxu0 %vm196_vm0, %v30847_v6 }
  0xfb   :  { %25309 = vmatprep.mubr.msk.f32.mxu0 %vm196_vm0, %v30856_v9 }
  0xfe   :  { %25310 = vmatmul.mubr.msk.f32.gmra.mrb[4].mxu0 %vm196_vm0, %v30861_v10 }
  0xff   :  { %25312 = vmatprep.mubr.msk.f32.mxu0 %vm196_vm0, %v30870_v12 }
 0x102   :  { %25313 = vmatmul.mubr.msk.f32.gmra.mrb[6].mxu0 %vm196_vm0, %v31094_v2 }
 0x103   :  { %25315 = vmatprep.mubr.msk.f32.mxu0 %vm196_vm0, %v30881_v25  ;;  %v31115_v25 = vld [vmem:[%s37007_s2 + $0x133] sm:$0xff] }
 0x106   :  { %25316 = vmatmul.mubr.msk.f32.gmra.mrb[8].mxu0 %vm196_vm0, %v30886_v26 }
 0x107   :  { %25318 = vmatprep.mubr.msk.f32.mxu0 %vm196_vm0, %v30895_v27 }
 0x10a   :  { %25319 = vmatmul.mubr.msk.f32.gmra.mrb[10].mxu0 %vm196_vm0, %v30900_v30 }
 0x10b   :  { %25321 = vmatprep.mubr.msk.f32.mxu0 %vm196_vm0, %v30909_v36 }
 0x10e   :  { %25322 = vmatmul.mubr.msk.f32.gmra.mrb[12].mxu0 %vm196_vm0, %v30914_v44 }
 0x10f   :  { %25324 = vmatprep.mubr.msk.f32.mxu0 %vm196_vm0, %v30923_v45 }
 0x112   :  { %25325 = vmatmul.mubr.msk.f32.gmra.mrb[14].mxu0 %vm196_vm0, %v31115_v25 }
 0x113   :  { %25331 = vmatprep.mubr.msk.f32.mxu0 %vm196_vm0, %v30609_v29  ;;  %v31142_v29 = vld [vmem:[%s37007_s2 + $0x90] sm:$0xff] }
 0x116   :  { %25332 = vmatmul.mubr.msk.f32.vlgmr.msra.gmra.mrb[0].mxu0 %vm196_vm0, %v30618_v31 }
 0x117   :  { %28142 = vmatpush3.bf16.msra.mxu0 %v28139_v63  ;;  %25334 = vmatprep.mubr.msk.f32.mxu0 %vm196_vm0, %v30623_v32  ;;  %v21596_v63 = vld [vmem:[%s37006_s24 + $0xc8] sm:$0xff] }
 0x118   :  { %28144 = vmatprep.subr.bf16.mxu0 %v28143_v4  ;;  %v28151_v0 = vpack.c.bf16 %v21596_v63, %v21595_v55  ;;  %v36901_v55 = vmov 0.0  }
 0x119   :  { %81 = vst.msk [vmem:[#allocation2 + $0x20] sm:$0xff] %vm75_vm1, %v36901_v55  ;;  %76 = vst.msk [vmem:[#allocation2] sm:$0xff] %vm75_vm1, %v36901_v55 }
 0x11a   :  { %25335 = vmatmul.mubr.msk.f32.gmra.mrb[2].mxu0 %vm196_vm0, %v30632_v33  ;;  %82 = vst.msk [vmem:[#allocation2 + $0x28] sm:$0x3] %vm77_vm2, %v36901_v55  ;;  %78 = vst.msk [vmem:[#allocation2 + $0x8] sm:$0x3] %vm77_vm2, %v36901_v55 }
 0x11b   :  { %25337 = vmatprep.mubr.msk.f32.mxu0 %vm196_vm0, %v30637_v34  ;;  %79 = vst.msk [vmem:[#allocation2 + $0x10] sm:$0xff] %vm75_vm1, %v36901_v55  ;;  %83 = vst.msk [vmem:[#allocation2 + $0x30] sm:$0xff] %vm75_vm1, %v36901_v55 }
 0x11c   :  { %80 = vst.msk [vmem:[#allocation2 + $0x18] sm:$0x3] %vm77_vm2, %v36901_v55  ;;  %84 = vst.msk [vmem:[#allocation2 + $0x38] sm:$0x3] %vm77_vm2, %v36901_v55 }
 0x11d   :  { %85 = vst.msk [vmem:[#allocation2 + $0x40] sm:$0xff] %vm75_vm1, %v36901_v55  ;;  %87 = vst.msk [vmem:[#allocation2 + $0x50] sm:$0xff] %vm75_vm1, %v36901_v55 }
 0x11e   :  { %25338 = vmatmul.mubr.msk.f32.gmra.mrb[4].mxu0 %vm196_vm0, %v30646_v35  ;;  %86 = vst.msk [vmem:[#allocation2 + $0x48] sm:$0x3] %vm77_vm2, %v36901_v55  ;;  %88 = vst.msk [vmem:[#allocation2 + $0x58] sm:$0x3] %vm77_vm2, %v36901_v55 }
 0x11f   :  { %25340 = vmatprep.mubr.msk.f32.mxu0 %vm196_vm0, %v30950_v28  ;;  %89 = vst.msk [vmem:[#allocation2 + $0x60] sm:$0xff] %vm75_vm1, %v36901_v55  ;;  %91 = vst.msk [vmem:[#allocation2 + $0x70] sm:$0xff] %vm75_vm1, %v36901_v55 }
 0x120   :  { %90 = vst.msk [vmem:[#allocation2 + $0x68] sm:$0x3] %vm77_vm2, %v36901_v55  ;;  %92 = vst.msk [vmem:[#allocation2 + $0x78] sm:$0x3] %vm77_vm2, %v36901_v55 }
 0x121   :  { %93 = vst.msk [vmem:[#allocation2 + $0x80] sm:$0xff] %vm75_vm1, %v36901_v55  ;;  %95 = vst.msk [vmem:[#allocation2 + $0x90] sm:$0xff] %vm75_vm1, %v36901_v55 }
 0x122   :  { %25341 = vmatmul.mubr.msk.f32.gmra.mrb[6].mxu0 %vm196_vm0, %v31142_v29  ;;  %94 = vst.msk [vmem:[#allocation2 + $0x88] sm:$0x3] %vm77_vm2, %v36901_v55  ;;  %96 = vst.msk [vmem:[#allocation2 + $0x98] sm:$0x3] %vm77_vm2, %v36901_v55 }
 0x123   :  { %25343 = vmatprep.mubr.msk.f32.mxu0 %vm196_vm0, %v30662_v38  ;;  %v31163_v38 = vld [vmem:[%s37007_s2 + $0x140] sm:$0xff]  ;;  %97 = vst.msk [vmem:[#allocation2 + $0xa0] sm:$0xff] %vm75_vm1, %v36901_v55  ;;  %99 = vst.msk [vmem:[#allocation2 + $0xb0] sm:$0xff] %vm75_vm1, %v36901_v55 }
 0x124   :  { %98 = vst.msk [vmem:[#allocation2 + $0xa8] sm:$0x3] %vm77_vm2, %v36901_v55  ;;  %100 = vst.msk [vmem:[#allocation2 + $0xb8] sm:$0x3] %vm77_vm2, %v36901_v55 }
 0x125   :  { %101 = vst.msk [vmem:[#allocation2 + $0xc0] sm:$0xff] %vm75_vm1, %v36901_v55  ;;  %103 = vst.msk [vmem:[#allocation2 + $0xd0] sm:$0xff] %vm75_vm1, %v36901_v55 }
 0x126   :  { %25344 = vmatmul.mubr.msk.f32.gmra.mrb[8].mxu0 %vm196_vm0, %v30671_v39  ;;  %102 = vst.msk [vmem:[#allocation2 + $0xc8] sm:$0x3] %vm77_vm2, %v36901_v55  ;;  %104 = vst.msk [vmem:[#allocation2 + $0xd8] sm:$0x3] %vm77_vm2, %v36901_v55 }
 0x127   :  { %25346 = vmatprep.mubr.msk.f32.mxu0 %vm196_vm0, %v30676_v40  ;;  %105 = vst.msk [vmem:[#allocation2 + $0xe0] sm:$0xff] %vm75_vm1, %v36901_v55  ;;  %107 = vst.msk [vmem:[#allocation2 + $0xf0] sm:$0xff] %vm75_vm1, %v36901_v55 }
 0x128   :  { %106 = vst.msk [vmem:[#allocation2 + $0xe8] sm:$0x3] %vm77_vm2, %v36901_v55  ;;  %108 = vst.msk [vmem:[#allocation2 + $0xf8] sm:$0x3] %vm77_vm2, %v36901_v55 }
 0x129   :  { %109 = vst.msk [vmem:[#allocation2 + $0x100] sm:$0xff] %vm75_vm1, %v36901_v55  ;;  %111 = vst.msk [vmem:[#allocation2 + $0x110] sm:$0xff] %vm75_vm1, %v36901_v55 }
 0x12a   :  { %25347 = vmatmul.mubr.msk.f32.gmra.mrb[10].mxu0 %vm196_vm0, %v30685_v41  ;;  %110 = vst.msk [vmem:[#allocation2 + $0x108] sm:$0x3] %vm77_vm2, %v36901_v55  ;;  %112 = vst.msk [vmem:[#allocation2 + $0x118] sm:$0x3] %vm77_vm2, %v36901_v55 }
 0x12b   :  { %25349 = vmatprep.mubr.msk.f32.mxu0 %vm196_vm0, %v30690_v42  ;;  %113 = vst.msk [vmem:[#allocation2 + $0x120] sm:$0xff] %vm75_vm1, %v36901_v55  ;;  %115 = vst.msk [vmem:[#allocation2 + $0x130] sm:$0xff] %vm75_vm1, %v36901_v55 }
 0x12c   :  { %114 = vst.msk [vmem:[#allocation2 + $0x128] sm:$0x3] %vm77_vm2, %v36901_v55  ;;  %116 = vst.msk [vmem:[#allocation2 + $0x138] sm:$0x3] %vm77_vm2, %v36901_v55 }
 0x12e   :  { %25350 = vmatmul.mubr.msk.f32.gmra.mrb[12].mxu0 %vm196_vm0, %v30699_v43 }
 0x12f   :  { %25352 = vmatprep.mubr.msk.f32.mxu0 %vm196_vm0, %v30971_v37 }
 0x132   :  { %25353 = vmatmul.mubr.msk.f32.gmra.mrb[14].mxu0 %vm196_vm0, %v31163_v38 }
 0x133   :  { %25359 = vmatprep.mubr.msk.f32.mxu0 %vm196_vm0, %v30491_v8  ;;  %v31190_v8 = vld [vmem:[%s37007_s2 + $0x91] sm:$0xff] }
 0x136   :  { %25360 = vmatmul.mubr.msk.f32.vlgmr.msra.gmra.mrb[0].mxu0 %vm196_vm0, %v30506_v11 }
 0x137   :  { %28146 = vmatpush3.bf16.msra.mxu0 %v28143_v4  ;;  %25362 = vmatprep.mubr.msk.f32.mxu0 %vm196_vm0, %v30511_v13  ;;  %v21630_v4 = vld [vmem:[%s37006_s24 + $0xd8] sm:$0xff] }
 0x138   :  { %28148 = vmatprep.subr.bf16.mxu0 %v28147_v49  ;;  %v31271_v17 = vpack.c.bf16 %v21630_v4, %v21629_v1 }
 0x13a   :  { %25363 = vmatmul.mubr.msk.f32.gmra.mrb[2].mxu0 %vm196_vm0, %v30520_v14 }
 0x13b   :  { %25365 = vmatprep.mubr.msk.f32.mxu0 %vm196_vm0, %v30525_v15 }
 0x13e   :  { %25366 = vmatmul.mubr.msk.f32.gmra.mrb[4].mxu0 %vm196_vm0, %v30534_v16 }
 0x13f   :  { %25368 = vmatprep.mubr.msk.f32.mxu0 %vm196_vm0, %v30998_v7 }
 0x142   :  { %25369 = vmatmul.mubr.msk.f32.gmra.mrb[6].mxu0 %vm196_vm0, %v31190_v8 }
 0x143   :  { %25371 = vmatprep.mubr.msk.f32.mxu0 %vm196_vm0, %v30550_v19  ;;  %v31211_v19 = vld [vmem:[%s37007_s2 + $0x141] sm:$0xff] }
 0x146   :  { %25372 = vmatmul.mubr.msk.f32.gmra.mrb[8].mxu0 %vm196_vm0, %v30559_v20 }
 0x147   :  { %25374 = vmatprep.mubr.msk.f32.mxu0 %vm196_vm0, %v30564_v21 }
 0x14a   :  { %25375 = vmatmul.mubr.msk.f32.gmra.mrb[10].mxu0 %vm196_vm0, %v30573_v22 }
 0x14b   :  { %25377 = vmatprep.mubr.msk.f32.mxu0 %vm196_vm0, %v30578_v23 }
 0x14e   :  { %25378 = vmatmul.mubr.msk.f32.gmra.mrb[12].mxu0 %vm196_vm0, %v30587_v24 }
 0x14f   :  { %25380 = vmatprep.mubr.msk.f32.mxu0 %vm196_vm0, %v31019_v18 }
 0x152   :  { %25381 = vmatmul.mubr.msk.f32.gmra.mrb[14].mxu0 %vm196_vm0, %v31211_v19 }
 0x153   :  { %25387 = vmatprep.mubr.msk.f32.mxu0 %vm196_vm0, %v30721_v48  ;;  %v31238_v48 = vld [vmem:[%s37007_s2 + $0x92] sm:$0xff] }
 0x156   :  { %25388 = vmatmul.mubr.msk.f32.vlgmr.msra.gmra.mrb[0].mxu0 %vm196_vm0, %v30730_v50 }
 0x157   :  { %28150 = vmatpush3.bf16.msra.mxu0 %v28147_v49  ;;  %25390 = vmatprep.mubr.msk.f32.mxu0 %vm196_vm0, %v30735_v51  ;;  %v21664_v49 = vld [vmem:[%s37006_s24 + $0xe8] sm:$0xff] }
 0x158   :  { %28152 = vmatprep.subr.bf16.mxu0 %v28151_v0 }
 0x15a   :  { %25391 = vmatmul.mubr.msk.f32.gmra.mrb[2].mxu0 %vm196_vm0, %v30744_v52 }
 0x15b   :  { %25393 = vmatprep.mubr.msk.f32.mxu0 %vm196_vm0, %v30749_v53 }
 0x15e   :  { %25394 = vmatmul.mubr.msk.f32.gmra.mrb[4].mxu0 %vm196_vm0, %v30758_v54 }
 0x15f   :  { %25396 = vmatprep.mubr.msk.f32.mxu0 %vm196_vm0, %v31046_v47 }
 0x162   :  { %25397 = vmatmul.mubr.msk.f32.gmra.mrb[6].mxu0 %vm196_vm0, %v31238_v48 }
 0x163   :  { %25399 = vmatprep.mubr.msk.f32.mxu0 %vm196_vm0, %v30774_v57  ;;  %v31259_v57 = vld [vmem:[%s37007_s2 + $0x142] sm:$0xff] }
 0x166   :  { %25400 = vmatmul.mubr.msk.f32.gmra.mrb[8].mxu0 %vm196_vm0, %v30783_v58 }
 0x167   :  { %25402 = vmatprep.mubr.msk.f32.mxu0 %vm196_vm0, %v30788_v59 }
 0x16a   :  { %25403 = vmatmul.mubr.msk.f32.gmra.mrb[10].mxu0 %vm196_vm0, %v30797_v60 }
 0x16b   :  { %25405 = vmatprep.mubr.msk.f32.mxu0 %vm196_vm0, %v30802_v61 }
 0x16e   :  { %25406 = vmatmul.mubr.msk.f32.gmra.mrb[12].mxu0 %vm196_vm0, %v30811_v62 }
 0x16f   :  { %25408 = vmatprep.mubr.msk.f32.mxu0 %vm196_vm0, %v31067_v56 }
 0x172   :  { %25409 = vmatmul.mubr.msk.f32.gmra.mrb[14].mxu0 %vm196_vm0, %v31259_v57 }
 0x173   :  { %25415 = vmatprep.mubr.msk.f32.mxu0 %vm196_vm0, %v30833_v3  ;;  %v31289_v3 = vld [vmem:[%s37007_s2 + $0x93] sm:$0xff] }
 0x176   :  { %25416 = vmatmul.mubr.msk.f32.vlgmr.msra.gmra.mrb[0].mxu0 %vm196_vm0, %v30842_v5 }
 0x177   :  { %28154 = vmatpush3.bf16.msra.mxu0 %v28151_v0  ;;  %25418 = vmatprep.mubr.msk.f32.mxu0 %vm196_vm0, %v30847_v6 }
 0x178   :  { %28156 = vmatprep.subr.bf16.mxu0 %v31271_v17 }
 0x17a   :  { %25419 = vmatmul.mubr.msk.f32.gmra.mrb[2].mxu0 %vm196_vm0, %v30856_v9 }
 0x17b   :  { %25421 = vmatprep.mubr.msk.f32.mxu0 %vm196_vm0, %v30861_v10 }
 0x17e   :  { %25422 = vmatmul.mubr.msk.f32.gmra.mrb[4].mxu0 %vm196_vm0, %v30870_v12 }
 0x17f   :  { %25424 = vmatprep.mubr.msk.f32.mxu0 %vm196_vm0, %v31094_v2 }
 0x182   :  { %25425 = vmatmul.mubr.msk.f32.gmra.mrb[6].mxu0 %vm196_vm0, %v31289_v3 }
 0x183   :  { %25427 = vmatprep.mubr.msk.f32.mxu0 %vm196_vm0, %v30886_v26  ;;  %v31310_v26 = vld [vmem:[%s37007_s2 + $0x143] sm:$0xff] }
 0x186   :  { %25428 = vmatmul.mubr.msk.f32.gmra.mrb[8].mxu0 %vm196_vm0, %v30895_v27 }
 0x187   :  { %25430 = vmatprep.mubr.msk.f32.mxu0 %vm196_vm0, %v30900_v30 }
 0x18a   :  { %25431 = vmatmul.mubr.msk.f32.gmra.mrb[10].mxu0 %vm196_vm0, %v30909_v36 }
 0x18b   :  { %25433 = vmatprep.mubr.msk.f32.mxu0 %vm196_vm0, %v30914_v44 }
 0x18e   :  { %25434 = vmatmul.mubr.msk.f32.gmra.mrb[12].mxu0 %vm196_vm0, %v30923_v45 }
 0x18f   :  { %25436 = vmatprep.mubr.msk.f32.mxu0 %vm196_vm0, %v31115_v25 }
 0x192   :  { %25437 = vmatmul.mubr.msk.f32.gmra.mrb[14].mxu0 %vm196_vm0, %v31310_v26 }
 0x193   :  { %25443 = vmatprep.mubr.msk.f32.mxu0 %vm196_vm0, %v30618_v31  ;;  %v28159_v31 = vpack.c.bf16 %v21664_v49, %v21663_v46 }
 0x196   :  { %25444 = vmatmul.mubr.msk.f32.vlgmr.msra.gmra.mrb[0].mxu0 %vm196_vm0, %v30623_v32  ;;  %v21586_v32 = vld [vmem:[%s37007_s2 + $0xa0] sm:$0xff] }
 0x197   :  { %28158 = vmatpush3.bf16.msra.mxu0 %v31271_v17  ;;  %25446 = vmatprep.mubr.msk.f32.mxu0 %vm196_vm0, %v30632_v33  ;;  %v21594_v33 = vld [vmem:[%s37007_s2 + $0x150] sm:$0xff] }
 0x198   :  { %28160 = vmatprep.subr.bf16.mxu0 %v28159_v31 }
 0x19a   :  { %25447 = vmatmul.mubr.msk.f32.gmra.mrb[2].mxu0 %vm196_vm0, %v30637_v34  ;;  %v21697_v34 = vld [vmem:[%s37006_s24 + $0xf0] sm:$0xff] }
 0x19b   :  { %25449 = vmatprep.mubr.msk.f32.mxu0 %vm196_vm0, %v30646_v35  ;;  %v21698_v35 = vld [vmem:[%s37006_s24 + $0xf8] sm:$0xff]  ;;  %s37008_s24 = sld [smem:[#allocation21_spill]] }
 0x19e   :  { %25450 = vmatmul.mubr.msk.f32.gmra.mrb[4].mxu0 %vm196_vm0, %v30950_v28 }
 0x19f   :  { %25452 = vmatprep.mubr.msk.f32.mxu0 %vm196_vm0, %v31142_v29 }
 0x1a1   :  { %v21754_v49 = vld [vmem:[%s37008_s24 + $0x50] sm:$0xff] }
 0x1a2   :  { %25453 = vmatmul.mubr.msk.f32.gmra.mrb[6].mxu0 %vm196_vm0, %v21586_v32  ;;  %v21774_v55 = vld [vmem:[%s37008_s24 + $0x70] sm:$0xff] }
 0x1a3   :  { %25455 = vmatprep.mubr.msk.f32.mxu0 %vm196_vm0, %v30671_v39  ;;  %v28163_v39 = vpack.c.bf16 %v21698_v35, %v21697_v34 }
 0x1a6   :  { %25456 = vmatmul.mubr.msk.f32.gmra.mrb[8].mxu0 %vm196_vm0, %v30676_v40  ;;  %v21719_v40 = vld [vmem:[%s37008_s24 + $0x38] sm:$0xff] }
 0x1a7   :  { %25458 = vmatprep.mubr.msk.f32.mxu0 %vm196_vm0, %v30685_v41 }
 0x1aa   :  { %25459 = vmatmul.mubr.msk.f32.gmra.mrb[10].mxu0 %vm196_vm0, %v30690_v42  ;;  %v3850_v42 = vld [vmem:[%s37008_s24] sm:$0xff] }
 0x1ab   :  { %25461 = vmatprep.mubr.msk.f32.mxu0 %vm196_vm0, %v30699_v43  ;;  %v3851_v43 = vld [vmem:[%s37008_s24 + $0x8] sm:$0xff] }
 0x1ae   :  { %25462 = vmatmul.mubr.msk.f32.gmra.mrb[12].mxu0 %vm196_vm0, %v30971_v37 }
 0x1af   :  { %25464 = vmatprep.mubr.msk.f32.mxu0 %vm196_vm0, %v31163_v38 }
 0x1b2   :  { %25465 = vmatmul.mubr.msk.f32.gmra.mrb[14].mxu0 %vm196_vm0, %v21594_v33 }
 0x1b3   :  { %25471 = vmatprep.mubr.msk.f32.mxu0 %vm196_vm0, %v30506_v11  ;;  %v21620_v11 = vld [vmem:[%s37007_s2 + $0xa1] sm:$0xff] }
 0x1b6   :  { %25472 = vmatmul.mubr.msk.f32.vlgmr.msra.gmra.mrb[0].mxu0 %vm196_vm0, %v30511_v13  ;;  %v21628_v13 = vld [vmem:[%s37007_s2 + $0x151] sm:$0xff] }
 0x1b7   :  { %28162 = vmatpush3.bf16.msra.mxu0 %v28159_v31  ;;  %25474 = vmatprep.mubr.msk.f32.mxu0 %vm196_vm0, %v30520_v14  ;;  %v21654_v14 = vld [vmem:[%s37007_s2 + $0xa2] sm:$0xff]  ;;  %v21755_v31 = vld [vmem:[%s37008_s24 + $0x58] sm:$0xff] }
 0x1b8   :  { %28164 = vmatprep.subr.bf16.mxu0 %v28163_v39 }
 0x1ba   :  { %25475 = vmatmul.mubr.msk.f32.gmra.mrb[2].mxu0 %vm196_vm0, %v30525_v15  ;;  %v21662_v15 = vld [vmem:[%s37007_s2 + $0x152] sm:$0xff] }
 0x1bb   :  { %25477 = vmatprep.mubr.msk.f32.mxu0 %vm196_vm0, %v30534_v16  ;;  %v21688_v16 = vld [vmem:[%s37007_s2 + $0xa3] sm:$0xff] }
 0x1be   :  { %25478 = vmatmul.mubr.msk.f32.gmra.mrb[4].mxu0 %vm196_vm0, %v30998_v7 }
 0x1bf   :  { %25480 = vmatprep.mubr.msk.f32.mxu0 %vm196_vm0, %v31190_v8 }
 0x1c2   :  { %25481 = vmatmul.mubr.msk.f32.gmra.mrb[6].mxu0 %vm196_vm0, %v21620_v11 }
 0x1c3   :  { %25483 = vmatprep.mubr.msk.f32.mxu0 %vm196_vm0, %v30559_v20  ;;  %v21696_v20 = vld [vmem:[%s37007_s2 + $0x153] sm:$0xff]  ;;  %s37009_s2 = sld [smem:[#allocation20_spill]] }
 0x1c6   :  { %25484 = vmatmul.mubr.msk.f32.gmra.mrb[8].mxu0 %vm196_vm0, %v30564_v21  ;;  %v21716_v21 = vld [vmem:[%s37008_s24 + $0x20] sm:$0xff] }
 0x1c7   :  { %25486 = vmatprep.mubr.msk.f32.mxu0 %vm196_vm0, %v30573_v22  ;;  %v21717_v22 = vld [vmem:[%s37008_s24 + $0x28] sm:$0xff] }
 0x1ca   :  { %25487 = vmatmul.mubr.msk.f32.gmra.mrb[10].mxu0 %vm196_vm0, %v30578_v23  ;;  %v28167_v23 = vpack.c.bf16 %v21717_v22, %v21716_v21  ;;  %v21773_v22 = vld [vmem:[%s37008_s24 + $0x68] sm:$0xff] }
 0x1cb   :  { %25489 = vmatprep.mubr.msk.f32.mxu0 %vm196_vm0, %v30587_v24  ;;  %v21718_v24 = vld [vmem:[%s37008_s24 + $0x30] sm:$0xff] }
 0x1cc   :  { %v28171_v41 = vpack.c.bf16 %v21719_v40, %v21718_v24 }
 0x1ce   :  { %25490 = vmatmul.mubr.msk.f32.gmra.mrb[12].mxu0 %vm196_vm0, %v31019_v18 }
 0x1cf   :  { %25492 = vmatprep.mubr.msk.f32.mxu0 %vm196_vm0, %v31211_v19 }
 0x1d2   :  { %25493 = vmatmul.mubr.msk.f32.gmra.mrb[14].mxu0 %vm196_vm0, %v21628_v13 }
 0x1d3   :  { %25499 = vmatprep.mubr.msk.f32.mxu0 %vm196_vm0, %v30730_v50  ;;  %v31569_v50 = vld [vmem:[#allocation2 + $0x1] sm:$0xff] }
 0x1d6   :  { %25500 = vmatmul.mubr.msk.f32.vlgmr.msra.gmra.mrb[0].mxu0 %vm196_vm0, %v30735_v51  ;;  %v28175_v51 = vpack.c.bf16 %v3851_v43, %v3850_v42  ;;  %v31722_v42 = vld [vmem:[#allocation2 + $0xa0] sm:$0xff] }
 0x1d7   :  { %28166 = vmatpush3.bf16.msra.mxu0 %v28163_v39  ;;  %25502 = vmatprep.mubr.msk.f32.mxu0 %vm196_vm0, %v30744_v52  ;;  %v3852_v52 = vld [vmem:[%s37008_s24 + $0x10] sm:$0xff] }
 0x1d8   :  { %28168 = vmatprep.subr.bf16.mxu0 %v28167_v23  ;;  %28999 = vmatprep.subr.bf16.mxu1 %v28175_v51 }
 0x1d9   :  { %29001 = vmatpush3.bf16.msra.mxu1 %v28175_v51 }
 0x1da   :  { %25503 = vmatmul.mubr.msk.f32.gmra.mrb[2].mxu0 %vm196_vm0, %v30749_v53  ;;  %v3853_v53 = vld [vmem:[%s37008_s24 + $0x18] sm:$0xff] }
 0x1db   :  { %25505 = vmatprep.mubr.msk.f32.mxu0 %vm196_vm0, %v30758_v54  ;;  %v28179_v54 = vpack.c.bf16 %v3853_v53, %v3852_v52 }
 0x1dd   :  { %29000 = vmatprep.subr.bf16.mxu1 %v28179_v54 }
 0x1de   :  { %25506 = vmatmul.mubr.msk.f32.gmra.mrb[4].mxu0 %vm196_vm0, %v31046_v47  ;;  %29002 = vmatpush3.bf16.msra.mxu1 %v28179_v54 }
 0x1df   :  { %25508 = vmatprep.mubr.msk.f32.mxu0 %vm196_vm0, %v31238_v48 }
 0x1e2   :  { %25509 = vmatmul.mubr.msk.f32.gmra.mrb[6].mxu0 %vm196_vm0, %v21654_v14  ;;  %v28187_v14 = vpack.c.bf16 %v21755_v31, %v21754_v49 }
 0x1e3   :  { %25511 = vmatprep.mubr.msk.f32.mxu0 %vm196_vm0, %v30783_v58  ;;  %v21752_v58 = vld [vmem:[%s37008_s24 + $0x40] sm:$0xff] }
 0x1e6   :  { %25512 = vmatmul.mubr.msk.f32.gmra.mrb[8].mxu0 %vm196_vm0, %v30788_v59  ;;  %v21753_v59 = vld [vmem:[%s37008_s24 + $0x48] sm:$0xff] }
 0x1e7   :  { %25514 = vmatprep.mubr.msk.f32.mxu0 %vm196_vm0, %v30797_v60  ;;  %v31585_v60 = vpack.c.bf16 %v21753_v59, %v21752_v58 }
 0x1e9   :  { %28184 = vmatprep.subr.bf16.mxu1 %v31585_v60 }
 0x1ea   :  { %25515 = vmatmul.mubr.msk.f32.gmra.mrb[10].mxu0 %vm196_vm0, %v30802_v61  ;;  %v31591_v61 = vld [vmem:[%s37009_s2] ss:$0 sm:$0xff] }
 0x1eb   :  { %25517 = vmatprep.mubr.msk.f32.mxu0 %vm196_vm0, %v30811_v62 }
 0x1ee   :  { %25518 = vmatmul.mubr.msk.f32.gmra.mrb[12].mxu0 %vm196_vm0, %v31067_v56 }
 0x1ef   :  { %25520 = vmatprep.mubr.msk.f32.mxu0 %vm196_vm0, %v31259_v57 }
 0x1f2   :  { %25521 = vmatmul.mubr.msk.f32.gmra.mrb[14].mxu0 %vm196_vm0, %v21662_v15  ;;  %v21772_v15 = vld [vmem:[%s37008_s24 + $0x60] sm:$0xff] }
 0x1f3   :  { %25527 = vmatprep.mubr.msk.f32.mxu0 %vm196_vm0, %v30842_v5 }
 0x1f6   :  { %25528 = vmatmul.mubr.msk.f32.vlgmr.msra.gmra.mrb[0].mxu0 %vm196_vm0, %v30847_v6 }
 0x1f7   :  { %25530 = vmatprep.mubr.msk.f32.mxu0 %vm196_vm0, %v30856_v9  ;;  %28170 = vmatpush3.bf16.msra.mxu0 %v28167_v23 }
 0x1f8   :  { %28172 = vmatprep.subr.bf16.mxu0 %v28171_v41 }
 0x1fa   :  { %25531 = vmatmul.mubr.msk.f32.gmra.mrb[2].mxu0 %vm196_vm0, %v30861_v10 }
 0x1fb   :  { %25533 = vmatprep.mubr.msk.f32.mxu0 %vm196_vm0, %v30870_v12  ;;  %28174 = vmatpush3.bf16.msra.mxu0 %v28171_v41  ;;  %v31720_v41 = vld [vmem:[#allocation2 + $0xa1] sm:$0xff] }
 0x1fc   :  { %28176 = vmatprep.subr.bf16.mxu0 %v28175_v51 }
 0x1fe   :  { %25534 = vmatmul.mubr.msk.f32.gmra.mrb[4].mxu0 %vm196_vm0, %v31094_v2 }
 0x1ff   :  { %25536 = vmatprep.mubr.msk.f32.mxu0 %vm196_vm0, %v31289_v3 }
 0x202   :  { %25537 = vmatmul.mubr.msk.f32.gmra.mrb[6].mxu0 %vm196_vm0, %v21688_v16 }
 0x203   :  { %25539 = vmatprep.mubr.msk.f32.mxu0 %vm196_vm0, %v30895_v27 }
 0x206   :  { %25540 = vmatmul.mubr.msk.f32.gmra.mrb[8].mxu0 %vm196_vm0, %v30900_v30 }
 0x207   :  { %25542 = vmatprep.mubr.msk.f32.mxu0 %vm196_vm0, %v30909_v36 }
 0x20a   :  { %25543 = vmatmul.mubr.msk.f32.gmra.mrb[10].mxu0 %vm196_vm0, %v30914_v44 }
 0x20b   :  { %25545 = vmatprep.mubr.msk.f32.mxu0 %vm196_vm0, %v30923_v45 }
 0x20e   :  { %25546 = vmatmul.mubr.msk.f32.gmra.mrb[12].mxu0 %vm196_vm0, %v31115_v25 }
 0x20f   :  { %25548 = vmatprep.mubr.msk.f32.mxu0 %vm196_vm0, %v31310_v26 }
 0x212   :  { %25549 = vmatmul.mubr.msk.f32.gmra.mrb[14].mxu0 %vm196_vm0, %v21696_v20 }
 0x213   :  { %25559 = vmatprep.mubr.msk.f32.mxu0 %vm75_vm1, %v31569_v50 }
 0x2c9   :  { %v25529_v62 = vpop.f32.mrb[0].mxu0 }
 0x2ca   :  { %v31594_v5 = vadd.f32 %v25529_v62, %v31591_v61  ;;  %v3683_v6 = vpop.f32.mrb[1].mxu0 }
 0x2cb   :  { %v31597_v9 = vadd.f32 %v31591_v61, %v3683_v6 }
 0x2cc   :  { %v36918_v10 = vmax.f32 %v31594_v5, 0.0 }
 0x2cd   :  { %v36917_v12 = vmax.f32 %v31597_v9, 0.0  ;;  %v25532_v27 = vpop.f32.mrb[2].mxu0 }
 0x2ce   :  { %3819 = vst.msk [vmem:[#allocation2 + $0x21] sm:$0xff] %vm75_vm1, %v36918_v10  ;;  %v31605_v30 = vadd.f32 %v25532_v27, %v31591_v61  ;;  %v3693_v36 = vpop.f32.mrb[3].mxu0 }
 0x2cf   :  { %3818 = vst.msk [vmem:[#allocation2 + $0x11] sm:$0xff] %vm75_vm1, %v36917_v12  ;;  %v31611_v44 = vadd.f32 %v31591_v61, %v3693_v36 }
 0x2d0   :  { %v36916_v45 = vmax.f32 %v31605_v30, 0.0 }
 0x2d1   :  { %v36915_v28 = vmax.f32 %v31611_v44, 0.0  ;;  %v25535_v37 = vpop.f32.mrb[4].mxu0 }
 0x2d2   :  { %3821 = vst.msk [vmem:[#allocation2 + $0x41] sm:$0xff] %vm75_vm1, %v36916_v45  ;;  %v31619_v7 = vadd.f32 %v25535_v37, %v31591_v61  ;;  %v3703_v18 = vpop.f32.mrb[5].mxu0 }
 0x2d3   :  { %3820 = vst.msk [vmem:[#allocation2 + $0x31] sm:$0xff] %vm75_vm1, %v36915_v28  ;;  %v31625_v47 = vadd.f32 %v31591_v61, %v3703_v18 }
 0x2d4   :  { %v36914_v56 = vmax.f32 %v31619_v7, 0.0 }
 0x2d5   :  { %v36913_v2 = vmax.f32 %v31625_v47, 0.0  ;;  %v25538_v25 = vpop.f32.mrb[6].mxu0  ;;  %v31645_v63 = vld [vmem:[#allocation2 + $0x21] sm:$0xff] }
 0x2d6   :  { %3823 = vst.msk [vmem:[#allocation2 + $0x61] sm:$0xff] %vm75_vm1, %v36914_v56  ;;  %v31633_v29 = vadd.f32 %v25538_v25, %v31591_v61  ;;  %v3713_v38 = vpop.f32.mrb[7].mxu0  ;;  %v31635_v8 = vld [vmem:[#allocation2 + $0x11] sm:$0xff] }
 0x2d7   :  { %3822 = vst.msk [vmem:[#allocation2 + $0x51] sm:$0xff] %vm75_vm1, %v36913_v2  ;;  %v31641_v19 = vadd.f32 %v31591_v61, %v3713_v38  ;;  %25560 = vmatmul.mubr.msk.f32.vlgmr.msra.gmra.mrb[16].mxu0 %vm75_vm1, %v31635_v8 }
 0x2d8   :  { %v36912_v0 = vmax.f32 %v31633_v29, 0.0  ;;  %25562 = vmatprep.mubr.msk.f32.mxu0 %vm75_vm1, %v31645_v63  ;;  %28178 = vmatpush3.bf16.msra.mxu0 %v28175_v51 }
 0x2d9   :  { %v36911_v48 = vmax.f32 %v31641_v19, 0.0  ;;  %v25541_v57 = vpop.f32.mrb[8].mxu0  ;;  %v31651_v1 = vld [vmem:[#allocation2 + $0x40] sm:$0xff]  ;;  %28180 = vmatprep.subr.bf16.mxu0 %v28179_v54 }
 0x2da   :  { %3825 = vst.msk [vmem:[#allocation2 + $0x81] sm:$0xff] %vm75_vm1, %v36912_v0  ;;  %v31657_v4 = vadd.f32 %v25541_v57, %v31591_v61  ;;  %v3723_v17 = vpop.f32.mrb[9].mxu0  ;;  %25597 = vmatprep.mubr.msk.f32.mxu1 %vm75_vm1, %v31651_v1  ;;  %v31661_v3 = vld [vmem:[#allocation2 + $0x31] sm:$0xff]  ;;  %v31671_v46 = vld [vmem:[#allocation2 + $0x41] sm:$0xff] }
 0x2db   :  { %3824 = vst.msk [vmem:[#allocation2 + $0x71] sm:$0xff] %vm75_vm1, %v36911_v48  ;;  %v31667_v26 = vadd.f32 %v31591_v61, %v3723_v17  ;;  %25563 = vmatmul.mubr.msk.f32.gmra.mrb[18].mxu0 %vm75_vm1, %v31661_v3  ;;  %v31871_v0 = vld [vmem:[#allocation2 + $0x42] sm:$0xff] }
 0x2dc   :  { %v36910_v32 = vmax.f32 %v31657_v4, 0.0  ;;  %25565 = vmatprep.mubr.msk.f32.mxu0 %vm75_vm1, %v31671_v46  ;;  %28182 = vmatpush3.bf16.msra.mxu0 %v28179_v54  ;;  %v31734_v54 = vpack.c.bf16 %v21773_v22, %v21772_v15 }
 0x2dd   :  { %37010 = vst [vmem:[#allocation7_spill] sm:$0xff] %v31667_v26  ;;  %v36909_v33 = vmax.f32 %v31667_v26, 0.0  ;;  %v25544_v34 = vpop.f32.mrb[10].mxu0  ;;  %v31706_v20 = vld [vmem:[#allocation2 + $0x61] sm:$0xff] }
 0x2de   :  { %3827 = vst.msk [vmem:[#allocation2 + $0xc1] sm:$0xff] %vm75_vm1, %v36910_v32  ;;  %v31687_v35 = vadd.f32 %v25544_v34, %v31591_v61  ;;  %v3733_v39 = vpop.f32.mrb[11].mxu0  ;;  %v31689_v11 = vld [vmem:[#allocation2 + $0x51] sm:$0xff]  ;;  %v31708_v21 = vld [vmem:[#allocation2 + $0x60] sm:$0xff]  ;;  %v21793_v32 = vld [vmem:[%s37008_s24 + $0x88] sm:$0xff] }
 0x2df   :  { %v31691_v13 = vld [vmem:[#allocation2 + $0x50] sm:$0xff]  ;;  %3826 = vst.msk [vmem:[#allocation2 + $0xb1] sm:$0xff] %vm75_vm1, %v36909_v33  ;;  %v31700_v16 = vadd.f32 %v31591_v61, %v3733_v39  ;;  %25566 = vmatmul.mubr.msk.f32.gmra.mrb[20].mxu0 %vm75_vm1, %v31689_v11  ;;  %v31853_v33 = vld [vmem:[#allocation2 + $0x22] sm:$0xff] }
 0x2e0   :  { %37011 = vst [vmem:[#allocation8_spill] sm:$0xff] %v31687_v35  ;;  %25598 = vmatmul.mubr.msk.f32.vlgmr.msra.gmra.mrb[0].mxu1 %vm75_vm1, %v31691_v13  ;;  %v36908_v23 = vmax.f32 %v31687_v35, 0.0  ;;  %25568 = vmatprep.mubr.msk.f32.mxu0 %vm75_vm1, %v31706_v20  ;;  %v31875_v2 = vld [vmem:[#allocation2 + $0x52] sm:$0xff]  ;;  %v21813_v35 = vld [vmem:[%s37008_s24 + $0xa8] sm:$0xff] }
 0x2e1   :  { %37012 = vst [vmem:[#allocation9_spill] sm:$0xff] %v31700_v16  ;;  %25600 = vmatprep.mubr.msk.f32.mxu1 %vm75_vm1, %v31708_v21  ;;  %v36907_v24 = vmax.f32 %v31700_v16, 0.0  ;;  %28186 = vmatpush3.bf16.msra.mxu1 %v31585_v60  ;;  %v25547_v40 = vpop.f32.mrb[12].mxu0  ;;  %v21812_v16 = vld [vmem:[%s37008_s24 + $0xa0] sm:$0xff] }
 0x2e2   :  { %3829 = vst.msk [vmem:[#allocation2 + $0xe1] sm:$0xff] %vm75_vm1, %v36908_v23  ;;  %v31728_v43 = vadd.f32 %v25547_v40, %v31591_v61  ;;  %v3743_v51 = vpop.f32.mrb[13].mxu0  ;;  %v31730_v52 = vld [vmem:[#allocation2 + $0x71] sm:$0xff]  ;;  %28188 = vmatprep.subr.bf16.mxu1 %v28187_v14  ;;  %v31821_v40 = vld [vmem:[#allocation2] sm:$0xff]  ;;  %v28207_v26 = vpack.c.bf16 %v21813_v35, %v21812_v16 }
 0x2e3   :  { %v31732_v53 = vld [vmem:[#allocation2 + $0x70] sm:$0xff]  ;;  %3828 = vst.msk [vmem:[#allocation2 + $0xd1] sm:$0xff] %vm75_vm1, %v36907_v24  ;;  %v31740_v58 = vadd.f32 %v31591_v61, %v3743_v51  ;;  %25569 = vmatmul.mubr.msk.f32.gmra.mrb[22].mxu0 %vm75_vm1, %v31730_v52  ;;  %v31823_v51 = vld [vmem:[#allocation2 + $0x2] sm:$0xff]  ;;  %v21815_v16 = vld [vmem:[%s37008_s24 + $0xb8] sm:$0xff] }
 0x2e4   :  { %37013 = vst [vmem:[#allocation10_spill] sm:$0xff] %v31728_v43  ;;  %25601 = vmatmul.mubr.msk.f32.gmra.mrb[2].mxu1 %vm75_vm1, %v31732_v53  ;;  %v36906_v59 = vmax.f32 %v31728_v43, 0.0  ;;  %25571 = vmatprep.mubr.msk.f32.mxu0 %vm75_vm1, %v31720_v41  ;;  %v21792_v24 = vld [vmem:[%s37008_s24 + $0x80] sm:$0xff]  ;;  %v21814_v35 = vld [vmem:[%s37008_s24 + $0xb0] sm:$0xff] }
 0x2e5   :  { %37014 = vst [vmem:[#allocation11_spill] sm:$0xff] %v31740_v58  ;;  %25603 = vmatprep.mubr.msk.f32.mxu1 %vm75_vm1, %v31722_v42  ;;  %v36905_v60 = vmax.f32 %v31740_v58, 0.0  ;;  %v25550_v62 = vpop.f32.mrb[14].mxu0  ;;  %28190 = vmatpush3.bf16.msra.mxu1 %v28187_v14  ;;  %v31773_v25 = vld [vmem:[#allocation2 + $0xc1] sm:$0xff]  ;;  %v28199_v48 = vpack.c.bf16 %v21793_v32, %v21792_v24  ;;  %v31885_v24 = vld [vmem:[#allocation2 + $0x72] sm:$0xff] }
 0x2e6   :  { %3831 = vst.msk [vmem:[#allocation2 + $0x101] sm:$0xff] %vm75_vm1, %v36906_v59  ;;  %v31756_v6 = vadd.f32 %v25550_v62, %v31591_v61  ;;  %v3753_v27 = vpop.f32.mrb[15].mxu0  ;;  %v31758_v36 = vld [vmem:[#allocation2 + $0xb1] sm:$0xff]  ;;  %28192 = vmatprep.subr.bf16.mxu1 %v31734_v54  ;;  %v31775_v38 = vld [vmem:[#allocation2 + $0xc0] sm:$0xff] }
 0x2e7   :  { %v31760_v37 = vld [vmem:[#allocation2 + $0xb0] sm:$0xff]  ;;  %3830 = vst.msk [vmem:[#allocation2 + $0xf1] sm:$0xff] %vm75_vm1, %v36905_v60  ;;  %v31767_v18 = vadd.f32 %v31591_v61, %v3753_v27  ;;  %25572 = vmatmul.mubr.msk.f32.gmra.mrb[24].mxu0 %vm75_vm1, %v31758_v36  ;;  %v31851_v23 = vld [vmem:[#allocation2 + $0x20] sm:$0xff]  ;;  %v21795_v58 = vld [vmem:[%s37008_s24 + $0x98] sm:$0xff] }
 0x2e8   :  { %37015 = vst [vmem:[#allocation12_spill] sm:$0xff] %v31756_v6  ;;  %25604 = vmatmul.mubr.msk.f32.gmra.mrb[4].mxu1 %vm75_vm1, %v31760_v37  ;;  %v36904_v57 = vmax.f32 %v31756_v6, 0.0  ;;  %25574 = vmatprep.mubr.msk.f32.mxu0 %vm75_vm1, %v31773_v25  ;;  %v31843_v60 = vld [vmem:[#allocation2 + $0x12] sm:$0xff]  ;;  %v31883_v32 = vld [vmem:[#allocation2 + $0xa2] sm:$0xff] }
 0x2e9   :  { %37016 = vst [vmem:[#allocation13_spill] sm:$0xff] %v31767_v18  ;;  %25606 = vmatprep.mubr.msk.f32.mxu1 %vm75_vm1, %v31775_v38  ;;  %v36903_v61 = vmax.f32 %v31767_v18, 0.0  ;;  %v31797_v31 = vld [vmem:[#allocation2 + $0xe1] sm:$0xff]  ;;  %v21794_v6 = vld [vmem:[%s37008_s24 + $0x90] sm:$0xff] }
 0x2ea   :  { %3833 = vst.msk [vmem:[#allocation2 + $0x121] sm:$0xff] %vm75_vm1, %v36904_v57  ;;  %v31786_v17 = vld [vmem:[#allocation2 + $0xd1] sm:$0xff]  ;;  %v31799_v34 = vld [vmem:[#allocation2 + $0xe0] sm:$0xff]  ;;  %v28203_v43 = vpack.c.bf16 %v21795_v58, %v21794_v6 }
 0x2eb   :  { %v31788_v49 = vld [vmem:[#allocation2 + $0xd0] sm:$0xff]  ;;  %3832 = vst.msk [vmem:[#allocation2 + $0x111] sm:$0xff] %vm75_vm1, %v36903_v61  ;;  %25575 = vmatmul.mubr.msk.f32.gmra.mrb[26].mxu0 %vm75_vm1, %v31786_v17  ;;  %v21775_v61 = vld [vmem:[%s37008_s24 + $0x78] sm:$0xff]  ;;  %v31895_v56 = vld [vmem:[#allocation2 + $0xc2] sm:$0xff] }
 0x2ec   :  { %25607 = vmatmul.mubr.msk.f32.gmra.mrb[6].mxu1 %vm75_vm1, %v31788_v49  ;;  %25577 = vmatprep.mubr.msk.f32.mxu0 %vm75_vm1, %v31797_v31  ;;  %v3835_v57 = vld [vmem:[#allocation2 + $0x10] sm:$0xff]  ;;  %v28195_v59 = vpack.c.bf16 %v21775_v61, %v21774_v55  ;;  %v31903_v45 = vld [vmem:[#allocation2 + $0xe2] sm:$0xff] }
 0x2ed   :  { %25609 = vmatprep.mubr.msk.f32.mxu1 %vm75_vm1, %v31799_v34  ;;  %v31813_v15 = vld [vmem:[#allocation2 + $0x101] sm:$0xff]  ;;  %v31863_v55 = vld [vmem:[#allocation2 + $0x30] sm:$0xff] }
 0x2ee   :  { %v31805_v39 = vld [vmem:[#allocation2 + $0xf1] sm:$0xff]  ;;  %v31815_v22 = vld [vmem:[#allocation2 + $0x100] sm:$0xff] }
 0x2ef   :  { %v31807_v14 = vld [vmem:[#allocation2 + $0xf0] sm:$0xff]  ;;  %25578 = vmatmul.mubr.msk.f32.gmra.mrb[28].mxu0 %vm75_vm1, %v31805_v39  ;;  %v31911_v10 = vld [vmem:[#allocation2 + $0x102] sm:$0xff] }
 0x2f0   :  { %25610 = vmatmul.mubr.msk.f32.gmra.mrb[8].mxu1 %vm75_vm1, %v31807_v14  ;;  %25580 = vmatprep.mubr.msk.f32.mxu0 %vm75_vm1, %v31813_v15  ;;  %v31865_v61 = vld [vmem:[#allocation2 + $0x32] sm:$0xff]  ;;  %v31944_v58 = vld [vmem:[#allocation2 + $0x80] sm:$0xff] }
 0x2f1   :  { %25612 = vmatprep.mubr.msk.f32.mxu1 %vm75_vm1, %v31815_v22  ;;  %v31899_v28 = vld [vmem:[#allocation2 + $0xd2] sm:$0xff]  ;;  %v21832_v6 = vld [vmem:[%s37008_s24 + $0xc0] sm:$0xff] }
 0x2f2   :  { %v31825_v62 = vld [vmem:[#allocation2 + $0x111] sm:$0xff] }
 0x2f3   :  { %v31827_v27 = vld [vmem:[#allocation2 + $0x110] sm:$0xff]  ;;  %25581 = vmatmul.mubr.msk.f32.gmra.mrb[30].mxu0 %vm75_vm1, %v31825_v62 }
 0x2f4   :  { %25613 = vmatmul.mubr.msk.f32.gmra.mrb[10].mxu1 %vm75_vm1, %v31827_v27  ;;  %25591 = vmatprep.mubr.msk.f32.mxu0 %vm75_vm1, %v31821_v40  ;;  %v31907_v12 = vld [vmem:[#allocation2 + $0xf2] sm:$0xff] }
 0x2f5   :  { %25623 = vmatprep.mubr.msk.f32.mxu1 %vm75_vm1, %v31823_v51  ;;  %v31915_v18 = vld [vmem:[#allocation2 + $0x112] sm:$0xff] }
 0x2f7   :  { %25592 = vmatmul.mubr.msk.f32.vlgmr.msra.gmra.mrb[16].mxu0 %vm75_vm1, %v3835_v57 }
 0x2f8   :  { %25624 = vmatmul.mubr.msk.f32.vlgmr.msra.gmra.mrb[12].mxu1 %vm75_vm1, %v31843_v60  ;;  %25594 = vmatprep.mubr.msk.f32.mxu0 %vm75_vm1, %v31851_v23 }
 0x2f9   :  { %25626 = vmatprep.mubr.msk.f32.mxu1 %vm75_vm1, %v31853_v33  ;;  %28194 = vmatpush3.bf16.msra.mxu1 %v31734_v54  ;;  %v31879_v54 = vld [vmem:[#allocation2 + $0x62] sm:$0xff] }
 0x2fa   :  { %28196 = vmatprep.subr.bf16.mxu1 %v28195_v59 }
 0x2fb   :  { %25595 = vmatmul.mubr.msk.f32.gmra.mrb[18].mxu0 %vm75_vm1, %v31863_v55 }
 0x2fc   :  { %25627 = vmatmul.mubr.msk.f32.gmra.mrb[14].mxu1 %vm75_vm1, %v31865_v61 }
 0x2fd   :  { %25629 = vmatprep.mubr.msk.f32.mxu1 %vm75_vm1, %v31871_v0  ;;  %28198 = vmatpush3.bf16.msra.mxu1 %v28195_v59  ;;  %v31891_v59 = vld [vmem:[#allocation2 + $0xb2] sm:$0xff] }
 0x2fe   :  { %28200 = vmatprep.subr.bf16.mxu1 %v28199_v48 }
 0x300   :  { %25630 = vmatmul.mubr.msk.f32.gmra.mrb[0].mxu1 %vm75_vm1, %v31875_v2 }
 0x301   :  { %25632 = vmatprep.mubr.msk.f32.mxu1 %vm75_vm1, %v31879_v54 }
 0x304   :  { %25633 = vmatmul.mubr.msk.f32.gmra.mrb[2].mxu1 %vm75_vm1, %v31885_v24 }
 0x305   :  { %25635 = vmatprep.mubr.msk.f32.mxu1 %vm75_vm1, %v31883_v32 }
 0x308   :  { %25636 = vmatmul.mubr.msk.f32.gmra.mrb[4].mxu1 %vm75_vm1, %v31891_v59 }
 0x309   :  { %25638 = vmatprep.mubr.msk.f32.mxu1 %vm75_vm1, %v31895_v56 }
 0x30c   :  { %25639 = vmatmul.mubr.msk.f32.gmra.mrb[6].mxu1 %vm75_vm1, %v31899_v28 }
 0x30d   :  { %25641 = vmatprep.mubr.msk.f32.mxu1 %vm75_vm1, %v31903_v45 }
 0x310   :  { %25642 = vmatmul.mubr.msk.f32.gmra.mrb[8].mxu1 %vm75_vm1, %v31907_v12 }
 0x311   :  { %25644 = vmatprep.mubr.msk.f32.mxu1 %vm75_vm1, %v31911_v10 }
 0x314   :  { %25645 = vmatmul.mubr.msk.f32.gmra.mrb[10].mxu1 %vm75_vm1, %v31915_v18 }
 0x315   :  { %25655 = vmatprep.mubr.msk.f32.mxu1 %vm75_vm1, %v3835_v57 }
 0x318   :  { %25656 = vmatmul.mubr.msk.f32.vlgmr.msra.gmra.mrb[12].mxu1 %vm75_vm1, %v31851_v23 }
 0x319   :  { %25658 = vmatprep.mubr.msk.f32.mxu1 %vm75_vm1, %v31863_v55  ;;  %28202 = vmatpush3.bf16.msra.mxu1 %v28199_v48  ;;  %v31962_v48 = vld [vmem:[#allocation2 + $0x120] sm:$0xff] }
 0x31a   :  { %28204 = vmatprep.subr.bf16.mxu1 %v28203_v43 }
 0x31c   :  { %25659 = vmatmul.mubr.msk.f32.gmra.mrb[14].mxu1 %vm75_vm1, %v31651_v1 }
 0x31d   :  { %25661 = vmatprep.mubr.msk.f32.mxu1 %vm75_vm1, %v31691_v13  ;;  %28206 = vmatpush3.bf16.msra.mxu1 %v28203_v43  ;;  %v28211_v43 = vpack.c.bf16 %v21815_v16, %v21814_v35  ;;  %v21835_v35 = vld [vmem:[%s37008_s24 + $0xd8] sm:$0xff] }
 0x31e   :  { %28208 = vmatprep.subr.bf16.mxu1 %v28207_v26 }
 0x320   :  { %25662 = vmatmul.mubr.msk.f32.gmra.mrb[0].mxu1 %vm75_vm1, %v31708_v21 }
 0x321   :  { %25664 = vmatprep.mubr.msk.f32.mxu1 %vm75_vm1, %v31732_v53 }
 0x324   :  { %25665 = vmatmul.mubr.msk.f32.gmra.mrb[2].mxu1 %vm75_vm1, %v31944_v58 }
 0x325   :  { %25667 = vmatprep.mubr.msk.f32.mxu1 %vm75_vm1, %v31760_v37  ;;  %v21833_v37 = vld [vmem:[%s37008_s24 + $0xc8] sm:$0xff] }
 0x326   :  { %v28215_v57 = vpack.c.bf16 %v21833_v37, %v21832_v6  ;;  %v21853_v6 = vld [vmem:[%s37008_s24 + $0xe8] sm:$0xff] }
 0x328   :  { %25668 = vmatmul.mubr.msk.f32.gmra.mrb[4].mxu1 %vm75_vm1, %v31775_v38 }
 0x329   :  { %25670 = vmatprep.mubr.msk.f32.mxu1 %vm75_vm1, %v31788_v49 }
 0x32c   :  { %25671 = vmatmul.mubr.msk.f32.gmra.mrb[6].mxu1 %vm75_vm1, %v31799_v34 }
 0x32d   :  { %25673 = vmatprep.mubr.msk.f32.mxu1 %vm75_vm1, %v31807_v14 }
 0x330   :  { %25674 = vmatmul.mubr.msk.f32.gmra.mrb[8].mxu1 %vm75_vm1, %v31815_v22 }
 0x331   :  { %25676 = vmatprep.mubr.msk.f32.mxu1 %vm75_vm1, %v31827_v27 }
 0x334   :  { %25677 = vmatmul.mubr.msk.f32.gmra.mrb[10].mxu1 %vm75_vm1, %v31962_v48 }
 0x335   :  { %25687 = vmatprep.mubr.msk.f32.mxu1 %vm75_vm1, %v31635_v8  ;;  %v31992_v8 = vld [vmem:[#allocation2 + $0x81] sm:$0xff] }
 0x338   :  { %25688 = vmatmul.mubr.msk.f32.vlgmr.msra.gmra.mrb[12].mxu1 %vm75_vm1, %v31645_v63 }
 0x339   :  { %25690 = vmatprep.mubr.msk.f32.mxu1 %vm75_vm1, %v31661_v3  ;;  %28210 = vmatpush3.bf16.msra.mxu1 %v28207_v26  ;;  %v32010_v26 = vld [vmem:[#allocation2 + $0x121] sm:$0xff] }
 0x33a   :  { %28212 = vmatprep.subr.bf16.mxu1 %v28211_v43 }
 0x33c   :  { %25691 = vmatmul.mubr.msk.f32.gmra.mrb[14].mxu1 %vm75_vm1, %v31671_v46 }
 0x33d   :  { %25693 = vmatprep.mubr.msk.f32.mxu1 %vm75_vm1, %v31689_v11  ;;  %28214 = vmatpush3.bf16.msra.mxu1 %v28211_v43  ;;  %v21852_v43 = vld [vmem:[%s37008_s24 + $0xe0] sm:$0xff] }
 0x33e   :  { %28216 = vmatprep.subr.bf16.mxu1 %v28215_v57  ;;  %v28223_v37 = vpack.c.bf16 %v21853_v6, %v21852_v43  ;;  %v21873_v43 = vld [vmem:[%s37008_s24 + $0x108] sm:$0xff] }
 0x340   :  { %25694 = vmatmul.mubr.msk.f32.gmra.mrb[0].mxu1 %vm75_vm1, %v31706_v20 }
 0x341   :  { %25696 = vmatprep.mubr.msk.f32.mxu1 %vm75_vm1, %v31730_v52 }
 0x344   :  { %25697 = vmatmul.mubr.msk.f32.gmra.mrb[2].mxu1 %vm75_vm1, %v31992_v8 }
 0x345   :  { %25699 = vmatprep.mubr.msk.f32.mxu1 %vm75_vm1, %v31758_v36  ;;  %v21834_v36 = vld [vmem:[%s37008_s24 + $0xd0] sm:$0xff] }
 0x346   :  { %v28219_v16 = vpack.c.bf16 %v21835_v35, %v21834_v36  ;;  %v21855_v36 = vld [vmem:[%s37008_s24 + $0xf8] sm:$0xff] }
 0x348   :  { %25700 = vmatmul.mubr.msk.f32.gmra.mrb[4].mxu1 %vm75_vm1, %v31773_v25 }
 0x349   :  { %25702 = vmatprep.mubr.msk.f32.mxu1 %vm75_vm1, %v31786_v17 }
 0x34c   :  { %25703 = vmatmul.mubr.msk.f32.gmra.mrb[6].mxu1 %vm75_vm1, %v31797_v31 }
 0x34d   :  { %25705 = vmatprep.mubr.msk.f32.mxu1 %vm75_vm1, %v31805_v39 }
 0x350   :  { %25706 = vmatmul.mubr.msk.f32.gmra.mrb[8].mxu1 %vm75_vm1, %v31813_v15 }
 0x351   :  { %25708 = vmatprep.mubr.msk.f32.mxu1 %vm75_vm1, %v31825_v62 }
 0x354   :  { %25709 = vmatmul.mubr.msk.f32.gmra.mrb[10].mxu1 %vm75_vm1, %v32010_v26 }
 0x355   :  { %25719 = vmatprep.mubr.msk.f32.mxu1 %vm75_vm1, %v31843_v60  ;;  %v32040_v60 = vld [vmem:[#allocation2 + $0x82] sm:$0xff] }
 0x358   :  { %25720 = vmatmul.mubr.msk.f32.vlgmr.msra.gmra.mrb[12].mxu1 %vm75_vm1, %v31853_v33 }
 0x359   :  { %25722 = vmatprep.mubr.msk.f32.mxu1 %vm75_vm1, %v31865_v61  ;;  %28218 = vmatpush3.bf16.msra.mxu1 %v28215_v57  ;;  %v32058_v57 = vld [vmem:[#allocation2 + $0x122] sm:$0xff] }
 0x35a   :  { %28220 = vmatprep.subr.bf16.mxu1 %v28219_v16 }
 0x35c   :  { %25723 = vmatmul.mubr.msk.f32.gmra.mrb[14].mxu1 %vm75_vm1, %v31871_v0 }
 0x35d   :  { %25725 = vmatprep.mubr.msk.f32.mxu1 %vm75_vm1, %v31875_v2  ;;  %28222 = vmatpush3.bf16.msra.mxu1 %v28219_v16  ;;  %v21872_v16 = vld [vmem:[%s37008_s24 + $0x100] sm:$0xff] }
 0x35e   :  { %28224 = vmatprep.subr.bf16.mxu1 %v28223_v37  ;;  %v28231_v6 = vpack.c.bf16 %v21873_v43, %v21872_v16 }
 0x360   :  { %25726 = vmatmul.mubr.msk.f32.gmra.mrb[0].mxu1 %vm75_vm1, %v31879_v54 }
 0x361   :  { %25728 = vmatprep.mubr.msk.f32.mxu1 %vm75_vm1, %v31885_v24 }
 0x364   :  { %25729 = vmatmul.mubr.msk.f32.gmra.mrb[2].mxu1 %vm75_vm1, %v32040_v60 }
 0x365   :  { %25731 = vmatprep.mubr.msk.f32.mxu1 %vm75_vm1, %v31891_v59  ;;  %v21854_v59 = vld [vmem:[%s37008_s24 + $0xf0] sm:$0xff] }
 0x366   :  { %v28227_v35 = vpack.c.bf16 %v21855_v36, %v21854_v59 }
 0x368   :  { %25732 = vmatmul.mubr.msk.f32.gmra.mrb[4].mxu1 %vm75_vm1, %v31895_v56 }
 0x369   :  { %25734 = vmatprep.mubr.msk.f32.mxu1 %vm75_vm1, %v31899_v28 }
 0x36c   :  { %25735 = vmatmul.mubr.msk.f32.gmra.mrb[6].mxu1 %vm75_vm1, %v31903_v45 }
 0x36d   :  { %25737 = vmatprep.mubr.msk.f32.mxu1 %vm75_vm1, %v31907_v12 }
 0x370   :  { %25738 = vmatmul.mubr.msk.f32.gmra.mrb[8].mxu1 %vm75_vm1, %v31911_v10 }
 0x371   :  { %25740 = vmatprep.mubr.msk.f32.mxu1 %vm75_vm1, %v31915_v18 }
 0x374   :  { %25741 = vmatmul.mubr.msk.f32.gmra.mrb[10].mxu1 %vm75_vm1, %v32058_v57 }
 0x375   :  { %25751 = vmatprep.mubr.msk.f32.mxu1 %vm75_vm1, %v31851_v23  ;;  %v32088_v23 = vld [vmem:[#allocation2 + $0x90] sm:$0xff] }
 0x378   :  { %25752 = vmatmul.mubr.msk.f32.vlgmr.msra.gmra.mrb[12].mxu1 %vm75_vm1, %v31863_v55  ;;  %v5944_v55 = vld [vmem:[%s37017_s0 + $0x8] sm:$0xff] }
 0x379   :  { %25754 = vmatprep.mubr.msk.f32.mxu1 %vm75_vm1, %v31651_v1  ;;  %28226 = vmatpush3.bf16.msra.mxu1 %v28223_v37  ;;  %v32106_v1 = vld [vmem:[#allocation2 + $0x130] sm:$0xff] }
 0x37a   :  { %28228 = vmatprep.subr.bf16.mxu1 %v28227_v35 }
 0x37c   :  { %25755 = vmatmul.mubr.msk.f32.gmra.mrb[14].mxu1 %vm75_vm1, %v31691_v13  ;;  %v21874_v13 = vld [vmem:[%s37008_s24 + $0x110] sm:$0xff] }
 0x37d   :  { %25757 = vmatprep.mubr.msk.f32.mxu1 %vm75_vm1, %v31708_v21  ;;  %28230 = vmatpush3.bf16.msra.mxu1 %v28227_v35  ;;  %v21875_v21 = vld [vmem:[%s37008_s24 + $0x118] sm:$0xff] }
 0x37e   :  { %28232 = vmatprep.subr.bf16.mxu1 %v28231_v6 }
 0x380   :  { %25758 = vmatmul.mubr.msk.f32.gmra.mrb[0].mxu1 %vm75_vm1, %v31732_v53  ;;  %v28235_v53 = vpack.c.bf16 %v21875_v21, %v21874_v13 }
 0x381   :  { %25760 = vmatprep.mubr.msk.f32.mxu1 %vm75_vm1, %v31944_v58 }
 0x384   :  { %25761 = vmatmul.mubr.msk.f32.gmra.mrb[2].mxu1 %vm75_vm1, %v32088_v23 }
 0x385   :  { %25763 = vmatprep.mubr.msk.f32.mxu1 %vm75_vm1, %v31775_v38  ;;  %v21893_v38 = vld [vmem:[%s37017_s0 + $0x20] sm:$0xff] }
 0x388   :  { %25764 = vmatmul.mubr.msk.f32.gmra.mrb[4].mxu1 %vm75_vm1, %v31788_v49  ;;  %v21894_v49 = vld [vmem:[%s37017_s0 + $0x28] sm:$0xff] }
 0x389   :  { %25766 = vmatprep.mubr.msk.f32.mxu1 %vm75_vm1, %v31799_v34  ;;  %v28239_v34 = vpack.c.bf16 %v21894_v49, %v21893_v38 }
 0x38c   :  { %25767 = vmatmul.mubr.msk.f32.gmra.mrb[6].mxu1 %vm75_vm1, %v31807_v14 }
 0x38d   :  { %25769 = vmatprep.mubr.msk.f32.mxu1 %vm75_vm1, %v31815_v22 }
 0x390   :  { %25770 = vmatmul.mubr.msk.f32.gmra.mrb[8].mxu1 %vm75_vm1, %v31827_v27 }
 0x391   :  { %25772 = vmatprep.mubr.msk.f32.mxu1 %vm75_vm1, %v31962_v48 }
 0x394   :  { %25773 = vmatmul.mubr.msk.f32.gmra.mrb[10].mxu1 %vm75_vm1, %v32106_v1 }
 0x395   :  { %25783 = vmatprep.mubr.msk.f32.mxu1 %vm75_vm1, %v31645_v63  ;;  %v32136_v63 = vld [vmem:[#allocation2 + $0x91] sm:$0xff] }
 0x398   :  { %25784 = vmatmul.mubr.msk.f32.vlgmr.msra.gmra.mrb[12].mxu1 %vm75_vm1, %v31661_v3  ;;  %v32154_v3 = vld [vmem:[#allocation2 + $0x131] sm:$0xff] }
 0x399   :  { %25786 = vmatprep.mubr.msk.f32.mxu1 %vm75_vm1, %v31671_v46  ;;  %28234 = vmatpush3.bf16.msra.mxu1 %v28231_v6 }
 0x39a   :  { %28236 = vmatprep.subr.bf16.mxu1 %v28235_v53 }
 0x39c   :  { %25787 = vmatmul.mubr.msk.f32.gmra.mrb[14].mxu1 %vm75_vm1, %v31689_v11 }
 0x39d   :  { %25789 = vmatprep.mubr.msk.f32.mxu1 %vm75_vm1, %v31706_v20  ;;  %28238 = vmatpush3.bf16.msra.mxu1 %v28235_v53 }
 0x39e   :  { %28240 = vmatprep.subr.bf16.mxu1 %v28239_v34 }
 0x3a0   :  { %25790 = vmatmul.mubr.msk.f32.gmra.mrb[0].mxu1 %vm75_vm1, %v31730_v52 }
 0x3a1   :  { %25792 = vmatprep.mubr.msk.f32.mxu1 %vm75_vm1, %v31992_v8 }
 0x3a4   :  { %25793 = vmatmul.mubr.msk.f32.gmra.mrb[2].mxu1 %vm75_vm1, %v32136_v63 }
 0x3a5   :  { %25795 = vmatprep.mubr.msk.f32.mxu1 %vm75_vm1, %v31773_v25 }
 0x3a8   :  { %25796 = vmatmul.mubr.msk.f32.gmra.mrb[4].mxu1 %vm75_vm1, %v31786_v17 }
 0x3a9   :  { %25798 = vmatprep.mubr.msk.f32.mxu1 %vm75_vm1, %v31797_v31 }
 0x3ac   :  { %25799 = vmatmul.mubr.msk.f32.gmra.mrb[6].mxu1 %vm75_vm1, %v31805_v39 }
 0x3ad   :  { %25801 = vmatprep.mubr.msk.f32.mxu1 %vm75_vm1, %v31813_v15 }
 0x3b0   :  { %25802 = vmatmul.mubr.msk.f32.gmra.mrb[8].mxu1 %vm75_vm1, %v31825_v62 }
 0x3b1   :  { %25804 = vmatprep.mubr.msk.f32.mxu1 %vm75_vm1, %v32010_v26 }
 0x3b2   :  { %v32156_v46 = vpop.f32.mrb[20].mxu0 }
 0x3b3   :  { %v32158_v11 = vpop.f32.mrb[21].mxu0 }
 0x3b4   :  { %25805 = vmatmul.mubr.msk.f32.gmra.mrb[10].mxu1 %vm75_vm1, %v32154_v3 }
 0x3b5   :  { %25815 = vmatprep.mubr.msk.f32.mxu1 %vm75_vm1, %v31853_v33 }
 0x3b6   :  { %v32164_v20 = vpop.f32.mrb[22].mxu0 }
 0x3b7   :  { %v32166_v52 = vpop.f32.mrb[23].mxu0 }
 0x3b8   :  { %25816 = vmatmul.mubr.msk.f32.vlgmr.msra.gmra.mrb[12].mxu1 %vm75_vm1, %v31865_v61 }
 0x3b9   :  { %25818 = vmatprep.mubr.msk.f32.mxu1 %vm75_vm1, %v31871_v0  ;;  %28242 = vmatpush3.bf16.msra.mxu1 %v28239_v34  ;;  %v32188_v0 = vld [vmem:[#allocation2 + $0x92] sm:$0xff] }
 0x3ba   :  { %v32172_v25 = vpop.f32.mrb[24].mxu0 }
 0x3bb   :  { %v32174_v17 = vpop.f32.mrb[25].mxu0 }
 0x3bc   :  { %25819 = vmatmul.mubr.msk.f32.gmra.mrb[14].mxu1 %vm75_vm1, %v31875_v2 }
 0x3bd   :  { %25821 = vmatprep.mubr.msk.f32.mxu1 %vm75_vm1, %v31879_v54  ;;  %v32235_v54 = vld [vmem:[%s37018_s29] ss:$0 sm:$0xff] }
 0x3be   :  { %v32180_v33 = vpop.f32.mrb[26].mxu0 }
 0x3bf   :  { %v32182_v31 = vpop.f32.mrb[27].mxu0 }
 0x3c0   :  { %25822 = vmatmul.mubr.msk.f32.gmra.mrb[0].mxu1 %vm75_vm1, %v31885_v24 }
 0x3c1   :  { %25824 = vmatprep.mubr.msk.f32.mxu1 %vm75_vm1, %v32040_v60 }
 0x3c2   :  { %v32190_v39 = vpop.f32.mrb[28].mxu0 }
 0x3c3   :  { %v32192_v14 = vpop.f32.mrb[29].mxu0 }
 0x3c4   :  { %25825 = vmatmul.mubr.msk.f32.gmra.mrb[2].mxu1 %vm75_vm1, %v32188_v0 }
 0x3c5   :  { %25827 = vmatprep.mubr.msk.f32.mxu1 %vm75_vm1, %v31895_v56 }
 0x3c6   :  { %v32198_v2 = vpop.f32.mrb[30].mxu0 }
 0x3c7   :  { %v32200_v15 = vpop.f32.mrb[31].mxu0 }
 0x3c8   :  { %25828 = vmatmul.mubr.msk.f32.gmra.mrb[4].mxu1 %vm75_vm1, %v31899_v28  ;;  %v32214_v28 = vld [vmem:[#allocation2 + $0x132] sm:$0xff] }
 0x3c9   :  { %25830 = vmatprep.mubr.msk.f32.mxu1 %vm75_vm1, %v31903_v45 }
 0x3ca   :  { %v25593_v22 = vpop.f32.mrb[16].mxu0 }
 0x3cb   :  { %v4182_v62 = vpop.f32.mrb[17].mxu0 }
 0x3cc   :  { %25831 = vmatmul.mubr.msk.f32.gmra.mrb[6].mxu1 %vm75_vm1, %v31907_v12  ;;  %v21896_v12 = vld [vmem:[%s37017_s0 + $0x38] sm:$0xff] }
 0x3cd   :  { %25833 = vmatprep.mubr.msk.f32.mxu1 %vm75_vm1, %v31911_v10  ;;  %v21895_v10 = vld [vmem:[%s37017_s0 + $0x30] sm:$0xff] }
 0x3ce   :  { %v25596_v27 = vpop.f32.mrb[18].mxu0  ;;  %v28243_v45 = vpack.c.bf16 %v21896_v12, %v21895_v10 }
 0x3cf   :  { %v4192_v56 = vpop.f32.mrb[19].mxu0 }
 0x3d0   :  { %25834 = vmatmul.mubr.msk.f32.gmra.mrb[8].mxu1 %vm75_vm1, %v31915_v18  ;;  %28244 = vmatprep.subr.bf16.mxu1 %v28243_v45  ;;  %v5943_v18 = vld [vmem:[%s37017_s0] sm:$0xff] }
 0x3d1   :  { %25836 = vmatprep.mubr.msk.f32.mxu1 %vm75_vm1, %v32058_v57  ;;  %28246 = vmatpush3.bf16.msra.mxu1 %v28243_v45 }
 0x3d4   :  { %25837 = vmatmul.mubr.msk.f32.gmra.mrb[10].mxu1 %vm75_vm1, %v32214_v28 }
 0x3d5   :  { %25847 = vmatprep.mubr.msk.f32.mxu1 %vm75_vm1, %v31569_v50  ;;  %v28247_v50 = vpack.c.bf16 %v5944_v55, %v5943_v18 }
 0x3d7   :  { %28248 = vmatprep.subr.bf16.mxu1 %v28247_v50 }
 0x48b   :  { %v25817_v61 = vpop.f32.mrb[12].mxu1 }
 0x48c   :  { %v29003_v24 = vadd.f32 %v25817_v61, %v25593_v22  ;;  %v5777_v58 = vpop.f32.mrb[13].mxu1  ;;  %v5945_v22 = vld [vmem:[%s37017_s0 + $0x10] sm:$0xff] }
 0x48d   :  { %v29004_v48 = vadd.f32 %v5777_v58, %v4182_v62  ;;  %v5946_v62 = vld [vmem:[%s37017_s0 + $0x18] sm:$0xff]  ;;  %v21930_v58 = vld [vmem:[%s37017_s0 + $0x48] sm:$0xff] }
 0x48e   :  { %v5880_v8 = vadd.f32 %v29003_v24, %v32235_v54  ;;  %v28251_v18 = vpack.c.bf16 %v5946_v62, %v5945_v22  ;;  %v21929_v24 = vld [vmem:[%s37017_s0 + $0x40] sm:$0xff] }
 0x48f   :  { %v5879_v26 = vadd.f32 %v29004_v48, %v32235_v54  ;;  %v25820_v37 = vpop.f32.mrb[14].mxu1 }
 0x490   :  { %v5896_v60 = vmax.f32 %v5880_v8, 0.0  ;;  %v29005_v57 = vadd.f32 %v25820_v37, %v25596_v27  ;;  %v5787_v59 = vpop.f32.mrb[15].mxu1 }
 0x491   :  { %v5895_v36 = vmax.f32 %v5879_v26, 0.0  ;;  %v29006_v35 = vadd.f32 %v5787_v59, %v4192_v56  ;;  %v32277_v59 = vpack.c.bf16 %v21930_v58, %v21929_v24 }
 0x492   :  { %5912 = vst.msk [vmem:[#allocation2 + $0x21] sm:$0xff] %vm75_vm1, %v5896_v60  ;;  %v5882_v16 = vadd.f32 %v29005_v57, %v32235_v54 }
 0x493   :  { %5911 = vst.msk [vmem:[#allocation2 + $0x11] sm:$0xff] %vm75_vm1, %v5895_v36  ;;  %v5881_v43 = vadd.f32 %v29006_v35, %v32235_v54  ;;  %v25823_v6 = vpop.f32.mrb[0].mxu1 }
 0x494   :  { %v5898_v13 = vmax.f32 %v5882_v16, 0.0  ;;  %v29007_v21 = vadd.f32 %v25823_v6, %v32156_v46  ;;  %v5797_v53 = vpop.f32.mrb[1].mxu1 }
 0x495   :  { %v5897_v38 = vmax.f32 %v5881_v43, 0.0  ;;  %v29008_v49 = vadd.f32 %v5797_v53, %v32158_v11 }
 0x496   :  { %5914 = vst.msk [vmem:[#allocation2 + $0x41] sm:$0xff] %vm75_vm1, %v5898_v13  ;;  %v5884_v34 = vadd.f32 %v29007_v21, %v32235_v54 }
 0x497   :  { %5913 = vst.msk [vmem:[#allocation2 + $0x31] sm:$0xff] %vm75_vm1, %v5897_v38  ;;  %v5883_v46 = vadd.f32 %v29008_v49, %v32235_v54  ;;  %v25826_v27 = vpop.f32.mrb[2].mxu1 }
 0x498   :  { %v5900_v56 = vmax.f32 %v5884_v34, 0.0  ;;  %v29009_v11 = vadd.f32 %v25826_v27, %v32164_v20  ;;  %v5807_v10 = vpop.f32.mrb[3].mxu1 }
 0x499   :  { %v5899_v12 = vmax.f32 %v5883_v46, 0.0  ;;  %v29010_v45 = vadd.f32 %v5807_v10, %v32166_v52  ;;  %v32271_v48 = vld [vmem:[#allocation2 + $0x21] sm:$0xff] }
 0x49a   :  { %5916 = vst.msk [vmem:[#allocation2 + $0x61] sm:$0xff] %vm75_vm1, %v5900_v56  ;;  %v5886_v55 = vadd.f32 %v29009_v11, %v32235_v54  ;;  %v32259_v61 = vld [vmem:[#allocation2 + $0x11] sm:$0xff] }
 0x49b   :  { %5915 = vst.msk [vmem:[#allocation2 + $0x51] sm:$0xff] %vm75_vm1, %v5899_v12  ;;  %v5885_v20 = vadd.f32 %v29010_v45, %v32235_v54  ;;  %v25829_v52 = vpop.f32.mrb[4].mxu1  ;;  %25848 = vmatmul.mubr.msk.f32.vlgmr.msra.gmra.mrb[16].mxu1 %vm75_vm1, %v32259_v61 }
 0x49c   :  { %v5902_v8 = vmax.f32 %v5886_v55, 0.0  ;;  %v29011_v26 = vadd.f32 %v25829_v52, %v32172_v25  ;;  %v5817_v37 = vpop.f32.mrb[5].mxu1  ;;  %25850 = vmatprep.mubr.msk.f32.mxu1 %vm75_vm1, %v32271_v48  ;;  %28250 = vmatpush3.bf16.msra.mxu1 %v28247_v50 }
 0x49d   :  { %v5901_v60 = vmax.f32 %v5885_v20, 0.0  ;;  %v29012_v57 = vadd.f32 %v5817_v37, %v32174_v17  ;;  %28252 = vmatprep.subr.bf16.mxu1 %v28251_v18  ;;  %v32287_v50 = vld [vmem:[#allocation2 + $0x41] sm:$0xff] }
 0x49e   :  { %5918 = vst.msk [vmem:[#allocation2 + $0x81] sm:$0xff] %vm75_vm1, %v5902_v8  ;;  %v5888_v36 = vadd.f32 %v29011_v26, %v32235_v54  ;;  %v32281_v35 = vld [vmem:[#allocation2 + $0x31] sm:$0xff] }
 0x49f   :  { %5917 = vst.msk [vmem:[#allocation2 + $0x71] sm:$0xff] %vm75_vm1, %v5901_v60  ;;  %v5887_v25 = vadd.f32 %v29012_v57, %v32235_v54  ;;  %v25832_v16 = vpop.f32.mrb[6].mxu1  ;;  %25851 = vmatmul.mubr.msk.f32.gmra.mrb[18].mxu1 %vm75_vm1, %v32281_v35  ;;  %v21931_v60 = vld [vmem:[%s37017_s0 + $0x50] sm:$0xff]  ;;  %v21932_v57 = vld [vmem:[%s37017_s0 + $0x58] sm:$0xff] }
 0x4a0   :  { %v5904_v17 = vmax.f32 %v5888_v36, 0.0  ;;  %v29013_v43 = vadd.f32 %v25832_v16, %v32180_v33  ;;  %v5827_v6 = vpop.f32.mrb[7].mxu1  ;;  %25853 = vmatprep.mubr.msk.f32.mxu1 %vm75_vm1, %v32287_v50  ;;  %28254 = vmatpush3.bf16.msra.mxu1 %v28251_v18  ;;  %v28259_v36 = vpack.c.bf16 %v21932_v57, %v21931_v60  ;;  %v21949_v16 = vld [vmem:[%s37017_s0 + $0x60] sm:$0xff] }
 0x4a1   :  { %v5903_v13 = vmax.f32 %v5887_v25, 0.0  ;;  %v29014_v21 = vadd.f32 %v5827_v6, %v32182_v31  ;;  %28256 = vmatprep.subr.bf16.mxu1 %v32277_v59  ;;  %v32302_v34 = vld [vmem:[#allocation2 + $0x61] sm:$0xff]  ;;  %v32362_v25 = vld [vmem:[#allocation2 + $0x10] sm:$0xff] }
 0x4a2   :  { %5920 = vst.msk [vmem:[#allocation2 + $0xc1] sm:$0xff] %vm75_vm1, %v5904_v17  ;;  %v5890_v53 = vadd.f32 %v29013_v43, %v32235_v54  ;;  %v32296_v38 = vld [vmem:[#allocation2 + $0x51] sm:$0xff]  ;;  %v21950_v17 = vld [vmem:[%s37017_s0 + $0x68] sm:$0xff]  ;;  %v32372_v43 = vld [vmem:[#allocation2 + $0x20] sm:$0xff] }
 0x4a3   :  { %5919 = vst.msk [vmem:[#allocation2 + $0xb1] sm:$0xff] %vm75_vm1, %v5903_v13  ;;  %v5889_v33 = vadd.f32 %v29014_v21, %v32235_v54  ;;  %v25835_v49 = vpop.f32.mrb[8].mxu1  ;;  %25854 = vmatmul.mubr.msk.f32.gmra.mrb[20].mxu1 %vm75_vm1, %v32296_v38  ;;  %v32377_v6 = vld [vmem:[#allocation2 + $0x30] sm:$0xff]  ;;  %v32381_v13 = vld [vmem:[#allocation2 + $0x40] sm:$0xff] }
 0x4a4   :  { %v5906_v22 = vmax.f32 %v5890_v53, 0.0  ;;  %v29015_v31 = vadd.f32 %v25835_v49, %v32190_v39  ;;  %v5837_v62 = vpop.f32.mrb[9].mxu1  ;;  %25856 = vmatprep.mubr.msk.f32.mxu1 %vm75_vm1, %v32302_v34  ;;  %v32385_v21 = vld [vmem:[#allocation2 + $0x50] sm:$0xff] }
 0x4a5   :  { %v5905_v46 = vmax.f32 %v5889_v33, 0.0  ;;  %v29016_v27 = vadd.f32 %v5837_v62, %v32192_v14 }
 0x4a6   :  { %5922 = vst.msk [vmem:[#allocation2 + $0xe1] sm:$0xff] %vm75_vm1, %v5906_v22  ;;  %v5892_v56 = vadd.f32 %v29015_v31, %v32235_v54  ;;  %v32310_v11 = vld [vmem:[#allocation2 + $0x71] sm:$0xff] }
 0x4a7   :  { %5921 = vst.msk [vmem:[#allocation2 + $0xd1] sm:$0xff] %vm75_vm1, %v5905_v46  ;;  %v5891_v10 = vadd.f32 %v29016_v27, %v32235_v54  ;;  %v25838_v12 = vpop.f32.mrb[10].mxu1  ;;  %25857 = vmatmul.mubr.msk.f32.gmra.mrb[22].mxu1 %vm75_vm1, %v32310_v11  ;;  %v32393_v53 = vld [vmem:[#allocation2 + $0x70] sm:$0xff] }
 0x4a8   :  { %v5908_v39 = vmax.f32 %v5892_v56, 0.0  ;;  %v29017_v45 = vadd.f32 %v25838_v12, %v32198_v2  ;;  %v5847_v18 = vpop.f32.mrb[11].mxu1  ;;  %25859 = vmatprep.mubr.msk.f32.mxu1 %vm75_vm1, %v31720_v41  ;;  %v21951_v27 = vld [vmem:[%s37017_s0 + $0x70] sm:$0xff]  ;;  %v21952_v56 = vld [vmem:[%s37017_s0 + $0x78] sm:$0xff] }
 0x4a9   :  { %v5907_v14 = vmax.f32 %v5891_v10, 0.0  ;;  %v29018_v55 = vadd.f32 %v5847_v18, %v32200_v15  ;;  %v32328_v2 = vld [vmem:[#allocation2 + $0xc1] sm:$0xff]  ;;  %v28267_v10 = vpack.c.bf16 %v21952_v56, %v21951_v27  ;;  %v32435_v12 = vld [vmem:[#allocation2 + $0x12] sm:$0xff] }
 0x4aa   :  { %5924 = vst.msk [vmem:[#allocation2 + $0x101] sm:$0xff] %vm75_vm1, %v5908_v39  ;;  %v5894_v24 = vadd.f32 %v29017_v45, %v32235_v54  ;;  %v32322_v58 = vld [vmem:[#allocation2 + $0xb1] sm:$0xff]  ;;  %v32403_v49 = vld [vmem:[#allocation2 + $0xc0] sm:$0xff]  ;;  %v21970_v45 = vld [vmem:[%s37017_s0 + $0x88] sm:$0xff] }
 0x4ab   :  { %5923 = vst.msk [vmem:[#allocation2 + $0xf1] sm:$0xff] %vm75_vm1, %v5907_v14  ;;  %v5893_v20 = vadd.f32 %v29018_v55, %v32235_v54  ;;  %25860 = vmatmul.mubr.msk.f32.gmra.mrb[24].mxu1 %vm75_vm1, %v32322_v58  ;;  %v32399_v33 = vld [vmem:[#allocation2 + $0xb0] sm:$0xff]  ;;  %v21969_v39 = vld [vmem:[%s37017_s0 + $0x80] sm:$0xff]  ;;  %v21972_v27 = vld [vmem:[%s37017_s0 + $0x98] sm:$0xff] }
 0x4ac   :  { %v5910_v52 = vmax.f32 %v5894_v24, 0.0  ;;  %25862 = vmatprep.mubr.msk.f32.mxu1 %vm75_vm1, %v32328_v2  ;;  %v32445_v18 = vld [vmem:[#allocation2 + $0x22] sm:$0xff]  ;;  %v32449_v14 = vld [vmem:[#allocation2 + $0x32] sm:$0xff] }
 0x4ad   :  { %v5909_v41 = vmax.f32 %v5893_v20, 0.0  ;;  %v32338_v54 = vld [vmem:[#allocation2 + $0xe1] sm:$0xff]  ;;  %v32457_v24 = vld [vmem:[#allocation2 + $0x52] sm:$0xff] }
 0x4ae   :  { %5926 = vst.msk [vmem:[#allocation2 + $0x121] sm:$0xff] %vm75_vm1, %v5910_v52  ;;  %v32333_v15 = vld [vmem:[#allocation2 + $0xd1] sm:$0xff]  ;;  %v32411_v31 = vld [vmem:[#allocation2 + $0xe0] sm:$0xff] }
 0x4af   :  { %5925 = vst.msk [vmem:[#allocation2 + $0x111] sm:$0xff] %vm75_vm1, %v5909_v41  ;;  %25863 = vmatmul.mubr.msk.f32.gmra.mrb[26].mxu1 %vm75_vm1, %v32333_v15  ;;  %v32407_v22 = vld [vmem:[#allocation2 + $0xd0] sm:$0xff]  ;;  %v32453_v55 = vld [vmem:[#allocation2 + $0x42] sm:$0xff] }
 0x4b0   :  { %25865 = vmatprep.mubr.msk.f32.mxu1 %vm75_vm1, %v32338_v54  ;;  %v32461_v20 = vld [vmem:[#allocation2 + $0x62] sm:$0xff]  ;;  %v32465_v52 = vld [vmem:[#allocation2 + $0x72] sm:$0xff] }
 0x4b1   :  { %v32346_v26 = vld [vmem:[#allocation2 + $0x101] sm:$0xff]  ;;  %v32471_v41 = vld [vmem:[#allocation2 + $0xb2] sm:$0xff] }
 0x4b2   :  { %v32342_v8 = vld [vmem:[#allocation2 + $0xf1] sm:$0xff]  ;;  %v32419_v62 = vld [vmem:[#allocation2 + $0x100] sm:$0xff] }
 0x4b3   :  { %25866 = vmatmul.mubr.msk.f32.gmra.mrb[28].mxu1 %vm75_vm1, %v32342_v8  ;;  %v32475_v60 = vld [vmem:[#allocation2 + $0xc2] sm:$0xff]  ;;  %v32479_v57 = vld [vmem:[#allocation2 + $0xd2] sm:$0xff] }
 0x4b4   :  { %25868 = vmatprep.mubr.msk.f32.mxu1 %vm75_vm1, %v32346_v26 }
 0x4b6   :  { %v32350_v37 = vld [vmem:[#allocation2 + $0x111] sm:$0xff] }
 0x4b7   :  { %25869 = vmatmul.mubr.msk.f32.gmra.mrb[30].mxu1 %vm75_vm1, %v32350_v37  ;;  %v32423_v46 = vld [vmem:[#allocation2 + $0x110] sm:$0xff] }
 0x4b8   :  { %25879 = vmatprep.mubr.msk.f32.mxu1 %vm75_vm1, %v31821_v40  ;;  %v28263_v40 = vpack.c.bf16 %v21950_v17, %v21949_v16  ;;  %v32491_v16 = vld [vmem:[#allocation2 + $0x102] sm:$0xff]  ;;  %v32495_v17 = vld [vmem:[#allocation2 + $0x112] sm:$0xff] }
 0x4bb   :  { %25880 = vmatmul.mubr.msk.f32.vlgmr.msra.gmra.mrb[16].mxu1 %vm75_vm1, %v32362_v25 }
 0x4bc   :  { %25882 = vmatprep.mubr.msk.f32.mxu1 %vm75_vm1, %v32372_v43  ;;  %28258 = vmatpush3.bf16.msra.mxu1 %v32277_v59  ;;  %v32389_v59 = vld [vmem:[#allocation2 + $0x60] sm:$0xff] }
 0x4bd   :  { %28260 = vmatprep.subr.bf16.mxu1 %v28259_v36 }
 0x4bf   :  { %25883 = vmatmul.mubr.msk.f32.gmra.mrb[18].mxu1 %vm75_vm1, %v32377_v6 }
 0x4c0   :  { %25885 = vmatprep.mubr.msk.f32.mxu1 %vm75_vm1, %v32381_v13  ;;  %28262 = vmatpush3.bf16.msra.mxu1 %v28259_v36  ;;  %v32483_v36 = vld [vmem:[#allocation2 + $0xe2] sm:$0xff] }
 0x4c1   :  { %28264 = vmatprep.subr.bf16.mxu1 %v28263_v40 }
 0x4c3   :  { %25886 = vmatmul.mubr.msk.f32.gmra.mrb[20].mxu1 %vm75_vm1, %v32385_v21 }
 0x4c4   :  { %25888 = vmatprep.mubr.msk.f32.mxu1 %vm75_vm1, %v32389_v59 }
 0x4c7   :  { %25889 = vmatmul.mubr.msk.f32.gmra.mrb[22].mxu1 %vm75_vm1, %v32393_v53 }
 0x4c8   :  { %25891 = vmatprep.mubr.msk.f32.mxu1 %vm75_vm1, %v31722_v42  ;;  %v32415_v42 = vld [vmem:[#allocation2 + $0xf0] sm:$0xff] }
 0x4cb   :  { %25892 = vmatmul.mubr.msk.f32.gmra.mrb[24].mxu1 %vm75_vm1, %v32399_v33 }
 0x4cc   :  { %25894 = vmatprep.mubr.msk.f32.mxu1 %vm75_vm1, %v32403_v49 }
 0x4cf   :  { %25895 = vmatmul.mubr.msk.f32.gmra.mrb[26].mxu1 %vm75_vm1, %v32407_v22 }
 0x4d0   :  { %25897 = vmatprep.mubr.msk.f32.mxu1 %vm75_vm1, %v32411_v31 }
 0x4d3   :  { %25898 = vmatmul.mubr.msk.f32.gmra.mrb[28].mxu1 %vm75_vm1, %v32415_v42 }
 0x4d4   :  { %25900 = vmatprep.mubr.msk.f32.mxu1 %vm75_vm1, %v32419_v62 }
 0x4d7   :  { %25901 = vmatmul.mubr.msk.f32.gmra.mrb[30].mxu1 %vm75_vm1, %v32423_v46 }
 0x4d8   :  { %25911 = vmatprep.mubr.msk.f32.mxu1 %vm75_vm1, %v31823_v51  ;;  %v28271_v51 = vpack.c.bf16 %v21970_v45, %v21969_v39  ;;  %v21990_v39 = vld [vmem:[%s37017_s0 + $0xa8] sm:$0xff] }
 0x4db   :  { %25912 = vmatmul.mubr.msk.f32.vlgmr.msra.gmra.mrb[16].mxu1 %vm75_vm1, %v32435_v12 }
 0x4dc   :  { %25914 = vmatprep.mubr.msk.f32.mxu1 %vm75_vm1, %v32445_v18  ;;  %28266 = vmatpush3.bf16.msra.mxu1 %v28263_v40  ;;  %v21971_v40 = vld [vmem:[%s37017_s0 + $0x90] sm:$0xff] }
 0x4dd   :  { %28268 = vmatprep.subr.bf16.mxu1 %v28267_v10  ;;  %v28275_v56 = vpack.c.bf16 %v21972_v27, %v21971_v40  ;;  %v21992_v40 = vld [vmem:[%s37017_s0 + $0xb8] sm:$0xff] }
 0x4df   :  { %25915 = vmatmul.mubr.msk.f32.gmra.mrb[18].mxu1 %vm75_vm1, %v32449_v14 }
 0x4e0   :  { %25917 = vmatprep.mubr.msk.f32.mxu1 %vm75_vm1, %v32453_v55  ;;  %28270 = vmatpush3.bf16.msra.mxu1 %v28267_v10  ;;  %v21989_v10 = vld [vmem:[%s37017_s0 + $0xa0] sm:$0xff] }
 0x4e1   :  { %28272 = vmatprep.subr.bf16.mxu1 %v28271_v51  ;;  %v28279_v45 = vpack.c.bf16 %v21990_v39, %v21989_v10  ;;  %v22010_v10 = vld [vmem:[%s37017_s0 + $0xc8] sm:$0xff] }
 0x4e3   :  { %25918 = vmatmul.mubr.msk.f32.gmra.mrb[20].mxu1 %vm75_vm1, %v32457_v24 }
 0x4e4   :  { %25920 = vmatprep.mubr.msk.f32.mxu1 %vm75_vm1, %v32461_v20 }
 0x4e7   :  { %25921 = vmatmul.mubr.msk.f32.gmra.mrb[22].mxu1 %vm75_vm1, %v32465_v52 }
 0x4e8   :  { %25923 = vmatprep.mubr.msk.f32.mxu1 %vm75_vm1, %v31883_v32  ;;  %v32487_v32 = vld [vmem:[#allocation2 + $0xf2] sm:$0xff] }
 0x4eb   :  { %25924 = vmatmul.mubr.msk.f32.gmra.mrb[24].mxu1 %vm75_vm1, %v32471_v41 }
 0x4ec   :  { %25926 = vmatprep.mubr.msk.f32.mxu1 %vm75_vm1, %v32475_v60 }
 0x4ef   :  { %25927 = vmatmul.mubr.msk.f32.gmra.mrb[26].mxu1 %vm75_vm1, %v32479_v57 }
 0x4f0   :  { %25929 = vmatprep.mubr.msk.f32.mxu1 %vm75_vm1, %v32483_v36 }
 0x4f3   :  { %25930 = vmatmul.mubr.msk.f32.gmra.mrb[28].mxu1 %vm75_vm1, %v32487_v32 }
 0x4f4   :  { %25932 = vmatprep.mubr.msk.f32.mxu1 %vm75_vm1, %v32491_v16 }
 0x4f7   :  { %25933 = vmatmul.mubr.msk.f32.gmra.mrb[30].mxu1 %vm75_vm1, %v32495_v17 }
 0x4f8   :  { %25943 = vmatprep.mubr.msk.f32.mxu1 %vm75_vm1, %v32362_v25  ;;  %v32525_v25 = vld [vmem:[#allocation2 + $0x80] sm:$0xff] }
 0x4fb   :  { %25944 = vmatmul.mubr.msk.f32.vlgmr.msra.gmra.mrb[16].mxu1 %vm75_vm1, %v32372_v43 }
 0x4fc   :  { %25946 = vmatprep.mubr.msk.f32.mxu1 %vm75_vm1, %v32377_v6  ;;  %28274 = vmatpush3.bf16.msra.mxu1 %v28271_v51  ;;  %v32543_v51 = vld [vmem:[#allocation2 + $0x120] sm:$0xff] }
 0x4fd   :  { %28276 = vmatprep.subr.bf16.mxu1 %v28275_v56 }
 0x4ff   :  { %25947 = vmatmul.mubr.msk.f32.gmra.mrb[18].mxu1 %vm75_vm1, %v32381_v13 }
 0x500   :  { %25949 = vmatprep.mubr.msk.f32.mxu1 %vm75_vm1, %v32385_v21  ;;  %28278 = vmatpush3.bf16.msra.mxu1 %v28275_v56  ;;  %v22009_v56 = vld [vmem:[%s37017_s0 + $0xc0] sm:$0xff] }
 0x501   :  { %28280 = vmatprep.subr.bf16.mxu1 %v28279_v45  ;;  %v28287_v39 = vpack.c.bf16 %v22010_v10, %v22009_v56  ;;  %v22030_v56 = vld [vmem:[%s37017_s0 + $0xe8] sm:$0xff] }
 0x503   :  { %25950 = vmatmul.mubr.msk.f32.gmra.mrb[20].mxu1 %vm75_vm1, %v32389_v59 }
 0x504   :  { %25952 = vmatprep.mubr.msk.f32.mxu1 %vm75_vm1, %v32393_v53 }
 0x507   :  { %25953 = vmatmul.mubr.msk.f32.gmra.mrb[22].mxu1 %vm75_vm1, %v32525_v25 }
 0x508   :  { %25955 = vmatprep.mubr.msk.f32.mxu1 %vm75_vm1, %v32399_v33  ;;  %v21991_v33 = vld [vmem:[%s37017_s0 + $0xb0] sm:$0xff] }
 0x509   :  { %v28283_v27 = vpack.c.bf16 %v21992_v40, %v21991_v33  ;;  %v22012_v33 = vld [vmem:[%s37017_s0 + $0xd8] sm:$0xff] }
 0x50b   :  { %25956 = vmatmul.mubr.msk.f32.gmra.mrb[24].mxu1 %vm75_vm1, %v32403_v49 }
 0x50c   :  { %25958 = vmatprep.mubr.msk.f32.mxu1 %vm75_vm1, %v32407_v22 }
 0x50f   :  { %25959 = vmatmul.mubr.msk.f32.gmra.mrb[26].mxu1 %vm75_vm1, %v32411_v31 }
 0x510   :  { %25961 = vmatprep.mubr.msk.f32.mxu1 %vm75_vm1, %v32415_v42 }
 0x513   :  { %25962 = vmatmul.mubr.msk.f32.gmra.mrb[28].mxu1 %vm75_vm1, %v32419_v62 }
 0x514   :  { %25964 = vmatprep.mubr.msk.f32.mxu1 %vm75_vm1, %v32423_v46 }
 0x517   :  { %25965 = vmatmul.mubr.msk.f32.gmra.mrb[30].mxu1 %vm75_vm1, %v32543_v51 }
 0x518   :  { %25975 = vmatprep.mubr.msk.f32.mxu1 %vm75_vm1, %v32259_v61  ;;  %v32573_v61 = vld [vmem:[#allocation2 + $0x81] sm:$0xff] }
 0x51b   :  { %25976 = vmatmul.mubr.msk.f32.vlgmr.msra.gmra.mrb[16].mxu1 %vm75_vm1, %v32271_v48 }
 0x51c   :  { %25978 = vmatprep.mubr.msk.f32.mxu1 %vm75_vm1, %v32281_v35  ;;  %28282 = vmatpush3.bf16.msra.mxu1 %v28279_v45  ;;  %v32591_v45 = vld [vmem:[#allocation2 + $0x121] sm:$0xff] }
 0x51d   :  { %28284 = vmatprep.subr.bf16.mxu1 %v28283_v27 }
 0x51f   :  { %25979 = vmatmul.mubr.msk.f32.gmra.mrb[18].mxu1 %vm75_vm1, %v32287_v50 }
 0x520   :  { %25981 = vmatprep.mubr.msk.f32.mxu1 %vm75_vm1, %v32296_v38  ;;  %28286 = vmatpush3.bf16.msra.mxu1 %v28283_v27  ;;  %v22029_v27 = vld [vmem:[%s37017_s0 + $0xe0] sm:$0xff] }
 0x521   :  { %28288 = vmatprep.subr.bf16.mxu1 %v28287_v39  ;;  %v28295_v10 = vpack.c.bf16 %v22030_v56, %v22029_v27  ;;  %v22050_v27 = vld [vmem:[%s37017_s0 + $0x108] sm:$0xff] }
 0x523   :  { %25982 = vmatmul.mubr.msk.f32.gmra.mrb[20].mxu1 %vm75_vm1, %v32302_v34 }
 0x524   :  { %25984 = vmatprep.mubr.msk.f32.mxu1 %vm75_vm1, %v32310_v11 }
 0x527   :  { %25985 = vmatmul.mubr.msk.f32.gmra.mrb[22].mxu1 %vm75_vm1, %v32573_v61 }
 0x528   :  { %25987 = vmatprep.mubr.msk.f32.mxu1 %vm75_vm1, %v32322_v58  ;;  %v22011_v58 = vld [vmem:[%s37017_s0 + $0xd0] sm:$0xff] }
 0x529   :  { %v28291_v40 = vpack.c.bf16 %v22012_v33, %v22011_v58  ;;  %v22032_v58 = vld [vmem:[%s37017_s0 + $0xf8] sm:$0xff] }
 0x52b   :  { %25988 = vmatmul.mubr.msk.f32.gmra.mrb[24].mxu1 %vm75_vm1, %v32328_v2 }
 0x52c   :  { %25990 = vmatprep.mubr.msk.f32.mxu1 %vm75_vm1, %v32333_v15 }
 0x52f   :  { %25991 = vmatmul.mubr.msk.f32.gmra.mrb[26].mxu1 %vm75_vm1, %v32338_v54 }
 0x530   :  { %25993 = vmatprep.mubr.msk.f32.mxu1 %vm75_vm1, %v32342_v8 }
 0x533   :  { %25994 = vmatmul.mubr.msk.f32.gmra.mrb[28].mxu1 %vm75_vm1, %v32346_v26 }
 0x534   :  { %25996 = vmatprep.mubr.msk.f32.mxu1 %vm75_vm1, %v32350_v37 }
 0x537   :  { %25997 = vmatmul.mubr.msk.f32.gmra.mrb[30].mxu1 %vm75_vm1, %v32591_v45 }
 0x538   :  { %26007 = vmatprep.mubr.msk.f32.mxu1 %vm75_vm1, %v32435_v12  ;;  %v32621_v12 = vld [vmem:[#allocation2 + $0x82] sm:$0xff] }
 0x53b   :  { %26008 = vmatmul.mubr.msk.f32.vlgmr.msra.gmra.mrb[16].mxu1 %vm75_vm1, %v32445_v18 }
 0x53c   :  { %26010 = vmatprep.mubr.msk.f32.mxu1 %vm75_vm1, %v32449_v14  ;;  %28290 = vmatpush3.bf16.msra.mxu1 %v28287_v39  ;;  %v32639_v39 = vld [vmem:[#allocation2 + $0x122] sm:$0xff] }
 0x53d   :  { %28292 = vmatprep.subr.bf16.mxu1 %v28291_v40 }
 0x53f   :  { %26011 = vmatmul.mubr.msk.f32.gmra.mrb[18].mxu1 %vm75_vm1, %v32453_v55 }
 0x540   :  { %26013 = vmatprep.mubr.msk.f32.mxu1 %vm75_vm1, %v32457_v24  ;;  %28294 = vmatpush3.bf16.msra.mxu1 %v28291_v40  ;;  %v22049_v40 = vld [vmem:[%s37017_s0 + $0x100] sm:$0xff] }
 0x541   :  { %28296 = vmatprep.subr.bf16.mxu1 %v28295_v10  ;;  %v28303_v56 = vpack.c.bf16 %v22050_v27, %v22049_v40 }
 0x543   :  { %26014 = vmatmul.mubr.msk.f32.gmra.mrb[20].mxu1 %vm75_vm1, %v32461_v20 }
 0x544   :  { %26016 = vmatprep.mubr.msk.f32.mxu1 %vm75_vm1, %v32465_v52 }
 0x547   :  { %26017 = vmatmul.mubr.msk.f32.gmra.mrb[22].mxu1 %vm75_vm1, %v32621_v12 }
 0x548   :  { %26019 = vmatprep.mubr.msk.f32.mxu1 %vm75_vm1, %v32471_v41  ;;  %v22031_v41 = vld [vmem:[%s37017_s0 + $0xf0] sm:$0xff] }
 0x549   :  { %v28299_v33 = vpack.c.bf16 %v22032_v58, %v22031_v41  ;;  %v22107_v41 = vld [vmem:[%s37019_s25 + $0x48] sm:$0xff]  ;;  %v37030_v58 = vmax.f32 %v31641_v19, 0.0 }
 0x54b   :  { %26020 = vmatmul.mubr.msk.f32.gmra.mrb[24].mxu1 %vm75_vm1, %v32475_v60 }
 0x54c   :  { %26022 = vmatprep.mubr.msk.f32.mxu1 %vm75_vm1, %v32479_v57 }
 0x54f   :  { %26023 = vmatmul.mubr.msk.f32.gmra.mrb[26].mxu1 %vm75_vm1, %v32483_v36 }
 0x550   :  { %26025 = vmatprep.mubr.msk.f32.mxu1 %vm75_vm1, %v32487_v32 }
 0x553   :  { %26026 = vmatmul.mubr.msk.f32.gmra.mrb[28].mxu1 %vm75_vm1, %v32491_v16 }
 0x554   :  { %26028 = vmatprep.mubr.msk.f32.mxu1 %vm75_vm1, %v32495_v17 }
 0x557   :  { %26029 = vmatmul.mubr.msk.f32.gmra.mrb[30].mxu1 %vm75_vm1, %v32639_v39 }
 0x558   :  { %26039 = vmatprep.mubr.msk.f32.mxu1 %vm75_vm1, %v32372_v43  ;;  %v22052_v43 = vld [vmem:[%s37017_s0 + $0x118] sm:$0xff] }
 0x55b   :  { %26040 = vmatmul.mubr.msk.f32.vlgmr.msra.gmra.mrb[16].mxu1 %vm75_vm1, %v32377_v6 }
 0x55c   :  { %26042 = vmatprep.mubr.msk.f32.mxu1 %vm75_vm1, %v32381_v13  ;;  %28298 = vmatpush3.bf16.msra.mxu1 %v28295_v10  ;;  %v37022_v13 = vmax.f32 %v31597_v9, 0.0  ;;  %v37024_v9 = vmax.f32 %v31611_v44, 0.0  ;;  %v8053_v44 = vld [vmem:[%s37019_s25 + $0x10] sm:$0xff]  ;;  %v37028_v10 = vmax.f32 %v31633_v29, 0.0 }
 0x55d   :  { %28300 = vmatprep.subr.bf16.mxu1 %v28299_v33 }
 0x55f   :  { %26043 = vmatmul.mubr.msk.f32.gmra.mrb[18].mxu1 %vm75_vm1, %v32385_v21 }
 0x560   :  { %26045 = vmatprep.mubr.msk.f32.mxu1 %vm75_vm1, %v32389_v59  ;;  %28302 = vmatpush3.bf16.msra.mxu1 %v28299_v33 }
 0x561   :  { %28304 = vmatprep.subr.bf16.mxu1 %v28303_v56 }
 0x563   :  { %26046 = vmatmul.mubr.msk.f32.gmra.mrb[20].mxu1 %vm75_vm1, %v32393_v53 }
 0x564   :  { %26048 = vmatprep.mubr.msk.f32.mxu1 %vm75_vm1, %v32525_v25 }
 0x567   :  { %26049 = vmatmul.mubr.msk.f32.gmra.mrb[22].mxu1 %vm75_vm1, %v32088_v23  ;;  %v22051_v23 = vld [vmem:[%s37017_s0 + $0x110] sm:$0xff]  ;;  %s37020_s0 = sld [smem:[#allocation24_spill]] }
 0x568   :  { %26051 = vmatprep.mubr.msk.f32.mxu1 %vm75_vm1, %v32403_v49  ;;  %v28307_v6 = vpack.c.bf16 %v22052_v43, %v22051_v23 }
 0x56b   :  { %26052 = vmatmul.mubr.msk.f32.gmra.mrb[24].mxu1 %vm75_vm1, %v32407_v22 }
 0x56c   :  { %26054 = vmatprep.mubr.msk.f32.mxu1 %vm75_vm1, %v32411_v31 }
 0x56f   :  { %26055 = vmatmul.mubr.msk.f32.gmra.mrb[26].mxu1 %vm75_vm1, %v32415_v42 }
 0x570   :  { %26057 = vmatprep.mubr.msk.f32.mxu1 %vm75_vm1, %v32419_v62 }
 0x573   :  { %26058 = vmatmul.mubr.msk.f32.gmra.mrb[28].mxu1 %vm75_vm1, %v32423_v46 }
 0x574   :  { %26060 = vmatprep.mubr.msk.f32.mxu1 %vm75_vm1, %v32543_v51 }
 0x577   :  { %26061 = vmatmul.mubr.msk.f32.gmra.mrb[30].mxu1 %vm75_vm1, %v32106_v1  ;;  %v22070_v1 = vld [vmem:[%s37019_s25 + $0x20] sm:$0xff] }
 0x578   :  { %26071 = vmatprep.mubr.msk.f32.mxu1 %vm75_vm1, %v32271_v48  ;;  %v22073_v48 = vld [vmem:[%s37019_s25 + $0x38] sm:$0xff] }
 0x57b   :  { %26072 = vmatmul.mubr.msk.f32.vlgmr.msra.gmra.mrb[16].mxu1 %vm75_vm1, %v32281_v35  ;;  %v8055_v35 = vld [vmem:[#allocation2 + $0x1] sm:$0xff] }
 0x57c   :  { %26074 = vmatprep.mubr.msk.f32.mxu1 %vm75_vm1, %v32287_v50  ;;  %28306 = vmatpush3.bf16.msra.mxu1 %v28303_v56  ;;  %v8051_v50 = vld [vmem:[%s37019_s25] sm:$0xff] }
 0x57d   :  { %28308 = vmatprep.subr.bf16.mxu1 %v28307_v6  ;;  %26135 = vmatprep.mubr.msk.f32.mxu0 %vm75_vm1, %v8055_v35 }
 0x57f   :  { %26075 = vmatmul.mubr.msk.f32.gmra.mrb[18].mxu1 %vm75_vm1, %v32296_v38  ;;  %v8052_v38 = vld [vmem:[%s37019_s25 + $0x8] sm:$0xff] }
 0x580   :  { %26077 = vmatprep.mubr.msk.f32.mxu1 %vm75_vm1, %v32302_v34  ;;  %28310 = vmatpush3.bf16.msra.mxu1 %v28307_v6  ;;  %v28319_v34 = vpack.c.bf16 %v8052_v38, %v8051_v50 }
 0x583   :  { %26078 = vmatmul.mubr.msk.f32.gmra.mrb[20].mxu1 %vm75_vm1, %v32310_v11  ;;  %v32780_v11 = vld [vmem:[%s37020_s0] ss:$0 sm:$0xff] }
 0x584   :  { %26080 = vmatprep.mubr.msk.f32.mxu1 %vm75_vm1, %v32573_v61 }
 0x587   :  { %26081 = vmatmul.mubr.msk.f32.gmra.mrb[22].mxu1 %vm75_vm1, %v32136_v63  ;;  %v22071_v63 = vld [vmem:[%s37019_s25 + $0x28] sm:$0xff] }
 0x588   :  { %26083 = vmatprep.mubr.msk.f32.mxu1 %vm75_vm1, %v32328_v2 }
 0x58b   :  { %26084 = vmatmul.mubr.msk.f32.gmra.mrb[24].mxu1 %vm75_vm1, %v32333_v15 }
 0x58c   :  { %26086 = vmatprep.mubr.msk.f32.mxu1 %vm75_vm1, %v32338_v54 }
 0x58f   :  { %26087 = vmatmul.mubr.msk.f32.gmra.mrb[26].mxu1 %vm75_vm1, %v32342_v8 }
 0x590   :  { %26089 = vmatprep.mubr.msk.f32.mxu1 %vm75_vm1, %v32346_v26  ;;  %v37021_v26 = vmax.f32 %v31594_v5, 0.0  ;;  %v37023_v5 = vmax.f32 %v31605_v30, 0.0 }
 0x593   :  { %26090 = vmatmul.mubr.msk.f32.gmra.mrb[28].mxu1 %vm75_vm1, %v32350_v37 }
 0x594   :  { %26092 = vmatprep.mubr.msk.f32.mxu1 %vm75_vm1, %v32591_v45 }
 0x597   :  { %26093 = vmatmul.mubr.msk.f32.gmra.mrb[30].mxu1 %vm75_vm1, %v32154_v3  ;;  %v28311_v3 = vpack.c.bf16 %v22071_v63, %v22070_v1  ;;  %v37032_v1 = vmax.f32 %v31657_v4, 0.0 }
 0x598   :  { %26103 = vmatprep.mubr.msk.f32.mxu1 %vm75_vm1, %v32445_v18 }
 0x599   :  { %28312 = vmatprep.subr.bf16.mxu0 %v28311_v3 }
 0x59a   :  { %28314 = vmatpush3.bf16.msra.mxu0 %v28311_v3 }
 0x59b   :  { %26104 = vmatmul.mubr.msk.f32.vlgmr.msra.gmra.mrb[16].mxu1 %vm75_vm1, %v32449_v14 }
 0x59c   :  { %26106 = vmatprep.mubr.msk.f32.mxu1 %vm75_vm1, %v32453_v55 }
 0x59f   :  { %26107 = vmatmul.mubr.msk.f32.gmra.mrb[18].mxu1 %vm75_vm1, %v32457_v24 }
 0x5a0   :  { %26109 = vmatprep.mubr.msk.f32.mxu1 %vm75_vm1, %v32461_v20 }
 0x5a3   :  { %26110 = vmatmul.mubr.msk.f32.gmra.mrb[20].mxu1 %vm75_vm1, %v32465_v52  ;;  %v37025_v52 = vmax.f32 %v31619_v7, 0.0 }
 0x5a4   :  { %26112 = vmatprep.mubr.msk.f32.mxu1 %vm75_vm1, %v32621_v12 }
 0x5a7   :  { %26113 = vmatmul.mubr.msk.f32.gmra.mrb[22].mxu1 %vm75_vm1, %v32188_v0  ;;  %v22072_v0 = vld [vmem:[%s37019_s25 + $0x30] sm:$0xff] }
 0x5a8   :  { %26115 = vmatprep.mubr.msk.f32.mxu1 %vm75_vm1, %v32475_v60 }
 0x5ab   :  { %26116 = vmatmul.mubr.msk.f32.gmra.mrb[24].mxu1 %vm75_vm1, %v32479_v57  ;;  %v8054_v57 = vld [vmem:[%s37019_s25 + $0x18] sm:$0xff] }
 0x5ac   :  { %26118 = vmatprep.mubr.msk.f32.mxu1 %vm75_vm1, %v32483_v36  ;;  %v37026_v36 = vmax.f32 %v31625_v47, 0.0  ;;  %v28323_v45 = vpack.c.bf16 %v8054_v57, %v8053_v44  ;;  %v37043_v44 = vld [vmem:[#allocation10_spill] sm:$0xff] }
 0x5ad   :  { %v37044_v57 = vmax.f32 %v37043_v44, 0.0 }
 0x5af   :  { %26119 = vmatmul.mubr.msk.f32.gmra.mrb[26].mxu1 %vm75_vm1, %v32487_v32 }
 0x5b0   :  { %26121 = vmatprep.mubr.msk.f32.mxu1 %vm75_vm1, %v32491_v16 }
 0x5b3   :  { %26122 = vmatmul.mubr.msk.f32.gmra.mrb[28].mxu1 %vm75_vm1, %v32495_v17 }
 0x5b4   :  { %26124 = vmatprep.mubr.msk.f32.mxu1 %vm75_vm1, %v32639_v39  ;;  %v22106_v39 = vld [vmem:[%s37019_s25 + $0x40] sm:$0xff] }
 0x5b5   :  { %v32870_v6 = vpack.c.bf16 %v22107_v41, %v22106_v39 }
 0x5b7   :  { %26125 = vmatmul.mubr.msk.f32.gmra.mrb[30].mxu1 %vm75_vm1, %v32214_v28  ;;  %v28315_v28 = vpack.c.bf16 %v22073_v48, %v22072_v0  ;;  %v37034_v0 = vld [vmem:[#allocation7_spill] sm:$0xff] }
 0x5b8   :  { %26423 = vmatprep.mubr.msk.f32.mxu1 %vm75_vm1, %v8055_v35  ;;  %v37035_v48 = vmax.f32 %v37034_v0, 0.0  ;;  %v37052_v0 = vld [vmem:[#allocation13_spill] sm:$0xff] }
 0x5b9   :  { %28316 = vmatprep.subr.bf16.mxu0 %v28315_v28 }
 0x5ba   :  { %28318 = vmatpush3.bf16.msra.mxu0 %v28315_v28 }
 0x5bb   :  { %28320 = vmatprep.subr.bf16.mxu0 %v28319_v34 }
 0x66e   :  { %v26105_v2 = vpop.f32.mrb[16].mxu1 }
 0x66f   :  { %v7972_v15 = vadd.f32 %v26105_v2, %v32780_v11  ;;  %v7869_v54 = vpop.f32.mrb[17].mxu1 }
 0x670   :  { %v7971_v8 = vadd.f32 %v32780_v11, %v7869_v54  ;;  %v37037_v54 = vld [vmem:[#allocation8_spill] sm:$0xff] }
 0x671   :  { %v32786_v37 = vadd.f32 %v7972_v15, %v37021_v26 }
 0x672   :  { %v32790_v21 = vadd.f32 %v7971_v8, %v37022_v13  ;;  %v26108_v59 = vpop.f32.mrb[18].mxu1  ;;  %v37038_v8 = vmax.f32 %v37037_v54, 0.0 }
 0x673   :  { %v36941_v53 = vmax.f32 %v32786_v37, 0.0  ;;  %v7974_v49 = vadd.f32 %v26108_v59, %v32780_v11  ;;  %v7879_v22 = vpop.f32.mrb[19].mxu1  ;;  %v37040_v59 = vld [vmem:[#allocation9_spill] sm:$0xff] }
 0x674   :  { %v36940_v31 = vmax.f32 %v32790_v21, 0.0  ;;  %v7973_v42 = vadd.f32 %v32780_v11, %v7879_v22 }
 0x675   :  { %8020 = vst.msk [vmem:[#allocation2 + $0x21] sm:$0xff] %vm75_vm1, %v36941_v53  ;;  %v32801_v62 = vadd.f32 %v7974_v49, %v37023_v5  ;;  %v37041_v49 = vmax.f32 %v37040_v59, 0.0 }
 0x676   :  { %8019 = vst.msk [vmem:[#allocation2 + $0x11] sm:$0xff] %vm75_vm1, %v36940_v31  ;;  %v32808_v46 = vadd.f32 %v7973_v42, %v37024_v9  ;;  %v26111_v18 = vpop.f32.mrb[20].mxu1 }
 0x677   :  { %v36939_v14 = vmax.f32 %v32801_v62, 0.0  ;;  %v7976_v55 = vadd.f32 %v26111_v18, %v32780_v11  ;;  %v7889_v24 = vpop.f32.mrb[21].mxu1 }
 0x678   :  { %v36938_v20 = vmax.f32 %v32808_v46, 0.0  ;;  %v7975_v30 = vadd.f32 %v32780_v11, %v7889_v24 }
 0x679   :  { %8022 = vst.msk [vmem:[#allocation2 + $0x41] sm:$0xff] %vm75_vm1, %v36939_v14  ;;  %v32819_v60 = vadd.f32 %v7976_v55, %v37025_v52  ;;  %v32925_v52 = vld [vmem:[#allocation2 + $0xa1] sm:$0xff] }
 0x67a   :  { %8021 = vst.msk [vmem:[#allocation2 + $0x31] sm:$0xff] %vm75_vm1, %v36938_v20  ;;  %v32832_v32 = vadd.f32 %v7975_v30, %v37026_v36  ;;  %v26114_v16 = vpop.f32.mrb[22].mxu1 }
 0x67b   :  { %v36937_v7 = vmax.f32 %v32819_v60, 0.0  ;;  %v7978_v17 = vadd.f32 %v26114_v16, %v32780_v11  ;;  %v7899_v25 = vpop.f32.mrb[23].mxu1 }
 0x67c   :  { %37027 = vst [vmem:[#allocation14_spill] sm:$0xff] %v32832_v32  ;;  %v36936_v51 = vmax.f32 %v32832_v32, 0.0  ;;  %v7977_v61 = vadd.f32 %v32780_v11, %v7899_v25  ;;  %v32862_v40 = vld [vmem:[#allocation2 + $0x21] sm:$0xff] }
 0x67d   :  { %8024 = vst.msk [vmem:[#allocation2 + $0x61] sm:$0xff] %vm75_vm1, %v36937_v7  ;;  %v32843_v47 = vadd.f32 %v7978_v17, %v37028_v10  ;;  %v32845_v12 = vld [vmem:[#allocation2 + $0x11] sm:$0xff]  ;;  %v37046_v17 = vld [vmem:[#allocation11_spill] sm:$0xff] }
 0x67e   :  { %8023 = vst.msk [vmem:[#allocation2 + $0x51] sm:$0xff] %vm75_vm1, %v36936_v51  ;;  %v32858_v33 = vadd.f32 %v7977_v61, %v37030_v58  ;;  %v26117_v29 = vpop.f32.mrb[24].mxu1  ;;  %26136 = vmatmul.mubr.msk.f32.vlgmr.msra.gmra.mrb[32].mxu0 %vm75_vm1, %v32845_v12  ;;  %v37047_v25 = vmax.f32 %v37046_v17, 0.0  ;;  %v33011_v44 = vld [vmem:[#allocation2 + $0x10] sm:$0xff]  ;;  %v22127_v17 = vld [vmem:[%s37019_s25 + $0x68] sm:$0xff] }
 0x67f   :  { %37029 = vst [vmem:[#allocation15_spill] sm:$0xff] %v32843_v47  ;;  %v36935_v27 = vmax.f32 %v32843_v47, 0.0  ;;  %v7980_v56 = vadd.f32 %v26117_v29, %v32780_v11  ;;  %v7909_v23 = vpop.f32.mrb[25].mxu1  ;;  %26138 = vmatprep.mubr.msk.f32.mxu0 %vm75_vm1, %v32862_v40  ;;  %28322 = vmatpush3.bf16.msra.mxu0 %v28319_v34  ;;  %v22206_v47 = vld [vmem:[%s37019_s25 + $0xe0] sm:$0xff]  ;;  %v22207_v32 = vld [vmem:[%s37019_s25 + $0xe8] sm:$0xff] }
 0x680   :  { %37031 = vst [vmem:[#allocation16_spill] sm:$0xff] %v32858_v33  ;;  %v36934_v43 = vmax.f32 %v32858_v33, 0.0  ;;  %v7979_v19 = vadd.f32 %v32780_v11, %v7909_v23  ;;  %28324 = vmatprep.subr.bf16.mxu0 %v28323_v45  ;;  %v32890_v50 = vld [vmem:[#allocation2 + $0x41] sm:$0xff] }
 0x681   :  { %8026 = vst.msk [vmem:[#allocation2 + $0x81] sm:$0xff] %vm75_vm1, %v36935_v27  ;;  %v32877_v63 = vadd.f32 %v7980_v56, %v37032_v1  ;;  %v32879_v3 = vld [vmem:[#allocation2 + $0x31] sm:$0xff] }
 0x682   :  { %8025 = vst.msk [vmem:[#allocation2 + $0x71] sm:$0xff] %vm75_vm1, %v36934_v43  ;;  %v32886_v28 = vadd.f32 %v7979_v19, %v37035_v48  ;;  %v26120_v35 = vpop.f32.mrb[26].mxu1  ;;  %26139 = vmatmul.mubr.msk.f32.gmra.mrb[34].mxu0 %vm75_vm1, %v32879_v3  ;;  %v37049_v56 = vld [vmem:[#allocation12_spill] sm:$0xff]  ;;  %v37053_v48 = vmax.f32 %v37052_v0, 0.0  ;;  %v33106_v43 = vld [vmem:[#allocation2 + $0x42] sm:$0xff] }
 0x683   :  { %37033 = vst [vmem:[#allocation17_spill] sm:$0xff] %v32877_v63  ;;  %v36933_v4 = vmax.f32 %v32877_v63, 0.0  ;;  %v7982_v38 = vadd.f32 %v26120_v35, %v32780_v11  ;;  %v7919_v34 = vpop.f32.mrb[27].mxu1  ;;  %26141 = vmatprep.mubr.msk.f32.mxu0 %vm75_vm1, %v32890_v50  ;;  %28326 = vmatpush3.bf16.msra.mxu0 %v28323_v45  ;;  %v37050_v23 = vmax.f32 %v37049_v56, 0.0  ;;  %v33042_v56 = vld [vmem:[#allocation2 + $0xa0] sm:$0xff] }
 0x684   :  { %37036 = vst [vmem:[#allocation7_spill] sm:$0xff] %v32886_v28  ;;  %v36932_v2 = vmax.f32 %v32886_v28, 0.0  ;;  %v7981_v15 = vadd.f32 %v32780_v11, %v7919_v34  ;;  %28328 = vmatprep.subr.bf16.mxu0 %v32870_v6  ;;  %v32917_v5 = vld [vmem:[#allocation2 + $0x61] sm:$0xff]  ;;  %v22250_v28 = vld [vmem:[%s36881_s9 + $0x38] sm:$0xff] }
 0x685   :  { %8028 = vst.msk [vmem:[#allocation2 + $0xc1] sm:$0xff] %vm75_vm1, %v36933_v4  ;;  %v32904_v26 = vadd.f32 %v7982_v38, %v37038_v8  ;;  %v32906_v13 = vld [vmem:[#allocation2 + $0x51] sm:$0xff]  ;;  %v33098_v4 = vld [vmem:[#allocation2 + $0x22] sm:$0xff] }
 0x686   :  { %8027 = vst.msk [vmem:[#allocation2 + $0xb1] sm:$0xff] %vm75_vm1, %v36932_v2  ;;  %v32913_v22 = vadd.f32 %v7981_v15, %v37041_v49  ;;  %v26123_v42 = vpop.f32.mrb[28].mxu1  ;;  %26142 = vmatmul.mubr.msk.f32.gmra.mrb[36].mxu0 %vm75_vm1, %v32906_v13  ;;  %v32997_v49 = vld [vmem:[#allocation2] sm:$0xff]  ;;  %v22147_v2 = vld [vmem:[%s37019_s25 + $0x88] sm:$0xff]  ;;  %v33110_v27 = vld [vmem:[#allocation2 + $0x52] sm:$0xff] }
 0x687   :  { %37039 = vst [vmem:[#allocation8_spill] sm:$0xff] %v32904_v26  ;;  %v36931_v9 = vmax.f32 %v32904_v26, 0.0  ;;  %v7984_v18 = vadd.f32 %v26123_v42, %v32780_v11  ;;  %v7929_v55 = vpop.f32.mrb[29].mxu1  ;;  %26144 = vmatprep.mubr.msk.f32.mxu0 %vm75_vm1, %v32917_v5 }
 0x688   :  { %37042 = vst [vmem:[#allocation9_spill] sm:$0xff] %v32913_v22  ;;  %v36930_v24 = vmax.f32 %v32913_v22, 0.0  ;;  %v7983_v30 = vadd.f32 %v32780_v11, %v7929_v55  ;;  %v22109_v55 = vld [vmem:[%s37019_s25 + $0x58] sm:$0xff]  ;;  %v22167_v22 = vld [vmem:[%s37019_s25 + $0xa8] sm:$0xff] }
 0x689   :  { %8030 = vst.msk [vmem:[#allocation2 + $0xe1] sm:$0xff] %vm75_vm1, %v36931_v9  ;;  %v32932_v36 = vadd.f32 %v7984_v18, %v37044_v57  ;;  %v32934_v16 = vld [vmem:[#allocation2 + $0x71] sm:$0xff]  ;;  %v22126_v57 = vld [vmem:[%s37019_s25 + $0x60] sm:$0xff] }
 0x68a   :  { %8029 = vst.msk [vmem:[#allocation2 + $0xd1] sm:$0xff] %vm75_vm1, %v36930_v24  ;;  %v32941_v61 = vadd.f32 %v7983_v30, %v37047_v25  ;;  %v26126_v45 = vpop.f32.mrb[30].mxu1  ;;  %26145 = vmatmul.mubr.msk.f32.gmra.mrb[38].mxu0 %vm75_vm1, %v32934_v16  ;;  %v22108_v18 = vld [vmem:[%s37019_s25 + $0x50] sm:$0xff]  ;;  %v33021_v25 = vld [vmem:[#allocation2 + $0x20] sm:$0xff] }
 0x68b   :  { %37045 = vst [vmem:[#allocation10_spill] sm:$0xff] %v32932_v36  ;;  %v36929_v10 = vmax.f32 %v32932_v36, 0.0  ;;  %v7986_v39 = vadd.f32 %v26126_v45, %v32780_v11  ;;  %v7939_v41 = vpop.f32.mrb[31].mxu1  ;;  %26147 = vmatprep.mubr.msk.f32.mxu0 %vm75_vm1, %v32925_v52  ;;  %v28331_v30 = vpack.c.bf16 %v22109_v55, %v22108_v18  ;;  %v28335_v45 = vpack.c.bf16 %v22127_v17, %v22126_v57  ;;  %v33074_v17 = vld [vmem:[#allocation2 + $0x2] sm:$0xff]  ;;  %v33088_v24 = vld [vmem:[#allocation2 + $0x12] sm:$0xff] }
 0x68c   :  { %37048 = vst [vmem:[#allocation11_spill] sm:$0xff] %v32941_v61  ;;  %v36928_v58 = vmax.f32 %v32941_v61, 0.0  ;;  %v7985_v29 = vadd.f32 %v32780_v11, %v7939_v41  ;;  %v32969_v11 = vld [vmem:[#allocation2 + $0xc1] sm:$0xff] }
 0x68d   :  { %8032 = vst.msk [vmem:[#allocation2 + $0x101] sm:$0xff] %vm75_vm1, %v36929_v10  ;;  %v32956_v19 = vadd.f32 %v7986_v39, %v37050_v23  ;;  %v32958_v1 = vld [vmem:[#allocation2 + $0xb1] sm:$0xff]  ;;  %v33030_v41 = vld [vmem:[#allocation2 + $0x40] sm:$0xff] }
 0x68e   :  { %8031 = vst.msk [vmem:[#allocation2 + $0xf1] sm:$0xff] %vm75_vm1, %v36928_v58  ;;  %v32965_v35 = vadd.f32 %v7985_v29, %v37053_v48  ;;  %26148 = vmatmul.mubr.msk.f32.gmra.mrb[40].mxu0 %vm75_vm1, %v32958_v1  ;;  %v33026_v39 = vld [vmem:[#allocation2 + $0x30] sm:$0xff]  ;;  %v33054_v48 = vld [vmem:[#allocation2 + $0xc0] sm:$0xff]  ;;  %v22129_v58 = vld [vmem:[%s37019_s25 + $0x78] sm:$0xff] }
 0x68f   :  { %37051 = vst [vmem:[#allocation12_spill] sm:$0xff] %v32956_v19  ;;  %v36927_v38 = vmax.f32 %v32956_v19, 0.0  ;;  %26150 = vmatprep.mubr.msk.f32.mxu0 %vm75_vm1, %v32969_v11  ;;  %v33034_v29 = vld [vmem:[#allocation2 + $0x50] sm:$0xff]  ;;  %v22146_v9 = vld [vmem:[%s37019_s25 + $0x80] sm:$0xff]  ;;  %v22149_v19 = vld [vmem:[%s37019_s25 + $0x98] sm:$0xff] }
 0x690   :  { %37054 = vst [vmem:[#allocation13_spill] sm:$0xff] %v32965_v35  ;;  %v36926_v34 = vmax.f32 %v32965_v35, 0.0  ;;  %v32985_v54 = vld [vmem:[#allocation2 + $0xe1] sm:$0xff]  ;;  %v33044_v23 = vld [vmem:[#allocation2 + $0x70] sm:$0xff] }
 0x691   :  { %8034 = vst.msk [vmem:[#allocation2 + $0x121] sm:$0xff] %vm75_vm1, %v36927_v38  ;;  %v32978_v15 = vld [vmem:[#allocation2 + $0xd1] sm:$0xff]  ;;  %v33062_v55 = vld [vmem:[#allocation2 + $0xe0] sm:$0xff] }
 0x692   :  { %8033 = vst.msk [vmem:[#allocation2 + $0x111] sm:$0xff] %vm75_vm1, %v36926_v34  ;;  %26151 = vmatmul.mubr.msk.f32.gmra.mrb[42].mxu0 %vm75_vm1, %v32978_v15  ;;  %v33050_v0 = vld [vmem:[#allocation2 + $0xb0] sm:$0xff]  ;;  %v33130_v51 = vld [vmem:[#allocation2 + $0xc2] sm:$0xff] }
 0x693   :  { %26153 = vmatprep.mubr.msk.f32.mxu0 %vm75_vm1, %v32985_v54  ;;  %v33058_v18 = vld [vmem:[#allocation2 + $0xd0] sm:$0xff]  ;;  %v33138_v20 = vld [vmem:[#allocation2 + $0xe2] sm:$0xff] }
 0x694   :  { %v32993_v59 = vld [vmem:[#allocation2 + $0x101] sm:$0xff]  ;;  %v22128_v38 = vld [vmem:[%s37019_s25 + $0x70] sm:$0xff] }
 0x695   :  { %v32989_v8 = vld [vmem:[#allocation2 + $0xf1] sm:$0xff]  ;;  %v33070_v57 = vld [vmem:[#allocation2 + $0x100] sm:$0xff]  ;;  %v28339_v10 = vpack.c.bf16 %v22129_v58, %v22128_v38  ;;  %v28343_v58 = vpack.c.bf16 %v22147_v2, %v22146_v9 }
 0x696   :  { %26154 = vmatmul.mubr.msk.f32.gmra.mrb[44].mxu0 %vm75_vm1, %v32989_v8  ;;  %v33102_v38 = vld [vmem:[#allocation2 + $0x32] sm:$0xff]  ;;  %v33118_v2 = vld [vmem:[#allocation2 + $0xa2] sm:$0xff] }
 0x697   :  { %26156 = vmatprep.mubr.msk.f32.mxu0 %vm75_vm1, %v32993_v59  ;;  %v33120_v9 = vld [vmem:[#allocation2 + $0x72] sm:$0xff]  ;;  %v33146_v31 = vld [vmem:[#allocation2 + $0x102] sm:$0xff] }
 0x698   :  { %v33134_v7 = vld [vmem:[#allocation2 + $0xd2] sm:$0xff]  ;;  %v22166_v36 = vld [vmem:[%s37019_s25 + $0xa0] sm:$0xff] }
 0x699   :  { %v32999_v42 = vld [vmem:[#allocation2 + $0x111] sm:$0xff]  ;;  %v28351_v26 = vpack.c.bf16 %v22167_v22, %v22166_v36  ;;  %v33198_v22 = vld [vmem:[#allocation2 + $0x120] sm:$0xff] }
 0x69a   :  { %26157 = vmatmul.mubr.msk.f32.gmra.mrb[46].mxu0 %vm75_vm1, %v32999_v42  ;;  %v33076_v34 = vld [vmem:[#allocation2 + $0x110] sm:$0xff] }
 0x69b   :  { %26167 = vmatprep.mubr.msk.f32.mxu0 %vm75_vm1, %v32997_v49  ;;  %v33142_v14 = vld [vmem:[#allocation2 + $0xf2] sm:$0xff] }
 0x69c   :  { %v33150_v53 = vld [vmem:[#allocation2 + $0x112] sm:$0xff] }
 0x69d   :  { %v22148_v35 = vld [vmem:[%s37019_s25 + $0x90] sm:$0xff] }
 0x69e   :  { %26168 = vmatmul.mubr.msk.f32.vlgmr.msra.gmra.mrb[32].mxu0 %vm75_vm1, %v33011_v44  ;;  %v28347_v61 = vpack.c.bf16 %v22149_v19, %v22148_v35  ;;  %v33180_v19 = vld [vmem:[#allocation2 + $0x80] sm:$0xff]  ;;  %v22168_v36 = vld [vmem:[%s37019_s25 + $0xb0] sm:$0xff] }
 0x69f   :  { %26170 = vmatprep.mubr.msk.f32.mxu0 %vm75_vm1, %v33021_v25  ;;  %28330 = vmatpush3.bf16.msra.mxu0 %v32870_v6  ;;  %v33038_v6 = vld [vmem:[#allocation2 + $0x60] sm:$0xff] }
 0x6a0   :  { %28332 = vmatprep.subr.bf16.mxu0 %v28331_v30 }
 0x6a2   :  { %26171 = vmatmul.mubr.msk.f32.gmra.mrb[34].mxu0 %vm75_vm1, %v33026_v39 }
 0x6a3   :  { %26173 = vmatprep.mubr.msk.f32.mxu0 %vm75_vm1, %v33030_v41  ;;  %28334 = vmatpush3.bf16.msra.mxu0 %v28331_v30  ;;  %v33066_v30 = vld [vmem:[#allocation2 + $0xf0] sm:$0xff] }
 0x6a4   :  { %28336 = vmatprep.subr.bf16.mxu0 %v28335_v45 }
 0x6a6   :  { %26174 = vmatmul.mubr.msk.f32.gmra.mrb[36].mxu0 %vm75_vm1, %v33034_v29 }
 0x6a7   :  { %26176 = vmatprep.mubr.msk.f32.mxu0 %vm75_vm1, %v33038_v6 }
 0x6aa   :  { %26177 = vmatmul.mubr.msk.f32.gmra.mrb[38].mxu0 %vm75_vm1, %v33044_v23 }
 0x6ab   :  { %26179 = vmatprep.mubr.msk.f32.mxu0 %vm75_vm1, %v33042_v56 }
 0x6ae   :  { %26180 = vmatmul.mubr.msk.f32.gmra.mrb[40].mxu0 %vm75_vm1, %v33050_v0 }
 0x6af   :  { %26182 = vmatprep.mubr.msk.f32.mxu0 %vm75_vm1, %v33054_v48 }
 0x6b2   :  { %26183 = vmatmul.mubr.msk.f32.gmra.mrb[42].mxu0 %vm75_vm1, %v33058_v18 }
 0x6b3   :  { %26185 = vmatprep.mubr.msk.f32.mxu0 %vm75_vm1, %v33062_v55 }
 0x6b6   :  { %26186 = vmatmul.mubr.msk.f32.gmra.mrb[44].mxu0 %vm75_vm1, %v33066_v30 }
 0x6b7   :  { %26188 = vmatprep.mubr.msk.f32.mxu0 %vm75_vm1, %v33070_v57 }
 0x6ba   :  { %26189 = vmatmul.mubr.msk.f32.gmra.mrb[46].mxu0 %vm75_vm1, %v33076_v34 }
 0x6bb   :  { %26199 = vmatprep.mubr.msk.f32.mxu0 %vm75_vm1, %v33074_v17 }
 0x6be   :  { %26200 = vmatmul.mubr.msk.f32.vlgmr.msra.gmra.mrb[32].mxu0 %vm75_vm1, %v33088_v24 }
 0x6bf   :  { %26202 = vmatprep.mubr.msk.f32.mxu0 %vm75_vm1, %v33098_v4  ;;  %28338 = vmatpush3.bf16.msra.mxu0 %v28335_v45  ;;  %v33114_v45 = vld [vmem:[#allocation2 + $0x62] sm:$0xff] }
 0x6c0   :  { %28340 = vmatprep.subr.bf16.mxu0 %v28339_v10 }
 0x6c2   :  { %26203 = vmatmul.mubr.msk.f32.gmra.mrb[34].mxu0 %vm75_vm1, %v33102_v38 }
 0x6c3   :  { %26205 = vmatprep.mubr.msk.f32.mxu0 %vm75_vm1, %v33106_v43  ;;  %28342 = vmatpush3.bf16.msra.mxu0 %v28339_v10  ;;  %v33126_v10 = vld [vmem:[#allocation2 + $0xb2] sm:$0xff] }
 0x6c4   :  { %28344 = vmatprep.subr.bf16.mxu0 %v28343_v58 }
 0x6c6   :  { %26206 = vmatmul.mubr.msk.f32.gmra.mrb[36].mxu0 %vm75_vm1, %v33110_v27 }
 0x6c7   :  { %26208 = vmatprep.mubr.msk.f32.mxu0 %vm75_vm1, %v33114_v45 }
 0x6ca   :  { %26209 = vmatmul.mubr.msk.f32.gmra.mrb[38].mxu0 %vm75_vm1, %v33120_v9 }
 0x6cb   :  { %26211 = vmatprep.mubr.msk.f32.mxu0 %vm75_vm1, %v33118_v2 }
 0x6ce   :  { %26212 = vmatmul.mubr.msk.f32.gmra.mrb[40].mxu0 %vm75_vm1, %v33126_v10 }
 0x6cf   :  { %26214 = vmatprep.mubr.msk.f32.mxu0 %vm75_vm1, %v33130_v51 }
 0x6d2   :  { %26215 = vmatmul.mubr.msk.f32.gmra.mrb[42].mxu0 %vm75_vm1, %v33134_v7 }
 0x6d3   :  { %26217 = vmatprep.mubr.msk.f32.mxu0 %vm75_vm1, %v33138_v20 }
 0x6d6   :  { %26218 = vmatmul.mubr.msk.f32.gmra.mrb[44].mxu0 %vm75_vm1, %v33142_v14 }
 0x6d7   :  { %26220 = vmatprep.mubr.msk.f32.mxu0 %vm75_vm1, %v33146_v31 }
 0x6da   :  { %26221 = vmatmul.mubr.msk.f32.gmra.mrb[46].mxu0 %vm75_vm1, %v33150_v53 }
 0x6db   :  { %26231 = vmatprep.mubr.msk.f32.mxu0 %vm75_vm1, %v33011_v44  ;;  %v22186_v44 = vld [vmem:[%s37019_s25 + $0xc0] sm:$0xff] }
 0x6de   :  { %26232 = vmatmul.mubr.msk.f32.vlgmr.msra.gmra.mrb[32].mxu0 %vm75_vm1, %v33021_v25 }
 0x6df   :  { %26234 = vmatprep.mubr.msk.f32.mxu0 %vm75_vm1, %v33026_v39  ;;  %28346 = vmatpush3.bf16.msra.mxu0 %v28343_v58 }
 0x6e0   :  { %28348 = vmatprep.subr.bf16.mxu0 %v28347_v61 }
 0x6e2   :  { %26235 = vmatmul.mubr.msk.f32.gmra.mrb[34].mxu0 %vm75_vm1, %v33030_v41 }
 0x6e3   :  { %26237 = vmatprep.mubr.msk.f32.mxu0 %vm75_vm1, %v33034_v29  ;;  %28350 = vmatpush3.bf16.msra.mxu0 %v28347_v61  ;;  %v22169_v61 = vld [vmem:[%s37019_s25 + $0xb8] sm:$0xff] }
 0x6e4   :  { %28352 = vmatprep.subr.bf16.mxu0 %v28351_v26  ;;  %v28355_v35 = vpack.c.bf16 %v22169_v61, %v22168_v36  ;;  %v22189_v36 = vld [vmem:[%s37019_s25 + $0xd8] sm:$0xff]  ;;  %v22247_v61 = vld [vmem:[%s36881_s9 + $0x20] sm:$0xff] }
 0x6e6   :  { %26238 = vmatmul.mubr.msk.f32.gmra.mrb[36].mxu0 %vm75_vm1, %v33038_v6 }
 0x6e7   :  { %26240 = vmatprep.mubr.msk.f32.mxu0 %vm75_vm1, %v33044_v23 }
 0x6ea   :  { %26241 = vmatmul.mubr.msk.f32.gmra.mrb[38].mxu0 %vm75_vm1, %v33180_v19 }
 0x6eb   :  { %26243 = vmatprep.mubr.msk.f32.mxu0 %vm75_vm1, %v33050_v0  ;;  %v22187_v0 = vld [vmem:[%s37019_s25 + $0xc8] sm:$0xff] }
 0x6ec   :  { %v28359_v58 = vpack.c.bf16 %v22187_v0, %v22186_v44  ;;  %v22249_v44 = vld [vmem:[%s36881_s9 + $0x30] sm:$0xff] }
 0x6ed   :  { %v28387_v33 = vpack.c.bf16 %v22250_v28, %v22249_v44  ;;  %v33288_v28 = vld [vmem:[#allocation2 + $0x82] sm:$0xff] }
 0x6ee   :  { %26244 = vmatmul.mubr.msk.f32.gmra.mrb[40].mxu0 %vm75_vm1, %v33054_v48 }
 0x6ef   :  { %26246 = vmatprep.mubr.msk.f32.mxu0 %vm75_vm1, %v33058_v18 }
 0x6f2   :  { %26247 = vmatmul.mubr.msk.f32.gmra.mrb[42].mxu0 %vm75_vm1, %v33062_v55 }
 0x6f3   :  { %26249 = vmatprep.mubr.msk.f32.mxu0 %vm75_vm1, %v33066_v30 }
 0x6f6   :  { %26250 = vmatmul.mubr.msk.f32.gmra.mrb[44].mxu0 %vm75_vm1, %v33070_v57 }
 0x6f7   :  { %26252 = vmatprep.mubr.msk.f32.mxu0 %vm75_vm1, %v33076_v34 }
 0x6fa   :  { %26253 = vmatmul.mubr.msk.f32.gmra.mrb[46].mxu0 %vm75_vm1, %v33198_v22 }
 0x6fb   :  { %26263 = vmatprep.mubr.msk.f32.mxu0 %vm75_vm1, %v32845_v12  ;;  %v33228_v12 = vld [vmem:[#allocation2 + $0x81] sm:$0xff] }
 0x6fe   :  { %26264 = vmatmul.mubr.msk.f32.vlgmr.msra.gmra.mrb[32].mxu0 %vm75_vm1, %v32862_v40 }
 0x6ff   :  { %26266 = vmatprep.mubr.msk.f32.mxu0 %vm75_vm1, %v32879_v3  ;;  %28354 = vmatpush3.bf16.msra.mxu0 %v28351_v26  ;;  %v33246_v26 = vld [vmem:[#allocation2 + $0x121] sm:$0xff] }
 0x700   :  { %28356 = vmatprep.subr.bf16.mxu0 %v28355_v35 }
 0x702   :  { %26267 = vmatmul.mubr.msk.f32.gmra.mrb[34].mxu0 %vm75_vm1, %v32890_v50 }
 0x703   :  { %26269 = vmatprep.mubr.msk.f32.mxu0 %vm75_vm1, %v32906_v13  ;;  %28358 = vmatpush3.bf16.msra.mxu0 %v28355_v35  ;;  %v22248_v35 = vld [vmem:[%s36881_s9 + $0x28] sm:$0xff] }
 0x704   :  { %28360 = vmatprep.subr.bf16.mxu0 %v28359_v58  ;;  %v28383_v0 = vpack.c.bf16 %v22248_v35, %v22247_v61 }
 0x706   :  { %26270 = vmatmul.mubr.msk.f32.gmra.mrb[36].mxu0 %vm75_vm1, %v32917_v5  ;;  %28384 = vmatprep.subr.bf16.mxu1 %v28383_v0 }
 0x707   :  { %26272 = vmatprep.mubr.msk.f32.mxu0 %vm75_vm1, %v32934_v16  ;;  %28386 = vmatpush3.bf16.msra.mxu1 %v28383_v0 }
 0x708   :  { %28388 = vmatprep.subr.bf16.mxu1 %v28387_v33 }
 0x70a   :  { %26273 = vmatmul.mubr.msk.f32.gmra.mrb[38].mxu0 %vm75_vm1, %v33228_v12 }
 0x70b   :  { %26275 = vmatprep.mubr.msk.f32.mxu0 %vm75_vm1, %v32958_v1  ;;  %v22188_v1 = vld [vmem:[%s37019_s25 + $0xd0] sm:$0xff]  ;;  %28390 = vmatpush3.bf16.msra.mxu1 %v28387_v33  ;;  %v22209_v33 = vld [vmem:[%s37019_s25 + $0xf8] sm:$0xff] }
 0x70c   :  { %v28363_v63 = vpack.c.bf16 %v22189_v36, %v22188_v1 }
 0x70e   :  { %26276 = vmatmul.mubr.msk.f32.gmra.mrb[40].mxu0 %vm75_vm1, %v32969_v11 }
 0x70f   :  { %26278 = vmatprep.mubr.msk.f32.mxu0 %vm75_vm1, %v32978_v15 }
 0x712   :  { %26279 = vmatmul.mubr.msk.f32.gmra.mrb[42].mxu0 %vm75_vm1, %v32985_v54 }
 0x713   :  { %26281 = vmatprep.mubr.msk.f32.mxu0 %vm75_vm1, %v32989_v8 }
 0x716   :  { %26282 = vmatmul.mubr.msk.f32.gmra.mrb[44].mxu0 %vm75_vm1, %v32993_v59 }
 0x717   :  { %26284 = vmatprep.mubr.msk.f32.mxu0 %vm75_vm1, %v32999_v42 }
 0x71a   :  { %26285 = vmatmul.mubr.msk.f32.gmra.mrb[46].mxu0 %vm75_vm1, %v33246_v26 }
 0x71b   :  { %26295 = vmatprep.mubr.msk.f32.mxu0 %vm75_vm1, %v33088_v24  ;;  %v28367_v24 = vpack.c.bf16 %v22207_v32, %v22206_v47  ;;  %v33306_v32 = vld [vmem:[#allocation2 + $0x122] sm:$0xff]  ;;  %v22208_v47 = vld [vmem:[%s37019_s25 + $0xf0] sm:$0xff] }
 0x71e   :  { %26296 = vmatmul.mubr.msk.f32.vlgmr.msra.gmra.mrb[32].mxu0 %vm75_vm1, %v33098_v4 }
 0x71f   :  { %26298 = vmatprep.mubr.msk.f32.mxu0 %vm75_vm1, %v33102_v38  ;;  %28362 = vmatpush3.bf16.msra.mxu0 %v28359_v58  ;;  %v22227_v58 = vld [vmem:[%s37019_s25 + $0x108] sm:$0xff] }
 0x720   :  { %28364 = vmatprep.subr.bf16.mxu0 %v28363_v63 }
 0x722   :  { %26299 = vmatmul.mubr.msk.f32.gmra.mrb[34].mxu0 %vm75_vm1, %v33106_v43 }
 0x723   :  { %26301 = vmatprep.mubr.msk.f32.mxu0 %vm75_vm1, %v33110_v27  ;;  %28366 = vmatpush3.bf16.msra.mxu0 %v28363_v63  ;;  %v28371_v63 = vpack.c.bf16 %v22209_v33, %v22208_v47 }
 0x724   :  { %28368 = vmatprep.subr.bf16.mxu0 %v28367_v24 }
 0x726   :  { %26302 = vmatmul.mubr.msk.f32.gmra.mrb[36].mxu0 %vm75_vm1, %v33114_v45 }
 0x727   :  { %26304 = vmatprep.mubr.msk.f32.mxu0 %vm75_vm1, %v33120_v9 }
 0x72a   :  { %26305 = vmatmul.mubr.msk.f32.gmra.mrb[38].mxu0 %vm75_vm1, %v33288_v28 }
 0x72b   :  { %26307 = vmatprep.mubr.msk.f32.mxu0 %vm75_vm1, %v33126_v10  ;;  %v22226_v10 = vld [vmem:[%s37019_s25 + $0x100] sm:$0xff] }
 0x72c   :  { %v28375_v1 = vpack.c.bf16 %v22227_v58, %v22226_v10 }
 0x72e   :  { %26308 = vmatmul.mubr.msk.f32.gmra.mrb[40].mxu0 %vm75_vm1, %v33130_v51 }
 0x72f   :  { %26310 = vmatprep.mubr.msk.f32.mxu0 %vm75_vm1, %v33134_v7 }
 0x732   :  { %26311 = vmatmul.mubr.msk.f32.gmra.mrb[42].mxu0 %vm75_vm1, %v33138_v20 }
 0x733   :  { %26313 = vmatprep.mubr.msk.f32.mxu0 %vm75_vm1, %v33142_v14 }
 0x736   :  { %26314 = vmatmul.mubr.msk.f32.gmra.mrb[44].mxu0 %vm75_vm1, %v33146_v31 }
 0x737   :  { %26316 = vmatprep.mubr.msk.f32.mxu0 %vm75_vm1, %v33150_v53 }
 0x73a   :  { %26317 = vmatmul.mubr.msk.f32.gmra.mrb[46].mxu0 %vm75_vm1, %v33306_v32 }
 0x73b   :  { %26327 = vmatprep.mubr.msk.f32.mxu0 %vm75_vm1, %v33021_v25  ;;  %v33336_v25 = vld [vmem:[#allocation2 + $0x90] sm:$0xff] }
 0x73e   :  { %26328 = vmatmul.mubr.msk.f32.vlgmr.msra.gmra.mrb[32].mxu0 %vm75_vm1, %v33026_v39  ;;  %v33354_v39 = vld [vmem:[#allocation2 + $0x130] sm:$0xff] }
 0x73f   :  { %26330 = vmatprep.mubr.msk.f32.mxu0 %vm75_vm1, %v33030_v41  ;;  %28370 = vmatpush3.bf16.msra.mxu0 %v28367_v24  ;;  %v22228_v41 = vld [vmem:[%s37019_s25 + $0x110] sm:$0xff] }
 0x740   :  { %28372 = vmatprep.subr.bf16.mxu0 %v28371_v63 }
 0x742   :  { %26331 = vmatmul.mubr.msk.f32.gmra.mrb[34].mxu0 %vm75_vm1, %v33034_v29  ;;  %v22229_v29 = vld [vmem:[%s37019_s25 + $0x118] sm:$0xff] }
 0x743   :  { %26333 = vmatprep.mubr.msk.f32.mxu0 %vm75_vm1, %v33038_v6  ;;  %28374 = vmatpush3.bf16.msra.mxu0 %v28371_v63 }
 0x744   :  { %28376 = vmatprep.subr.bf16.mxu0 %v28375_v1 }
 0x746   :  { %26334 = vmatmul.mubr.msk.f32.gmra.mrb[36].mxu0 %vm75_vm1, %v33044_v23 }
 0x747   :  { %26336 = vmatprep.mubr.msk.f32.mxu0 %vm75_vm1, %v33180_v19 }
 0x74a   :  { %26337 = vmatmul.mubr.msk.f32.gmra.mrb[38].mxu0 %vm75_vm1, %v33336_v25 }
 0x74b   :  { %26339 = vmatprep.mubr.msk.f32.mxu0 %vm75_vm1, %v33054_v48  ;;  %v10145_v48 = vld [vmem:[%s36881_s9 + $0x10] sm:$0xff] }
 0x74e   :  { %26340 = vmatmul.mubr.msk.f32.gmra.mrb[40].mxu0 %vm75_vm1, %v33058_v18  ;;  %v10146_v18 = vld [vmem:[%s36881_s9 + $0x18] sm:$0xff] }
 0x74f   :  { %26342 = vmatprep.mubr.msk.f32.mxu0 %vm75_vm1, %v33062_v55 }
 0x752   :  { %26343 = vmatmul.mubr.msk.f32.gmra.mrb[42].mxu0 %vm75_vm1, %v33066_v30 }
 0x753   :  { %26345 = vmatprep.mubr.msk.f32.mxu0 %vm75_vm1, %v33070_v57 }
 0x756   :  { %26346 = vmatmul.mubr.msk.f32.gmra.mrb[44].mxu0 %vm75_vm1, %v33076_v34  ;;  %v28379_v34 = vpack.c.bf16 %v22229_v29, %v22228_v41 }
 0x757   :  { %26348 = vmatprep.mubr.msk.f32.mxu0 %vm75_vm1, %v33198_v22 }
 0x75a   :  { %26349 = vmatmul.mubr.msk.f32.gmra.mrb[46].mxu0 %vm75_vm1, %v33354_v39 }
 0x75b   :  { %26359 = vmatprep.mubr.msk.f32.mxu0 %vm75_vm1, %v32862_v40  ;;  %v33378_v40 = vld [vmem:[#allocation2 + $0x91] sm:$0xff] }
 0x75e   :  { %26360 = vmatmul.mubr.msk.f32.vlgmr.msra.gmra.mrb[32].mxu0 %vm75_vm1, %v32879_v3  ;;  %v33396_v3 = vld [vmem:[#allocation2 + $0x131] sm:$0xff] }
 0x75f   :  { %26362 = vmatprep.mubr.msk.f32.mxu0 %vm75_vm1, %v32890_v50  ;;  %28378 = vmatpush3.bf16.msra.mxu0 %v28375_v1  ;;  %v33414_v50 = vld [vmem:[#allocation2 + $0x92] sm:$0xff] }
 0x760   :  { %28380 = vmatprep.subr.bf16.mxu0 %v28379_v34 }
 0x762   :  { %26363 = vmatmul.mubr.msk.f32.gmra.mrb[34].mxu0 %vm75_vm1, %v32906_v13 }
 0x763   :  { %26365 = vmatprep.mubr.msk.f32.mxu0 %vm75_vm1, %v32917_v5  ;;  %28382 = vmatpush3.bf16.msra.mxu0 %v28379_v34 }
 0x766   :  { %26366 = vmatmul.mubr.msk.f32.gmra.mrb[36].mxu0 %vm75_vm1, %v32934_v16 }
 0x767   :  { %26368 = vmatprep.mubr.msk.f32.mxu0 %vm75_vm1, %v33228_v12  ;;  %v22283_v12 = vld [vmem:[%s36881_s9 + $0x40] sm:$0xff] }
 0x76a   :  { %26369 = vmatmul.mubr.msk.f32.gmra.mrb[38].mxu0 %vm75_vm1, %v33378_v40 }
 0x76b   :  { %26371 = vmatprep.mubr.msk.f32.mxu0 %vm75_vm1, %v32969_v11 }
 0x76e   :  { %26372 = vmatmul.mubr.msk.f32.gmra.mrb[40].mxu0 %vm75_vm1, %v32978_v15 }
 0x76f   :  { %26374 = vmatprep.mubr.msk.f32.mxu0 %vm75_vm1, %v32985_v54 }
 0x772   :  { %26375 = vmatmul.mubr.msk.f32.gmra.mrb[42].mxu0 %vm75_vm1, %v32989_v8 }
 0x773   :  { %26377 = vmatprep.mubr.msk.f32.mxu0 %vm75_vm1, %v32993_v59 }
 0x776   :  { %26378 = vmatmul.mubr.msk.f32.gmra.mrb[44].mxu0 %vm75_vm1, %v32999_v42 }
 0x777   :  { %26380 = vmatprep.mubr.msk.f32.mxu0 %vm75_vm1, %v33246_v26  ;;  %v22284_v26 = vld [vmem:[%s36881_s9 + $0x48] sm:$0xff] }
 0x778   :  { %v33481_v24 = vpack.c.bf16 %v22284_v26, %v22283_v12  ;;  %v22304_v12 = vld [vmem:[%s36881_s9 + $0x68] sm:$0xff] }
 0x77a   :  { %26381 = vmatmul.mubr.msk.f32.gmra.mrb[46].mxu0 %vm75_vm1, %v33396_v3 }
 0x77b   :  { %26391 = vmatprep.mubr.msk.f32.mxu0 %vm75_vm1, %v33098_v4 }
 0x77e   :  { %26392 = vmatmul.mubr.msk.f32.vlgmr.msra.gmra.mrb[32].mxu0 %vm75_vm1, %v33102_v38 }
 0x77f   :  { %26394 = vmatprep.mubr.msk.f32.mxu0 %vm75_vm1, %v33106_v43 }
 0x782   :  { %26395 = vmatmul.mubr.msk.f32.gmra.mrb[34].mxu0 %vm75_vm1, %v33110_v27  ;;  %v33432_v27 = vld [vmem:[#allocation2 + $0x132] sm:$0xff] }
 0x783   :  { %26397 = vmatprep.mubr.msk.f32.mxu0 %vm75_vm1, %v33114_v45  ;;  %v28395_v45 = vpack.c.bf16 %v10146_v18, %v10145_v48 }
 0x786   :  { %26398 = vmatmul.mubr.msk.f32.gmra.mrb[36].mxu0 %vm75_vm1, %v33120_v9 }
 0x787   :  { %26400 = vmatprep.mubr.msk.f32.mxu0 %vm75_vm1, %v33288_v28 }
 0x78a   :  { %26401 = vmatmul.mubr.msk.f32.gmra.mrb[38].mxu0 %vm75_vm1, %v33414_v50 }
 0x78b   :  { %26403 = vmatprep.mubr.msk.f32.mxu0 %vm75_vm1, %v33130_v51 }
 0x78e   :  { %26404 = vmatmul.mubr.msk.f32.gmra.mrb[40].mxu0 %vm75_vm1, %v33134_v7 }
 0x78f   :  { %26406 = vmatprep.mubr.msk.f32.mxu0 %vm75_vm1, %v33138_v20  ;;  %v10143_v20 = vld [vmem:[%s36881_s9] sm:$0xff] }
 0x792   :  { %26407 = vmatmul.mubr.msk.f32.gmra.mrb[42].mxu0 %vm75_vm1, %v33142_v14  ;;  %v10144_v14 = vld [vmem:[%s36881_s9 + $0x8] sm:$0xff] }
 0x793   :  { %26409 = vmatprep.mubr.msk.f32.mxu0 %vm75_vm1, %v33146_v31  ;;  %v28391_v31 = vpack.c.bf16 %v10144_v14, %v10143_v20 }
 0x795   :  { %28392 = vmatprep.subr.bf16.mxu1 %v28391_v31 }
 0x796   :  { %26410 = vmatmul.mubr.msk.f32.gmra.mrb[44].mxu0 %vm75_vm1, %v33150_v53  ;;  %v33445_v53 = vld [vmem:[%s36880_s8] ss:$0 sm:$0xff] }
 0x797   :  { %26412 = vmatprep.mubr.msk.f32.mxu0 %vm75_vm1, %v33306_v32 }
 0x79a   :  { %26413 = vmatmul.mubr.msk.f32.gmra.mrb[46].mxu0 %vm75_vm1, %v33432_v27 }
 0x851   :  { %v26393_v7 = vpop.f32.mrb[32].mxu0 }
 0x852   :  { %v10080_v51 = vadd.f32 %v26393_v7, %v33445_v53  ;;  %v9977_v43 = vpop.f32.mrb[33].mxu0 }
 0x853   :  { %v10079_v4 = vadd.f32 %v33445_v53, %v9977_v43 }
 0x854   :  { %v10096_v13 = vmax.f32 %v10080_v51, 0.0 }
 0x855   :  { %v10095_v5 = vmax.f32 %v10079_v4, 0.0  ;;  %v26396_v16 = vpop.f32.mrb[34].mxu0 }
 0x856   :  { %10112 = vst.msk [vmem:[#allocation2 + $0x21] sm:$0xff] %vm75_vm1, %v10096_v13  ;;  %v10082_v11 = vadd.f32 %v26396_v16, %v33445_v53  ;;  %v9987_v15 = vpop.f32.mrb[35].mxu0 }
 0x857   :  { %10111 = vst.msk [vmem:[#allocation2 + $0x11] sm:$0xff] %vm75_vm1, %v10095_v5  ;;  %v10081_v54 = vadd.f32 %v33445_v53, %v9987_v15 }
 0x858   :  { %v10098_v8 = vmax.f32 %v10082_v11, 0.0 }
 0x859   :  { %v10097_v59 = vmax.f32 %v10081_v54, 0.0  ;;  %v26399_v42 = vpop.f32.mrb[36].mxu0 }
 0x85a   :  { %10114 = vst.msk [vmem:[#allocation2 + $0x41] sm:$0xff] %vm75_vm1, %v10098_v8  ;;  %v10084_v6 = vadd.f32 %v26399_v42, %v33445_v53  ;;  %v9997_v23 = vpop.f32.mrb[37].mxu0 }
 0x85b   :  { %10113 = vst.msk [vmem:[#allocation2 + $0x31] sm:$0xff] %vm75_vm1, %v10097_v59  ;;  %v10083_v55 = vadd.f32 %v33445_v53, %v9997_v23 }
 0x85c   :  { %v10100_v30 = vmax.f32 %v10084_v6, 0.0 }
 0x85d   :  { %v10099_v57 = vmax.f32 %v10083_v55, 0.0  ;;  %v26402_v38 = vpop.f32.mrb[38].mxu0  ;;  %v33477_v61 = vld [vmem:[#allocation2 + $0x21] sm:$0xff] }
 0x85e   :  { %10116 = vst.msk [vmem:[#allocation2 + $0x61] sm:$0xff] %vm75_vm1, %v10100_v30  ;;  %v10086_v9 = vadd.f32 %v26402_v38, %v33445_v53  ;;  %v10007_v19 = vpop.f32.mrb[39].mxu0  ;;  %v33465_v22 = vld [vmem:[#allocation2 + $0x11] sm:$0xff]  ;;  %v33570_v26 = vld [vmem:[#allocation2 + $0x20] sm:$0xff] }
 0x85f   :  { %10115 = vst.msk [vmem:[#allocation2 + $0x51] sm:$0xff] %vm75_vm1, %v10099_v57  ;;  %v10085_v36 = vadd.f32 %v33445_v53, %v10007_v19  ;;  %26424 = vmatmul.mubr.msk.f32.vlgmr.msra.gmra.mrb[32].mxu1 %vm75_vm1, %v33465_v22  ;;  %v22285_v57 = vld [vmem:[%s36881_s9 + $0x50] sm:$0xff]  ;;  %v22286_v38 = vld [vmem:[%s36881_s9 + $0x58] sm:$0xff]  ;;  %v22303_v19 = vld [vmem:[%s36881_s9 + $0x60] sm:$0xff] }
 0x860   :  { %v10102_v35 = vmax.f32 %v10086_v9, 0.0  ;;  %26426 = vmatprep.mubr.msk.f32.mxu1 %vm75_vm1, %v33477_v61  ;;  %28394 = vmatpush3.bf16.msra.mxu1 %v28391_v31  ;;  %v33560_v9 = vld [vmem:[#allocation2 + $0x10] sm:$0xff] }
 0x861   :  { %v10101_v44 = vmax.f32 %v10085_v36, 0.0  ;;  %v26405_v0 = vpop.f32.mrb[40].mxu0  ;;  %28396 = vmatprep.subr.bf16.mxu1 %v28395_v45  ;;  %v33491_v63 = vld [vmem:[#allocation2 + $0x41] sm:$0xff] }
 0x862   :  { %10118 = vst.msk [vmem:[#allocation2 + $0x81] sm:$0xff] %vm75_vm1, %v10102_v35  ;;  %v10088_v28 = vadd.f32 %v26405_v0, %v33445_v53  ;;  %v10017_v32 = vpop.f32.mrb[41].mxu0  ;;  %v33485_v47 = vld [vmem:[#allocation2 + $0x31] sm:$0xff]  ;;  %v33579_v35 = vld [vmem:[#allocation2 + $0x40] sm:$0xff] }
 0x863   :  { %10117 = vst.msk [vmem:[#allocation2 + $0x71] sm:$0xff] %vm75_vm1, %v10101_v44  ;;  %v10087_v33 = vadd.f32 %v33445_v53, %v10017_v32  ;;  %26427 = vmatmul.mubr.msk.f32.gmra.mrb[34].mxu1 %vm75_vm1, %v33485_v47  ;;  %v33575_v36 = vld [vmem:[#allocation2 + $0x30] sm:$0xff] }
 0x864   :  { %v10104_v10 = vmax.f32 %v10088_v28, 0.0  ;;  %26429 = vmatprep.mubr.msk.f32.mxu1 %vm75_vm1, %v33491_v63  ;;  %28398 = vmatpush3.bf16.msra.mxu1 %v28395_v45  ;;  %v28403_v45 = vpack.c.bf16 %v22286_v38, %v22285_v57  ;;  %v22325_v38 = vld [vmem:[%s36881_s9 + $0x90] sm:$0xff] }
 0x865   :  { %v10103_v58 = vmax.f32 %v10087_v33, 0.0  ;;  %v26408_v1 = vpop.f32.mrb[42].mxu0  ;;  %28400 = vmatprep.subr.bf16.mxu1 %v33481_v24  ;;  %v33504_v14 = vld [vmem:[#allocation2 + $0x61] sm:$0xff] }
 0x866   :  { %10120 = vst.msk [vmem:[#allocation2 + $0xc1] sm:$0xff] %vm75_vm1, %v10104_v10  ;;  %v10090_v41 = vadd.f32 %v26408_v1, %v33445_v53  ;;  %v10027_v29 = vpop.f32.mrb[43].mxu0  ;;  %v33498_v34 = vld [vmem:[#allocation2 + $0x51] sm:$0xff]  ;;  %v33587_v0 = vld [vmem:[#allocation2 + $0x60] sm:$0xff] }
 0x867   :  { %10119 = vst.msk [vmem:[#allocation2 + $0xb1] sm:$0xff] %vm75_vm1, %v10103_v58  ;;  %v10089_v20 = vadd.f32 %v33445_v53, %v10027_v29  ;;  %26430 = vmatmul.mubr.msk.f32.gmra.mrb[36].mxu1 %vm75_vm1, %v33498_v34  ;;  %v33583_v44 = vld [vmem:[#allocation2 + $0x50] sm:$0xff]  ;;  %v22306_v29 = vld [vmem:[%s36881_s9 + $0x78] sm:$0xff] }
 0x868   :  { %v10106_v31 = vmax.f32 %v10090_v41, 0.0  ;;  %26432 = vmatprep.mubr.msk.f32.mxu1 %vm75_vm1, %v33504_v14  ;;  %v22305_v41 = vld [vmem:[%s36881_s9 + $0x70] sm:$0xff] }
 0x869   :  { %v10105_v7 = vmax.f32 %v10089_v20, 0.0  ;;  %v26411_v51 = vpop.f32.mrb[44].mxu0  ;;  %v28411_v20 = vpack.c.bf16 %v22306_v29, %v22305_v41 }
 0x86a   :  { %10122 = vst.msk [vmem:[#allocation2 + $0xe1] sm:$0xff] %vm75_vm1, %v10106_v31  ;;  %v10092_v43 = vadd.f32 %v26411_v51, %v33445_v53  ;;  %v10037_v4 = vpop.f32.mrb[45].mxu0  ;;  %v33510_v13 = vld [vmem:[#allocation2 + $0x71] sm:$0xff]  ;;  %v22324_v51 = vld [vmem:[%s36881_s9 + $0x88] sm:$0xff] }
 0x86b   :  { %10121 = vst.msk [vmem:[#allocation2 + $0xd1] sm:$0xff] %vm75_vm1, %v10105_v7  ;;  %v10091_v5 = vadd.f32 %v33445_v53, %v10037_v4  ;;  %26433 = vmatmul.mubr.msk.f32.gmra.mrb[38].mxu1 %vm75_vm1, %v33510_v13  ;;  %v33633_v31 = vld [vmem:[#allocation2 + $0x12] sm:$0xff]  ;;  %v22323_v7 = vld [vmem:[%s36881_s9 + $0x80] sm:$0xff] }
 0x86c   :  { %v10108_v16 = vmax.f32 %v10092_v43, 0.0  ;;  %26435 = vmatprep.mubr.msk.f32.mxu1 %vm75_vm1, %v32925_v52  ;;  %v33643_v43 = vld [vmem:[#allocation2 + $0x22] sm:$0xff]  ;;  %v33647_v4 = vld [vmem:[#allocation2 + $0x32] sm:$0xff] }
 0x86d   :  { %v10107_v11 = vmax.f32 %v10091_v5, 0.0  ;;  %v26414_v15 = vpop.f32.mrb[46].mxu0  ;;  %v33526_v6 = vld [vmem:[#allocation2 + $0xc1] sm:$0xff] }
 0x86e   :  { %10124 = vst.msk [vmem:[#allocation2 + $0x101] sm:$0xff] %vm75_vm1, %v10108_v16  ;;  %v10094_v54 = vadd.f32 %v26414_v15, %v33445_v53  ;;  %v10047_v8 = vpop.f32.mrb[47].mxu0  ;;  %v33520_v59 = vld [vmem:[#allocation2 + $0xb1] sm:$0xff]  ;;  %v33601_v32 = vld [vmem:[#allocation2 + $0xc0] sm:$0xff] }
 0x86f   :  { %10123 = vst.msk [vmem:[#allocation2 + $0xf1] sm:$0xff] %vm75_vm1, %v10107_v11  ;;  %v10093_v42 = vadd.f32 %v33445_v53, %v10047_v8  ;;  %26436 = vmatmul.mubr.msk.f32.gmra.mrb[40].mxu1 %vm75_vm1, %v33520_v59  ;;  %v33597_v28 = vld [vmem:[#allocation2 + $0xb0] sm:$0xff]  ;;  %v33651_v5 = vld [vmem:[#allocation2 + $0x42] sm:$0xff] }
 0x870   :  { %v10110_v23 = vmax.f32 %v10094_v54, 0.0  ;;  %26438 = vmatprep.mubr.msk.f32.mxu1 %vm75_vm1, %v33526_v6  ;;  %v33655_v16 = vld [vmem:[#allocation2 + $0x52] sm:$0xff]  ;;  %v33659_v11 = vld [vmem:[#allocation2 + $0x62] sm:$0xff] }
 0x871   :  { %v10109_v52 = vmax.f32 %v10093_v42, 0.0  ;;  %v33536_v53 = vld [vmem:[#allocation2 + $0xe1] sm:$0xff]  ;;  %v33663_v15 = vld [vmem:[#allocation2 + $0x72] sm:$0xff] }
 0x872   :  { %10126 = vst.msk [vmem:[#allocation2 + $0x121] sm:$0xff] %vm75_vm1, %v10110_v23  ;;  %v33531_v48 = vld [vmem:[#allocation2 + $0xd1] sm:$0xff]  ;;  %v33609_v10 = vld [vmem:[#allocation2 + $0xe0] sm:$0xff] }
 0x873   :  { %10125 = vst.msk [vmem:[#allocation2 + $0x111] sm:$0xff] %vm75_vm1, %v10109_v52  ;;  %26439 = vmatmul.mubr.msk.f32.gmra.mrb[42].mxu1 %vm75_vm1, %v33531_v48  ;;  %v33605_v33 = vld [vmem:[#allocation2 + $0xd0] sm:$0xff]  ;;  %v33673_v8 = vld [vmem:[#allocation2 + $0xc2] sm:$0xff] }
 0x874   :  { %26441 = vmatprep.mubr.msk.f32.mxu1 %vm75_vm1, %v33536_v53  ;;  %v33669_v54 = vld [vmem:[#allocation2 + $0xb2] sm:$0xff]  ;;  %v33681_v23 = vld [vmem:[#allocation2 + $0xe2] sm:$0xff] }
 0x875   :  { %v33544_v55 = vld [vmem:[#allocation2 + $0x101] sm:$0xff]  ;;  %v33677_v42 = vld [vmem:[#allocation2 + $0xd2] sm:$0xff] }
 0x876   :  { %v33540_v18 = vld [vmem:[#allocation2 + $0xf1] sm:$0xff]  ;;  %v33617_v58 = vld [vmem:[#allocation2 + $0x100] sm:$0xff] }
 0x877   :  { %26442 = vmatmul.mubr.msk.f32.gmra.mrb[44].mxu1 %vm75_vm1, %v33540_v18  ;;  %v33689_v52 = vld [vmem:[#allocation2 + $0x102] sm:$0xff] }
 0x878   :  { %26444 = vmatprep.mubr.msk.f32.mxu1 %vm75_vm1, %v33544_v55 }
 0x879   :  { %v33741_v29 = vld [vmem:[#allocation2 + $0x120] sm:$0xff] }
 0x87a   :  { %v33548_v30 = vld [vmem:[#allocation2 + $0x111] sm:$0xff] }
 0x87b   :  { %26445 = vmatmul.mubr.msk.f32.gmra.mrb[46].mxu1 %vm75_vm1, %v33548_v30  ;;  %v33621_v1 = vld [vmem:[#allocation2 + $0x110] sm:$0xff] }
 0x87c   :  { %26455 = vmatprep.mubr.msk.f32.mxu1 %vm75_vm1, %v32997_v49  ;;  %v28407_v49 = vpack.c.bf16 %v22304_v12, %v22303_v19  ;;  %v33693_v57 = vld [vmem:[#allocation2 + $0x112] sm:$0xff]  ;;  %v22343_v12 = vld [vmem:[%s36881_s9 + $0xa0] sm:$0xff] }
 0x87f   :  { %26456 = vmatmul.mubr.msk.f32.vlgmr.msra.gmra.mrb[32].mxu1 %vm75_vm1, %v33560_v9 }
 0x880   :  { %26458 = vmatprep.mubr.msk.f32.mxu1 %vm75_vm1, %v33570_v26  ;;  %28402 = vmatpush3.bf16.msra.mxu1 %v33481_v24  ;;  %v33591_v24 = vld [vmem:[#allocation2 + $0x70] sm:$0xff] }
 0x881   :  { %28404 = vmatprep.subr.bf16.mxu1 %v28403_v45 }
 0x883   :  { %26459 = vmatmul.mubr.msk.f32.gmra.mrb[34].mxu1 %vm75_vm1, %v33575_v36 }
 0x884   :  { %26461 = vmatprep.mubr.msk.f32.mxu1 %vm75_vm1, %v33579_v35  ;;  %28406 = vmatpush3.bf16.msra.mxu1 %v28403_v45  ;;  %v22326_v45 = vld [vmem:[%s36881_s9 + $0x98] sm:$0xff] }
 0x885   :  { %28408 = vmatprep.subr.bf16.mxu1 %v28407_v49  ;;  %v28419_v19 = vpack.c.bf16 %v22326_v45, %v22325_v38  ;;  %v33789_v45 = vld [vmem:[#allocation2 + $0x121] sm:$0xff] }
 0x887   :  { %26462 = vmatmul.mubr.msk.f32.gmra.mrb[36].mxu1 %vm75_vm1, %v33583_v44 }
 0x888   :  { %26464 = vmatprep.mubr.msk.f32.mxu1 %vm75_vm1, %v33587_v0 }
 0x88b   :  { %26465 = vmatmul.mubr.msk.f32.gmra.mrb[38].mxu1 %vm75_vm1, %v33591_v24 }
 0x88c   :  { %26467 = vmatprep.mubr.msk.f32.mxu1 %vm75_vm1, %v33042_v56  ;;  %v33613_v56 = vld [vmem:[#allocation2 + $0xf0] sm:$0xff] }
 0x88f   :  { %26468 = vmatmul.mubr.msk.f32.gmra.mrb[40].mxu1 %vm75_vm1, %v33597_v28 }
 0x890   :  { %26470 = vmatprep.mubr.msk.f32.mxu1 %vm75_vm1, %v33601_v32 }
 0x893   :  { %26471 = vmatmul.mubr.msk.f32.gmra.mrb[42].mxu1 %vm75_vm1, %v33605_v33 }
 0x894   :  { %26473 = vmatprep.mubr.msk.f32.mxu1 %vm75_vm1, %v33609_v10 }
 0x897   :  { %26474 = vmatmul.mubr.msk.f32.gmra.mrb[44].mxu1 %vm75_vm1, %v33613_v56 }
 0x898   :  { %26476 = vmatprep.mubr.msk.f32.mxu1 %vm75_vm1, %v33617_v58 }
 0x89b   :  { %26477 = vmatmul.mubr.msk.f32.gmra.mrb[46].mxu1 %vm75_vm1, %v33621_v1 }
 0x89c   :  { %26487 = vmatprep.mubr.msk.f32.mxu1 %vm75_vm1, %v33074_v17  ;;  %v28415_v17 = vpack.c.bf16 %v22324_v51, %v22323_v7  ;;  %v22363_v51 = vld [vmem:[%s36881_s9 + $0xc0] sm:$0xff] }
 0x89f   :  { %26488 = vmatmul.mubr.msk.f32.vlgmr.msra.gmra.mrb[32].mxu1 %vm75_vm1, %v33633_v31 }
 0x8a0   :  { %26490 = vmatprep.mubr.msk.f32.mxu1 %vm75_vm1, %v33643_v43  ;;  %28410 = vmatpush3.bf16.msra.mxu1 %v28407_v49  ;;  %v22344_v49 = vld [vmem:[%s36881_s9 + $0xa8] sm:$0xff] }
 0x8a1   :  { %28412 = vmatprep.subr.bf16.mxu1 %v28411_v20  ;;  %v28423_v41 = vpack.c.bf16 %v22344_v49, %v22343_v12  ;;  %v22424_v12 = vld [vmem:[%s36883_s11 + $0x20] sm:$0xff]  ;;  %v22425_v49 = vld [vmem:[%s36883_s11 + $0x28] sm:$0xff] }
 0x8a3   :  { %26491 = vmatmul.mubr.msk.f32.gmra.mrb[34].mxu1 %vm75_vm1, %v33647_v4 }
 0x8a4   :  { %26493 = vmatprep.mubr.msk.f32.mxu1 %vm75_vm1, %v33651_v5  ;;  %28414 = vmatpush3.bf16.msra.mxu1 %v28411_v20  ;;  %v22346_v20 = vld [vmem:[%s36881_s9 + $0xb8] sm:$0xff] }
 0x8a5   :  { %28416 = vmatprep.subr.bf16.mxu1 %v28415_v17 }
 0x8a7   :  { %26494 = vmatmul.mubr.msk.f32.gmra.mrb[36].mxu1 %vm75_vm1, %v33655_v16 }
 0x8a8   :  { %26496 = vmatprep.mubr.msk.f32.mxu1 %vm75_vm1, %v33659_v11 }
 0x8ab   :  { %26497 = vmatmul.mubr.msk.f32.gmra.mrb[38].mxu1 %vm75_vm1, %v33663_v15 }
 0x8ac   :  { %26499 = vmatprep.mubr.msk.f32.mxu1 %vm75_vm1, %v33118_v2  ;;  %v33685_v2 = vld [vmem:[#allocation2 + $0xf2] sm:$0xff] }
 0x8af   :  { %26500 = vmatmul.mubr.msk.f32.gmra.mrb[40].mxu1 %vm75_vm1, %v33669_v54 }
 0x8b0   :  { %26502 = vmatprep.mubr.msk.f32.mxu1 %vm75_vm1, %v33673_v8 }
 0x8b3   :  { %26503 = vmatmul.mubr.msk.f32.gmra.mrb[42].mxu1 %vm75_vm1, %v33677_v42 }
 0x8b4   :  { %26505 = vmatprep.mubr.msk.f32.mxu1 %vm75_vm1, %v33681_v23 }
 0x8b7   :  { %26506 = vmatmul.mubr.msk.f32.gmra.mrb[44].mxu1 %vm75_vm1, %v33685_v2 }
 0x8b8   :  { %26508 = vmatprep.mubr.msk.f32.mxu1 %vm75_vm1, %v33689_v52 }
 0x8bb   :  { %26509 = vmatmul.mubr.msk.f32.gmra.mrb[46].mxu1 %vm75_vm1, %v33693_v57 }
 0x8bc   :  { %26519 = vmatprep.mubr.msk.f32.mxu1 %vm75_vm1, %v33560_v9  ;;  %v33723_v9 = vld [vmem:[#allocation2 + $0x80] sm:$0xff] }
 0x8bf   :  { %26520 = vmatmul.mubr.msk.f32.vlgmr.msra.gmra.mrb[32].mxu1 %vm75_vm1, %v33570_v26 }
 0x8c0   :  { %26522 = vmatprep.mubr.msk.f32.mxu1 %vm75_vm1, %v33575_v36  ;;  %28418 = vmatpush3.bf16.msra.mxu1 %v28415_v17  ;;  %v22364_v17 = vld [vmem:[%s36881_s9 + $0xc8] sm:$0xff] }
 0x8c1   :  { %28420 = vmatprep.subr.bf16.mxu1 %v28419_v19  ;;  %v28431_v38 = vpack.c.bf16 %v22364_v17, %v22363_v51  ;;  %v33825_v51 = vld [vmem:[#allocation2 + $0x82] sm:$0xff] }
 0x8c2   :  { %v33843_v17 = vld [vmem:[#allocation2 + $0x122] sm:$0xff] }
 0x8c3   :  { %26523 = vmatmul.mubr.msk.f32.gmra.mrb[34].mxu1 %vm75_vm1, %v33579_v35 }
 0x8c4   :  { %26525 = vmatprep.mubr.msk.f32.mxu1 %vm75_vm1, %v33583_v44  ;;  %28422 = vmatpush3.bf16.msra.mxu1 %v28419_v19  ;;  %v22366_v19 = vld [vmem:[%s36881_s9 + $0xd8] sm:$0xff] }
 0x8c5   :  { %28424 = vmatprep.subr.bf16.mxu1 %v28423_v41 }
 0x8c7   :  { %26526 = vmatmul.mubr.msk.f32.gmra.mrb[36].mxu1 %vm75_vm1, %v33587_v0 }
 0x8c8   :  { %26528 = vmatprep.mubr.msk.f32.mxu1 %vm75_vm1, %v33591_v24 }
 0x8cb   :  { %26529 = vmatmul.mubr.msk.f32.gmra.mrb[38].mxu1 %vm75_vm1, %v33723_v9 }
 0x8cc   :  { %26531 = vmatprep.mubr.msk.f32.mxu1 %vm75_vm1, %v33597_v28  ;;  %v22345_v28 = vld [vmem:[%s36881_s9 + $0xb0] sm:$0xff] }
 0x8cd   :  { %v28427_v7 = vpack.c.bf16 %v22346_v20, %v22345_v28  ;;  %v22383_v20 = vld [vmem:[%s36881_s9 + $0xe0] sm:$0xff] }
 0x8cf   :  { %26532 = vmatmul.mubr.msk.f32.gmra.mrb[40].mxu1 %vm75_vm1, %v33601_v32 }
 0x8d0   :  { %26534 = vmatprep.mubr.msk.f32.mxu1 %vm75_vm1, %v33605_v33 }
 0x8d3   :  { %26535 = vmatmul.mubr.msk.f32.gmra.mrb[42].mxu1 %vm75_vm1, %v33609_v10 }
 0x8d4   :  { %26537 = vmatprep.mubr.msk.f32.mxu1 %vm75_vm1, %v33613_v56 }
 0x8d7   :  { %26538 = vmatmul.mubr.msk.f32.gmra.mrb[44].mxu1 %vm75_vm1, %v33617_v58 }
 0x8d8   :  { %26540 = vmatprep.mubr.msk.f32.mxu1 %vm75_vm1, %v33621_v1 }
 0x8db   :  { %26541 = vmatmul.mubr.msk.f32.gmra.mrb[46].mxu1 %vm75_vm1, %v33741_v29 }
 0x8dc   :  { %26551 = vmatprep.mubr.msk.f32.mxu1 %vm75_vm1, %v33465_v22  ;;  %v33771_v22 = vld [vmem:[#allocation2 + $0x81] sm:$0xff] }
 0x8df   :  { %26552 = vmatmul.mubr.msk.f32.vlgmr.msra.gmra.mrb[32].mxu1 %vm75_vm1, %v33477_v61 }
 0x8e0   :  { %26554 = vmatprep.mubr.msk.f32.mxu1 %vm75_vm1, %v33485_v47  ;;  %28426 = vmatpush3.bf16.msra.mxu1 %v28423_v41  ;;  %v28455_v41 = vpack.c.bf16 %v22425_v49, %v22424_v12  ;;  %v22404_v12 = vld [vmem:[%s36881_s9 + $0x108] sm:$0xff] }
 0x8e1   :  { %28428 = vmatprep.subr.bf16.mxu1 %v28427_v7 }
 0x8e2   :  { %28456 = vmatprep.subr.bf16.mxu0 %v28455_v41 }
 0x8e3   :  { %26555 = vmatmul.mubr.msk.f32.gmra.mrb[34].mxu1 %vm75_vm1, %v33491_v63  ;;  %28458 = vmatpush3.bf16.msra.mxu0 %v28455_v41 }
 0x8e4   :  { %26557 = vmatprep.mubr.msk.f32.mxu1 %vm75_vm1, %v33498_v34  ;;  %28430 = vmatpush3.bf16.msra.mxu1 %v28427_v7  ;;  %v22384_v7 = vld [vmem:[%s36881_s9 + $0xe8] sm:$0xff] }
 0x8e5   :  { %28432 = vmatprep.subr.bf16.mxu1 %v28431_v38 }
 0x8e7   :  { %26558 = vmatmul.mubr.msk.f32.gmra.mrb[36].mxu1 %vm75_vm1, %v33504_v14 }
 0x8e8   :  { %26560 = vmatprep.mubr.msk.f32.mxu1 %vm75_vm1, %v33510_v13 }
 0x8eb   :  { %26561 = vmatmul.mubr.msk.f32.gmra.mrb[38].mxu1 %vm75_vm1, %v33771_v22 }
 0x8ec   :  { %26563 = vmatprep.mubr.msk.f32.mxu1 %vm75_vm1, %v33520_v59  ;;  %v22365_v59 = vld [vmem:[%s36881_s9 + $0xd0] sm:$0xff] }
 0x8ed   :  { %v28435_v28 = vpack.c.bf16 %v22366_v19, %v22365_v59  ;;  %v22403_v19 = vld [vmem:[%s36881_s9 + $0x100] sm:$0xff] }
 0x8ee   :  { %v28447_v49 = vpack.c.bf16 %v22404_v12, %v22403_v19 }
 0x8ef   :  { %26564 = vmatmul.mubr.msk.f32.gmra.mrb[40].mxu1 %vm75_vm1, %v33526_v6 }
 0x8f0   :  { %26566 = vmatprep.mubr.msk.f32.mxu1 %vm75_vm1, %v33531_v48 }
 0x8f3   :  { %26567 = vmatmul.mubr.msk.f32.gmra.mrb[42].mxu1 %vm75_vm1, %v33536_v53 }
 0x8f4   :  { %26569 = vmatprep.mubr.msk.f32.mxu1 %vm75_vm1, %v33540_v18 }
 0x8f7   :  { %26570 = vmatmul.mubr.msk.f32.gmra.mrb[44].mxu1 %vm75_vm1, %v33544_v55 }
 0x8f8   :  { %26572 = vmatprep.mubr.msk.f32.mxu1 %vm75_vm1, %v33548_v30 }
 0x8fb   :  { %26573 = vmatmul.mubr.msk.f32.gmra.mrb[46].mxu1 %vm75_vm1, %v33789_v45 }
 0x8fc   :  { %26583 = vmatprep.mubr.msk.f32.mxu1 %vm75_vm1, %v33633_v31  ;;  %v28439_v31 = vpack.c.bf16 %v22384_v7, %v22383_v20  ;;  %v22460_v20 = vld [vmem:[%s36883_s11 + $0x40] sm:$0xff]  ;;  %v22461_v7 = vld [vmem:[%s36883_s11 + $0x48] sm:$0xff] }
 0x8ff   :  { %26584 = vmatmul.mubr.msk.f32.vlgmr.msra.gmra.mrb[32].mxu1 %vm75_vm1, %v33643_v43 }
 0x900   :  { %26586 = vmatprep.mubr.msk.f32.mxu1 %vm75_vm1, %v33647_v4  ;;  %28434 = vmatpush3.bf16.msra.mxu1 %v28431_v38  ;;  %v22386_v38 = vld [vmem:[%s36881_s9 + $0xf8] sm:$0xff] }
 0x901   :  { %28436 = vmatprep.subr.bf16.mxu1 %v28435_v28 }
 0x903   :  { %26587 = vmatmul.mubr.msk.f32.gmra.mrb[34].mxu1 %vm75_vm1, %v33651_v5 }
 0x904   :  { %26589 = vmatprep.mubr.msk.f32.mxu1 %vm75_vm1, %v33655_v16  ;;  %28438 = vmatpush3.bf16.msra.mxu1 %v28435_v28 }
 0x905   :  { %28440 = vmatprep.subr.bf16.mxu1 %v28439_v31 }
 0x907   :  { %26590 = vmatmul.mubr.msk.f32.gmra.mrb[36].mxu1 %vm75_vm1, %v33659_v11 }
 0x908   :  { %26592 = vmatprep.mubr.msk.f32.mxu1 %vm75_vm1, %v33663_v15 }
 0x90b   :  { %26593 = vmatmul.mubr.msk.f32.gmra.mrb[38].mxu1 %vm75_vm1, %v33825_v51 }
 0x90c   :  { %26595 = vmatprep.mubr.msk.f32.mxu1 %vm75_vm1, %v33669_v54  ;;  %v22385_v54 = vld [vmem:[%s36881_s9 + $0xf0] sm:$0xff] }
 0x90d   :  { %v28443_v59 = vpack.c.bf16 %v22386_v38, %v22385_v54 }
 0x90f   :  { %26596 = vmatmul.mubr.msk.f32.gmra.mrb[40].mxu1 %vm75_vm1, %v33673_v8 }
 0x910   :  { %26598 = vmatprep.mubr.msk.f32.mxu1 %vm75_vm1, %v33677_v42 }
 0x913   :  { %26599 = vmatmul.mubr.msk.f32.gmra.mrb[42].mxu1 %vm75_vm1, %v33681_v23 }
 0x914   :  { %26601 = vmatprep.mubr.msk.f32.mxu1 %vm75_vm1, %v33685_v2 }
 0x917   :  { %26602 = vmatmul.mubr.msk.f32.gmra.mrb[44].mxu1 %vm75_vm1, %v33689_v52 }
 0x918   :  { %26604 = vmatprep.mubr.msk.f32.mxu1 %vm75_vm1, %v33693_v57 }
 0x91b   :  { %26605 = vmatmul.mubr.msk.f32.gmra.mrb[46].mxu1 %vm75_vm1, %v33843_v17 }
 0x91c   :  { %26615 = vmatprep.mubr.msk.f32.mxu1 %vm75_vm1, %v33570_v26  ;;  %v22406_v26 = vld [vmem:[%s36881_s9 + $0x118] sm:$0xff] }
 0x91f   :  { %26616 = vmatmul.mubr.msk.f32.vlgmr.msra.gmra.mrb[32].mxu1 %vm75_vm1, %v33575_v36 }
 0x920   :  { %26618 = vmatprep.mubr.msk.f32.mxu1 %vm75_vm1, %v33579_v35  ;;  %28442 = vmatpush3.bf16.msra.mxu1 %v28439_v31  ;;  %v37064_v31 = vld [vmem:[#allocation16_spill] sm:$0xff] }
 0x921   :  { %28444 = vmatprep.subr.bf16.mxu1 %v28443_v59 }
 0x923   :  { %26619 = vmatmul.mubr.msk.f32.gmra.mrb[34].mxu1 %vm75_vm1, %v33583_v44 }
 0x924   :  { %26621 = vmatprep.mubr.msk.f32.mxu1 %vm75_vm1, %v33587_v0  ;;  %28446 = vmatpush3.bf16.msra.mxu1 %v28443_v59 }
 0x925   :  { %28448 = vmatprep.subr.bf16.mxu1 %v28447_v49 }
 0x927   :  { %26622 = vmatmul.mubr.msk.f32.gmra.mrb[36].mxu1 %vm75_vm1, %v33591_v24 }
 0x928   :  { %26624 = vmatprep.mubr.msk.f32.mxu1 %vm75_vm1, %v33723_v9 }
 0x92b   :  { %26625 = vmatmul.mubr.msk.f32.gmra.mrb[38].mxu1 %vm75_vm1, %v33336_v25  ;;  %v22405_v25 = vld [vmem:[%s36881_s9 + $0x110] sm:$0xff] }
 0x92c   :  { %26627 = vmatprep.mubr.msk.f32.mxu1 %vm75_vm1, %v33601_v32  ;;  %v28451_v36 = vpack.c.bf16 %v22406_v26, %v22405_v25  ;;  %v34067_v26 = vpack.c.bf16 %v22461_v7, %v22460_v20 }
 0x92f   :  { %26628 = vmatmul.mubr.msk.f32.gmra.mrb[40].mxu1 %vm75_vm1, %v33605_v33 }
 0x930   :  { %26630 = vmatprep.mubr.msk.f32.mxu1 %vm75_vm1, %v33609_v10 }
 0x933   :  { %26631 = vmatmul.mubr.msk.f32.gmra.mrb[42].mxu1 %vm75_vm1, %v33613_v56 }
 0x934   :  { %26633 = vmatprep.mubr.msk.f32.mxu1 %vm75_vm1, %v33617_v58 }
 0x937   :  { %26634 = vmatmul.mubr.msk.f32.gmra.mrb[44].mxu1 %vm75_vm1, %v33621_v1 }
 0x938   :  { %26636 = vmatprep.mubr.msk.f32.mxu1 %vm75_vm1, %v33741_v29 }
 0x93b   :  { %26637 = vmatmul.mubr.msk.f32.gmra.mrb[46].mxu1 %vm75_vm1, %v33354_v39  ;;  %v22426_v39 = vld [vmem:[%s36883_s11 + $0x30] sm:$0xff] }
 0x93c   :  { %26647 = vmatprep.mubr.msk.f32.mxu1 %vm75_vm1, %v33477_v61  ;;  %v12251_v61 = vld [vmem:[%s36883_s11] sm:$0xff] }
 0x93f   :  { %26648 = vmatmul.mubr.msk.f32.vlgmr.msra.gmra.mrb[32].mxu1 %vm75_vm1, %v33485_v47 }
 0x940   :  { %26650 = vmatprep.mubr.msk.f32.mxu1 %vm75_vm1, %v33491_v63  ;;  %28450 = vmatpush3.bf16.msra.mxu1 %v28447_v49  ;;  %v33977_v63 = vld [vmem:[%s36882_s10] ss:$0 sm:$0xff] }
 0x941   :  { %28452 = vmatprep.subr.bf16.mxu1 %v28451_v36 }
 0x943   :  { %26651 = vmatmul.mubr.msk.f32.gmra.mrb[34].mxu1 %vm75_vm1, %v33498_v34 }
 0x944   :  { %26653 = vmatprep.mubr.msk.f32.mxu1 %vm75_vm1, %v33504_v14  ;;  %28454 = vmatpush3.bf16.msra.mxu1 %v28451_v36  ;;  %v37066_v36 = vld [vmem:[#allocation17_spill] sm:$0xff] }
 0x947   :  { %26654 = vmatmul.mubr.msk.f32.gmra.mrb[36].mxu1 %vm75_vm1, %v33510_v13 }
 0x948   :  { %26656 = vmatprep.mubr.msk.f32.mxu1 %vm75_vm1, %v33771_v22  ;;  %v37062_v22 = vld [vmem:[#allocation15_spill] sm:$0xff] }
 0x94b   :  { %26657 = vmatmul.mubr.msk.f32.gmra.mrb[38].mxu1 %vm75_vm1, %v33378_v40  ;;  %v22427_v40 = vld [vmem:[%s36883_s11 + $0x38] sm:$0xff] }
 0x94c   :  { %26659 = vmatprep.mubr.msk.f32.mxu1 %vm75_vm1, %v33526_v6 }
 0x94f   :  { %26660 = vmatmul.mubr.msk.f32.gmra.mrb[40].mxu1 %vm75_vm1, %v33531_v48  ;;  %v37055_v48 = vmax.f32 %v32786_v37, 0.0  ;;  %v37057_v37 = vmax.f32 %v32801_v62, 0.0 }
 0x950   :  { %26662 = vmatprep.mubr.msk.f32.mxu1 %vm75_vm1, %v33536_v53 }
 0x953   :  { %26663 = vmatmul.mubr.msk.f32.gmra.mrb[42].mxu1 %vm75_vm1, %v33540_v18  ;;  %v37056_v18 = vmax.f32 %v32790_v21, 0.0  ;;  %v37058_v21 = vmax.f32 %v32808_v46, 0.0  ;;  %v12253_v46 = vld [vmem:[%s36883_s11 + $0x10] sm:$0xff] }
 0x954   :  { %26665 = vmatprep.mubr.msk.f32.mxu1 %vm75_vm1, %v33544_v55 }
 0x957   :  { %26666 = vmatmul.mubr.msk.f32.gmra.mrb[44].mxu1 %vm75_vm1, %v33548_v30 }
 0x958   :  { %26668 = vmatprep.mubr.msk.f32.mxu1 %vm75_vm1, %v33789_v45  ;;  %v37063_v45 = vmax.f32 %v37062_v22, 0.0 }
 0x95b   :  { %26669 = vmatmul.mubr.msk.f32.gmra.mrb[46].mxu1 %vm75_vm1, %v33396_v3  ;;  %v28459_v3 = vpack.c.bf16 %v22427_v40, %v22426_v39  ;;  %v37067_v39 = vmax.f32 %v37066_v36, 0.0 }
 0x95c   :  { %26679 = vmatprep.mubr.msk.f32.mxu1 %vm75_vm1, %v33643_v43 }
 0x95d   :  { %28460 = vmatprep.subr.bf16.mxu0 %v28459_v3 }
 0x95e   :  { %28462 = vmatpush3.bf16.msra.mxu0 %v28459_v3 }
 0x95f   :  { %26680 = vmatmul.mubr.msk.f32.vlgmr.msra.gmra.mrb[32].mxu1 %vm75_vm1, %v33647_v4 }
 0x960   :  { %26682 = vmatprep.mubr.msk.f32.mxu1 %vm75_vm1, %v33651_v5  ;;  %v37059_v5 = vmax.f32 %v32819_v60, 0.0 }
 0x963   :  { %26683 = vmatmul.mubr.msk.f32.gmra.mrb[34].mxu1 %vm75_vm1, %v33655_v16 }
 0x964   :  { %26685 = vmatprep.mubr.msk.f32.mxu1 %vm75_vm1, %v33659_v11  ;;  %v12254_v11 = vld [vmem:[%s36883_s11 + $0x18] sm:$0xff] }
 0x965   :  { %v28467_v29 = vpack.c.bf16 %v12254_v11, %v12253_v46 }
 0x967   :  { %26686 = vmatmul.mubr.msk.f32.gmra.mrb[36].mxu1 %vm75_vm1, %v33663_v15  ;;  %v37060_v15 = vld [vmem:[#allocation14_spill] sm:$0xff] }
 0x968   :  { %26688 = vmatprep.mubr.msk.f32.mxu1 %vm75_vm1, %v33825_v51  ;;  %v37065_v51 = vmax.f32 %v37064_v31, 0.0 }
 0x96b   :  { %26689 = vmatmul.mubr.msk.f32.gmra.mrb[38].mxu1 %vm75_vm1, %v33414_v50  ;;  %v12255_v50 = vld [vmem:[#allocation2 + $0x1] sm:$0xff] }
 0x96c   :  { %26691 = vmatprep.mubr.msk.f32.mxu1 %vm75_vm1, %v33673_v8  ;;  %26711 = vmatprep.mubr.msk.f32.mxu0 %vm75_vm1, %v12255_v50  ;;  %v37061_v8 = vmax.f32 %v37060_v15, 0.0  ;;  %v37068_v50 = vld [vmem:[#allocation7_spill] sm:$0xff] }
 0x96f   :  { %26692 = vmatmul.mubr.msk.f32.gmra.mrb[40].mxu1 %vm75_vm1, %v33677_v42 }
 0x970   :  { %26694 = vmatprep.mubr.msk.f32.mxu1 %vm75_vm1, %v33681_v23 }
 0x973   :  { %26695 = vmatmul.mubr.msk.f32.gmra.mrb[42].mxu1 %vm75_vm1, %v33685_v2 }
 0x974   :  { %26697 = vmatprep.mubr.msk.f32.mxu1 %vm75_vm1, %v33689_v52 }
 0x977   :  { %26698 = vmatmul.mubr.msk.f32.gmra.mrb[44].mxu1 %vm75_vm1, %v33693_v57 }
 0x978   :  { %26700 = vmatprep.mubr.msk.f32.mxu1 %vm75_vm1, %v33843_v17 }
 0x97b   :  { %26701 = vmatmul.mubr.msk.f32.gmra.mrb[46].mxu1 %vm75_vm1, %v33432_v27  ;;  %v12252_v27 = vld [vmem:[%s36883_s11 + $0x8] sm:$0xff] }
 0x97c   :  { %v28463_v47 = vpack.c.bf16 %v12252_v27, %v12251_v61  ;;  %v37069_v61 = vmax.f32 %v37068_v50, 0.0  ;;  %v37085_v50 = vld [vmem:[#allocation13_spill] sm:$0xff] }
 0x97e   :  { %28464 = vmatprep.subr.bf16.mxu0 %v28463_v47 }
 0xa32   :  { %v26681_v34 = vpop.f32.mrb[32].mxu1 }
 0xa33   :  { %v12172_v14 = vadd.f32 %v26681_v34, %v33977_v63  ;;  %v12069_v13 = vpop.f32.mrb[33].mxu1 }
 0xa34   :  { %v12171_v6 = vadd.f32 %v33977_v63, %v12069_v13 }
 0xa35   :  { %v33983_v53 = vadd.f32 %v12172_v14, %v37055_v48 }
 0xa36   :  { %v33987_v55 = vadd.f32 %v12171_v6, %v37056_v18  ;;  %v26684_v30 = vpop.f32.mrb[34].mxu1 }
 0xa37   :  { %v36967_v35 = vmax.f32 %v33983_v53, 0.0  ;;  %v12174_v44 = vadd.f32 %v26684_v30, %v33977_v63  ;;  %v12079_v0 = vpop.f32.mrb[35].mxu1  ;;  %v37070_v30 = vld [vmem:[#allocation8_spill] sm:$0xff] }
 0xa38   :  { %v36968_v24 = vmax.f32 %v33987_v55, 0.0  ;;  %v12173_v32 = vadd.f32 %v33977_v63, %v12079_v0 }
 0xa39   :  { %12220 = vst.msk [vmem:[#allocation2 + $0x21] sm:$0xff] %vm75_vm1, %v36967_v35  ;;  %v33998_v33 = vadd.f32 %v12174_v44, %v37057_v37  ;;  %v37071_v44 = vmax.f32 %v37070_v30, 0.0  ;;  %v37073_v37 = vld [vmem:[#allocation9_spill] sm:$0xff]  ;;  %v22520_v35 = vld [vmem:[%s36883_s11 + $0xa0] sm:$0xff] }
 0xa3a   :  { %12219 = vst.msk [vmem:[#allocation2 + $0x11] sm:$0xff] %vm75_vm1, %v36968_v24  ;;  %v34005_v10 = vadd.f32 %v12173_v32, %v37058_v21  ;;  %v26687_v56 = vpop.f32.mrb[36].mxu1  ;;  %v37074_v21 = vmax.f32 %v37073_v37, 0.0  ;;  %v22521_v24 = vld [vmem:[%s36883_s11 + $0xa8] sm:$0xff] }
 0xa3b   :  { %v36965_v58 = vmax.f32 %v33998_v33, 0.0  ;;  %v12176_v1 = vadd.f32 %v26687_v56, %v33977_v63  ;;  %v12089_v43 = vpop.f32.mrb[37].mxu1 }
 0xa3c   :  { %v36966_v4 = vmax.f32 %v34005_v10, 0.0  ;;  %v12175_v62 = vadd.f32 %v33977_v63, %v12089_v43 }
 0xa3d   :  { %12222 = vst.msk [vmem:[#allocation2 + $0x41] sm:$0xff] %vm75_vm1, %v36965_v58  ;;  %v34016_v16 = vadd.f32 %v12176_v1, %v37059_v5  ;;  %v22503_v58 = vld [vmem:[%s36883_s11 + $0x98] sm:$0xff] }
 0xa3e   :  { %12221 = vst.msk [vmem:[#allocation2 + $0x31] sm:$0xff] %vm75_vm1, %v36966_v4  ;;  %v34029_v42 = vadd.f32 %v12175_v62, %v37061_v8  ;;  %v26690_v23 = vpop.f32.mrb[38].mxu1  ;;  %v12263_v8 = vld [vmem:[#allocation2 + $0xa1] sm:$0xff] }
 0xa3f   :  { %v36963_v60 = vmax.f32 %v34016_v16, 0.0  ;;  %v12178_v2 = vadd.f32 %v26690_v23, %v33977_v63  ;;  %v12099_v52 = vpop.f32.mrb[39].mxu1  ;;  %v37076_v23 = vld [vmem:[#allocation10_spill] sm:$0xff] }
 0xa40   :  { %v36964_v57 = vmax.f32 %v34029_v42, 0.0  ;;  %v12177_v9 = vadd.f32 %v33977_v63, %v12099_v52  ;;  %v34059_v38 = vld [vmem:[#allocation2 + $0x21] sm:$0xff] }
 0xa41   :  { %12224 = vst.msk [vmem:[#allocation2 + $0x61] sm:$0xff] %vm75_vm1, %v36963_v60  ;;  %v34040_v41 = vadd.f32 %v12178_v2, %v37063_v45  ;;  %v34042_v28 = vld [vmem:[#allocation2 + $0x11] sm:$0xff]  ;;  %v37077_v2 = vmax.f32 %v37076_v23, 0.0  ;;  %v22480_v23 = vld [vmem:[%s36883_s11 + $0x60] sm:$0xff] }
 0xa42   :  { %12223 = vst.msk [vmem:[#allocation2 + $0x51] sm:$0xff] %vm75_vm1, %v36964_v57  ;;  %v34055_v17 = vadd.f32 %v12177_v9, %v37065_v51  ;;  %v26693_v54 = vpop.f32.mrb[40].mxu1  ;;  %26712 = vmatmul.mubr.msk.f32.vlgmr.msra.gmra.mrb[48].mxu0 %vm75_vm1, %v34042_v28  ;;  %v22502_v57 = vld [vmem:[%s36883_s11 + $0x90] sm:$0xff] }
 0xa43   :  { %v36961_v59 = vmax.f32 %v34040_v41, 0.0  ;;  %v12180_v19 = vadd.f32 %v26693_v54, %v33977_v63  ;;  %v12109_v12 = vpop.f32.mrb[41].mxu1  ;;  %26714 = vmatprep.mubr.msk.f32.mxu0 %vm75_vm1, %v34059_v38  ;;  %28466 = vmatpush3.bf16.msra.mxu0 %v28463_v47  ;;  %v28491_v4 = vpack.c.bf16 %v22503_v58, %v22502_v57 }
 0xa44   :  { %v36962_v49 = vmax.f32 %v34055_v17, 0.0  ;;  %v12179_v25 = vadd.f32 %v33977_v63, %v12109_v12  ;;  %28468 = vmatprep.subr.bf16.mxu0 %v28467_v29  ;;  %v34087_v34 = vld [vmem:[#allocation2 + $0x41] sm:$0xff]  ;;  %v37082_v12 = vld [vmem:[#allocation12_spill] sm:$0xff] }
 0xa45   :  { %12226 = vst.msk [vmem:[#allocation2 + $0x81] sm:$0xff] %vm75_vm1, %v36961_v59  ;;  %v34074_v40 = vadd.f32 %v12180_v19, %v37067_v39  ;;  %v34076_v3 = vld [vmem:[#allocation2 + $0x31] sm:$0xff] }
 0xa46   :  { %12225 = vst.msk [vmem:[#allocation2 + $0x71] sm:$0xff] %vm75_vm1, %v36962_v49  ;;  %v34083_v27 = vadd.f32 %v12179_v25, %v37069_v61  ;;  %v26696_v47 = vpop.f32.mrb[42].mxu1  ;;  %26715 = vmatmul.mubr.msk.f32.gmra.mrb[50].mxu0 %vm75_vm1, %v34076_v3  ;;  %v37083_v25 = vmax.f32 %v37082_v12, 0.0  ;;  %v37086_v61 = vmax.f32 %v37085_v50, 0.0 }
 0xa47   :  { %v36959_v14 = vmax.f32 %v34074_v40, 0.0  ;;  %v12182_v13 = vadd.f32 %v26696_v47, %v33977_v63  ;;  %v12119_v6 = vpop.f32.mrb[43].mxu1  ;;  %26717 = vmatprep.mubr.msk.f32.mxu0 %vm75_vm1, %v34087_v34  ;;  %28470 = vmatpush3.bf16.msra.mxu0 %v28467_v29  ;;  %v37079_v29 = vld [vmem:[#allocation11_spill] sm:$0xff] }
 0xa48   :  { %v36960_v48 = vmax.f32 %v34083_v27, 0.0  ;;  %v12181_v18 = vadd.f32 %v33977_v63, %v12119_v6  ;;  %28472 = vmatprep.subr.bf16.mxu0 %v34067_v26  ;;  %v34114_v43 = vld [vmem:[#allocation2 + $0x61] sm:$0xff]  ;;  %v37080_v22 = vmax.f32 %v37079_v29, 0.0 }
 0xa49   :  { %12228 = vst.msk [vmem:[#allocation2 + $0xc1] sm:$0xff] %vm75_vm1, %v36959_v14  ;;  %v34101_v0 = vadd.f32 %v12182_v13, %v37071_v44  ;;  %v34103_v32 = vld [vmem:[#allocation2 + $0x51] sm:$0xff]  ;;  %v34212_v29 = vld [vmem:[#allocation2 + $0x20] sm:$0xff] }
 0xa4a   :  { %12227 = vst.msk [vmem:[#allocation2 + $0xb1] sm:$0xff] %vm75_vm1, %v36960_v48  ;;  %v34110_v56 = vadd.f32 %v12181_v18, %v37074_v21  ;;  %v26699_v1 = vpop.f32.mrb[44].mxu1  ;;  %26718 = vmatmul.mubr.msk.f32.gmra.mrb[52].mxu0 %vm75_vm1, %v34103_v32  ;;  %v12235_v21 = vld [vmem:[#allocation2] sm:$0xff] }
 0xa4b   :  { %37072 = vst [vmem:[#allocation14_spill] sm:$0xff] %v34101_v0  ;;  %v36957_v62 = vmax.f32 %v34101_v0, 0.0  ;;  %v12184_v5 = vadd.f32 %v26699_v1, %v33977_v63  ;;  %v12129_v46 = vpop.f32.mrb[45].mxu1  ;;  %26720 = vmatprep.mubr.msk.f32.mxu0 %vm75_vm1, %v34114_v43  ;;  %v22605_v0 = vld [vmem:[%s36885_s13 + $0x60] sm:$0xff] }
 0xa4c   :  { %37075 = vst [vmem:[#allocation15_spill] sm:$0xff] %v34110_v56  ;;  %v36958_v11 = vmax.f32 %v34110_v56, 0.0  ;;  %v12183_v15 = vadd.f32 %v33977_v63, %v12129_v46  ;;  %v22463_v46 = vld [vmem:[%s36883_s11 + $0x58] sm:$0xff]  ;;  %v34362_v58 = vld [vmem:[#allocation2 + $0x80] sm:$0xff]  ;;  %v22606_v56 = vld [vmem:[%s36885_s13 + $0x68] sm:$0xff] }
 0xa4d   :  { %12230 = vst.msk [vmem:[#allocation2 + $0xe1] sm:$0xff] %vm75_vm1, %v36957_v62  ;;  %v34127_v52 = vadd.f32 %v12184_v5, %v37077_v2  ;;  %v34129_v9 = vld [vmem:[#allocation2 + $0x71] sm:$0xff]  ;;  %v22481_v2 = vld [vmem:[%s36883_s11 + $0x68] sm:$0xff] }
 0xa4e   :  { %12229 = vst.msk [vmem:[#allocation2 + $0xd1] sm:$0xff] %vm75_vm1, %v36958_v11  ;;  %v34136_v45 = vadd.f32 %v12183_v15, %v37080_v22  ;;  %v26702_v20 = vpop.f32.mrb[46].mxu1  ;;  %26721 = vmatmul.mubr.msk.f32.gmra.mrb[54].mxu0 %vm75_vm1, %v34129_v9  ;;  %v22462_v5 = vld [vmem:[%s36883_s11 + $0x50] sm:$0xff]  ;;  %v28479_v22 = vpack.c.bf16 %v22481_v2, %v22480_v23  ;;  %v34283_v62 = vld [vmem:[#allocation2 + $0x22] sm:$0xff] }
 0xa4f   :  { %37078 = vst [vmem:[#allocation16_spill] sm:$0xff] %v34127_v52  ;;  %v36955_v7 = vmax.f32 %v34127_v52, 0.0  ;;  %v12186_v31 = vadd.f32 %v26702_v20, %v33977_v63  ;;  %v12139_v51 = vpop.f32.mrb[47].mxu1  ;;  %26723 = vmatprep.mubr.msk.f32.mxu0 %vm75_vm1, %v12263_v8  ;;  %v28475_v15 = vpack.c.bf16 %v22463_v46, %v22462_v5  ;;  %v34202_v8 = vld [vmem:[#allocation2 + $0x10] sm:$0xff]  ;;  %v37088_v52 = vmov 0.0  }
 0xa50   :  { %37081 = vst [vmem:[#allocation17_spill] sm:$0xff] %v34136_v45  ;;  %v36956_v54 = vmax.f32 %v34136_v45, 0.0  ;;  %v12185_v19 = vadd.f32 %v33977_v63, %v12139_v51  ;;  %v34163_v63 = vld [vmem:[#allocation2 + $0xc1] sm:$0xff]  ;;  %v34217_v20 = vld [vmem:[#allocation2 + $0x30] sm:$0xff]  ;;  %123 = vst.msk [vmem:[#allocation3 + $0x20] sm:$0xff] %vm117_vm3, %v37088_v52 }
 0xa51   :  { %12232 = vst.msk [vmem:[#allocation2 + $0x101] sm:$0xff] %vm75_vm1, %v36955_v7  ;;  %v34150_v36 = vadd.f32 %v12186_v31, %v37083_v25  ;;  %v34152_v39 = vld [vmem:[#allocation2 + $0xb1] sm:$0xff]  ;;  %v34221_v31 = vld [vmem:[#allocation2 + $0x40] sm:$0xff]  ;;  %v22561_v45 = vld [vmem:[%s36883_s11 + $0xe8] sm:$0xff] }
 0xa52   :  { %12231 = vst.msk [vmem:[#allocation2 + $0xf1] sm:$0xff] %vm75_vm1, %v36956_v54  ;;  %v34159_v47 = vadd.f32 %v12185_v19, %v37086_v61  ;;  %26724 = vmatmul.mubr.msk.f32.gmra.mrb[56].mxu0 %vm75_vm1, %v34152_v39  ;;  %v34225_v51 = vld [vmem:[#allocation2 + $0x50] sm:$0xff]  ;;  %v12243_v19 = vld [vmem:[#allocation2 + $0xa0] sm:$0xff]  ;;  %v22501_v54 = vld [vmem:[%s36883_s11 + $0x88] sm:$0xff] }
 0xa53   :  { %37084 = vst [vmem:[#allocation7_spill] sm:$0xff] %v34150_v36  ;;  %v36953_v13 = vmax.f32 %v34150_v36, 0.0  ;;  %26726 = vmatprep.mubr.msk.f32.mxu0 %vm75_vm1, %v34163_v63  ;;  %v34233_v12 = vld [vmem:[#allocation2 + $0x70] sm:$0xff]  ;;  %v34242_v50 = vld [vmem:[#allocation2 + $0xc0] sm:$0xff]  ;;  %v28495_v36 = vpack.c.bf16 %v22521_v24, %v22520_v35  ;;  %124 = vst.msk [vmem:[#allocation3 + $0x28] sm:$0x3] %vm119_vm4, %v37088_v52 }
 0xa54   :  { %37087 = vst [vmem:[#allocation8_spill] sm:$0xff] %v34159_v47  ;;  %v36954_v6 = vmax.f32 %v34159_v47, 0.0  ;;  %v34179_v30 = vld [vmem:[#allocation2 + $0xe1] sm:$0xff]  ;;  %v34238_v25 = vld [vmem:[#allocation2 + $0xb0] sm:$0xff]  ;;  %v22604_v47 = vld [vmem:[%s36885_s13 + $0x58] sm:$0xff] }
 0xa55   :  { %12234 = vst.msk [vmem:[#allocation2 + $0x121] sm:$0xff] %vm75_vm1, %v36953_v13  ;;  %v34172_v18 = vld [vmem:[#allocation2 + $0xd1] sm:$0xff]  ;;  %v22500_v7 = vld [vmem:[%s36883_s11 + $0x80] sm:$0xff] }
 0xa56   :  { %12233 = vst.msk [vmem:[#allocation2 + $0x111] sm:$0xff] %vm75_vm1, %v36954_v6  ;;  %26727 = vmatmul.mubr.msk.f32.gmra.mrb[58].mxu0 %vm75_vm1, %v34172_v18  ;;  %v34246_v61 = vld [vmem:[#allocation2 + $0xd0] sm:$0xff]  ;;  %v34312_v14 = vld [vmem:[#allocation2 + $0xc2] sm:$0xff] }
 0xa57   :  { %26729 = vmatprep.mubr.msk.f32.mxu0 %vm75_vm1, %v34179_v30  ;;  %v22482_v2 = vld [vmem:[%s36883_s11 + $0x70] sm:$0xff]  ;;  %v34320_v59 = vld [vmem:[#allocation2 + $0xe2] sm:$0xff]  ;;  %118 = vst.msk [vmem:[#allocation3] sm:$0xff] %vm117_vm3, %v37088_v52  ;;  %121 = vst.msk [vmem:[#allocation3 + $0x10] sm:$0xff] %vm117_vm3, %v37088_v52 }
 0xa58   :  { %v34187_v37 = vld [vmem:[#allocation2 + $0x101] sm:$0xff]  ;;  %v34273_v6 = vld [vmem:[#allocation2 + $0x12] sm:$0xff]  ;;  %120 = vst.msk [vmem:[#allocation3 + $0x8] sm:$0x3] %vm119_vm4, %v37088_v52  ;;  %122 = vst.msk [vmem:[#allocation3 + $0x18] sm:$0x3] %vm119_vm4, %v37088_v52 }
 0xa59   :  { %v34183_v44 = vld [vmem:[#allocation2 + $0xf1] sm:$0xff]  ;;  %v34258_v46 = vld [vmem:[#allocation2 + $0x100] sm:$0xff]  ;;  %125 = vst.msk [vmem:[#allocation3 + $0x30] sm:$0xff] %vm117_vm3, %v37088_v52  ;;  %127 = vst.msk [vmem:[#allocation3 + $0x40] sm:$0xff] %vm117_vm3, %v37088_v52 }
 0xa5a   :  { %26730 = vmatmul.mubr.msk.f32.gmra.mrb[60].mxu0 %vm75_vm1, %v34183_v44  ;;  %v34254_v5 = vld [vmem:[#allocation2 + $0xf0] sm:$0xff]  ;;  %v34328_v49 = vld [vmem:[#allocation2 + $0x102] sm:$0xff]  ;;  %126 = vst.msk [vmem:[#allocation3 + $0x38] sm:$0x3] %vm119_vm4, %v37088_v52  ;;  %128 = vst.msk [vmem:[#allocation3 + $0x48] sm:$0x3] %vm119_vm4, %v37088_v52 }
 0xa5b   :  { %26732 = vmatprep.mubr.msk.f32.mxu0 %vm75_vm1, %v34187_v37  ;;  %v34295_v11 = vld [vmem:[#allocation2 + $0x52] sm:$0xff]  ;;  %129 = vst.msk [vmem:[#allocation3 + $0x50] sm:$0xff] %vm117_vm3, %v37088_v52  ;;  %131 = vst.msk [vmem:[#allocation3 + $0x60] sm:$0xff] %vm117_vm3, %v37088_v52 }
 0xa5c   :  { %v34316_v48 = vld [vmem:[#allocation2 + $0xd2] sm:$0xff]  ;;  %v34380_v35 = vld [vmem:[#allocation2 + $0x120] sm:$0xff]  ;;  %130 = vst.msk [vmem:[#allocation3 + $0x58] sm:$0x3] %vm119_vm4, %v37088_v52  ;;  %132 = vst.msk [vmem:[#allocation3 + $0x68] sm:$0x3] %vm119_vm4, %v37088_v52 }
 0xa5d   :  { %v34191_v1 = vld [vmem:[#allocation2 + $0x111] sm:$0xff]  ;;  %133 = vst.msk [vmem:[#allocation3 + $0x70] sm:$0xff] %vm117_vm3, %v37088_v52  ;;  %135 = vst.msk [vmem:[#allocation3 + $0x80] sm:$0xff] %vm117_vm3, %v37088_v52 }
 0xa5e   :  { %26733 = vmatmul.mubr.msk.f32.gmra.mrb[62].mxu0 %vm75_vm1, %v34191_v1  ;;  %v34262_v23 = vld [vmem:[#allocation2 + $0x110] sm:$0xff]  ;;  %134 = vst.msk [vmem:[#allocation3 + $0x78] sm:$0x3] %vm119_vm4, %v37088_v52  ;;  %136 = vst.msk [vmem:[#allocation3 + $0x88] sm:$0x3] %vm119_vm4, %v37088_v52 }
 0xa5f   :  { %26743 = vmatprep.mubr.msk.f32.mxu0 %vm75_vm1, %v12235_v21  ;;  %v34250_v21 = vld [vmem:[#allocation2 + $0xe0] sm:$0xff]  ;;  %v34332_v60 = vld [vmem:[#allocation2 + $0x112] sm:$0xff]  ;;  %137 = vst.msk [vmem:[#allocation3 + $0x90] sm:$0xff] %vm117_vm3, %v37088_v52  ;;  %139 = vst.msk [vmem:[#allocation3 + $0xa0] sm:$0xff] %vm117_vm3, %v37088_v52 }
 0xa60   :  { %v22522_v24 = vld [vmem:[%s36883_s11 + $0xb0] sm:$0xff]  ;;  %138 = vst.msk [vmem:[#allocation3 + $0x98] sm:$0x3] %vm119_vm4, %v37088_v52  ;;  %140 = vst.msk [vmem:[#allocation3 + $0xa8] sm:$0x3] %vm119_vm4, %v37088_v52 }
 0xa61   :  { %141 = vst.msk [vmem:[#allocation3 + $0xb0] sm:$0xff] %vm117_vm3, %v37088_v52  ;;  %143 = vst.msk [vmem:[#allocation3 + $0xc0] sm:$0xff] %vm117_vm3, %v37088_v52 }
 0xa62   :  { %26744 = vmatmul.mubr.msk.f32.vlgmr.msra.gmra.mrb[48].mxu0 %vm75_vm1, %v34202_v8  ;;  %142 = vst.msk [vmem:[#allocation3 + $0xb8] sm:$0x3] %vm119_vm4, %v37088_v52  ;;  %144 = vst.msk [vmem:[#allocation3 + $0xc8] sm:$0x3] %vm119_vm4, %v37088_v52 }
 0xa63   :  { %26746 = vmatprep.mubr.msk.f32.mxu0 %vm75_vm1, %v34212_v29  ;;  %28474 = vmatpush3.bf16.msra.mxu0 %v34067_v26  ;;  %v34229_v26 = vld [vmem:[#allocation2 + $0x60] sm:$0xff]  ;;  %145 = vst.msk [vmem:[#allocation3 + $0xd0] sm:$0xff] %vm117_vm3, %v37088_v52  ;;  %147 = vst.msk [vmem:[#allocation3 + $0xe0] sm:$0xff] %vm117_vm3, %v37088_v52 }
 0xa64   :  { %28476 = vmatprep.subr.bf16.mxu0 %v28475_v15  ;;  %146 = vst.msk [vmem:[#allocation3 + $0xd8] sm:$0x3] %vm119_vm4, %v37088_v52  ;;  %148 = vst.msk [vmem:[#allocation3 + $0xe8] sm:$0x3] %vm119_vm4, %v37088_v52 }
 0xa65   :  { %149 = vst.msk [vmem:[#allocation3 + $0xf0] sm:$0xff] %vm117_vm3, %v37088_v52  ;;  %151 = vst.msk [vmem:[#allocation3 + $0x100] sm:$0xff] %vm117_vm3, %v37088_v52 }
 0xa66   :  { %26747 = vmatmul.mubr.msk.f32.gmra.mrb[50].mxu0 %vm75_vm1, %v34217_v20  ;;  %150 = vst.msk [vmem:[#allocation3 + $0xf8] sm:$0x3] %vm119_vm4, %v37088_v52  ;;  %152 = vst.msk [vmem:[#allocation3 + $0x108] sm:$0x3] %vm119_vm4, %v37088_v52 }
 0xa67   :  { %26749 = vmatprep.mubr.msk.f32.mxu0 %vm75_vm1, %v34221_v31  ;;  %28478 = vmatpush3.bf16.msra.mxu0 %v28475_v15  ;;  %v12662_v15 = vld [vmem:[#allocation2 + $0x2] sm:$0xff]  ;;  %153 = vst.msk [vmem:[#allocation3 + $0x110] sm:$0xff] %vm117_vm3, %v37088_v52  ;;  %155 = vst.msk [vmem:[#allocation3 + $0x120] sm:$0xff] %vm117_vm3, %v37088_v52 }
 0xa68   :  { %28480 = vmatprep.subr.bf16.mxu0 %v28479_v22  ;;  %154 = vst.msk [vmem:[#allocation3 + $0x118] sm:$0x3] %vm119_vm4, %v37088_v52  ;;  %156 = vst.msk [vmem:[#allocation3 + $0x128] sm:$0x3] %vm119_vm4, %v37088_v52 }
 0xa69   :  { %157 = vst.msk [vmem:[#allocation3 + $0x130] sm:$0xff] %vm117_vm3, %v37088_v52 }
 0xa6a   :  { %26750 = vmatmul.mubr.msk.f32.gmra.mrb[52].mxu0 %vm75_vm1, %v34225_v51  ;;  %158 = vst.msk [vmem:[#allocation3 + $0x138] sm:$0x3] %vm119_vm4, %v37088_v52  ;;  %v22766_v52 = vld [vmem:[%s36885_s13 + $0x1e8] sm:$0xff] }
 0xa6b   :  { %26752 = vmatprep.mubr.msk.f32.mxu0 %vm75_vm1, %v34229_v26 }
 0xa6e   :  { %26753 = vmatmul.mubr.msk.f32.gmra.mrb[54].mxu0 %vm75_vm1, %v34233_v12 }
 0xa6f   :  { %26755 = vmatprep.mubr.msk.f32.mxu0 %vm75_vm1, %v12243_v19  ;;  %v22483_v19 = vld [vmem:[%s36883_s11 + $0x78] sm:$0xff] }
 0xa70   :  { %v28483_v13 = vpack.c.bf16 %v22483_v19, %v22482_v2  ;;  %v34287_v2 = vld [vmem:[#allocation2 + $0x32] sm:$0xff]  ;;  %v34291_v19 = vld [vmem:[#allocation2 + $0x42] sm:$0xff] }
 0xa72   :  { %26756 = vmatmul.mubr.msk.f32.gmra.mrb[56].mxu0 %vm75_vm1, %v34238_v25 }
 0xa73   :  { %26758 = vmatprep.mubr.msk.f32.mxu0 %vm75_vm1, %v34242_v50 }
 0xa76   :  { %26759 = vmatmul.mubr.msk.f32.gmra.mrb[58].mxu0 %vm75_vm1, %v34246_v61 }
 0xa77   :  { %26761 = vmatprep.mubr.msk.f32.mxu0 %vm75_vm1, %v34250_v21 }
 0xa7a   :  { %26762 = vmatmul.mubr.msk.f32.gmra.mrb[60].mxu0 %vm75_vm1, %v34254_v5 }
 0xa7b   :  { %26764 = vmatprep.mubr.msk.f32.mxu0 %vm75_vm1, %v34258_v46 }
 0xa7e   :  { %26765 = vmatmul.mubr.msk.f32.gmra.mrb[62].mxu0 %vm75_vm1, %v34262_v23 }
 0xa7f   :  { %26775 = vmatprep.mubr.msk.f32.mxu0 %vm75_vm1, %v12662_v15  ;;  %v28487_v15 = vpack.c.bf16 %v22501_v54, %v22500_v7  ;;  %v12670_v7 = vld [vmem:[#allocation2 + $0xa2] sm:$0xff]  ;;  %v34303_v54 = vld [vmem:[#allocation2 + $0x72] sm:$0xff] }
 0xa82   :  { %26776 = vmatmul.mubr.msk.f32.vlgmr.msra.gmra.mrb[48].mxu0 %vm75_vm1, %v34273_v6 }
 0xa83   :  { %26778 = vmatprep.mubr.msk.f32.mxu0 %vm75_vm1, %v34283_v62  ;;  %28482 = vmatpush3.bf16.msra.mxu0 %v28479_v22  ;;  %v34299_v22 = vld [vmem:[#allocation2 + $0x62] sm:$0xff] }
 0xa84   :  { %28484 = vmatprep.subr.bf16.mxu0 %v28483_v13 }
 0xa86   :  { %26779 = vmatmul.mubr.msk.f32.gmra.mrb[50].mxu0 %vm75_vm1, %v34287_v2 }
 0xa87   :  { %26781 = vmatprep.mubr.msk.f32.mxu0 %vm75_vm1, %v34291_v19  ;;  %28486 = vmatpush3.bf16.msra.mxu0 %v28483_v13  ;;  %v34308_v13 = vld [vmem:[#allocation2 + $0xb2] sm:$0xff] }
 0xa88   :  { %28488 = vmatprep.subr.bf16.mxu0 %v28487_v15 }
 0xa8a   :  { %26782 = vmatmul.mubr.msk.f32.gmra.mrb[52].mxu0 %vm75_vm1, %v34295_v11 }
 0xa8b   :  { %26784 = vmatprep.mubr.msk.f32.mxu0 %vm75_vm1, %v34299_v22 }
 0xa8e   :  { %26785 = vmatmul.mubr.msk.f32.gmra.mrb[54].mxu0 %vm75_vm1, %v34303_v54 }
 0xa8f   :  { %26787 = vmatprep.mubr.msk.f32.mxu0 %vm75_vm1, %v12670_v7  ;;  %v34324_v7 = vld [vmem:[#allocation2 + $0xf2] sm:$0xff] }
 0xa92   :  { %26788 = vmatmul.mubr.msk.f32.gmra.mrb[56].mxu0 %vm75_vm1, %v34308_v13 }
 0xa93   :  { %26790 = vmatprep.mubr.msk.f32.mxu0 %vm75_vm1, %v34312_v14 }
 0xa96   :  { %26791 = vmatmul.mubr.msk.f32.gmra.mrb[58].mxu0 %vm75_vm1, %v34316_v48 }
 0xa97   :  { %26793 = vmatprep.mubr.msk.f32.mxu0 %vm75_vm1, %v34320_v59 }
 0xa9a   :  { %26794 = vmatmul.mubr.msk.f32.gmra.mrb[60].mxu0 %vm75_vm1, %v34324_v7 }
 0xa9b   :  { %26796 = vmatprep.mubr.msk.f32.mxu0 %vm75_vm1, %v34328_v49 }
 0xa9e   :  { %26797 = vmatmul.mubr.msk.f32.gmra.mrb[62].mxu0 %vm75_vm1, %v34332_v60 }
 0xa9f   :  { %26807 = vmatprep.mubr.msk.f32.mxu0 %vm75_vm1, %v34202_v8  ;;  %v22540_v8 = vld [vmem:[%s36883_s11 + $0xc0] sm:$0xff] }
 0xaa2   :  { %26808 = vmatmul.mubr.msk.f32.vlgmr.msra.gmra.mrb[48].mxu0 %vm75_vm1, %v34212_v29 }
 0xaa3   :  { %26810 = vmatprep.mubr.msk.f32.mxu0 %vm75_vm1, %v34217_v20  ;;  %28490 = vmatpush3.bf16.msra.mxu0 %v28487_v15 }
 0xaa4   :  { %28492 = vmatprep.subr.bf16.mxu0 %v28491_v4 }
 0xaa6   :  { %26811 = vmatmul.mubr.msk.f32.gmra.mrb[50].mxu0 %vm75_vm1, %v34221_v31 }
 0xaa7   :  { %26813 = vmatprep.mubr.msk.f32.mxu0 %vm75_vm1, %v34225_v51  ;;  %28494 = vmatpush3.bf16.msra.mxu0 %v28491_v4  ;;  %v22523_v4 = vld [vmem:[%s36883_s11 + $0xb8] sm:$0xff] }
 0xaa8   :  { %28496 = vmatprep.subr.bf16.mxu0 %v28495_v36  ;;  %v28499_v57 = vpack.c.bf16 %v22523_v4, %v22522_v24  ;;  %v22543_v24 = vld [vmem:[%s36883_s11 + $0xd8] sm:$0xff]  ;;  %v22601_v4 = vld [vmem:[%s36885_s13 + $0x40] sm:$0xff] }
 0xaaa   :  { %26814 = vmatmul.mubr.msk.f32.gmra.mrb[52].mxu0 %vm75_vm1, %v34229_v26 }
 0xaab   :  { %26816 = vmatprep.mubr.msk.f32.mxu0 %vm75_vm1, %v34233_v12 }
 0xaae   :  { %26817 = vmatmul.mubr.msk.f32.gmra.mrb[54].mxu0 %vm75_vm1, %v34362_v58 }
 0xaaf   :  { %26819 = vmatprep.mubr.msk.f32.mxu0 %vm75_vm1, %v34238_v25  ;;  %v22541_v25 = vld [vmem:[%s36883_s11 + $0xc8] sm:$0xff] }
 0xab0   :  { %v34402_v15 = vpack.c.bf16 %v22541_v25, %v22540_v8  ;;  %v22603_v8 = vld [vmem:[%s36885_s13 + $0x50] sm:$0xff] }
 0xab2   :  { %26820 = vmatmul.mubr.msk.f32.gmra.mrb[56].mxu0 %vm75_vm1, %v34242_v50 }
 0xab3   :  { %26822 = vmatprep.mubr.msk.f32.mxu0 %vm75_vm1, %v34246_v61 }
 0xab6   :  { %26823 = vmatmul.mubr.msk.f32.gmra.mrb[58].mxu0 %vm75_vm1, %v34250_v21 }
 0xab7   :  { %26825 = vmatprep.mubr.msk.f32.mxu0 %vm75_vm1, %v34254_v5 }
 0xaba   :  { %26826 = vmatmul.mubr.msk.f32.gmra.mrb[60].mxu0 %vm75_vm1, %v34258_v46 }
 0xabb   :  { %26828 = vmatprep.mubr.msk.f32.mxu0 %vm75_vm1, %v34262_v23 }
 0xabe   :  { %26829 = vmatmul.mubr.msk.f32.gmra.mrb[62].mxu0 %vm75_vm1, %v34380_v35 }
 0xabf   :  { %26839 = vmatprep.mubr.msk.f32.mxu0 %vm75_vm1, %v34042_v28  ;;  %v34413_v28 = vld [vmem:[#allocation2 + $0x81] sm:$0xff] }
 0xac2   :  { %26840 = vmatmul.mubr.msk.f32.vlgmr.msra.gmra.mrb[48].mxu0 %vm75_vm1, %v34059_v38 }
 0xac3   :  { %26842 = vmatprep.mubr.msk.f32.mxu0 %vm75_vm1, %v34076_v3  ;;  %28498 = vmatpush3.bf16.msra.mxu0 %v28495_v36  ;;  %v34431_v36 = vld [vmem:[#allocation2 + $0x121] sm:$0xff] }
 0xac4   :  { %28500 = vmatprep.subr.bf16.mxu0 %v28499_v57 }
 0xac6   :  { %26843 = vmatmul.mubr.msk.f32.gmra.mrb[50].mxu0 %vm75_vm1, %v34087_v34 }
 0xac7   :  { %26845 = vmatprep.mubr.msk.f32.mxu0 %vm75_vm1, %v34103_v32  ;;  %28502 = vmatpush3.bf16.msra.mxu0 %v28499_v57  ;;  %v22602_v57 = vld [vmem:[%s36885_s13 + $0x48] sm:$0xff] }
 0xac8   :  { %28504 = vmatprep.subr.bf16.mxu0 %v34402_v15  ;;  %v28527_v25 = vpack.c.bf16 %v22602_v57, %v22601_v4  ;;  %v22560_v4 = vld [vmem:[%s36883_s11 + $0xe0] sm:$0xff]  ;;  %v28531_v57 = vpack.c.bf16 %v22604_v47, %v22603_v8  ;;  %v22581_v8 = vld [vmem:[%s36883_s11 + $0x108] sm:$0xff] }
 0xac9   :  { %v28511_v47 = vpack.c.bf16 %v22561_v45, %v22560_v4  ;;  %v34560_v45 = vld [vmem:[#allocation2 + $0x82] sm:$0xff] }
 0xaca   :  { %26846 = vmatmul.mubr.msk.f32.gmra.mrb[52].mxu0 %vm75_vm1, %v34114_v43  ;;  %28528 = vmatprep.subr.bf16.mxu1 %v28527_v25 }
 0xacb   :  { %26848 = vmatprep.mubr.msk.f32.mxu0 %vm75_vm1, %v34129_v9  ;;  %28530 = vmatpush3.bf16.msra.mxu1 %v28527_v25 }
 0xacc   :  { %28532 = vmatprep.subr.bf16.mxu1 %v28531_v57 }
 0xace   :  { %26849 = vmatmul.mubr.msk.f32.gmra.mrb[54].mxu0 %vm75_vm1, %v34413_v28 }
 0xacf   :  { %26851 = vmatprep.mubr.msk.f32.mxu0 %vm75_vm1, %v34152_v39  ;;  %v22542_v39 = vld [vmem:[%s36883_s11 + $0xd0] sm:$0xff]  ;;  %28534 = vmatpush3.bf16.msra.mxu1 %v28531_v57  ;;  %v14348_v57 = vld [vmem:[%s36885_s13 + $0x20] sm:$0xff] }
 0xad2   :  { %26852 = vmatmul.mubr.msk.f32.gmra.mrb[56].mxu0 %vm75_vm1, %v34163_v63 }
 0xad3   :  { %26854 = vmatprep.mubr.msk.f32.mxu0 %vm75_vm1, %v34172_v18 }
 0xad6   :  { %26855 = vmatmul.mubr.msk.f32.gmra.mrb[58].mxu0 %vm75_vm1, %v34179_v30 }
 0xad7   :  { %26857 = vmatprep.mubr.msk.f32.mxu0 %vm75_vm1, %v34183_v44 }
 0xada   :  { %26858 = vmatmul.mubr.msk.f32.gmra.mrb[60].mxu0 %vm75_vm1, %v34187_v37 }
 0xadb   :  { %26860 = vmatprep.mubr.msk.f32.mxu0 %vm75_vm1, %v34191_v1 }
 0xade   :  { %26861 = vmatmul.mubr.msk.f32.gmra.mrb[62].mxu0 %vm75_vm1, %v34431_v36 }
 0xadf   :  { %26871 = vmatprep.mubr.msk.f32.mxu0 %vm75_vm1, %v34273_v6  ;;  %v28507_v6 = vpack.c.bf16 %v22543_v24, %v22542_v39  ;;  %v28535_v39 = vpack.c.bf16 %v22606_v56, %v22605_v0  ;;  %v34578_v0 = vld [vmem:[#allocation2 + $0x122] sm:$0xff]  ;;  %v22562_v56 = vld [vmem:[%s36883_s11 + $0xf0] sm:$0xff] }
 0xae0   :  { %v22580_v24 = vld [vmem:[%s36883_s11 + $0x100] sm:$0xff] }
 0xae1   :  { %28536 = vmatprep.subr.bf16.mxu1 %v28535_v39  ;;  %v28519_v25 = vpack.c.bf16 %v22581_v8, %v22580_v24 }
 0xae2   :  { %26872 = vmatmul.mubr.msk.f32.vlgmr.msra.gmra.mrb[48].mxu0 %vm75_vm1, %v34283_v62  ;;  %28538 = vmatpush3.bf16.msra.mxu1 %v28535_v39 }
 0xae3   :  { %26874 = vmatprep.mubr.msk.f32.mxu0 %vm75_vm1, %v34287_v2  ;;  %28506 = vmatpush3.bf16.msra.mxu0 %v34402_v15 }
 0xae4   :  { %28508 = vmatprep.subr.bf16.mxu0 %v28507_v6 }
 0xae6   :  { %26875 = vmatmul.mubr.msk.f32.gmra.mrb[50].mxu0 %vm75_vm1, %v34291_v19 }
 0xae7   :  { %26877 = vmatprep.mubr.msk.f32.mxu0 %vm75_vm1, %v34295_v11  ;;  %28510 = vmatpush3.bf16.msra.mxu0 %v28507_v6 }
 0xae8   :  { %28512 = vmatprep.subr.bf16.mxu0 %v28511_v47 }
 0xaea   :  { %26878 = vmatmul.mubr.msk.f32.gmra.mrb[52].mxu0 %vm75_vm1, %v34299_v22 }
 0xaeb   :  { %26880 = vmatprep.mubr.msk.f32.mxu0 %vm75_vm1, %v34303_v54 }
 0xaee   :  { %26881 = vmatmul.mubr.msk.f32.gmra.mrb[54].mxu0 %vm75_vm1, %v34560_v45 }
 0xaef   :  { %26883 = vmatprep.mubr.msk.f32.mxu0 %vm75_vm1, %v34308_v13  ;;  %v22563_v13 = vld [vmem:[%s36883_s11 + $0xf8] sm:$0xff] }
 0xaf0   :  { %v28515_v15 = vpack.c.bf16 %v22563_v13, %v22562_v56 }
 0xaf2   :  { %26884 = vmatmul.mubr.msk.f32.gmra.mrb[56].mxu0 %vm75_vm1, %v34312_v14 }
 0xaf3   :  { %26886 = vmatprep.mubr.msk.f32.mxu0 %vm75_vm1, %v34316_v48 }
 0xaf6   :  { %26887 = vmatmul.mubr.msk.f32.gmra.mrb[58].mxu0 %vm75_vm1, %v34320_v59 }
 0xaf7   :  { %26889 = vmatprep.mubr.msk.f32.mxu0 %vm75_vm1, %v34324_v7 }
 0xafa   :  { %26890 = vmatmul.mubr.msk.f32.gmra.mrb[60].mxu0 %vm75_vm1, %v34328_v49 }
 0xafb   :  { %26892 = vmatprep.mubr.msk.f32.mxu0 %vm75_vm1, %v34332_v60 }
 0xafe   :  { %26893 = vmatmul.mubr.msk.f32.gmra.mrb[62].mxu0 %vm75_vm1, %v34578_v0 }
 0xaff   :  { %26903 = vmatprep.mubr.msk.f32.mxu0 %vm75_vm1, %v34212_v29  ;;  %v13589_v29 = vld [vmem:[#allocation2 + $0x90] sm:$0xff] }
 0xb02   :  { %26904 = vmatmul.mubr.msk.f32.vlgmr.msra.gmra.mrb[48].mxu0 %vm75_vm1, %v34217_v20  ;;  %v13597_v20 = vld [vmem:[#allocation2 + $0x130] sm:$0xff] }
 0xb03   :  { %26906 = vmatprep.mubr.msk.f32.mxu0 %vm75_vm1, %v34221_v31  ;;  %28514 = vmatpush3.bf16.msra.mxu0 %v28511_v47  ;;  %v22582_v31 = vld [vmem:[%s36883_s11 + $0x110] sm:$0xff]  ;;  %v14349_v47 = vld [vmem:[%s36885_s13 + $0x28] sm:$0xff] }
 0xb04   :  { %28516 = vmatprep.subr.bf16.mxu0 %v28515_v15 }
 0xb06   :  { %26907 = vmatmul.mubr.msk.f32.gmra.mrb[50].mxu0 %vm75_vm1, %v34225_v51  ;;  %v22583_v51 = vld [vmem:[%s36883_s11 + $0x118] sm:$0xff] }
 0xb07   :  { %26909 = vmatprep.mubr.msk.f32.mxu0 %vm75_vm1, %v34229_v26  ;;  %28518 = vmatpush3.bf16.msra.mxu0 %v28515_v15  ;;  %v28523_v26 = vpack.c.bf16 %v22583_v51, %v22582_v31  ;;  %v28551_v15 = vpack.c.bf16 %v14349_v47, %v14348_v57  ;;  %v22644_v57 = vld [vmem:[%s36885_s13 + $0x98] sm:$0xff] }
 0xb08   :  { %28520 = vmatprep.subr.bf16.mxu0 %v28519_v25 }
 0xb0a   :  { %26910 = vmatmul.mubr.msk.f32.gmra.mrb[52].mxu0 %vm75_vm1, %v34233_v12 }
 0xb0b   :  { %26912 = vmatprep.mubr.msk.f32.mxu0 %vm75_vm1, %v34362_v58 }
 0xb0e   :  { %26913 = vmatmul.mubr.msk.f32.gmra.mrb[54].mxu0 %vm75_vm1, %v13589_v29  ;;  %v14350_v29 = vld [vmem:[%s36885_s13 + $0x30] sm:$0xff] }
 0xb0f   :  { %26915 = vmatprep.mubr.msk.f32.mxu0 %vm75_vm1, %v34242_v50 }
 0xb12   :  { %26916 = vmatmul.mubr.msk.f32.gmra.mrb[56].mxu0 %vm75_vm1, %v34246_v61 }
 0xb13   :  { %26918 = vmatprep.mubr.msk.f32.mxu0 %vm75_vm1, %v34250_v21 }
 0xb16   :  { %26919 = vmatmul.mubr.msk.f32.gmra.mrb[58].mxu0 %vm75_vm1, %v34254_v5 }
 0xb17   :  { %26921 = vmatprep.mubr.msk.f32.mxu0 %vm75_vm1, %v34258_v46 }
 0xb1a   :  { %26922 = vmatmul.mubr.msk.f32.gmra.mrb[60].mxu0 %vm75_vm1, %v34262_v23 }
 0xb1b   :  { %26924 = vmatprep.mubr.msk.f32.mxu0 %vm75_vm1, %v34380_v35 }
 0xb1e   :  { %26925 = vmatmul.mubr.msk.f32.gmra.mrb[62].mxu0 %vm75_vm1, %v13597_v20  ;;  %v14351_v20 = vld [vmem:[%s36885_s13 + $0x38] sm:$0xff] }
 0xb1f   :  { %26935 = vmatprep.mubr.msk.f32.mxu0 %vm75_vm1, %v34059_v38  ;;  %v13819_v38 = vld [vmem:[#allocation2 + $0x91] sm:$0xff] }
 0xb22   :  { %26936 = vmatmul.mubr.msk.f32.vlgmr.msra.gmra.mrb[48].mxu0 %vm75_vm1, %v34076_v3  ;;  %v13827_v3 = vld [vmem:[#allocation2 + $0x131] sm:$0xff] }
 0xb23   :  { %26938 = vmatprep.mubr.msk.f32.mxu0 %vm75_vm1, %v34087_v34  ;;  %28522 = vmatpush3.bf16.msra.mxu0 %v28519_v25  ;;  %v14049_v34 = vld [vmem:[#allocation2 + $0x92] sm:$0xff] }
 0xb24   :  { %28524 = vmatprep.subr.bf16.mxu0 %v28523_v26 }
 0xb26   :  { %26939 = vmatmul.mubr.msk.f32.gmra.mrb[50].mxu0 %vm75_vm1, %v34103_v32  ;;  %v14057_v32 = vld [vmem:[#allocation2 + $0x132] sm:$0xff] }
 0xb27   :  { %26941 = vmatprep.mubr.msk.f32.mxu0 %vm75_vm1, %v34114_v43  ;;  %28526 = vmatpush3.bf16.msra.mxu0 %v28523_v26  ;;  %v14345_v43 = vld [vmem:[%s36885_s13 + $0x8] sm:$0xff] }
 0xb2a   :  { %26942 = vmatmul.mubr.msk.f32.gmra.mrb[52].mxu0 %vm75_vm1, %v34129_v9 }
 0xb2b   :  { %26944 = vmatprep.mubr.msk.f32.mxu0 %vm75_vm1, %v34413_v28 }
 0xb2e   :  { %26945 = vmatmul.mubr.msk.f32.gmra.mrb[54].mxu0 %vm75_vm1, %v13819_v38 }
 0xb2f   :  { %26947 = vmatprep.mubr.msk.f32.mxu0 %vm75_vm1, %v34163_v63 }
 0xb32   :  { %26948 = vmatmul.mubr.msk.f32.gmra.mrb[56].mxu0 %vm75_vm1, %v34172_v18 }
 0xb33   :  { %26950 = vmatprep.mubr.msk.f32.mxu0 %vm75_vm1, %v34179_v30 }
 0xb36   :  { %26951 = vmatmul.mubr.msk.f32.gmra.mrb[58].mxu0 %vm75_vm1, %v34183_v44 }
 0xb37   :  { %26953 = vmatprep.mubr.msk.f32.mxu0 %vm75_vm1, %v34187_v37 }
 0xb3a   :  { %26954 = vmatmul.mubr.msk.f32.gmra.mrb[60].mxu0 %vm75_vm1, %v34191_v1 }
 0xb3b   :  { %26956 = vmatprep.mubr.msk.f32.mxu0 %vm75_vm1, %v34431_v36 }
 0xb3e   :  { %26957 = vmatmul.mubr.msk.f32.gmra.mrb[62].mxu0 %vm75_vm1, %v13827_v3 }
 0xb3f   :  { %26967 = vmatprep.mubr.msk.f32.mxu0 %vm75_vm1, %v34283_v62 }
 0xb42   :  { %26968 = vmatmul.mubr.msk.f32.vlgmr.msra.gmra.mrb[48].mxu0 %vm75_vm1, %v34287_v2 }
 0xb43   :  { %26970 = vmatprep.mubr.msk.f32.mxu0 %vm75_vm1, %v34291_v19  ;;  %v14346_v19 = vld [vmem:[%s36885_s13 + $0x10] sm:$0xff] }
 0xb46   :  { %26971 = vmatmul.mubr.msk.f32.gmra.mrb[50].mxu0 %vm75_vm1, %v34295_v11  ;;  %v34706_v11 = vld [vmem:[%s36884_s12] ss:$0 sm:$0xff] }
 0xb47   :  { %26973 = vmatprep.mubr.msk.f32.mxu0 %vm75_vm1, %v34299_v22  ;;  %v14347_v22 = vld [vmem:[%s36885_s13 + $0x18] sm:$0xff] }
 0xb48   :  { %v28547_v28 = vpack.c.bf16 %v14347_v22, %v14346_v19 }
 0xb4a   :  { %26974 = vmatmul.mubr.msk.f32.gmra.mrb[52].mxu0 %vm75_vm1, %v34303_v54 }
 0xb4b   :  { %26976 = vmatprep.mubr.msk.f32.mxu0 %vm75_vm1, %v34560_v45 }
 0xb4e   :  { %26977 = vmatmul.mubr.msk.f32.gmra.mrb[54].mxu0 %vm75_vm1, %v14049_v34  ;;  %v28555_v34 = vpack.c.bf16 %v14351_v20, %v14350_v29  ;;  %v22648_v29 = vld [vmem:[%s36885_s13 + $0xb8] sm:$0xff] }
 0xb4f   :  { %26979 = vmatprep.mubr.msk.f32.mxu0 %vm75_vm1, %v34312_v14  ;;  %v22607_v14 = vld [vmem:[%s36885_s13 + $0x70] sm:$0xff] }
 0xb52   :  { %26980 = vmatmul.mubr.msk.f32.gmra.mrb[56].mxu0 %vm75_vm1, %v34316_v48 }
 0xb53   :  { %26982 = vmatprep.mubr.msk.f32.mxu0 %vm75_vm1, %v34320_v59  ;;  %v22608_v59 = vld [vmem:[%s36885_s13 + $0x78] sm:$0xff] }
 0xb54   :  { %v28539_v48 = vpack.c.bf16 %v22608_v59, %v22607_v14 }
 0xb56   :  { %26983 = vmatmul.mubr.msk.f32.gmra.mrb[58].mxu0 %vm75_vm1, %v34324_v7  ;;  %28540 = vmatprep.subr.bf16.mxu1 %v28539_v48 }
 0xb57   :  { %26985 = vmatprep.mubr.msk.f32.mxu0 %vm75_vm1, %v34328_v49  ;;  %28542 = vmatpush3.bf16.msra.mxu1 %v28539_v48  ;;  %v14352_v49 = vld [vmem:[#allocation3 + $0x1] sm:$0xff] }
 0xb58   :  { %27007 = vmatprep.mubr.msk.f32.mxu1 %vm117_vm3, %v14352_v49  ;;  %v22641_v48 = vld [vmem:[%s36885_s13 + $0x80] sm:$0xff]  ;;  %v22642_v49 = vld [vmem:[%s36885_s13 + $0x88] sm:$0xff] }
 0xb5a   :  { %26986 = vmatmul.mubr.msk.f32.gmra.mrb[60].mxu0 %vm75_vm1, %v34332_v60  ;;  %v14344_v60 = vld [vmem:[%s36885_s13] sm:$0xff] }
 0xb5b   :  { %26988 = vmatprep.mubr.msk.f32.mxu0 %vm75_vm1, %v34578_v0  ;;  %v28543_v62 = vpack.c.bf16 %v14345_v43, %v14344_v60 }
 0xb5d   :  { %28544 = vmatprep.subr.bf16.mxu1 %v28543_v62 }
 0xb5e   :  { %26989 = vmatmul.mubr.msk.f32.gmra.mrb[62].mxu0 %vm75_vm1, %v14057_v32 }
 0xc15   :  { %v26969_v9 = vpop.f32.mrb[48].mxu0 }
 0xc16   :  { %v14280_v63 = vadd.f32 %v26969_v9, %v34706_v11  ;;  %v14177_v18 = vpop.f32.mrb[49].mxu0 }
 0xc17   :  { %v14279_v30 = vadd.f32 %v34706_v11, %v14177_v18  ;;  %v14360_v18 = vld [vmem:[#allocation3 + $0xa1] sm:$0xff] }
 0xc18   :  { %v14296_v44 = vmax.f32 %v14280_v63, 0.0 }
 0xc19   :  { %v14295_v37 = vmax.f32 %v14279_v30, 0.0  ;;  %v26972_v1 = vpop.f32.mrb[50].mxu0  ;;  %v28559_v30 = vpack.c.bf16 %v22642_v49, %v22641_v48 }
 0xc1a   :  { %14313 = vst.msk [vmem:[#allocation3 + $0x21] sm:$0xff] %vm117_vm3, %v14296_v44  ;;  %v14282_v12 = vadd.f32 %v26972_v1, %v34706_v11  ;;  %v14187_v50 = vpop.f32.mrb[51].mxu0 }
 0xc1b   :  { %14312 = vst.msk [vmem:[#allocation3 + $0x11] sm:$0xff] %vm117_vm3, %v14295_v37  ;;  %v14281_v61 = vadd.f32 %v34706_v11, %v14187_v50 }
 0xc1c   :  { %v14298_v21 = vmax.f32 %v14282_v12, 0.0 }
 0xc1d   :  { %v14297_v5 = vmax.f32 %v14281_v61, 0.0  ;;  %v26975_v46 = vpop.f32.mrb[52].mxu0 }
 0xc1e   :  { %14315 = vst.msk [vmem:[#allocation3 + $0x41] sm:$0xff] %vm117_vm3, %v14298_v21  ;;  %v14284_v23 = vadd.f32 %v26975_v46, %v34706_v11  ;;  %v14197_v2 = vpop.f32.mrb[53].mxu0 }
 0xc1f   :  { %14314 = vst.msk [vmem:[#allocation3 + $0x31] sm:$0xff] %vm117_vm3, %v14297_v5  ;;  %v14283_v54 = vadd.f32 %v34706_v11, %v14197_v2 }
 0xc20   :  { %v14300_v7 = vmax.f32 %v14284_v23, 0.0 }
 0xc21   :  { %v14299_v58 = vmax.f32 %v14283_v54, 0.0  ;;  %v26978_v35 = vpop.f32.mrb[54].mxu0  ;;  %v34738_v45 = vld [vmem:[#allocation3 + $0x21] sm:$0xff] }
 0xc22   :  { %14317 = vst.msk [vmem:[#allocation3 + $0x61] sm:$0xff] %vm117_vm3, %v14300_v7  ;;  %v14286_v36 = vadd.f32 %v26978_v35, %v34706_v11  ;;  %v14207_v6 = vpop.f32.mrb[55].mxu0  ;;  %v34726_v4 = vld [vmem:[#allocation3 + $0x11] sm:$0xff] }
 0xc23   :  { %14316 = vst.msk [vmem:[#allocation3 + $0x51] sm:$0xff] %vm117_vm3, %v14299_v58  ;;  %v14285_v39 = vadd.f32 %v34706_v11, %v14207_v6  ;;  %27008 = vmatmul.mubr.msk.f32.vlgmr.msra.gmra.mrb[48].mxu1 %vm117_vm3, %v34726_v4  ;;  %v22643_v6 = vld [vmem:[%s36885_s13 + $0x90] sm:$0xff] }
 0xc24   :  { %v14302_v0 = vmax.f32 %v14286_v36, 0.0  ;;  %27010 = vmatprep.mubr.msk.f32.mxu1 %vm117_vm3, %v34738_v45  ;;  %28546 = vmatpush3.bf16.msra.mxu1 %v28543_v62  ;;  %v28563_v47 = vpack.c.bf16 %v22644_v57, %v22643_v6 }
 0xc25   :  { %v14301_v56 = vmax.f32 %v14285_v39, 0.0  ;;  %v26981_v13 = vpop.f32.mrb[56].mxu0  ;;  %28548 = vmatprep.subr.bf16.mxu1 %v28547_v28  ;;  %v34756_v51 = vld [vmem:[#allocation3 + $0x41] sm:$0xff]  ;;  %v34828_v39 = vld [vmem:[#allocation3 + $0x10] sm:$0xff] }
 0xc26   :  { %14319 = vst.msk [vmem:[#allocation3 + $0x81] sm:$0xff] %vm117_vm3, %v14302_v0  ;;  %v14288_v24 = vadd.f32 %v26981_v13, %v34706_v11  ;;  %v14217_v8 = vpop.f32.mrb[57].mxu0  ;;  %v34744_v25 = vld [vmem:[#allocation3 + $0x31] sm:$0xff]  ;;  %v22645_v0 = vld [vmem:[%s36885_s13 + $0xa0] sm:$0xff] }
 0xc27   :  { %14318 = vst.msk [vmem:[#allocation3 + $0x71] sm:$0xff] %vm117_vm3, %v14301_v56  ;;  %v14287_v31 = vadd.f32 %v34706_v11, %v14217_v8  ;;  %27011 = vmatmul.mubr.msk.f32.gmra.mrb[50].mxu1 %vm117_vm3, %v34744_v25  ;;  %v22646_v56 = vld [vmem:[%s36885_s13 + $0xa8] sm:$0xff]  ;;  %v34838_v13 = vld [vmem:[#allocation3 + $0x20] sm:$0xff]  ;;  %v22647_v8 = vld [vmem:[%s36885_s13 + $0xb0] sm:$0xff] }
 0xc28   :  { %v14304_v26 = vmax.f32 %v14288_v24, 0.0  ;;  %27013 = vmatprep.mubr.msk.f32.mxu1 %vm117_vm3, %v34756_v51  ;;  %28550 = vmatpush3.bf16.msra.mxu1 %v28547_v28  ;;  %v14328_v28 = vld [vmem:[#allocation3] sm:$0xff]  ;;  %v34842_v24 = vld [vmem:[#allocation3 + $0x30] sm:$0xff] }
 0xc29   :  { %v14303_v38 = vmax.f32 %v14287_v31, 0.0  ;;  %v26984_v3 = vpop.f32.mrb[58].mxu0  ;;  %28552 = vmatprep.subr.bf16.mxu1 %v28551_v15  ;;  %v34774_v43 = vld [vmem:[#allocation3 + $0x61] sm:$0xff]  ;;  %v28571_v31 = vpack.c.bf16 %v22648_v29, %v22647_v8 }
 0xc2a   :  { %14321 = vst.msk [vmem:[#allocation3 + $0xc1] sm:$0xff] %vm117_vm3, %v14304_v26  ;;  %v14290_v32 = vadd.f32 %v26984_v3, %v34706_v11  ;;  %v14227_v14 = vpop.f32.mrb[59].mxu0  ;;  %v34762_v59 = vld [vmem:[#allocation3 + $0x51] sm:$0xff]  ;;  %v34852_v20 = vld [vmem:[#allocation3 + $0x40] sm:$0xff]  ;;  %v22666_v3 = vld [vmem:[%s36885_s13 + $0xc8] sm:$0xff] }
 0xc2b   :  { %14320 = vst.msk [vmem:[#allocation3 + $0xb1] sm:$0xff] %vm117_vm3, %v14303_v38  ;;  %v14289_v60 = vadd.f32 %v34706_v11, %v14227_v14  ;;  %27014 = vmatmul.mubr.msk.f32.gmra.mrb[52].mxu1 %vm117_vm3, %v34762_v59  ;;  %v34856_v26 = vld [vmem:[#allocation3 + $0x50] sm:$0xff]  ;;  %v22665_v38 = vld [vmem:[%s36885_s13 + $0xc0] sm:$0xff] }
 0xc2c   :  { %v14306_v62 = vmax.f32 %v14290_v32, 0.0  ;;  %27016 = vmatprep.mubr.msk.f32.mxu1 %vm117_vm3, %v34774_v43  ;;  %28554 = vmatpush3.bf16.msra.mxu1 %v28551_v15  ;;  %v28567_v15 = vpack.c.bf16 %v22646_v56, %v22645_v0  ;;  %v14336_v32 = vld [vmem:[#allocation3 + $0xa0] sm:$0xff]  ;;  %v28575_v14 = vpack.c.bf16 %v22666_v3, %v22665_v38  ;;  %v22690_v56 = vld [vmem:[%s36885_s13 + $0x108] sm:$0xff] }
 0xc2d   :  { %v14305_v9 = vmax.f32 %v14289_v60, 0.0  ;;  %v26987_v63 = vpop.f32.mrb[60].mxu0  ;;  %28556 = vmatprep.subr.bf16.mxu1 %v28555_v34  ;;  %v34934_v6 = vld [vmem:[#allocation3 + $0x42] sm:$0xff] }
 0xc2e   :  { %14323 = vst.msk [vmem:[#allocation3 + $0xe1] sm:$0xff] %vm117_vm3, %v14306_v62  ;;  %v14292_v44 = vadd.f32 %v26987_v63, %v34706_v11  ;;  %v14237_v37 = vpop.f32.mrb[61].mxu0  ;;  %v34780_v1 = vld [vmem:[#allocation3 + $0x71] sm:$0xff]  ;;  %v22689_v0 = vld [vmem:[%s36885_s13 + $0x100] sm:$0xff] }
 0xc2f   :  { %14322 = vst.msk [vmem:[#allocation3 + $0xd1] sm:$0xff] %vm117_vm3, %v14305_v9  ;;  %v14291_v12 = vadd.f32 %v34706_v11, %v14237_v37  ;;  %27017 = vmatmul.mubr.msk.f32.gmra.mrb[54].mxu1 %vm117_vm3, %v34780_v1  ;;  %v34870_v48 = vld [vmem:[#allocation3 + $0x70] sm:$0xff]  ;;  %v14771_v8 = vld [vmem:[#allocation3 + $0xa2] sm:$0xff]  ;;  %v28591_v29 = vpack.c.bf16 %v22690_v56, %v22689_v0 }
 0xc30   :  { %v14308_v50 = vmax.f32 %v14292_v44, 0.0  ;;  %27019 = vmatprep.mubr.msk.f32.mxu1 %vm117_vm3, %v14360_v18  ;;  %28558 = vmatpush3.bf16.msra.mxu1 %v28555_v34  ;;  %v34866_v34 = vld [vmem:[#allocation3 + $0x60] sm:$0xff]  ;;  %v22667_v37 = vld [vmem:[%s36885_s13 + $0xd0] sm:$0xff] }
 0xc31   :  { %v14307_v61 = vmax.f32 %v14291_v12, 0.0  ;;  %v26990_v21 = vpop.f32.mrb[62].mxu0  ;;  %28560 = vmatprep.subr.bf16.mxu1 %v28559_v30  ;;  %v34795_v19 = vld [vmem:[#allocation3 + $0xc1] sm:$0xff]  ;;  %v22668_v12 = vld [vmem:[%s36885_s13 + $0xd8] sm:$0xff] }
 0xc32   :  { %14325 = vst.msk [vmem:[#allocation3 + $0x101] sm:$0xff] %vm117_vm3, %v14308_v50  ;;  %v14294_v5 = vadd.f32 %v26990_v21, %v34706_v11  ;;  %v14247_v46 = vpop.f32.mrb[63].mxu0  ;;  %v34789_v23 = vld [vmem:[#allocation3 + $0xb1] sm:$0xff]  ;;  %v34879_v60 = vld [vmem:[#allocation3 + $0xc0] sm:$0xff]  ;;  %v28579_v50 = vpack.c.bf16 %v22668_v12, %v22667_v37 }
 0xc33   :  { %14324 = vst.msk [vmem:[#allocation3 + $0xf1] sm:$0xff] %vm117_vm3, %v14307_v61  ;;  %v14293_v2 = vadd.f32 %v34706_v11, %v14247_v46  ;;  %27020 = vmatmul.mubr.msk.f32.gmra.mrb[56].mxu1 %vm117_vm3, %v34789_v23  ;;  %v34875_v49 = vld [vmem:[#allocation3 + $0xb0] sm:$0xff]  ;;  %v22669_v21 = vld [vmem:[%s36885_s13 + $0xe0] sm:$0xff] }
 0xc34   :  { %v14310_v22 = vmax.f32 %v14294_v5, 0.0  ;;  %27022 = vmatprep.mubr.msk.f32.mxu1 %vm117_vm3, %v34795_v19  ;;  %v34910_v61 = vld [vmem:[#allocation3 + $0x12] sm:$0xff]  ;;  %v22670_v5 = vld [vmem:[%s36885_s13 + $0xe8] sm:$0xff]  ;;  %v22713_v56 = vld [vmem:[%s36885_s13 + $0x140] sm:$0xff] }
 0xc35   :  { %v14309_v54 = vmax.f32 %v14293_v2, 0.0  ;;  %v34805_v11 = vld [vmem:[#allocation3 + $0xe1] sm:$0xff]  ;;  %v28583_v2 = vpack.c.bf16 %v22670_v5, %v22669_v21  ;;  %v34957_v38 = vld [vmem:[#allocation3 + $0xb2] sm:$0xff] }
 0xc36   :  { %14327 = vst.msk [vmem:[#allocation3 + $0x121] sm:$0xff] %vm117_vm3, %v14310_v22  ;;  %v34800_v7 = vld [vmem:[#allocation3 + $0xd1] sm:$0xff]  ;;  %v34887_v9 = vld [vmem:[#allocation3 + $0xe0] sm:$0xff] }
 0xc37   :  { %14326 = vst.msk [vmem:[#allocation3 + $0x111] sm:$0xff] %vm117_vm3, %v14309_v54  ;;  %27023 = vmatmul.mubr.msk.f32.gmra.mrb[58].mxu1 %vm117_vm3, %v34800_v7  ;;  %v34883_v62 = vld [vmem:[#allocation3 + $0xd0] sm:$0xff]  ;;  %v34920_v46 = vld [vmem:[#allocation3 + $0x22] sm:$0xff]  ;;  %v22692_v21 = vld [vmem:[%s36885_s13 + $0x118] sm:$0xff] }
 0xc38   :  { %27025 = vmatprep.mubr.msk.f32.mxu1 %vm117_vm3, %v34805_v11  ;;  %v34924_v22 = vld [vmem:[#allocation3 + $0x32] sm:$0xff]  ;;  %v34961_v3 = vld [vmem:[#allocation3 + $0xc2] sm:$0xff] }
 0xc39   :  { %v34813_v35 = vld [vmem:[#allocation3 + $0x101] sm:$0xff]  ;;  %v22671_v54 = vld [vmem:[%s36885_s13 + $0xf0] sm:$0xff] }
 0xc3a   :  { %v34809_v58 = vld [vmem:[#allocation3 + $0xf1] sm:$0xff]  ;;  %v34895_v18 = vld [vmem:[#allocation3 + $0x100] sm:$0xff] }
 0xc3b   :  { %27026 = vmatmul.mubr.msk.f32.gmra.mrb[60].mxu1 %vm117_vm3, %v34809_v58  ;;  %v34891_v63 = vld [vmem:[#allocation3 + $0xf0] sm:$0xff]  ;;  %v34977_v37 = vld [vmem:[#allocation3 + $0x102] sm:$0xff] }
 0xc3c   :  { %27028 = vmatprep.mubr.msk.f32.mxu1 %vm117_vm3, %v34813_v35 }
 0xc3e   :  { %v34817_v36 = vld [vmem:[#allocation3 + $0x111] sm:$0xff] }
 0xc3f   :  { %27029 = vmatmul.mubr.msk.f32.gmra.mrb[62].mxu1 %vm117_vm3, %v34817_v36  ;;  %v34899_v44 = vld [vmem:[#allocation3 + $0x110] sm:$0xff] }
 0xc40   :  { %27047 = vmatprep.mubr.msk.f32.mxu1 %vm117_vm3, %v14328_v28  ;;  %v22672_v28 = vld [vmem:[%s36885_s13 + $0xf8] sm:$0xff] }
 0xc41   :  { %v28587_v57 = vpack.c.bf16 %v22672_v28, %v22671_v54  ;;  %v34981_v12 = vld [vmem:[#allocation3 + $0x112] sm:$0xff]  ;;  %v22694_v54 = vld [vmem:[%s36885_s13 + $0x128] sm:$0xff] }
 0xc43   :  { %27048 = vmatmul.mubr.msk.f32.vlgmr.msra.gmra.mrb[48].mxu1 %vm117_vm3, %v34828_v39 }
 0xc44   :  { %27050 = vmatprep.mubr.msk.f32.mxu1 %vm117_vm3, %v34838_v13  ;;  %28562 = vmatpush3.bf16.msra.mxu1 %v28559_v30  ;;  %v14763_v30 = vld [vmem:[#allocation3 + $0x2] sm:$0xff] }
 0xc45   :  { %28564 = vmatprep.subr.bf16.mxu1 %v28563_v47 }
 0xc47   :  { %27051 = vmatmul.mubr.msk.f32.gmra.mrb[50].mxu1 %vm117_vm3, %v34842_v24 }
 0xc48   :  { %27053 = vmatprep.mubr.msk.f32.mxu1 %vm117_vm3, %v34852_v20  ;;  %28566 = vmatpush3.bf16.msra.mxu1 %v28563_v47  ;;  %v34938_v47 = vld [vmem:[#allocation3 + $0x52] sm:$0xff] }
 0xc49   :  { %28568 = vmatprep.subr.bf16.mxu1 %v28567_v15 }
 0xc4b   :  { %27054 = vmatmul.mubr.msk.f32.gmra.mrb[52].mxu1 %vm117_vm3, %v34856_v26 }
 0xc4c   :  { %27056 = vmatprep.mubr.msk.f32.mxu1 %vm117_vm3, %v34866_v34  ;;  %28570 = vmatpush3.bf16.msra.mxu1 %v28567_v15  ;;  %v34948_v15 = vld [vmem:[#allocation3 + $0x62] sm:$0xff] }
 0xc4d   :  { %28572 = vmatprep.subr.bf16.mxu1 %v28571_v31 }
 0xc4f   :  { %27057 = vmatmul.mubr.msk.f32.gmra.mrb[54].mxu1 %vm117_vm3, %v34870_v48 }
 0xc50   :  { %27059 = vmatprep.mubr.msk.f32.mxu1 %vm117_vm3, %v14336_v32  ;;  %28574 = vmatpush3.bf16.msra.mxu1 %v28571_v31  ;;  %v34952_v31 = vld [vmem:[#allocation3 + $0x72] sm:$0xff] }
 0xc51   :  { %28576 = vmatprep.subr.bf16.mxu1 %v28575_v14  ;;  %v34965_v32 = vld [vmem:[#allocation3 + $0xd2] sm:$0xff] }
 0xc53   :  { %27060 = vmatmul.mubr.msk.f32.gmra.mrb[56].mxu1 %vm117_vm3, %v34875_v49 }
 0xc54   :  { %27062 = vmatprep.mubr.msk.f32.mxu1 %vm117_vm3, %v34879_v60 }
 0xc57   :  { %27063 = vmatmul.mubr.msk.f32.gmra.mrb[58].mxu1 %vm117_vm3, %v34883_v62 }
 0xc58   :  { %27065 = vmatprep.mubr.msk.f32.mxu1 %vm117_vm3, %v34887_v9 }
 0xc5b   :  { %27066 = vmatmul.mubr.msk.f32.gmra.mrb[60].mxu1 %vm117_vm3, %v34891_v63 }
 0xc5c   :  { %27068 = vmatprep.mubr.msk.f32.mxu1 %vm117_vm3, %v34895_v18 }
 0xc5f   :  { %27069 = vmatmul.mubr.msk.f32.gmra.mrb[62].mxu1 %vm117_vm3, %v34899_v44 }
 0xc60   :  { %27087 = vmatprep.mubr.msk.f32.mxu1 %vm117_vm3, %v14763_v30  ;;  %v34973_v30 = vld [vmem:[#allocation3 + $0xf2] sm:$0xff] }
 0xc63   :  { %27088 = vmatmul.mubr.msk.f32.vlgmr.msra.gmra.mrb[48].mxu1 %vm117_vm3, %v34910_v61 }
 0xc64   :  { %27090 = vmatprep.mubr.msk.f32.mxu1 %vm117_vm3, %v34920_v46  ;;  %28578 = vmatpush3.bf16.msra.mxu1 %v28575_v14  ;;  %v34969_v14 = vld [vmem:[#allocation3 + $0xe2] sm:$0xff] }
 0xc65   :  { %28580 = vmatprep.subr.bf16.mxu1 %v28579_v50 }
 0xc67   :  { %27091 = vmatmul.mubr.msk.f32.gmra.mrb[50].mxu1 %vm117_vm3, %v34924_v22 }
 0xc68   :  { %27093 = vmatprep.mubr.msk.f32.mxu1 %vm117_vm3, %v34934_v6  ;;  %28582 = vmatpush3.bf16.msra.mxu1 %v28579_v50  ;;  %v22691_v50 = vld [vmem:[%s36885_s13 + $0x110] sm:$0xff] }
 0xc69   :  { %28584 = vmatprep.subr.bf16.mxu1 %v28583_v2  ;;  %v28595_v5 = vpack.c.bf16 %v22692_v21, %v22691_v50  ;;  %v35023_v50 = vld [vmem:[#allocation3 + $0x80] sm:$0xff]  ;;  %v22715_v21 = vld [vmem:[%s36885_s13 + $0x150] sm:$0xff] }
 0xc6b   :  { %27094 = vmatmul.mubr.msk.f32.gmra.mrb[52].mxu1 %vm117_vm3, %v34938_v47 }
 0xc6c   :  { %27096 = vmatprep.mubr.msk.f32.mxu1 %vm117_vm3, %v34948_v15  ;;  %28586 = vmatpush3.bf16.msra.mxu1 %v28583_v2  ;;  %v22693_v2 = vld [vmem:[%s36885_s13 + $0x120] sm:$0xff] }
 0xc6d   :  { %28588 = vmatprep.subr.bf16.mxu1 %v28587_v57  ;;  %v28599_v28 = vpack.c.bf16 %v22694_v54, %v22693_v2  ;;  %v22717_v54 = vld [vmem:[%s36885_s13 + $0x160] sm:$0xff] }
 0xc6f   :  { %27097 = vmatmul.mubr.msk.f32.gmra.mrb[54].mxu1 %vm117_vm3, %v34952_v31 }
 0xc70   :  { %27099 = vmatprep.mubr.msk.f32.mxu1 %vm117_vm3, %v14771_v8  ;;  %28590 = vmatpush3.bf16.msra.mxu1 %v28587_v57  ;;  %v22696_v57 = vld [vmem:[%s36885_s13 + $0x138] sm:$0xff]  ;;  %v22714_v8 = vld [vmem:[%s36885_s13 + $0x148] sm:$0xff] }
 0xc71   :  { %28592 = vmatprep.subr.bf16.mxu1 %v28591_v29 }
 0xc73   :  { %27100 = vmatmul.mubr.msk.f32.gmra.mrb[56].mxu1 %vm117_vm3, %v34957_v38 }
 0xc74   :  { %27102 = vmatprep.mubr.msk.f32.mxu1 %vm117_vm3, %v34961_v3 }
 0xc77   :  { %27103 = vmatmul.mubr.msk.f32.gmra.mrb[58].mxu1 %vm117_vm3, %v34965_v32 }
 0xc78   :  { %27105 = vmatprep.mubr.msk.f32.mxu1 %vm117_vm3, %v34969_v14 }
 0xc7b   :  { %27106 = vmatmul.mubr.msk.f32.gmra.mrb[60].mxu1 %vm117_vm3, %v34973_v30 }
 0xc7c   :  { %27108 = vmatprep.mubr.msk.f32.mxu1 %vm117_vm3, %v34977_v37 }
 0xc7f   :  { %27109 = vmatmul.mubr.msk.f32.gmra.mrb[62].mxu1 %vm117_vm3, %v34981_v12 }
 0xc80   :  { %27127 = vmatprep.mubr.msk.f32.mxu1 %vm117_vm3, %v34828_v39  ;;  %v22695_v39 = vld [vmem:[%s36885_s13 + $0x130] sm:$0xff] }
 0xc81   :  { %v28603_v0 = vpack.c.bf16 %v22696_v57, %v22695_v39  ;;  %v22720_v57 = vld [vmem:[%s36885_s13 + $0x178] sm:$0xff] }
 0xc83   :  { %27128 = vmatmul.mubr.msk.f32.vlgmr.msra.gmra.mrb[48].mxu1 %vm117_vm3, %v34838_v13 }
 0xc84   :  { %27130 = vmatprep.mubr.msk.f32.mxu1 %vm117_vm3, %v34842_v24  ;;  %28594 = vmatpush3.bf16.msra.mxu1 %v28591_v29  ;;  %v28607_v29 = vpack.c.bf16 %v22714_v8, %v22713_v56  ;;  %v22737_v56 = vld [vmem:[%s36885_s13 + $0x180] sm:$0xff]  ;;  %v22738_v8 = vld [vmem:[%s36885_s13 + $0x188] sm:$0xff] }
 0xc85   :  { %28596 = vmatprep.subr.bf16.mxu1 %v28595_v5 }
 0xc87   :  { %27131 = vmatmul.mubr.msk.f32.gmra.mrb[50].mxu1 %vm117_vm3, %v34852_v20 }
 0xc88   :  { %27133 = vmatprep.mubr.msk.f32.mxu1 %vm117_vm3, %v34856_v26  ;;  %28598 = vmatpush3.bf16.msra.mxu1 %v28595_v5  ;;  %v22716_v5 = vld [vmem:[%s36885_s13 + $0x158] sm:$0xff] }
 0xc89   :  { %28600 = vmatprep.subr.bf16.mxu1 %v28599_v28  ;;  %v28611_v2 = vpack.c.bf16 %v22716_v5, %v22715_v21  ;;  %v35083_v21 = vld [vmem:[#allocation3 + $0x81] sm:$0xff]  ;;  %v22739_v5 = vld [vmem:[%s36885_s13 + $0x190] sm:$0xff] }
 0xc8b   :  { %27134 = vmatmul.mubr.msk.f32.gmra.mrb[52].mxu1 %vm117_vm3, %v34866_v34 }
 0xc8c   :  { %27136 = vmatprep.mubr.msk.f32.mxu1 %vm117_vm3, %v34870_v48  ;;  %28602 = vmatpush3.bf16.msra.mxu1 %v28599_v28  ;;  %v22718_v28 = vld [vmem:[%s36885_s13 + $0x168] sm:$0xff] }
 0xc8d   :  { %28604 = vmatprep.subr.bf16.mxu1 %v28603_v0  ;;  %v28615_v39 = vpack.c.bf16 %v22718_v28, %v22717_v54  ;;  %v22741_v28 = vld [vmem:[%s36885_s13 + $0x1a0] sm:$0xff] }
 0xc8f   :  { %27137 = vmatmul.mubr.msk.f32.gmra.mrb[54].mxu1 %vm117_vm3, %v35023_v50 }
 0xc90   :  { %27139 = vmatprep.mubr.msk.f32.mxu1 %vm117_vm3, %v34875_v49  ;;  %28606 = vmatpush3.bf16.msra.mxu1 %v28603_v0  ;;  %v35041_v49 = vld [vmem:[#allocation3 + $0x120] sm:$0xff] }
 0xc91   :  { %28608 = vmatprep.subr.bf16.mxu1 %v28607_v29 }
 0xc93   :  { %27140 = vmatmul.mubr.msk.f32.gmra.mrb[56].mxu1 %vm117_vm3, %v34879_v60 }
 0xc94   :  { %27142 = vmatprep.mubr.msk.f32.mxu1 %vm117_vm3, %v34883_v62 }
 0xc97   :  { %27143 = vmatmul.mubr.msk.f32.gmra.mrb[58].mxu1 %vm117_vm3, %v34887_v9 }
 0xc98   :  { %27145 = vmatprep.mubr.msk.f32.mxu1 %vm117_vm3, %v34891_v63 }
 0xc9b   :  { %27146 = vmatmul.mubr.msk.f32.gmra.mrb[60].mxu1 %vm117_vm3, %v34895_v18 }
 0xc9c   :  { %27148 = vmatprep.mubr.msk.f32.mxu1 %vm117_vm3, %v34899_v44 }
 0xc9f   :  { %27149 = vmatmul.mubr.msk.f32.gmra.mrb[62].mxu1 %vm117_vm3, %v35041_v49 }
 0xca0   :  { %27167 = vmatprep.mubr.msk.f32.mxu1 %vm117_vm3, %v34726_v4  ;;  %v22719_v4 = vld [vmem:[%s36885_s13 + $0x170] sm:$0xff] }
 0xca1   :  { %v28619_v0 = vpack.c.bf16 %v22720_v57, %v22719_v4  ;;  %v22744_v57 = vld [vmem:[%s36885_s13 + $0x1b8] sm:$0xff] }
 0xca3   :  { %27168 = vmatmul.mubr.msk.f32.vlgmr.msra.gmra.mrb[48].mxu1 %vm117_vm3, %v34738_v45 }
 0xca4   :  { %27170 = vmatprep.mubr.msk.f32.mxu1 %vm117_vm3, %v34744_v25  ;;  %28610 = vmatpush3.bf16.msra.mxu1 %v28607_v29  ;;  %v28623_v29 = vpack.c.bf16 %v22738_v8, %v22737_v56  ;;  %v22761_v56 = vld [vmem:[%s36885_s13 + $0x1c0] sm:$0xff]  ;;  %v22762_v8 = vld [vmem:[%s36885_s13 + $0x1c8] sm:$0xff] }
 0xca5   :  { %28612 = vmatprep.subr.bf16.mxu1 %v28611_v2 }
 0xca7   :  { %27171 = vmatmul.mubr.msk.f32.gmra.mrb[50].mxu1 %vm117_vm3, %v34756_v51 }
 0xca8   :  { %27173 = vmatprep.mubr.msk.f32.mxu1 %vm117_vm3, %v34762_v59  ;;  %28614 = vmatpush3.bf16.msra.mxu1 %v28611_v2  ;;  %v22740_v2 = vld [vmem:[%s36885_s13 + $0x198] sm:$0xff] }
 0xca9   :  { %28616 = vmatprep.subr.bf16.mxu1 %v28615_v39  ;;  %v28627_v54 = vpack.c.bf16 %v22740_v2, %v22739_v5  ;;  %v35143_v5 = vld [vmem:[#allocation3 + $0x82] sm:$0xff]  ;;  %v22763_v2 = vld [vmem:[%s36885_s13 + $0x1d0] sm:$0xff] }
 0xcab   :  { %27174 = vmatmul.mubr.msk.f32.gmra.mrb[52].mxu1 %vm117_vm3, %v34774_v43 }
 0xcac   :  { %27176 = vmatprep.mubr.msk.f32.mxu1 %vm117_vm3, %v34780_v1  ;;  %28618 = vmatpush3.bf16.msra.mxu1 %v28615_v39  ;;  %v22742_v39 = vld [vmem:[%s36885_s13 + $0x1a8] sm:$0xff] }
 0xcad   :  { %28620 = vmatprep.subr.bf16.mxu1 %v28619_v0  ;;  %v28631_v4 = vpack.c.bf16 %v22742_v39, %v22741_v28  ;;  %v22827_v28 = vld [vmem:[%s36889_s17 + $0x40] sm:$0xff]  ;;  %v22828_v39 = vld [vmem:[%s36889_s17 + $0x48] sm:$0xff] }
 0xcaf   :  { %27177 = vmatmul.mubr.msk.f32.gmra.mrb[54].mxu1 %vm117_vm3, %v35083_v21 }
 0xcb0   :  { %27179 = vmatprep.mubr.msk.f32.mxu1 %vm117_vm3, %v34789_v23  ;;  %28622 = vmatpush3.bf16.msra.mxu1 %v28619_v0  ;;  %v35101_v23 = vld [vmem:[#allocation3 + $0x121] sm:$0xff] }
 0xcb1   :  { %28624 = vmatprep.subr.bf16.mxu1 %v28623_v29 }
 0xcb3   :  { %27180 = vmatmul.mubr.msk.f32.gmra.mrb[56].mxu1 %vm117_vm3, %v34795_v19 }
 0xcb4   :  { %27182 = vmatprep.mubr.msk.f32.mxu1 %vm117_vm3, %v34800_v7 }
 0xcb7   :  { %27183 = vmatmul.mubr.msk.f32.gmra.mrb[58].mxu1 %vm117_vm3, %v34805_v11 }
 0xcb8   :  { %27185 = vmatprep.mubr.msk.f32.mxu1 %vm117_vm3, %v34809_v58 }
 0xcbb   :  { %27186 = vmatmul.mubr.msk.f32.gmra.mrb[60].mxu1 %vm117_vm3, %v34813_v35 }
 0xcbc   :  { %27188 = vmatprep.mubr.msk.f32.mxu1 %vm117_vm3, %v34817_v36 }
 0xcbf   :  { %27189 = vmatmul.mubr.msk.f32.gmra.mrb[62].mxu1 %vm117_vm3, %v35101_v23 }
 0xcc0   :  { %27207 = vmatprep.mubr.msk.f32.mxu1 %vm117_vm3, %v34910_v61  ;;  %v22743_v61 = vld [vmem:[%s36885_s13 + $0x1b0] sm:$0xff] }
 0xcc1   :  { %v28635_v0 = vpack.c.bf16 %v22744_v57, %v22743_v61  ;;  %v28679_v61 = vpack.c.bf16 %v22828_v39, %v22827_v28  ;;  %v22830_v57 = vld [vmem:[%s36889_s17 + $0x58] sm:$0xff]  ;;  %v16701_v28 = vld [vmem:[#allocation3 + $0x1] sm:$0xff] }
 0xcc2   :  { %27399 = vmatprep.mubr.msk.f32.mxu0 %vm117_vm3, %v16701_v28  ;;  %v16693_v39 = vld [vmem:[%s36889_s17] sm:$0xff] }
 0xcc3   :  { %27208 = vmatmul.mubr.msk.f32.vlgmr.msra.gmra.mrb[48].mxu1 %vm117_vm3, %v34920_v46  ;;  %28680 = vmatprep.subr.bf16.mxu0 %v28679_v61 }
 0xcc4   :  { %27210 = vmatprep.mubr.msk.f32.mxu1 %vm117_vm3, %v34924_v22  ;;  %28626 = vmatpush3.bf16.msra.mxu1 %v28623_v29  ;;  %v28639_v29 = vpack.c.bf16 %v22762_v8, %v22761_v56  ;;  %v22765_v8 = vld [vmem:[%s36885_s13 + $0x1e0] sm:$0xff] }
 0xcc5   :  { %28628 = vmatprep.subr.bf16.mxu1 %v28627_v54  ;;  %28682 = vmatpush3.bf16.msra.mxu0 %v28679_v61 }
 0xcc7   :  { %27211 = vmatmul.mubr.msk.f32.gmra.mrb[50].mxu1 %vm117_vm3, %v34934_v6 }
 0xcc8   :  { %27213 = vmatprep.mubr.msk.f32.mxu1 %vm117_vm3, %v34938_v47  ;;  %28630 = vmatpush3.bf16.msra.mxu1 %v28627_v54  ;;  %v22764_v54 = vld [vmem:[%s36885_s13 + $0x1d8] sm:$0xff] }
 0xcc9   :  { %28632 = vmatprep.subr.bf16.mxu1 %v28631_v4 }
 0xccb   :  { %27214 = vmatmul.mubr.msk.f32.gmra.mrb[52].mxu1 %vm117_vm3, %v34948_v15 }
 0xccc   :  { %27216 = vmatprep.mubr.msk.f32.mxu1 %vm117_vm3, %v34952_v31  ;;  %28634 = vmatpush3.bf16.msra.mxu1 %v28631_v4  ;;  %v22829_v4 = vld [vmem:[%s36889_s17 + $0x50] sm:$0xff] }
 0xccd   :  { %28636 = vmatprep.subr.bf16.mxu1 %v28635_v0  ;;  %v28683_v56 = vpack.c.bf16 %v22830_v57, %v22829_v4  ;;  %v16694_v4 = vld [vmem:[%s36889_s17 + $0x8] sm:$0xff]  ;;  %v22809_v57 = vld [vmem:[%s36886_s14] ss:$0 sm:$0xff] }
 0xcce   :  { %v28695_v61 = vpack.c.bf16 %v16694_v4, %v16693_v39  ;;  %v16709_v4 = vld [vmem:[#allocation3 + $0xa1] sm:$0xff] }
 0xccf   :  { %27217 = vmatmul.mubr.msk.f32.gmra.mrb[54].mxu1 %vm117_vm3, %v35143_v5  ;;  %28684 = vmatprep.subr.bf16.mxu0 %v28683_v56 }
 0xcd0   :  { %27219 = vmatprep.mubr.msk.f32.mxu1 %vm117_vm3, %v34957_v38  ;;  %28638 = vmatpush3.bf16.msra.mxu1 %v28635_v0  ;;  %v35161_v38 = vld [vmem:[#allocation3 + $0x122] sm:$0xff]  ;;  %v28643_v0 = vpack.c.bf16 %v22764_v54, %v22763_v2  ;;  %v22767_v2 = vld [vmem:[%s36885_s13 + $0x1f0] sm:$0xff]  ;;  %v22768_v54 = vld [vmem:[%s36885_s13 + $0x1f8] sm:$0xff] }
 0xcd1   :  { %28640 = vmatprep.subr.bf16.mxu1 %v28639_v29  ;;  %28686 = vmatpush3.bf16.msra.mxu0 %v28683_v56 }
 0xcd3   :  { %27220 = vmatmul.mubr.msk.f32.gmra.mrb[56].mxu1 %vm117_vm3, %v34961_v3 }
 0xcd4   :  { %27222 = vmatprep.mubr.msk.f32.mxu1 %vm117_vm3, %v34965_v32 }
 0xcd7   :  { %27223 = vmatmul.mubr.msk.f32.gmra.mrb[58].mxu1 %vm117_vm3, %v34969_v14 }
 0xcd8   :  { %27225 = vmatprep.mubr.msk.f32.mxu1 %vm117_vm3, %v34973_v30 }
 0xcdb   :  { %27226 = vmatmul.mubr.msk.f32.gmra.mrb[60].mxu1 %vm117_vm3, %v34977_v37 }
 0xcdc   :  { %27228 = vmatprep.mubr.msk.f32.mxu1 %vm117_vm3, %v34981_v12 }
 0xcdf   :  { %27229 = vmatmul.mubr.msk.f32.gmra.mrb[62].mxu1 %vm117_vm3, %v35161_v38 }
 0xce0   :  { %27247 = vmatprep.mubr.msk.f32.mxu1 %vm117_vm3, %v34838_v13  ;;  %v28647_v13 = vpack.c.bf16 %v22766_v52, %v22765_v8  ;;  %v22785_v52 = vld [vmem:[%s36885_s13 + $0x200] sm:$0xff] }
 0xce3   :  { %27248 = vmatmul.mubr.msk.f32.vlgmr.msra.gmra.mrb[48].mxu1 %vm117_vm3, %v34842_v24  ;;  %v28651_v24 = vpack.c.bf16 %v22768_v54, %v22767_v2 }
 0xce4   :  { %27250 = vmatprep.mubr.msk.f32.mxu1 %vm117_vm3, %v34852_v20  ;;  %28642 = vmatpush3.bf16.msra.mxu1 %v28639_v29  ;;  %v22786_v20 = vld [vmem:[%s36885_s13 + $0x208] sm:$0xff]  ;;  %v22833_v29 = vld [vmem:[%s36889_s17 + $0x70] sm:$0xff] }
 0xce5   :  { %28644 = vmatprep.subr.bf16.mxu1 %v28643_v0 }
 0xce7   :  { %27251 = vmatmul.mubr.msk.f32.gmra.mrb[50].mxu1 %vm117_vm3, %v34856_v26  ;;  %v15707_v26 = vld [vmem:[#allocation3 + $0x90] sm:$0xff] }
 0xce8   :  { %27253 = vmatprep.mubr.msk.f32.mxu1 %vm117_vm3, %v34866_v34  ;;  %28646 = vmatpush3.bf16.msra.mxu1 %v28643_v0  ;;  %v28655_v34 = vpack.c.bf16 %v22786_v20, %v22785_v52  ;;  %v22810_v0 = vld [vmem:[%s36888_s16] ss:$0 sm:$0xff] }
 0xce9   :  { %28648 = vmatprep.subr.bf16.mxu1 %v28647_v13 }
 0xceb   :  { %27254 = vmatmul.mubr.msk.f32.gmra.mrb[52].mxu1 %vm117_vm3, %v34870_v48  ;;  %v15715_v48 = vld [vmem:[#allocation3 + $0x130] sm:$0xff] }
 0xcec   :  { %27256 = vmatprep.mubr.msk.f32.mxu1 %vm117_vm3, %v35023_v50  ;;  %28650 = vmatpush3.bf16.msra.mxu1 %v28647_v13  ;;  %v22792_v50 = vld [vmem:[%s36885_s13 + $0x238] sm:$0xff]  ;;  %v35394_v13 = vadd.f32 %v22810_v0, %v22809_v57 }
 0xced   :  { %28652 = vmatprep.subr.bf16.mxu1 %v28651_v24 }
 0xcef   :  { %27257 = vmatmul.mubr.msk.f32.gmra.mrb[54].mxu1 %vm117_vm3, %v15707_v26 }
 0xcf0   :  { %27259 = vmatprep.mubr.msk.f32.mxu1 %vm117_vm3, %v34879_v60  ;;  %28654 = vmatpush3.bf16.msra.mxu1 %v28651_v24  ;;  %v22787_v60 = vld [vmem:[%s36885_s13 + $0x210] sm:$0xff] }
 0xcf1   :  { %28656 = vmatprep.subr.bf16.mxu1 %v28655_v34 }
 0xcf3   :  { %27260 = vmatmul.mubr.msk.f32.gmra.mrb[56].mxu1 %vm117_vm3, %v34883_v62  ;;  %v22788_v62 = vld [vmem:[%s36885_s13 + $0x218] sm:$0xff] }
 0xcf4   :  { %27262 = vmatprep.mubr.msk.f32.mxu1 %vm117_vm3, %v34887_v9  ;;  %v28659_v9 = vpack.c.bf16 %v22788_v62, %v22787_v60 }
 0xcf7   :  { %27263 = vmatmul.mubr.msk.f32.gmra.mrb[58].mxu1 %vm117_vm3, %v34891_v63  ;;  %v22789_v63 = vld [vmem:[%s36885_s13 + $0x220] sm:$0xff] }
 0xcf8   :  { %27265 = vmatprep.mubr.msk.f32.mxu1 %vm117_vm3, %v34895_v18  ;;  %v22790_v18 = vld [vmem:[%s36885_s13 + $0x228] sm:$0xff] }
 0xcfb   :  { %27266 = vmatmul.mubr.msk.f32.gmra.mrb[60].mxu1 %vm117_vm3, %v34899_v44  ;;  %v28663_v44 = vpack.c.bf16 %v22790_v18, %v22789_v63 }
 0xcfc   :  { %27268 = vmatprep.mubr.msk.f32.mxu1 %vm117_vm3, %v35041_v49  ;;  %v16426_v49 = vld [vmem:[%s36887_s15 + $0x8] sm:$0xff] }
 0xcff   :  { %27269 = vmatmul.mubr.msk.f32.gmra.mrb[62].mxu1 %vm117_vm3, %v15715_v48 }
 0xd00   :  { %27287 = vmatprep.mubr.msk.f32.mxu1 %vm117_vm3, %v34738_v45  ;;  %v22791_v45 = vld [vmem:[%s36885_s13 + $0x230] sm:$0xff] }
 0xd03   :  { %27288 = vmatmul.mubr.msk.f32.vlgmr.msra.gmra.mrb[48].mxu1 %vm117_vm3, %v34744_v25  ;;  %v28667_v25 = vpack.c.bf16 %v22792_v50, %v22791_v45 }
 0xd04   :  { %27290 = vmatprep.mubr.msk.f32.mxu1 %vm117_vm3, %v34756_v51  ;;  %28658 = vmatpush3.bf16.msra.mxu1 %v28655_v34  ;;  %v16425_v51 = vld [vmem:[%s36887_s15] sm:$0xff] }
 0xd05   :  { %28660 = vmatprep.subr.bf16.mxu1 %v28659_v9 }
 0xd07   :  { %27291 = vmatmul.mubr.msk.f32.gmra.mrb[50].mxu1 %vm117_vm3, %v34762_v59  ;;  %v15941_v59 = vld [vmem:[#allocation3 + $0x91] sm:$0xff] }
 0xd08   :  { %27293 = vmatprep.mubr.msk.f32.mxu1 %vm117_vm3, %v34774_v43  ;;  %28662 = vmatpush3.bf16.msra.mxu1 %v28659_v9  ;;  %v28671_v43 = vpack.c.bf16 %v16426_v49, %v16425_v51  ;;  %v16695_v51 = vld [vmem:[%s36889_s17 + $0x10] sm:$0xff]  ;;  %v16696_v49 = vld [vmem:[%s36889_s17 + $0x18] sm:$0xff] }
 0xd09   :  { %28664 = vmatprep.subr.bf16.mxu1 %v28663_v44 }
 0xd0b   :  { %27294 = vmatmul.mubr.msk.f32.gmra.mrb[52].mxu1 %vm117_vm3, %v34780_v1  ;;  %v15949_v1 = vld [vmem:[#allocation3 + $0x131] sm:$0xff] }
 0xd0c   :  { %27296 = vmatprep.mubr.msk.f32.mxu1 %vm117_vm3, %v35083_v21  ;;  %28666 = vmatpush3.bf16.msra.mxu1 %v28663_v44  ;;  %v22832_v21 = vld [vmem:[%s36889_s17 + $0x68] sm:$0xff] }
 0xd0d   :  { %28668 = vmatprep.subr.bf16.mxu1 %v28667_v25 }
 0xd0f   :  { %27297 = vmatmul.mubr.msk.f32.gmra.mrb[54].mxu1 %vm117_vm3, %v15941_v59 }
 0xd10   :  { %27299 = vmatprep.mubr.msk.f32.mxu1 %vm117_vm3, %v34795_v19  ;;  %28670 = vmatpush3.bf16.msra.mxu1 %v28667_v25  ;;  %v16427_v19 = vld [vmem:[%s36887_s15 + $0x10] sm:$0xff] }
 0xd11   :  { %28672 = vmatprep.subr.bf16.mxu1 %v28671_v43 }
 0xd13   :  { %27300 = vmatmul.mubr.msk.f32.gmra.mrb[56].mxu1 %vm117_vm3, %v34800_v7  ;;  %v16428_v7 = vld [vmem:[%s36887_s15 + $0x18] sm:$0xff] }
 0xd14   :  { %27302 = vmatprep.mubr.msk.f32.mxu1 %vm117_vm3, %v34805_v11  ;;  %v28675_v11 = vpack.c.bf16 %v16428_v7, %v16427_v19 }
 0xd17   :  { %27303 = vmatmul.mubr.msk.f32.gmra.mrb[58].mxu1 %vm117_vm3, %v34809_v58  ;;  %v16175_v58 = vld [vmem:[#allocation3 + $0x92] sm:$0xff] }
 0xd18   :  { %27305 = vmatprep.mubr.msk.f32.mxu1 %vm117_vm3, %v34813_v35  ;;  %v16183_v35 = vld [vmem:[#allocation3 + $0x132] sm:$0xff] }
 0xd1b   :  { %27306 = vmatmul.mubr.msk.f32.gmra.mrb[60].mxu1 %vm117_vm3, %v34817_v36  ;;  %v37089_v36 = vmax.f32 %v33987_v55, 0.0  ;;  %v37094_v55 = vmax.f32 %v34016_v16, 0.0 }
 0xd1c   :  { %27308 = vmatprep.mubr.msk.f32.mxu1 %vm117_vm3, %v35101_v23 }
 0xd1f   :  { %27309 = vmatmul.mubr.msk.f32.gmra.mrb[62].mxu1 %vm117_vm3, %v15949_v1 }
 0xd20   :  { %27327 = vmatprep.mubr.msk.f32.mxu1 %vm117_vm3, %v34920_v46  ;;  %v37090_v46 = vmax.f32 %v33983_v53, 0.0  ;;  %v37095_v53 = vmax.f32 %v34055_v17, 0.0 }
 0xd23   :  { %27328 = vmatmul.mubr.msk.f32.vlgmr.msra.gmra.mrb[48].mxu1 %vm117_vm3, %v34924_v22  ;;  %v37091_v22 = vmax.f32 %v34005_v10, 0.0  ;;  %v37096_v10 = vmax.f32 %v34040_v41, 0.0 }
 0xd24   :  { %27330 = vmatprep.mubr.msk.f32.mxu1 %vm117_vm3, %v34934_v6  ;;  %28674 = vmatpush3.bf16.msra.mxu1 %v28671_v43  ;;  %v37092_v6 = vmax.f32 %v33998_v33, 0.0  ;;  %v37097_v33 = vmax.f32 %v34083_v27, 0.0 }
 0xd25   :  { %28676 = vmatprep.subr.bf16.mxu1 %v28675_v11 }
 0xd27   :  { %27331 = vmatmul.mubr.msk.f32.gmra.mrb[50].mxu1 %vm117_vm3, %v34938_v47  ;;  %v37093_v47 = vmax.f32 %v34029_v42, 0.0  ;;  %v37098_v42 = vmax.f32 %v34074_v40, 0.0 }
 0xd28   :  { %27333 = vmatprep.mubr.msk.f32.mxu1 %vm117_vm3, %v34948_v15  ;;  %28678 = vmatpush3.bf16.msra.mxu1 %v28675_v11  ;;  %v37099_v15 = vld [vmem:[#allocation15_spill] sm:$0xff]  ;;  %v28699_v11 = vpack.c.bf16 %v16696_v49, %v16695_v51 }
 0xd29   :  { %v37100_v16 = vmax.f32 %v37099_v15, 0.0 }
 0xd2b   :  { %27334 = vmatmul.mubr.msk.f32.gmra.mrb[52].mxu1 %vm117_vm3, %v34952_v31  ;;  %v37101_v31 = vld [vmem:[#allocation14_spill] sm:$0xff] }
 0xd2c   :  { %27336 = vmatprep.mubr.msk.f32.mxu1 %vm117_vm3, %v35143_v5  ;;  %v37102_v17 = vmax.f32 %v37101_v31, 0.0  ;;  %v22834_v5 = vld [vmem:[%s36889_s17 + $0x78] sm:$0xff] }
 0xd2d   :  { %v16700_v31 = vld [vmem:[%s36889_s17 + $0x38] sm:$0xff] }
 0xd2f   :  { %27337 = vmatmul.mubr.msk.f32.gmra.mrb[54].mxu1 %vm117_vm3, %v16175_v58 }
 0xd30   :  { %27339 = vmatprep.mubr.msk.f32.mxu1 %vm117_vm3, %v34961_v3  ;;  %v37103_v3 = vld [vmem:[#allocation17_spill] sm:$0xff] }
 0xd31   :  { %v37104_v41 = vmax.f32 %v37103_v3, 0.0 }
 0xd33   :  { %27340 = vmatmul.mubr.msk.f32.gmra.mrb[56].mxu1 %vm117_vm3, %v34965_v32  ;;  %v37105_v32 = vld [vmem:[#allocation16_spill] sm:$0xff] }
 0xd34   :  { %27342 = vmatprep.mubr.msk.f32.mxu1 %vm117_vm3, %v34969_v14  ;;  %v37106_v27 = vmax.f32 %v37105_v32, 0.0  ;;  %v37107_v14 = vld [vmem:[#allocation8_spill] sm:$0xff] }
 0xd35   :  { %v37108_v40 = vmax.f32 %v37107_v14, 0.0 }
 0xd37   :  { %27343 = vmatmul.mubr.msk.f32.gmra.mrb[58].mxu1 %vm117_vm3, %v34973_v30  ;;  %v37109_v30 = vld [vmem:[#allocation7_spill] sm:$0xff] }
 0xd38   :  { %27345 = vmatprep.mubr.msk.f32.mxu1 %vm117_vm3, %v34977_v37  ;;  %v37110_v37 = vmax.f32 %v37109_v30, 0.0 }
 0xd3b   :  { %27346 = vmatmul.mubr.msk.f32.gmra.mrb[60].mxu1 %vm117_vm3, %v34981_v12  ;;  %v22831_v12 = vld [vmem:[%s36889_s17 + $0x60] sm:$0xff] }
 0xd3c   :  { %27348 = vmatprep.mubr.msk.f32.mxu1 %vm117_vm3, %v35161_v38  ;;  %v28687_v23 = vpack.c.bf16 %v22832_v21, %v22831_v12  ;;  %v28691_v38 = vpack.c.bf16 %v22834_v5, %v22833_v29  ;;  %v22867_v12 = vld [vmem:[%s36889_s17 + $0x80] sm:$0xff]  ;;  %v22868_v21 = vld [vmem:[%s36889_s17 + $0x88] sm:$0xff] }
 0xd3e   :  { %28688 = vmatprep.subr.bf16.mxu0 %v28687_v23 }
 0xd3f   :  { %27349 = vmatmul.mubr.msk.f32.gmra.mrb[62].mxu1 %vm117_vm3, %v16183_v35  ;;  %28690 = vmatpush3.bf16.msra.mxu0 %v28687_v23 }
 0xd40   :  { %27359 = vmatprep.mubr.msk.f32.mxu1 %vm75_vm1, %v37089_v36  ;;  %28692 = vmatprep.subr.bf16.mxu0 %v28691_v38  ;;  %v16697_v36 = vld [vmem:[%s36889_s17 + $0x20] sm:$0xff] }
 0xd43   :  { %27360 = vmatmul.mubr.msk.f32.vlgmr.msra.gmra.mrb[48].mxu1 %vm75_vm1, %v37090_v46  ;;  %28694 = vmatpush3.bf16.msra.mxu0 %v28691_v38  ;;  %v16698_v46 = vld [vmem:[%s36889_s17 + $0x28] sm:$0xff] }
 0xd44   :  { %27362 = vmatprep.mubr.msk.f32.mxu1 %vm75_vm1, %v37091_v22  ;;  %28696 = vmatprep.subr.bf16.mxu0 %v28695_v61 }
 0xd47   :  { %27363 = vmatmul.mubr.msk.f32.gmra.mrb[50].mxu1 %vm75_vm1, %v37092_v6 }
 0xd48   :  { %27365 = vmatprep.mubr.msk.f32.mxu1 %vm75_vm1, %v37093_v47 }
 0xd4b   :  { %27366 = vmatmul.mubr.msk.f32.gmra.mrb[52].mxu1 %vm75_vm1, %v37094_v55 }
 0xd4c   :  { %27368 = vmatprep.mubr.msk.f32.mxu1 %vm75_vm1, %v37095_v53 }
 0xd4f   :  { %27369 = vmatmul.mubr.msk.f32.gmra.mrb[54].mxu1 %vm75_vm1, %v37096_v10 }
 0xd50   :  { %27371 = vmatprep.mubr.msk.f32.mxu1 %vm75_vm1, %v37097_v33  ;;  %v28703_v33 = vpack.c.bf16 %v16698_v46, %v16697_v36  ;;  %v22869_v46 = vld [vmem:[%s36889_s17 + $0x90] sm:$0xff] }
 0xd53   :  { %27372 = vmatmul.mubr.msk.f32.gmra.mrb[56].mxu1 %vm75_vm1, %v37098_v42 }
 0xd54   :  { %27374 = vmatprep.mubr.msk.f32.mxu1 %vm75_vm1, %v37100_v16  ;;  %v16699_v16 = vld [vmem:[%s36889_s17 + $0x30] sm:$0xff] }
 0xd57   :  { %27375 = vmatmul.mubr.msk.f32.gmra.mrb[58].mxu1 %vm75_vm1, %v37102_v17 }
 0xd58   :  { %27377 = vmatprep.mubr.msk.f32.mxu1 %vm75_vm1, %v37104_v41 }
 0xd5b   :  { %27378 = vmatmul.mubr.msk.f32.gmra.mrb[60].mxu1 %vm75_vm1, %v37106_v27 }
 0xd5c   :  { %27380 = vmatprep.mubr.msk.f32.mxu1 %vm75_vm1, %v37108_v40  ;;  %v28707_v40 = vpack.c.bf16 %v16700_v31, %v16699_v16  ;;  %v22871_v16 = vld [vmem:[%s36889_s17 + $0xa0] sm:$0xff]  ;;  %v22872_v31 = vld [vmem:[%s36889_s17 + $0xa8] sm:$0xff] }
 0xd5f   :  { %27381 = vmatmul.mubr.msk.f32.gmra.mrb[62].mxu1 %vm75_vm1, %v37110_v37 }
 0xe16   :  { %v27361_v56 = vpop.f32.mrb[48].mxu1 }
 0xe17   :  { %v29019_v8 = vadd.f32 %v27361_v56, %v22809_v57  ;;  %v16550_v2 = vpop.f32.mrb[49].mxu1 }
 0xe18   :  { %v29021_v54 = vadd.f32 %v22809_v57, %v16550_v2 }
 0xe19   :  { %v35396_v24 = vadd.f32 %v29019_v8, %v22810_v0 }
 0xe1a   :  { %v35398_v52 = vadd.f32 %v29021_v54, %v22810_v0  ;;  %v27364_v20 = vpop.f32.mrb[50].mxu1 }
 0xe1b   :  { %v36991_v26 = vmax.f32 %v35396_v24, 0.0  ;;  %v35402_v34 = vadd.f32 %v35394_v13, %v27364_v20  ;;  %v16560_v48 = vpop.f32.mrb[51].mxu1 }
 0xe1c   :  { %v36990_v60 = vmax.f32 %v35398_v52, 0.0  ;;  %v35406_v62 = vadd.f32 %v35394_v13, %v16560_v48 }
 0xe1d   :  { %16662 = vst.msk [vmem:[#allocation3 + $0x21] sm:$0xff] %vm117_vm3, %v36991_v26  ;;  %v36989_v9 = vmax.f32 %v35402_v34, 0.0  ;;  %v22920_v26 = vld [vmem:[%s36889_s17 + $0x128] sm:$0xff] }
 0xe1e   :  { %16661 = vst.msk [vmem:[#allocation3 + $0x11] sm:$0xff] %vm117_vm3, %v36990_v60  ;;  %v36988_v63 = vmax.f32 %v35406_v62, 0.0  ;;  %v27367_v18 = vpop.f32.mrb[52].mxu1  ;;  %v22919_v60 = vld [vmem:[%s36889_s17 + $0x120] sm:$0xff] }
 0xe1f   :  { %16664 = vst.msk [vmem:[#allocation3 + $0x41] sm:$0xff] %vm117_vm3, %v36989_v9  ;;  %v35420_v44 = vadd.f32 %v35394_v13, %v27367_v18  ;;  %v16570_v45 = vpop.f32.mrb[53].mxu1 }
 0xe20   :  { %16663 = vst.msk [vmem:[#allocation3 + $0x31] sm:$0xff] %vm117_vm3, %v36988_v63  ;;  %v35426_v50 = vadd.f32 %v35394_v13, %v16570_v45  ;;  %v22918_v63 = vld [vmem:[%s36889_s17 + $0x118] sm:$0xff] }
 0xe21   :  { %v36987_v25 = vmax.f32 %v35420_v44, 0.0 }
 0xe22   :  { %v36986_v59 = vmax.f32 %v35426_v50, 0.0  ;;  %v27370_v43 = vpop.f32.mrb[54].mxu1 }
 0xe23   :  { %16666 = vst.msk [vmem:[#allocation3 + $0x61] sm:$0xff] %vm117_vm3, %v36987_v25  ;;  %v35440_v1 = vadd.f32 %v35394_v13, %v27370_v43  ;;  %v16580_v19 = vpop.f32.mrb[55].mxu1  ;;  %v22917_v25 = vld [vmem:[%s36889_s17 + $0x110] sm:$0xff] }
 0xe24   :  { %16665 = vst.msk [vmem:[#allocation3 + $0x51] sm:$0xff] %vm117_vm3, %v36986_v59  ;;  %v35446_v7 = vadd.f32 %v35394_v13, %v16580_v19  ;;  %v35460_v47 = vld [vmem:[#allocation3 + $0x21] sm:$0xff]  ;;  %v28747_v9 = vpack.c.bf16 %v22918_v63, %v22917_v25  ;;  %v22921_v63 = vld [vmem:[%s36889_s17 + $0x130] sm:$0xff]  ;;  %v22922_v25 = vld [vmem:[%s36889_s17 + $0x138] sm:$0xff] }
 0xe25   :  { %v36985_v58 = vmax.f32 %v35440_v1, 0.0  ;;  %v35449_v35 = vld [vmem:[#allocation3 + $0x11] sm:$0xff] }
 0xe26   :  { %v36984_v22 = vmax.f32 %v35446_v7, 0.0  ;;  %v27373_v6 = vpop.f32.mrb[56].mxu1  ;;  %27400 = vmatmul.mubr.msk.f32.vlgmr.msra.gmra.mrb[64].mxu0 %vm117_vm3, %v35449_v35  ;;  %v35488_v41 = vld [vmem:[#allocation3 + $0x41] sm:$0xff] }
 0xe27   :  { %16668 = vst.msk [vmem:[#allocation3 + $0x81] sm:$0xff] %vm117_vm3, %v36985_v58  ;;  %v35466_v55 = vadd.f32 %v35394_v13, %v27373_v6  ;;  %v16590_v53 = vpop.f32.mrb[57].mxu1  ;;  %27402 = vmatprep.mubr.msk.f32.mxu0 %vm117_vm3, %v35460_v47  ;;  %28698 = vmatpush3.bf16.msra.mxu0 %v28695_v61  ;;  %v35477_v15 = vld [vmem:[#allocation3 + $0x31] sm:$0xff]  ;;  %v28711_v61 = vpack.c.bf16 %v22868_v21, %v22867_v12 }
 0xe28   :  { %16667 = vst.msk [vmem:[#allocation3 + $0x71] sm:$0xff] %vm117_vm3, %v36984_v22  ;;  %v35474_v10 = vadd.f32 %v35394_v13, %v16590_v53  ;;  %28700 = vmatprep.subr.bf16.mxu0 %v28699_v11  ;;  %v22870_v6 = vld [vmem:[%s36889_s17 + $0x98] sm:$0xff]  ;;  %v22873_v12 = vld [vmem:[%s36889_s17 + $0xb0] sm:$0xff] }
 0xe29   :  { %v36983_v42 = vmax.f32 %v35466_v55, 0.0  ;;  %v28715_v53 = vpack.c.bf16 %v22870_v6, %v22869_v46  ;;  %v22874_v21 = vld [vmem:[%s36889_s17 + $0xb8] sm:$0xff] }
 0xe2a   :  { %v36982_v17 = vmax.f32 %v35474_v10, 0.0  ;;  %v27376_v3 = vpop.f32.mrb[58].mxu1  ;;  %27403 = vmatmul.mubr.msk.f32.gmra.mrb[66].mxu0 %vm117_vm3, %v35477_v15  ;;  %v35516_v5 = vld [vmem:[#allocation3 + $0x61] sm:$0xff] }
 0xe2b   :  { %16670 = vst.msk [vmem:[#allocation3 + $0xc1] sm:$0xff] %vm117_vm3, %v36983_v42  ;;  %v35494_v32 = vadd.f32 %v35394_v13, %v27376_v3  ;;  %v16600_v27 = vpop.f32.mrb[59].mxu1  ;;  %27405 = vmatprep.mubr.msk.f32.mxu0 %vm117_vm3, %v35488_v41  ;;  %28702 = vmatpush3.bf16.msra.mxu0 %v28699_v11  ;;  %v35505_v37 = vld [vmem:[#allocation3 + $0x51] sm:$0xff]  ;;  %v16677_v11 = vld [vmem:[#allocation3] sm:$0xff]  ;;  %v22916_v42 = vld [vmem:[%s36889_s17 + $0x108] sm:$0xff] }
 0xe2c   :  { %16669 = vst.msk [vmem:[#allocation3 + $0xb1] sm:$0xff] %vm117_vm3, %v36982_v17  ;;  %v35502_v14 = vadd.f32 %v35394_v13, %v16600_v27  ;;  %28704 = vmatprep.subr.bf16.mxu0 %v28703_v33  ;;  %v35604_v3 = vld [vmem:[#allocation3 + $0x20] sm:$0xff]  ;;  %v28719_v27 = vpack.c.bf16 %v22872_v31, %v22871_v16 }
 0xe2d   :  { %37111 = vst [vmem:[#allocation9_spill] sm:$0xff] %v35494_v32  ;;  %v36981_v30 = vmax.f32 %v35494_v32, 0.0  ;;  %v35700_v17 = vld [vmem:[#allocation3 + $0x42] sm:$0xff] }
 0xe2e   :  { %37112 = vst [vmem:[#allocation10_spill] sm:$0xff] %v35502_v14  ;;  %v36980_v23 = vmax.f32 %v35502_v14, 0.0  ;;  %v27379_v29 = vpop.f32.mrb[60].mxu1  ;;  %27406 = vmatmul.mubr.msk.f32.gmra.mrb[68].mxu0 %vm117_vm3, %v35505_v37  ;;  %v35714_v22 = vld [vmem:[#allocation3 + $0x62] sm:$0xff] }
 0xe2f   :  { %16672 = vst.msk [vmem:[#allocation3 + $0xe1] sm:$0xff] %vm117_vm3, %v36981_v30  ;;  %v35522_v38 = vadd.f32 %v35394_v13, %v27379_v29  ;;  %v16610_v28 = vpop.f32.mrb[61].mxu1  ;;  %27408 = vmatprep.mubr.msk.f32.mxu0 %vm117_vm3, %v35516_v5  ;;  %28706 = vmatpush3.bf16.msra.mxu0 %v28703_v33  ;;  %v35533_v0 = vld [vmem:[#allocation3 + $0x71] sm:$0xff]  ;;  %v35618_v29 = vld [vmem:[#allocation3 + $0x40] sm:$0xff]  ;;  %v22968_v32 = vld [vmem:[%s36889_s17 + $0x1a8] sm:$0xff] }
 0xe30   :  { %16671 = vst.msk [vmem:[#allocation3 + $0xd1] sm:$0xff] %vm117_vm3, %v36980_v23  ;;  %v35530_v39 = vadd.f32 %v35394_v13, %v16610_v28  ;;  %28708 = vmatprep.subr.bf16.mxu0 %v28707_v40  ;;  %v35594_v33 = vld [vmem:[#allocation3 + $0x10] sm:$0xff]  ;;  %v28723_v28 = vpack.c.bf16 %v22874_v21, %v22873_v12  ;;  %v35686_v23 = vld [vmem:[#allocation3 + $0x22] sm:$0xff]  ;;  %v22898_v30 = vld [vmem:[%s36889_s17 + $0xf8] sm:$0xff] }
 0xe31   :  { %37113 = vst [vmem:[#allocation11_spill] sm:$0xff] %v35522_v38  ;;  %v36979_v57 = vmax.f32 %v35522_v38, 0.0  ;;  %v35636_v6 = vld [vmem:[#allocation3 + $0x70] sm:$0xff]  ;;  %v22967_v38 = vld [vmem:[%s36889_s17 + $0x1a0] sm:$0xff] }
 0xe32   :  { %37114 = vst [vmem:[#allocation12_spill] sm:$0xff] %v35530_v39  ;;  %v36978_v56 = vmax.f32 %v35530_v39, 0.0  ;;  %v27382_v8 = vpop.f32.mrb[62].mxu1  ;;  %27409 = vmatmul.mubr.msk.f32.gmra.mrb[70].mxu0 %vm117_vm3, %v35533_v0  ;;  %v35557_v51 = vld [vmem:[#allocation3 + $0xc1] sm:$0xff] }
 0xe33   :  { %16674 = vst.msk [vmem:[#allocation3 + $0x101] sm:$0xff] %vm117_vm3, %v36979_v57  ;;  %v35542_v2 = vadd.f32 %v35394_v13, %v27382_v8  ;;  %v16620_v54 = vpop.f32.mrb[63].mxu1  ;;  %27411 = vmatprep.mubr.msk.f32.mxu0 %vm117_vm3, %v16709_v4  ;;  %28710 = vmatpush3.bf16.msra.mxu0 %v28707_v40  ;;  %v35552_v18 = vld [vmem:[#allocation3 + $0xb1] sm:$0xff]  ;;  %v22892_v8 = vld [vmem:[%s36889_s17 + $0xc8] sm:$0xff]  ;;  %v35645_v16 = vld [vmem:[#allocation3 + $0xc0] sm:$0xff] }
 0xe34   :  { %16673 = vst.msk [vmem:[#allocation3 + $0xf1] sm:$0xff] %vm117_vm3, %v36978_v56  ;;  %v35549_v20 = vadd.f32 %v35394_v13, %v16620_v54  ;;  %28712 = vmatprep.subr.bf16.mxu0 %v28711_v61  ;;  %v35608_v40 = vld [vmem:[#allocation3 + $0x30] sm:$0xff]  ;;  %v35632_v54 = vld [vmem:[#allocation3 + $0x60] sm:$0xff]  ;;  %v22896_v57 = vld [vmem:[%s36889_s17 + $0xe8] sm:$0xff] }
 0xe35   :  { %37115 = vst [vmem:[#allocation13_spill] sm:$0xff] %v35542_v2  ;;  %v36977_v48 = vmax.f32 %v35542_v2, 0.0  ;;  %v35622_v4 = vld [vmem:[#allocation3 + $0x50] sm:$0xff]  ;;  %v22895_v56 = vld [vmem:[%s36889_s17 + $0xe0] sm:$0xff]  ;;  %v23039_v2 = vld [vmem:[%s36891_s19 + $0x58] sm:$0xff] }
 0xe36   :  { %37116 = vst [vmem:[#allocation15_spill] sm:$0xff] %v35549_v20  ;;  %v36976_v45 = vmax.f32 %v35549_v20, 0.0  ;;  %27412 = vmatmul.mubr.msk.f32.gmra.mrb[72].mxu0 %vm117_vm3, %v35552_v18  ;;  %v35571_v49 = vld [vmem:[#allocation3 + $0xe1] sm:$0xff]  ;;  %v35723_v58 = vld [vmem:[#allocation3 + $0xb2] sm:$0xff]  ;;  %v28751_v20 = vpack.c.bf16 %v22920_v26, %v22919_v60 }
 0xe37   :  { %16676 = vst.msk [vmem:[#allocation3 + $0x121] sm:$0xff] %vm117_vm3, %v36977_v48  ;;  %27414 = vmatprep.mubr.msk.f32.mxu0 %vm117_vm3, %v35557_v51  ;;  %v35567_v13 = vld [vmem:[#allocation3 + $0xd1] sm:$0xff]  ;;  %v35727_v59 = vld [vmem:[#allocation3 + $0xc2] sm:$0xff] }
 0xe38   :  { %16675 = vst.msk [vmem:[#allocation3 + $0x111] sm:$0xff] %vm117_vm3, %v36976_v45  ;;  %v35649_v31 = vld [vmem:[#allocation3 + $0xd0] sm:$0xff]  ;;  %v22939_v26 = vld [vmem:[%s36889_s17 + $0x140] sm:$0xff]  ;;  %v22940_v60 = vld [vmem:[%s36889_s17 + $0x148] sm:$0xff] }
 0xe39   :  { %v35676_v48 = vld [vmem:[#allocation3 + $0x12] sm:$0xff] }
 0xe3a   :  { %27415 = vmatmul.mubr.msk.f32.gmra.mrb[74].mxu0 %vm117_vm3, %v35567_v13  ;;  %v35579_v19 = vld [vmem:[#allocation3 + $0x101] sm:$0xff] }
 0xe3b   :  { %27417 = vmatprep.mubr.msk.f32.mxu0 %vm117_vm3, %v35571_v49  ;;  %v35575_v43 = vld [vmem:[#allocation3 + $0xf1] sm:$0xff]  ;;  %v35661_v21 = vld [vmem:[#allocation3 + $0x100] sm:$0xff] }
 0xe3c   :  { %v35657_v12 = vld [vmem:[#allocation3 + $0xf0] sm:$0xff] }
 0xe3e   :  { %27418 = vmatmul.mubr.msk.f32.gmra.mrb[76].mxu0 %vm117_vm3, %v35575_v43 }
 0xe3f   :  { %27420 = vmatprep.mubr.msk.f32.mxu0 %vm117_vm3, %v35579_v19  ;;  %v35583_v36 = vld [vmem:[#allocation3 + $0x111] sm:$0xff] }
 0xe42   :  { %27421 = vmatmul.mubr.msk.f32.gmra.mrb[78].mxu0 %vm117_vm3, %v35583_v36 }
 0xe43   :  { %27439 = vmatprep.mubr.msk.f32.mxu0 %vm117_vm3, %v16677_v11  ;;  %v16685_v11 = vld [vmem:[#allocation3 + $0xa0] sm:$0xff] }
 0xe46   :  { %27440 = vmatmul.mubr.msk.f32.vlgmr.msra.gmra.mrb[64].mxu0 %vm117_vm3, %v35594_v33 }
 0xe47   :  { %27442 = vmatprep.mubr.msk.f32.mxu0 %vm117_vm3, %v35604_v3  ;;  %28714 = vmatpush3.bf16.msra.mxu0 %v28711_v61  ;;  %v22891_v61 = vld [vmem:[%s36889_s17 + $0xc0] sm:$0xff] }
 0xe48   :  { %28716 = vmatprep.subr.bf16.mxu0 %v28715_v53  ;;  %v28727_v46 = vpack.c.bf16 %v22892_v8, %v22891_v61  ;;  %v35665_v61 = vld [vmem:[#allocation3 + $0x110] sm:$0xff] }
 0xe49   :  { %v22893_v8 = vld [vmem:[%s36889_s17 + $0xd0] sm:$0xff] }
 0xe4a   :  { %27443 = vmatmul.mubr.msk.f32.gmra.mrb[66].mxu0 %vm117_vm3, %v35608_v40 }
 0xe4b   :  { %27445 = vmatprep.mubr.msk.f32.mxu0 %vm117_vm3, %v35618_v29  ;;  %28718 = vmatpush3.bf16.msra.mxu0 %v28715_v53  ;;  %v35641_v53 = vld [vmem:[#allocation3 + $0xb0] sm:$0xff] }
 0xe4c   :  { %28720 = vmatprep.subr.bf16.mxu0 %v28719_v27 }
 0xe4e   :  { %27446 = vmatmul.mubr.msk.f32.gmra.mrb[68].mxu0 %vm117_vm3, %v35622_v4 }
 0xe4f   :  { %27448 = vmatprep.mubr.msk.f32.mxu0 %vm117_vm3, %v35632_v54  ;;  %28722 = vmatpush3.bf16.msra.mxu0 %v28719_v27  ;;  %v35653_v27 = vld [vmem:[#allocation3 + $0xe0] sm:$0xff] }
 0xe50   :  { %28724 = vmatprep.subr.bf16.mxu0 %v28723_v28 }
 0xe52   :  { %27449 = vmatmul.mubr.msk.f32.gmra.mrb[70].mxu0 %vm117_vm3, %v35636_v6 }
 0xe53   :  { %27451 = vmatprep.mubr.msk.f32.mxu0 %vm117_vm3, %v16685_v11  ;;  %28726 = vmatpush3.bf16.msra.mxu0 %v28723_v28  ;;  %v17112_v28 = vld [vmem:[#allocation3 + $0x2] sm:$0xff]  ;;  %v22894_v11 = vld [vmem:[%s36889_s17 + $0xd8] sm:$0xff] }
 0xe54   :  { %28728 = vmatprep.subr.bf16.mxu0 %v28727_v46  ;;  %v28731_v45 = vpack.c.bf16 %v22894_v11, %v22893_v8  ;;  %v35690_v8 = vld [vmem:[#allocation3 + $0x32] sm:$0xff] }
 0xe55   :  { %v22897_v11 = vld [vmem:[%s36889_s17 + $0xf0] sm:$0xff] }
 0xe56   :  { %27452 = vmatmul.mubr.msk.f32.gmra.mrb[72].mxu0 %vm117_vm3, %v35641_v53 }
 0xe57   :  { %27454 = vmatprep.mubr.msk.f32.mxu0 %vm117_vm3, %v35645_v16 }
 0xe5a   :  { %27455 = vmatmul.mubr.msk.f32.gmra.mrb[74].mxu0 %vm117_vm3, %v35649_v31 }
 0xe5b   :  { %27457 = vmatprep.mubr.msk.f32.mxu0 %vm117_vm3, %v35653_v27 }
 0xe5e   :  { %27458 = vmatmul.mubr.msk.f32.gmra.mrb[76].mxu0 %vm117_vm3, %v35657_v12 }
 0xe5f   :  { %27460 = vmatprep.mubr.msk.f32.mxu0 %vm117_vm3, %v35661_v21 }
 0xe62   :  { %27461 = vmatmul.mubr.msk.f32.gmra.mrb[78].mxu0 %vm117_vm3, %v35665_v61 }
 0xe63   :  { %27479 = vmatprep.mubr.msk.f32.mxu0 %vm117_vm3, %v17112_v28  ;;  %v28735_v28 = vpack.c.bf16 %v22896_v57, %v22895_v56  ;;  %v28739_v57 = vpack.c.bf16 %v22898_v30, %v22897_v11  ;;  %v35704_v56 = vld [vmem:[#allocation3 + $0x52] sm:$0xff]  ;;  %v17120_v30 = vld [vmem:[#allocation3 + $0xa2] sm:$0xff] }
 0xe64   :  { %v35718_v11 = vld [vmem:[#allocation3 + $0x72] sm:$0xff] }
 0xe66   :  { %27480 = vmatmul.mubr.msk.f32.vlgmr.msra.gmra.mrb[64].mxu0 %vm117_vm3, %v35676_v48 }
 0xe67   :  { %27482 = vmatprep.mubr.msk.f32.mxu0 %vm117_vm3, %v35686_v23  ;;  %28730 = vmatpush3.bf16.msra.mxu0 %v28727_v46  ;;  %v22915_v46 = vld [vmem:[%s36889_s17 + $0x100] sm:$0xff] }
 0xe68   :  { %28732 = vmatprep.subr.bf16.mxu0 %v28731_v45 }
 0xe6a   :  { %27483 = vmatmul.mubr.msk.f32.gmra.mrb[66].mxu0 %vm117_vm3, %v35690_v8 }
 0xe6b   :  { %27485 = vmatprep.mubr.msk.f32.mxu0 %vm117_vm3, %v35700_v17  ;;  %28734 = vmatpush3.bf16.msra.mxu0 %v28731_v45  ;;  %v28743_v45 = vpack.c.bf16 %v22916_v42, %v22915_v46  ;;  %v35731_v42 = vld [vmem:[#allocation3 + $0xd2] sm:$0xff]  ;;  %v35743_v46 = vld [vmem:[#allocation3 + $0x102] sm:$0xff] }
 0xe6c   :  { %28736 = vmatprep.subr.bf16.mxu0 %v28735_v28 }
 0xe6e   :  { %27486 = vmatmul.mubr.msk.f32.gmra.mrb[68].mxu0 %vm117_vm3, %v35704_v56 }
 0xe6f   :  { %27488 = vmatprep.mubr.msk.f32.mxu0 %vm117_vm3, %v35714_v22  ;;  %28738 = vmatpush3.bf16.msra.mxu0 %v28735_v28  ;;  %v35735_v28 = vld [vmem:[#allocation3 + $0xe2] sm:$0xff] }
 0xe70   :  { %28740 = vmatprep.subr.bf16.mxu0 %v28739_v57 }
 0xe72   :  { %27489 = vmatmul.mubr.msk.f32.gmra.mrb[70].mxu0 %vm117_vm3, %v35718_v11 }
 0xe73   :  { %27491 = vmatprep.mubr.msk.f32.mxu0 %vm117_vm3, %v17120_v30  ;;  %28742 = vmatpush3.bf16.msra.mxu0 %v28739_v57  ;;  %v35739_v57 = vld [vmem:[#allocation3 + $0xf2] sm:$0xff] }
 0xe74   :  { %28744 = vmatprep.subr.bf16.mxu0 %v28743_v45  ;;  %v35747_v30 = vld [vmem:[#allocation3 + $0x112] sm:$0xff] }
 0xe76   :  { %27492 = vmatmul.mubr.msk.f32.gmra.mrb[72].mxu0 %vm117_vm3, %v35723_v58 }
 0xe77   :  { %27494 = vmatprep.mubr.msk.f32.mxu0 %vm117_vm3, %v35727_v59 }
 0xe7a   :  { %27495 = vmatmul.mubr.msk.f32.gmra.mrb[74].mxu0 %vm117_vm3, %v35731_v42 }
 0xe7b   :  { %27497 = vmatprep.mubr.msk.f32.mxu0 %vm117_vm3, %v35735_v28 }
 0xe7e   :  { %27498 = vmatmul.mubr.msk.f32.gmra.mrb[76].mxu0 %vm117_vm3, %v35739_v57 }
 0xe7f   :  { %27500 = vmatprep.mubr.msk.f32.mxu0 %vm117_vm3, %v35743_v46 }
 0xe82   :  { %27501 = vmatmul.mubr.msk.f32.gmra.mrb[78].mxu0 %vm117_vm3, %v35747_v30 }
 0xe83   :  { %27519 = vmatprep.mubr.msk.f32.mxu0 %vm117_vm3, %v35594_v33  ;;  %v28755_v33 = vpack.c.bf16 %v22922_v25, %v22921_v63  ;;  %v22942_v63 = vld [vmem:[%s36889_s17 + $0x158] sm:$0xff] }
 0xe86   :  { %27520 = vmatmul.mubr.msk.f32.vlgmr.msra.gmra.mrb[64].mxu0 %vm117_vm3, %v35604_v3 }
 0xe87   :  { %27522 = vmatprep.mubr.msk.f32.mxu0 %vm117_vm3, %v35608_v40  ;;  %28746 = vmatpush3.bf16.msra.mxu0 %v28743_v45  ;;  %v28759_v45 = vpack.c.bf16 %v22940_v60, %v22939_v26  ;;  %v22944_v26 = vld [vmem:[%s36889_s17 + $0x168] sm:$0xff] }
 0xe88   :  { %28748 = vmatprep.subr.bf16.mxu0 %v28747_v9 }
 0xe8a   :  { %27523 = vmatmul.mubr.msk.f32.gmra.mrb[66].mxu0 %vm117_vm3, %v35618_v29 }
 0xe8b   :  { %27525 = vmatprep.mubr.msk.f32.mxu0 %vm117_vm3, %v35622_v4  ;;  %28750 = vmatpush3.bf16.msra.mxu0 %v28747_v9  ;;  %v35789_v9 = vld [vmem:[#allocation3 + $0x80] sm:$0xff] }
 0xe8c   :  { %28752 = vmatprep.subr.bf16.mxu0 %v28751_v20 }
 0xe8e   :  { %27526 = vmatmul.mubr.msk.f32.gmra.mrb[68].mxu0 %vm117_vm3, %v35632_v54 }
 0xe8f   :  { %27528 = vmatprep.mubr.msk.f32.mxu0 %vm117_vm3, %v35636_v6  ;;  %28754 = vmatpush3.bf16.msra.mxu0 %v28751_v20  ;;  %v35807_v20 = vld [vmem:[#allocation3 + $0x120] sm:$0xff] }
 0xe90   :  { %28756 = vmatprep.subr.bf16.mxu0 %v28755_v33 }
 0xe92   :  { %27529 = vmatmul.mubr.msk.f32.gmra.mrb[70].mxu0 %vm117_vm3, %v35789_v9 }
 0xe93   :  { %27531 = vmatprep.mubr.msk.f32.mxu0 %vm117_vm3, %v35641_v53  ;;  %28758 = vmatpush3.bf16.msra.mxu0 %v28755_v33  ;;  %v22941_v53 = vld [vmem:[%s36889_s17 + $0x150] sm:$0xff]  ;;  %v22943_v33 = vld [vmem:[%s36889_s17 + $0x160] sm:$0xff] }
 0xe94   :  { %28760 = vmatprep.subr.bf16.mxu0 %v28759_v45  ;;  %v28763_v25 = vpack.c.bf16 %v22942_v63, %v22941_v53  ;;  %v28767_v60 = vpack.c.bf16 %v22944_v26, %v22943_v33  ;;  %v22946_v53 = vld [vmem:[%s36889_s17 + $0x178] sm:$0xff]  ;;  %v22964_v33 = vld [vmem:[%s36889_s17 + $0x188] sm:$0xff] }
 0xe96   :  { %27532 = vmatmul.mubr.msk.f32.gmra.mrb[72].mxu0 %vm117_vm3, %v35645_v16 }
 0xe97   :  { %27534 = vmatprep.mubr.msk.f32.mxu0 %vm117_vm3, %v35649_v31 }
 0xe9a   :  { %27535 = vmatmul.mubr.msk.f32.gmra.mrb[74].mxu0 %vm117_vm3, %v35653_v27 }
 0xe9b   :  { %27537 = vmatprep.mubr.msk.f32.mxu0 %vm117_vm3, %v35657_v12 }
 0xe9e   :  { %27538 = vmatmul.mubr.msk.f32.gmra.mrb[76].mxu0 %vm117_vm3, %v35661_v21 }
 0xe9f   :  { %27540 = vmatprep.mubr.msk.f32.mxu0 %vm117_vm3, %v35665_v61 }
 0xea2   :  { %27541 = vmatmul.mubr.msk.f32.gmra.mrb[78].mxu0 %vm117_vm3, %v35807_v20 }
 0xea3   :  { %27559 = vmatprep.mubr.msk.f32.mxu0 %vm117_vm3, %v35449_v35  ;;  %v22945_v35 = vld [vmem:[%s36889_s17 + $0x170] sm:$0xff] }
 0xea4   :  { %v28771_v63 = vpack.c.bf16 %v22946_v53, %v22945_v35  ;;  %v22966_v35 = vld [vmem:[%s36889_s17 + $0x198] sm:$0xff]  ;;  %v23036_v53 = vld [vmem:[%s36891_s19 + $0x40] sm:$0xff] }
 0xea6   :  { %27560 = vmatmul.mubr.msk.f32.vlgmr.msra.gmra.mrb[64].mxu0 %vm117_vm3, %v35460_v47 }
 0xea7   :  { %27562 = vmatprep.mubr.msk.f32.mxu0 %vm117_vm3, %v35477_v15  ;;  %28762 = vmatpush3.bf16.msra.mxu0 %v28759_v45  ;;  %v22963_v45 = vld [vmem:[%s36889_s17 + $0x180] sm:$0xff] }
 0xea8   :  { %28764 = vmatprep.subr.bf16.mxu0 %v28763_v25  ;;  %v28775_v26 = vpack.c.bf16 %v22964_v33, %v22963_v45  ;;  %v23038_v45 = vld [vmem:[%s36891_s19 + $0x50] sm:$0xff] }
 0xea9   :  { %v28827_v14 = vpack.c.bf16 %v23039_v2, %v23038_v45  ;;  %v28783_v2 = vpack.c.bf16 %v22968_v32, %v22967_v38  ;;  %v22987_v38 = vld [vmem:[%s36889_s17 + $0x1c0] sm:$0xff]  ;;  %v22989_v45 = vld [vmem:[%s36889_s17 + $0x1d0] sm:$0xff] }
 0xeaa   :  { %27563 = vmatmul.mubr.msk.f32.gmra.mrb[66].mxu0 %vm117_vm3, %v35488_v41 }
 0xeab   :  { %27565 = vmatprep.mubr.msk.f32.mxu0 %vm117_vm3, %v35505_v37  ;;  %28766 = vmatpush3.bf16.msra.mxu0 %v28763_v25  ;;  %v35849_v25 = vld [vmem:[#allocation3 + $0x81] sm:$0xff] }
 0xeac   :  { %28768 = vmatprep.subr.bf16.mxu0 %v28767_v60 }
 0xeae   :  { %27566 = vmatmul.mubr.msk.f32.gmra.mrb[68].mxu0 %vm117_vm3, %v35516_v5 }
 0xeaf   :  { %27568 = vmatprep.mubr.msk.f32.mxu0 %vm117_vm3, %v35533_v0  ;;  %28770 = vmatpush3.bf16.msra.mxu0 %v28767_v60  ;;  %v22965_v60 = vld [vmem:[%s36889_s17 + $0x190] sm:$0xff] }
 0xeb0   :  { %28772 = vmatprep.subr.bf16.mxu0 %v28771_v63  ;;  %v28779_v39 = vpack.c.bf16 %v22966_v35, %v22965_v60  ;;  %v22969_v35 = vld [vmem:[%s36889_s17 + $0x1b0] sm:$0xff] }
 0xeb2   :  { %27569 = vmatmul.mubr.msk.f32.gmra.mrb[70].mxu0 %vm117_vm3, %v35849_v25 }
 0xeb3   :  { %27571 = vmatprep.mubr.msk.f32.mxu0 %vm117_vm3, %v35552_v18  ;;  %28774 = vmatpush3.bf16.msra.mxu0 %v28771_v63  ;;  %v35867_v18 = vld [vmem:[#allocation3 + $0x121] sm:$0xff] }
 0xeb4   :  { %28776 = vmatprep.subr.bf16.mxu0 %v28775_v26  ;;  %v23037_v63 = vld [vmem:[%s36891_s19 + $0x48] sm:$0xff] }
 0xeb5   :  { %v28823_v33 = vpack.c.bf16 %v23037_v63, %v23036_v53  ;;  %v23041_v53 = vld [vmem:[%s36891_s19 + $0x68] sm:$0xff]  ;;  %v22970_v63 = vld [vmem:[%s36889_s17 + $0x1b8] sm:$0xff] }
 0xeb6   :  { %27572 = vmatmul.mubr.msk.f32.gmra.mrb[72].mxu0 %vm117_vm3, %v35557_v51  ;;  %v28787_v32 = vpack.c.bf16 %v22970_v63, %v22969_v35  ;;  %v22994_v35 = vld [vmem:[%s36889_s17 + $0x1f8] sm:$0xff]  ;;  %v23012_v63 = vld [vmem:[%s36889_s17 + $0x208] sm:$0xff] }
 0xeb7   :  { %27574 = vmatprep.mubr.msk.f32.mxu0 %vm117_vm3, %v35567_v13  ;;  %28824 = vmatprep.subr.bf16.mxu1 %v28823_v33 }
 0xeb8   :  { %28826 = vmatpush3.bf16.msra.mxu1 %v28823_v33  ;;  %v22990_v33 = vld [vmem:[%s36889_s17 + $0x1d8] sm:$0xff] }
 0xeb9   :  { %28828 = vmatprep.subr.bf16.mxu1 %v28827_v14 }
 0xeba   :  { %27575 = vmatmul.mubr.msk.f32.gmra.mrb[74].mxu0 %vm117_vm3, %v35571_v49 }
 0xebb   :  { %27577 = vmatprep.mubr.msk.f32.mxu0 %vm117_vm3, %v35575_v43 }
 0xebc   :  { %28830 = vmatpush3.bf16.msra.mxu1 %v28827_v14 }
 0xebe   :  { %27578 = vmatmul.mubr.msk.f32.gmra.mrb[76].mxu0 %vm117_vm3, %v35579_v19 }
 0xebf   :  { %27580 = vmatprep.mubr.msk.f32.mxu0 %vm117_vm3, %v35583_v36 }
 0xec2   :  { %27581 = vmatmul.mubr.msk.f32.gmra.mrb[78].mxu0 %vm117_vm3, %v35867_v18 }
 0xec3   :  { %27599 = vmatprep.mubr.msk.f32.mxu0 %vm117_vm3, %v35676_v48  ;;  %v23040_v48 = vld [vmem:[%s36891_s19 + $0x60] sm:$0xff] }
 0xec4   :  { %v28831_v60 = vpack.c.bf16 %v23041_v53, %v23040_v48  ;;  %v28795_v48 = vpack.c.bf16 %v22990_v33, %v22989_v45  ;;  %v22991_v53 = vld [vmem:[%s36889_s17 + $0x1e0] sm:$0xff] }
 0xec6   :  { %27600 = vmatmul.mubr.msk.f32.vlgmr.msra.gmra.mrb[64].mxu0 %vm117_vm3, %v35686_v23  ;;  %28832 = vmatprep.subr.bf16.mxu1 %v28831_v60 }
 0xec7   :  { %27602 = vmatprep.mubr.msk.f32.mxu0 %vm117_vm3, %v35690_v8  ;;  %28778 = vmatpush3.bf16.msra.mxu0 %v28775_v26  ;;  %v22988_v26 = vld [vmem:[%s36889_s17 + $0x1c8] sm:$0xff] }
 0xec8   :  { %28780 = vmatprep.subr.bf16.mxu0 %v28779_v39  ;;  %28834 = vmatpush3.bf16.msra.mxu1 %v28831_v60  ;;  %v28791_v14 = vpack.c.bf16 %v22988_v26, %v22987_v38 }
 0xeca   :  { %27603 = vmatmul.mubr.msk.f32.gmra.mrb[66].mxu0 %vm117_vm3, %v35700_v17 }
 0xecb   :  { %27605 = vmatprep.mubr.msk.f32.mxu0 %vm117_vm3, %v35704_v56  ;;  %28782 = vmatpush3.bf16.msra.mxu0 %v28779_v39  ;;  %v35927_v39 = vld [vmem:[#allocation3 + $0x82] sm:$0xff] }
 0xecc   :  { %28784 = vmatprep.subr.bf16.mxu0 %v28783_v2 }
 0xece   :  { %27606 = vmatmul.mubr.msk.f32.gmra.mrb[68].mxu0 %vm117_vm3, %v35714_v22 }
 0xecf   :  { %27608 = vmatprep.mubr.msk.f32.mxu0 %vm117_vm3, %v35718_v11  ;;  %28786 = vmatpush3.bf16.msra.mxu0 %v28783_v2  ;;  %v22992_v2 = vld [vmem:[%s36889_s17 + $0x1e8] sm:$0xff] }
 0xed0   :  { %28788 = vmatprep.subr.bf16.mxu0 %v28787_v32  ;;  %v28799_v60 = vpack.c.bf16 %v22992_v2, %v22991_v53 }
 0xed2   :  { %27609 = vmatmul.mubr.msk.f32.gmra.mrb[70].mxu0 %vm117_vm3, %v35927_v39 }
 0xed3   :  { %27611 = vmatprep.mubr.msk.f32.mxu0 %vm117_vm3, %v35723_v58  ;;  %28790 = vmatpush3.bf16.msra.mxu0 %v28787_v32  ;;  %v35945_v58 = vld [vmem:[#allocation3 + $0x122] sm:$0xff] }
 0xed4   :  { %28792 = vmatprep.subr.bf16.mxu0 %v28791_v14 }
 0xed6   :  { %27612 = vmatmul.mubr.msk.f32.gmra.mrb[72].mxu0 %vm117_vm3, %v35727_v59 }
 0xed7   :  { %27614 = vmatprep.mubr.msk.f32.mxu0 %vm117_vm3, %v35731_v42 }
 0xeda   :  { %27615 = vmatmul.mubr.msk.f32.gmra.mrb[74].mxu0 %vm117_vm3, %v35735_v28 }
 0xedb   :  { %27617 = vmatprep.mubr.msk.f32.mxu0 %vm117_vm3, %v35739_v57 }
 0xede   :  { %27618 = vmatmul.mubr.msk.f32.gmra.mrb[76].mxu0 %vm117_vm3, %v35743_v46 }
 0xedf   :  { %27620 = vmatprep.mubr.msk.f32.mxu0 %vm117_vm3, %v35747_v30 }
 0xee2   :  { %27621 = vmatmul.mubr.msk.f32.gmra.mrb[78].mxu0 %vm117_vm3, %v35945_v58 }
 0xee3   :  { %27639 = vmatprep.mubr.msk.f32.mxu0 %vm117_vm3, %v35604_v3  ;;  %v22993_v3 = vld [vmem:[%s36889_s17 + $0x1f0] sm:$0xff] }
 0xee6   :  { %27640 = vmatmul.mubr.msk.f32.vlgmr.msra.gmra.mrb[64].mxu0 %vm117_vm3, %v35608_v40  ;;  %v28803_v40 = vpack.c.bf16 %v22994_v35, %v22993_v3  ;;  %v18825_v35 = vld [vmem:[%s36891_s19 + $0x20] sm:$0xff] }
 0xee7   :  { %27642 = vmatprep.mubr.msk.f32.mxu0 %vm117_vm3, %v35618_v29  ;;  %28794 = vmatpush3.bf16.msra.mxu0 %v28791_v14  ;;  %v23011_v29 = vld [vmem:[%s36889_s17 + $0x200] sm:$0xff]  ;;  %v18823_v14 = vld [vmem:[%s36891_s19 + $0x10] sm:$0xff] }
 0xee8   :  { %28796 = vmatprep.subr.bf16.mxu0 %v28795_v48 }
 0xeea   :  { %27643 = vmatmul.mubr.msk.f32.gmra.mrb[66].mxu0 %vm117_vm3, %v35622_v4  ;;  %v18055_v4 = vld [vmem:[#allocation3 + $0x90] sm:$0xff] }
 0xeeb   :  { %27645 = vmatprep.mubr.msk.f32.mxu0 %vm117_vm3, %v35632_v54  ;;  %28798 = vmatpush3.bf16.msra.mxu0 %v28795_v48  ;;  %v28807_v54 = vpack.c.bf16 %v23012_v63, %v23011_v29 }
 0xeec   :  { %28800 = vmatprep.subr.bf16.mxu0 %v28799_v60 }
 0xeee   :  { %27646 = vmatmul.mubr.msk.f32.gmra.mrb[68].mxu0 %vm117_vm3, %v35636_v6  ;;  %v18063_v6 = vld [vmem:[#allocation3 + $0x130] sm:$0xff] }
 0xeef   :  { %27648 = vmatprep.mubr.msk.f32.mxu0 %vm117_vm3, %v35789_v9  ;;  %28802 = vmatpush3.bf16.msra.mxu0 %v28799_v60  ;;  %v23018_v9 = vld [vmem:[%s36889_s17 + $0x238] sm:$0xff] }
 0xef0   :  { %28804 = vmatprep.subr.bf16.mxu0 %v28803_v40 }
 0xef2   :  { %27649 = vmatmul.mubr.msk.f32.gmra.mrb[70].mxu0 %vm117_vm3, %v18055_v4 }
 0xef3   :  { %27651 = vmatprep.mubr.msk.f32.mxu0 %vm117_vm3, %v35645_v16  ;;  %28806 = vmatpush3.bf16.msra.mxu0 %v28803_v40  ;;  %v23013_v16 = vld [vmem:[%s36889_s17 + $0x210] sm:$0xff]  ;;  %v18826_v40 = vld [vmem:[%s36891_s19 + $0x28] sm:$0xff] }
 0xef4   :  { %28808 = vmatprep.subr.bf16.mxu0 %v28807_v54 }
 0xef6   :  { %27652 = vmatmul.mubr.msk.f32.gmra.mrb[72].mxu0 %vm117_vm3, %v35649_v31  ;;  %v23014_v31 = vld [vmem:[%s36889_s17 + $0x218] sm:$0xff] }
 0xef7   :  { %27654 = vmatprep.mubr.msk.f32.mxu0 %vm117_vm3, %v35653_v27  ;;  %v28811_v27 = vpack.c.bf16 %v23014_v31, %v23013_v16  ;;  %v28847_v16 = vpack.c.bf16 %v18826_v40, %v18825_v35  ;;  %v23079_v35 = vld [vmem:[%s36891_s19 + $0x98] sm:$0xff] }
 0xefa   :  { %27655 = vmatmul.mubr.msk.f32.gmra.mrb[74].mxu0 %vm117_vm3, %v35657_v12  ;;  %v23015_v12 = vld [vmem:[%s36889_s17 + $0x220] sm:$0xff] }
 0xefb   :  { %27657 = vmatprep.mubr.msk.f32.mxu0 %vm117_vm3, %v35661_v21  ;;  %v23016_v21 = vld [vmem:[%s36889_s17 + $0x228] sm:$0xff] }
 0xefe   :  { %27658 = vmatmul.mubr.msk.f32.gmra.mrb[76].mxu0 %vm117_vm3, %v35665_v61  ;;  %v28815_v61 = vpack.c.bf16 %v23016_v21, %v23015_v12  ;;  %v18827_v21 = vld [vmem:[%s36891_s19 + $0x30] sm:$0xff] }
 0xeff   :  { %27660 = vmatprep.mubr.msk.f32.mxu0 %vm117_vm3, %v35807_v20 }
 0xf02   :  { %27661 = vmatmul.mubr.msk.f32.gmra.mrb[78].mxu0 %vm117_vm3, %v18063_v6 }
 0xf03   :  { %27679 = vmatprep.mubr.msk.f32.mxu0 %vm117_vm3, %v35460_v47  ;;  %v23017_v47 = vld [vmem:[%s36889_s17 + $0x230] sm:$0xff] }
 0xf06   :  { %27680 = vmatmul.mubr.msk.f32.vlgmr.msra.gmra.mrb[64].mxu0 %vm117_vm3, %v35477_v15  ;;  %v28819_v15 = vpack.c.bf16 %v23018_v9, %v23017_v47 }
 0xf07   :  { %27682 = vmatprep.mubr.msk.f32.mxu0 %vm117_vm3, %v35488_v41  ;;  %28810 = vmatpush3.bf16.msra.mxu0 %v28807_v54  ;;  %v18289_v41 = vld [vmem:[#allocation3 + $0x91] sm:$0xff] }
 0xf08   :  { %28812 = vmatprep.subr.bf16.mxu0 %v28811_v27 }
 0xf0a   :  { %27683 = vmatmul.mubr.msk.f32.gmra.mrb[66].mxu0 %vm117_vm3, %v35505_v37  ;;  %v18297_v37 = vld [vmem:[#allocation3 + $0x131] sm:$0xff] }
 0xf0b   :  { %27685 = vmatprep.mubr.msk.f32.mxu0 %vm117_vm3, %v35516_v5  ;;  %28814 = vmatpush3.bf16.msra.mxu0 %v28811_v27  ;;  %v18523_v5 = vld [vmem:[#allocation3 + $0x92] sm:$0xff] }
 0xf0c   :  { %28816 = vmatprep.subr.bf16.mxu0 %v28815_v61 }
 0xf0e   :  { %27686 = vmatmul.mubr.msk.f32.gmra.mrb[68].mxu0 %vm117_vm3, %v35533_v0 }
 0xf0f   :  { %27688 = vmatprep.mubr.msk.f32.mxu0 %vm117_vm3, %v35849_v25  ;;  %28818 = vmatpush3.bf16.msra.mxu0 %v28815_v61  ;;  %v18828_v61 = vld [vmem:[%s36891_s19 + $0x38] sm:$0xff] }
 0xf10   :  { %28820 = vmatprep.subr.bf16.mxu0 %v28819_v15 }
 0xf12   :  { %27689 = vmatmul.mubr.msk.f32.gmra.mrb[70].mxu0 %vm117_vm3, %v18289_v41 }
 0xf13   :  { %27691 = vmatprep.mubr.msk.f32.mxu0 %vm117_vm3, %v35557_v51  ;;  %28822 = vmatpush3.bf16.msra.mxu0 %v28819_v15  ;;  %v18829_v51 = vld [vmem:[#allocation3 + $0x1] sm:$0xff] }
 0xf14   :  { %27759 = vmatprep.mubr.msk.f32.mxu1 %vm117_vm3, %v18829_v51  ;;  %v23077_v51 = vld [vmem:[%s36891_s19 + $0x88] sm:$0xff] }
 0xf16   :  { %27692 = vmatmul.mubr.msk.f32.gmra.mrb[72].mxu0 %vm117_vm3, %v35567_v13  ;;  %v18821_v13 = vld [vmem:[%s36891_s19] sm:$0xff] }
 0xf17   :  { %27694 = vmatprep.mubr.msk.f32.mxu0 %vm117_vm3, %v35571_v49  ;;  %v18822_v49 = vld [vmem:[%s36891_s19 + $0x8] sm:$0xff] }
 0xf1a   :  { %27695 = vmatmul.mubr.msk.f32.gmra.mrb[74].mxu0 %vm117_vm3, %v35575_v43  ;;  %v28839_v43 = vpack.c.bf16 %v18822_v49, %v18821_v13 }
 0xf1b   :  { %27697 = vmatprep.mubr.msk.f32.mxu0 %vm117_vm3, %v35579_v19  ;;  %v36098_v19 = vld [vmem:[%s36890_s18] ss:$0 sm:$0xff] }
 0xf1e   :  { %27698 = vmatmul.mubr.msk.f32.gmra.mrb[76].mxu0 %vm117_vm3, %v35583_v36 }
 0xf1f   :  { %27700 = vmatprep.mubr.msk.f32.mxu0 %vm117_vm3, %v35867_v18 }
 0xf22   :  { %27701 = vmatmul.mubr.msk.f32.gmra.mrb[78].mxu0 %vm117_vm3, %v18297_v37 }
 0xf23   :  { %27719 = vmatprep.mubr.msk.f32.mxu0 %vm117_vm3, %v35686_v23  ;;  %v23043_v23 = vld [vmem:[%s36891_s19 + $0x78] sm:$0xff] }
 0xf26   :  { %27720 = vmatmul.mubr.msk.f32.vlgmr.msra.gmra.mrb[64].mxu0 %vm117_vm3, %v35690_v8 }
 0xf27   :  { %27722 = vmatprep.mubr.msk.f32.mxu0 %vm117_vm3, %v35700_v17  ;;  %v23042_v17 = vld [vmem:[%s36891_s19 + $0x70] sm:$0xff] }
 0xf28   :  { %v28835_v0 = vpack.c.bf16 %v23043_v23, %v23042_v17 }
 0xf2a   :  { %27723 = vmatmul.mubr.msk.f32.gmra.mrb[66].mxu0 %vm117_vm3, %v35704_v56  ;;  %28836 = vmatprep.subr.bf16.mxu1 %v28835_v0 }
 0xf2b   :  { %27725 = vmatprep.mubr.msk.f32.mxu0 %vm117_vm3, %v35714_v22  ;;  %v18531_v22 = vld [vmem:[#allocation3 + $0x132] sm:$0xff]  ;;  %28838 = vmatpush3.bf16.msra.mxu1 %v28835_v0  ;;  %v23076_v0 = vld [vmem:[%s36891_s19 + $0x80] sm:$0xff] }
 0xf2c   :  { %28840 = vmatprep.subr.bf16.mxu1 %v28839_v43 }
 0xf2e   :  { %27726 = vmatmul.mubr.msk.f32.gmra.mrb[68].mxu0 %vm117_vm3, %v35718_v11 }
 0xf2f   :  { %27728 = vmatprep.mubr.msk.f32.mxu0 %vm117_vm3, %v35927_v39  ;;  %v18824_v39 = vld [vmem:[%s36891_s19 + $0x18] sm:$0xff] }
 0xf30   :  { %v28843_v53 = vpack.c.bf16 %v18824_v39, %v18823_v14 }
 0xf32   :  { %27729 = vmatmul.mubr.msk.f32.gmra.mrb[70].mxu0 %vm117_vm3, %v18523_v5  ;;  %v28851_v5 = vpack.c.bf16 %v18828_v61, %v18827_v21  ;;  %v23083_v21 = vld [vmem:[%s36891_s19 + $0xb8] sm:$0xff] }
 0xf33   :  { %27731 = vmatprep.mubr.msk.f32.mxu0 %vm117_vm3, %v35727_v59  ;;  %v37117_v59 = vmov 0.0  }
 0xf36   :  { %27732 = vmatmul.mubr.msk.f32.gmra.mrb[72].mxu0 %vm117_vm3, %v35731_v42 }
 0xf37   :  { %27734 = vmatprep.mubr.msk.f32.mxu0 %vm117_vm3, %v35735_v28 }
 0xf3a   :  { %27735 = vmatmul.mubr.msk.f32.gmra.mrb[74].mxu0 %vm117_vm3, %v35739_v57 }
 0xf3b   :  { %27737 = vmatprep.mubr.msk.f32.mxu0 %vm117_vm3, %v35743_v46 }
 0xf3e   :  { %27738 = vmatmul.mubr.msk.f32.gmra.mrb[76].mxu0 %vm117_vm3, %v35747_v30 }
 0xf3f   :  { %27740 = vmatprep.mubr.msk.f32.mxu0 %vm117_vm3, %v35945_v58 }
 0xf42   :  { %27741 = vmatmul.mubr.msk.f32.gmra.mrb[78].mxu0 %vm117_vm3, %v18531_v22 }
 0xf43   :  { %21102 = vmatprep.mubr.f32.mxu0 %v37117_v59 }
 0xff9   :  { %v27721_v36 = vpop.f32.mrb[64].mxu0 }
 0xffa   :  { %v18758_v8 = vadd.f32 %v27721_v36, %v36098_v19  ;;  %v18655_v56 = vpop.f32.mrb[65].mxu0 }
 0xffb   :  { %v18757_v11 = vadd.f32 %v36098_v19, %v18655_v56  ;;  %v18837_v56 = vld [vmem:[#allocation3 + $0xa1] sm:$0xff] }
 0xffc   :  { %v18774_v42 = vmax.f32 %v18758_v8, 0.0 }
 0xffd   :  { %v18773_v28 = vmax.f32 %v18757_v11, 0.0  ;;  %v27724_v57 = vpop.f32.mrb[66].mxu0  ;;  %v28855_v11 = vpack.c.bf16 %v23077_v51, %v23076_v0 }
 0xffe   :  { %18790 = vst.msk [vmem:[#allocation3 + $0x21] sm:$0xff] %vm117_vm3, %v18774_v42  ;;  %v18760_v46 = vadd.f32 %v27724_v57, %v36098_v19  ;;  %v18665_v30 = vpop.f32.mrb[67].mxu0 }
 0xfff   :  { %18789 = vst.msk [vmem:[#allocation3 + $0x11] sm:$0xff] %vm117_vm3, %v18773_v28  ;;  %v18759_v20 = vadd.f32 %v36098_v19, %v18665_v30 }
0x1000   :  { %v18776_v25 = vmax.f32 %v18760_v46, 0.0 }
0x1001   :  { %v18775_v18 = vmax.f32 %v18759_v20, 0.0  ;;  %v27727_v32 = vpop.f32.mrb[68].mxu0 }
0x1002   :  { %18792 = vst.msk [vmem:[#allocation3 + $0x41] sm:$0xff] %vm117_vm3, %v18776_v25  ;;  %v18762_v38 = vadd.f32 %v27727_v32, %v36098_v19  ;;  %v18675_v26 = vpop.f32.mrb[69].mxu0 }
0x1003   :  { %18791 = vst.msk [vmem:[#allocation3 + $0x31] sm:$0xff] %vm117_vm3, %v18775_v18  ;;  %v18761_v58 = vadd.f32 %v36098_v19, %v18675_v26 }
0x1004   :  { %v18778_v45 = vmax.f32 %v18762_v38, 0.0 }
0x1005   :  { %v18777_v33 = vmax.f32 %v18761_v58, 0.0  ;;  %v27730_v48 = vpop.f32.mrb[70].mxu0  ;;  %v36130_v63 = vld [vmem:[#allocation3 + $0x21] sm:$0xff] }
0x1006   :  { %18794 = vst.msk [vmem:[#allocation3 + $0x61] sm:$0xff] %vm117_vm3, %v18778_v45  ;;  %v18764_v2 = vadd.f32 %v27730_v48, %v36098_v19  ;;  %v18685_v60 = vpop.f32.mrb[71].mxu0  ;;  %v36118_v3 = vld [vmem:[#allocation3 + $0x11] sm:$0xff] }
0x1007   :  { %18793 = vst.msk [vmem:[#allocation3 + $0x51] sm:$0xff] %vm117_vm3, %v18777_v33  ;;  %v18763_v29 = vadd.f32 %v36098_v19, %v18685_v60  ;;  %27760 = vmatmul.mubr.msk.f32.vlgmr.msra.gmra.mrb[64].mxu1 %vm117_vm3, %v36118_v3  ;;  %v23078_v60 = vld [vmem:[%s36891_s19 + $0x90] sm:$0xff] }
0x1008   :  { %v18780_v4 = vmax.f32 %v18764_v2, 0.0  ;;  %27762 = vmatprep.mubr.msk.f32.mxu1 %vm117_vm3, %v36130_v63  ;;  %28842 = vmatpush3.bf16.msra.mxu1 %v28839_v43  ;;  %v28859_v40 = vpack.c.bf16 %v23079_v35, %v23078_v60 }
0x1009   :  { %v18779_v54 = vmax.f32 %v18763_v29, 0.0  ;;  %v27733_v6 = vpop.f32.mrb[72].mxu0  ;;  %28844 = vmatprep.subr.bf16.mxu1 %v28843_v53  ;;  %v36148_v9 = vld [vmem:[#allocation3 + $0x41] sm:$0xff]  ;;  %v36220_v29 = vld [vmem:[#allocation3 + $0x10] sm:$0xff] }
0x100a   :  { %18796 = vst.msk [vmem:[#allocation3 + $0x81] sm:$0xff] %vm117_vm3, %v18780_v4  ;;  %v18766_v31 = vadd.f32 %v27733_v6, %v36098_v19  ;;  %v18695_v27 = vpop.f32.mrb[73].mxu0  ;;  %v36136_v12 = vld [vmem:[#allocation3 + $0x31] sm:$0xff]  ;;  %v23080_v4 = vld [vmem:[%s36891_s19 + $0xa0] sm:$0xff] }
0x100b   :  { %18795 = vst.msk [vmem:[#allocation3 + $0x71] sm:$0xff] %vm117_vm3, %v18779_v54  ;;  %v18765_v47 = vadd.f32 %v36098_v19, %v18695_v27  ;;  %27763 = vmatmul.mubr.msk.f32.gmra.mrb[66].mxu1 %vm117_vm3, %v36136_v12  ;;  %v23081_v54 = vld [vmem:[%s36891_s19 + $0xa8] sm:$0xff]  ;;  %v36230_v6 = vld [vmem:[#allocation3 + $0x20] sm:$0xff]  ;;  %v23082_v27 = vld [vmem:[%s36891_s19 + $0xb0] sm:$0xff] }
0x100c   :  { %v18782_v15 = vmax.f32 %v18766_v31, 0.0  ;;  %27765 = vmatprep.mubr.msk.f32.mxu1 %vm117_vm3, %v36148_v9  ;;  %28846 = vmatpush3.bf16.msra.mxu1 %v28843_v53  ;;  %v18805_v53 = vld [vmem:[#allocation3] sm:$0xff]  ;;  %v36234_v31 = vld [vmem:[#allocation3 + $0x30] sm:$0xff] }
0x100d   :  { %v18781_v41 = vmax.f32 %v18765_v47, 0.0  ;;  %v27736_v37 = vpop.f32.mrb[74].mxu0  ;;  %28848 = vmatprep.subr.bf16.mxu1 %v28847_v16  ;;  %v36166_v49 = vld [vmem:[#allocation3 + $0x61] sm:$0xff]  ;;  %v28867_v47 = vpack.c.bf16 %v23083_v21, %v23082_v27 }
0x100e   :  { %18798 = vst.msk [vmem:[#allocation3 + $0xc1] sm:$0xff] %vm117_vm3, %v18782_v15  ;;  %v18768_v22 = vadd.f32 %v27736_v37, %v36098_v19  ;;  %v18705_v17 = vpop.f32.mrb[75].mxu0  ;;  %v36154_v23 = vld [vmem:[#allocation3 + $0x51] sm:$0xff]  ;;  %v36244_v61 = vld [vmem:[#allocation3 + $0x40] sm:$0xff]  ;;  %v23101_v37 = vld [vmem:[%s36891_s19 + $0xc8] sm:$0xff] }
0x100f   :  { %18797 = vst.msk [vmem:[#allocation3 + $0xb1] sm:$0xff] %vm117_vm3, %v18781_v41  ;;  %v18767_v13 = vadd.f32 %v36098_v19, %v18705_v17  ;;  %27766 = vmatmul.mubr.msk.f32.gmra.mrb[68].mxu1 %vm117_vm3, %v36154_v23  ;;  %v36248_v15 = vld [vmem:[#allocation3 + $0x50] sm:$0xff]  ;;  %v23100_v41 = vld [vmem:[%s36891_s19 + $0xc0] sm:$0xff] }
0x1010   :  { %v18784_v43 = vmax.f32 %v18768_v22, 0.0  ;;  %27768 = vmatprep.mubr.msk.f32.mxu1 %vm117_vm3, %v36166_v49  ;;  %28850 = vmatpush3.bf16.msra.mxu1 %v28847_v16  ;;  %v28863_v16 = vpack.c.bf16 %v23081_v54, %v23080_v4  ;;  %v18813_v22 = vld [vmem:[#allocation3 + $0xa0] sm:$0xff]  ;;  %v28871_v17 = vpack.c.bf16 %v23101_v37, %v23100_v41  ;;  %v23125_v54 = vld [vmem:[%s36891_s19 + $0x108] sm:$0xff] }
0x1011   :  { %v18783_v36 = vmax.f32 %v18767_v13, 0.0  ;;  %v27739_v8 = vpop.f32.mrb[76].mxu0  ;;  %28852 = vmatprep.subr.bf16.mxu1 %v28851_v5  ;;  %v36326_v60 = vld [vmem:[#allocation3 + $0x42] sm:$0xff] }
0x1012   :  { %18800 = vst.msk [vmem:[#allocation3 + $0xe1] sm:$0xff] %vm117_vm3, %v18784_v43  ;;  %v18770_v42 = vadd.f32 %v27739_v8, %v36098_v19  ;;  %v18715_v28 = vpop.f32.mrb[77].mxu0  ;;  %v36172_v57 = vld [vmem:[#allocation3 + $0x71] sm:$0xff]  ;;  %v23124_v4 = vld [vmem:[%s36891_s19 + $0x100] sm:$0xff] }
0x1013   :  { %18799 = vst.msk [vmem:[#allocation3 + $0xd1] sm:$0xff] %vm117_vm3, %v18783_v36  ;;  %v18769_v46 = vadd.f32 %v36098_v19, %v18715_v28  ;;  %27769 = vmatmul.mubr.msk.f32.gmra.mrb[70].mxu1 %vm117_vm3, %v36172_v57  ;;  %v36262_v0 = vld [vmem:[#allocation3 + $0x70] sm:$0xff]  ;;  %v19248_v27 = vld [vmem:[#allocation3 + $0xa2] sm:$0xff]  ;;  %v28887_v21 = vpack.c.bf16 %v23125_v54, %v23124_v4 }
0x1014   :  { %v18786_v30 = vmax.f32 %v18770_v42, 0.0  ;;  %27771 = vmatprep.mubr.msk.f32.mxu1 %vm117_vm3, %v18837_v56  ;;  %28854 = vmatpush3.bf16.msra.mxu1 %v28851_v5  ;;  %v36258_v5 = vld [vmem:[#allocation3 + $0x60] sm:$0xff]  ;;  %v23102_v28 = vld [vmem:[%s36891_s19 + $0xd0] sm:$0xff] }
0x1015   :  { %v18785_v20 = vmax.f32 %v18769_v46, 0.0  ;;  %v27742_v25 = vpop.f32.mrb[78].mxu0  ;;  %28856 = vmatprep.subr.bf16.mxu1 %v28855_v11  ;;  %v36187_v14 = vld [vmem:[#allocation3 + $0xc1] sm:$0xff]  ;;  %v23103_v46 = vld [vmem:[%s36891_s19 + $0xd8] sm:$0xff] }
0x1016   :  { %18802 = vst.msk [vmem:[#allocation3 + $0x101] sm:$0xff] %vm117_vm3, %v18786_v30  ;;  %v18772_v18 = vadd.f32 %v27742_v25, %v36098_v19  ;;  %v18725_v32 = vpop.f32.mrb[79].mxu0  ;;  %v36181_v38 = vld [vmem:[#allocation3 + $0xb1] sm:$0xff]  ;;  %v36271_v13 = vld [vmem:[#allocation3 + $0xc0] sm:$0xff]  ;;  %v28875_v30 = vpack.c.bf16 %v23103_v46, %v23102_v28 }
0x1017   :  { %18801 = vst.msk [vmem:[#allocation3 + $0xf1] sm:$0xff] %vm117_vm3, %v18785_v20  ;;  %v18771_v26 = vadd.f32 %v36098_v19, %v18725_v32  ;;  %27772 = vmatmul.mubr.msk.f32.gmra.mrb[72].mxu1 %vm117_vm3, %v36181_v38  ;;  %v36267_v51 = vld [vmem:[#allocation3 + $0xb0] sm:$0xff]  ;;  %v23104_v25 = vld [vmem:[%s36891_s19 + $0xe0] sm:$0xff] }
0x1018   :  { %v18788_v39 = vmax.f32 %v18772_v18, 0.0  ;;  %27774 = vmatprep.mubr.msk.f32.mxu1 %vm117_vm3, %v36187_v14  ;;  %v36302_v20 = vld [vmem:[#allocation3 + $0x12] sm:$0xff]  ;;  %v23105_v18 = vld [vmem:[%s36891_s19 + $0xe8] sm:$0xff]  ;;  %v23148_v54 = vld [vmem:[%s36891_s19 + $0x140] sm:$0xff] }
0x1019   :  { %v18787_v58 = vmax.f32 %v18771_v26, 0.0  ;;  %v36197_v19 = vld [vmem:[#allocation3 + $0xe1] sm:$0xff]  ;;  %v28879_v26 = vpack.c.bf16 %v23105_v18, %v23104_v25  ;;  %v36349_v41 = vld [vmem:[#allocation3 + $0xb2] sm:$0xff] }
0x101a   :  { %18804 = vst.msk [vmem:[#allocation3 + $0x121] sm:$0xff] %vm117_vm3, %v18788_v39  ;;  %v36192_v45 = vld [vmem:[#allocation3 + $0xd1] sm:$0xff]  ;;  %v36279_v36 = vld [vmem:[#allocation3 + $0xe0] sm:$0xff] }
0x101b   :  { %18803 = vst.msk [vmem:[#allocation3 + $0x111] sm:$0xff] %vm117_vm3, %v18787_v58  ;;  %27775 = vmatmul.mubr.msk.f32.gmra.mrb[74].mxu1 %vm117_vm3, %v36192_v45  ;;  %v36275_v43 = vld [vmem:[#allocation3 + $0xd0] sm:$0xff]  ;;  %v36312_v32 = vld [vmem:[#allocation3 + $0x22] sm:$0xff]  ;;  %v23127_v25 = vld [vmem:[%s36891_s19 + $0x118] sm:$0xff] }
0x101c   :  { %27777 = vmatprep.mubr.msk.f32.mxu1 %vm117_vm3, %v36197_v19  ;;  %v36316_v39 = vld [vmem:[#allocation3 + $0x32] sm:$0xff]  ;;  %v36353_v37 = vld [vmem:[#allocation3 + $0xc2] sm:$0xff] }
0x101d   :  { %v36205_v48 = vld [vmem:[#allocation3 + $0x101] sm:$0xff]  ;;  %v23106_v58 = vld [vmem:[%s36891_s19 + $0xf0] sm:$0xff] }
0x101e   :  { %v36201_v33 = vld [vmem:[#allocation3 + $0xf1] sm:$0xff]  ;;  %v36287_v56 = vld [vmem:[#allocation3 + $0x100] sm:$0xff] }
0x101f   :  { %27778 = vmatmul.mubr.msk.f32.gmra.mrb[76].mxu1 %vm117_vm3, %v36201_v33  ;;  %v36283_v8 = vld [vmem:[#allocation3 + $0xf0] sm:$0xff]  ;;  %v36369_v28 = vld [vmem:[#allocation3 + $0x102] sm:$0xff] }
0x1020   :  { %27780 = vmatprep.mubr.msk.f32.mxu1 %vm117_vm3, %v36205_v48 }
0x1022   :  { %v36209_v2 = vld [vmem:[#allocation3 + $0x111] sm:$0xff] }
0x1023   :  { %27781 = vmatmul.mubr.msk.f32.gmra.mrb[78].mxu1 %vm117_vm3, %v36209_v2  ;;  %v36291_v42 = vld [vmem:[#allocation3 + $0x110] sm:$0xff] }
0x1024   :  { %27799 = vmatprep.mubr.msk.f32.mxu1 %vm117_vm3, %v18805_v53  ;;  %v23107_v53 = vld [vmem:[%s36891_s19 + $0xf8] sm:$0xff] }
0x1025   :  { %v28883_v35 = vpack.c.bf16 %v23107_v53, %v23106_v58  ;;  %v36373_v46 = vld [vmem:[#allocation3 + $0x112] sm:$0xff]  ;;  %v23129_v58 = vld [vmem:[%s36891_s19 + $0x128] sm:$0xff] }
0x1027   :  { %27800 = vmatmul.mubr.msk.f32.vlgmr.msra.gmra.mrb[64].mxu1 %vm117_vm3, %v36220_v29 }
0x1028   :  { %27802 = vmatprep.mubr.msk.f32.mxu1 %vm117_vm3, %v36230_v6  ;;  %28858 = vmatpush3.bf16.msra.mxu1 %v28855_v11  ;;  %v19240_v11 = vld [vmem:[#allocation3 + $0x2] sm:$0xff] }
0x1029   :  { %28860 = vmatprep.subr.bf16.mxu1 %v28859_v40 }
0x102b   :  { %27803 = vmatmul.mubr.msk.f32.gmra.mrb[66].mxu1 %vm117_vm3, %v36234_v31 }
0x102c   :  { %27805 = vmatprep.mubr.msk.f32.mxu1 %vm117_vm3, %v36244_v61  ;;  %28862 = vmatpush3.bf16.msra.mxu1 %v28859_v40  ;;  %v36330_v40 = vld [vmem:[#allocation3 + $0x52] sm:$0xff] }
0x102d   :  { %28864 = vmatprep.subr.bf16.mxu1 %v28863_v16 }
0x102f   :  { %27806 = vmatmul.mubr.msk.f32.gmra.mrb[68].mxu1 %vm117_vm3, %v36248_v15 }
0x1030   :  { %27808 = vmatprep.mubr.msk.f32.mxu1 %vm117_vm3, %v36258_v5  ;;  %28866 = vmatpush3.bf16.msra.mxu1 %v28863_v16  ;;  %v36340_v16 = vld [vmem:[#allocation3 + $0x62] sm:$0xff] }
0x1031   :  { %28868 = vmatprep.subr.bf16.mxu1 %v28867_v47 }
0x1033   :  { %27809 = vmatmul.mubr.msk.f32.gmra.mrb[70].mxu1 %vm117_vm3, %v36262_v0 }
0x1034   :  { %27811 = vmatprep.mubr.msk.f32.mxu1 %vm117_vm3, %v18813_v22  ;;  %28870 = vmatpush3.bf16.msra.mxu1 %v28867_v47  ;;  %v36344_v47 = vld [vmem:[#allocation3 + $0x72] sm:$0xff] }
0x1035   :  { %28872 = vmatprep.subr.bf16.mxu1 %v28871_v17  ;;  %v36357_v22 = vld [vmem:[#allocation3 + $0xd2] sm:$0xff] }
0x1037   :  { %27812 = vmatmul.mubr.msk.f32.gmra.mrb[72].mxu1 %vm117_vm3, %v36267_v51 }
0x1038   :  { %27814 = vmatprep.mubr.msk.f32.mxu1 %vm117_vm3, %v36271_v13 }
0x103b   :  { %27815 = vmatmul.mubr.msk.f32.gmra.mrb[74].mxu1 %vm117_vm3, %v36275_v43 }
0x103c   :  { %27817 = vmatprep.mubr.msk.f32.mxu1 %vm117_vm3, %v36279_v36 }
0x103f   :  { %27818 = vmatmul.mubr.msk.f32.gmra.mrb[76].mxu1 %vm117_vm3, %v36283_v8 }
0x1040   :  { %27820 = vmatprep.mubr.msk.f32.mxu1 %vm117_vm3, %v36287_v56 }
0x1043   :  { %27821 = vmatmul.mubr.msk.f32.gmra.mrb[78].mxu1 %vm117_vm3, %v36291_v42 }
0x1044   :  { %27839 = vmatprep.mubr.msk.f32.mxu1 %vm117_vm3, %v19240_v11  ;;  %v36365_v11 = vld [vmem:[#allocation3 + $0xf2] sm:$0xff] }
0x1047   :  { %27840 = vmatmul.mubr.msk.f32.vlgmr.msra.gmra.mrb[64].mxu1 %vm117_vm3, %v36302_v20 }
0x1048   :  { %27842 = vmatprep.mubr.msk.f32.mxu1 %vm117_vm3, %v36312_v32  ;;  %28874 = vmatpush3.bf16.msra.mxu1 %v28871_v17  ;;  %v36361_v17 = vld [vmem:[#allocation3 + $0xe2] sm:$0xff] }
0x1049   :  { %28876 = vmatprep.subr.bf16.mxu1 %v28875_v30 }
0x104b   :  { %27843 = vmatmul.mubr.msk.f32.gmra.mrb[66].mxu1 %vm117_vm3, %v36316_v39 }
0x104c   :  { %27845 = vmatprep.mubr.msk.f32.mxu1 %vm117_vm3, %v36326_v60  ;;  %28878 = vmatpush3.bf16.msra.mxu1 %v28875_v30  ;;  %v23126_v30 = vld [vmem:[%s36891_s19 + $0x110] sm:$0xff] }
0x104d   :  { %28880 = vmatprep.subr.bf16.mxu1 %v28879_v26  ;;  %v28891_v18 = vpack.c.bf16 %v23127_v25, %v23126_v30  ;;  %v36415_v30 = vld [vmem:[#allocation3 + $0x80] sm:$0xff]  ;;  %v23150_v25 = vld [vmem:[%s36891_s19 + $0x150] sm:$0xff] }
0x104f   :  { %27846 = vmatmul.mubr.msk.f32.gmra.mrb[68].mxu1 %vm117_vm3, %v36330_v40 }
0x1050   :  { %27848 = vmatprep.mubr.msk.f32.mxu1 %vm117_vm3, %v36340_v16  ;;  %28882 = vmatpush3.bf16.msra.mxu1 %v28879_v26  ;;  %v23128_v26 = vld [vmem:[%s36891_s19 + $0x120] sm:$0xff] }
0x1051   :  { %28884 = vmatprep.subr.bf16.mxu1 %v28883_v35  ;;  %v28895_v53 = vpack.c.bf16 %v23129_v58, %v23128_v26  ;;  %v23152_v58 = vld [vmem:[%s36891_s19 + $0x160] sm:$0xff] }
0x1053   :  { %27849 = vmatmul.mubr.msk.f32.gmra.mrb[70].mxu1 %vm117_vm3, %v36344_v47 }
0x1054   :  { %27851 = vmatprep.mubr.msk.f32.mxu1 %vm117_vm3, %v19248_v27  ;;  %28886 = vmatpush3.bf16.msra.mxu1 %v28883_v35  ;;  %v23131_v35 = vld [vmem:[%s36891_s19 + $0x138] sm:$0xff]  ;;  %v23149_v27 = vld [vmem:[%s36891_s19 + $0x148] sm:$0xff] }
0x1055   :  { %28888 = vmatprep.subr.bf16.mxu1 %v28887_v21 }
0x1057   :  { %27852 = vmatmul.mubr.msk.f32.gmra.mrb[72].mxu1 %vm117_vm3, %v36349_v41 }
0x1058   :  { %27854 = vmatprep.mubr.msk.f32.mxu1 %vm117_vm3, %v36353_v37 }
0x105b   :  { %27855 = vmatmul.mubr.msk.f32.gmra.mrb[74].mxu1 %vm117_vm3, %v36357_v22 }
0x105c   :  { %27857 = vmatprep.mubr.msk.f32.mxu1 %vm117_vm3, %v36361_v17 }
0x105f   :  { %27858 = vmatmul.mubr.msk.f32.gmra.mrb[76].mxu1 %vm117_vm3, %v36365_v11 }
0x1060   :  { %27860 = vmatprep.mubr.msk.f32.mxu1 %vm117_vm3, %v36369_v28 }
0x1063   :  { %27861 = vmatmul.mubr.msk.f32.gmra.mrb[78].mxu1 %vm117_vm3, %v36373_v46 }
0x1064   :  { %27879 = vmatprep.mubr.msk.f32.mxu1 %vm117_vm3, %v36220_v29  ;;  %v23130_v29 = vld [vmem:[%s36891_s19 + $0x130] sm:$0xff] }
0x1065   :  { %v28899_v4 = vpack.c.bf16 %v23131_v35, %v23130_v29  ;;  %v23155_v35 = vld [vmem:[%s36891_s19 + $0x178] sm:$0xff] }
0x1067   :  { %27880 = vmatmul.mubr.msk.f32.vlgmr.msra.gmra.mrb[64].mxu1 %vm117_vm3, %v36230_v6 }
0x1068   :  { %27882 = vmatprep.mubr.msk.f32.mxu1 %vm117_vm3, %v36234_v31  ;;  %28890 = vmatpush3.bf16.msra.mxu1 %v28887_v21  ;;  %v28903_v21 = vpack.c.bf16 %v23149_v27, %v23148_v54  ;;  %v23172_v54 = vld [vmem:[%s36891_s19 + $0x180] sm:$0xff]  ;;  %v23173_v27 = vld [vmem:[%s36891_s19 + $0x188] sm:$0xff] }
0x1069   :  { %28892 = vmatprep.subr.bf16.mxu1 %v28891_v18 }
0x106b   :  { %27883 = vmatmul.mubr.msk.f32.gmra.mrb[66].mxu1 %vm117_vm3, %v36244_v61 }
0x106c   :  { %27885 = vmatprep.mubr.msk.f32.mxu1 %vm117_vm3, %v36248_v15  ;;  %28894 = vmatpush3.bf16.msra.mxu1 %v28891_v18  ;;  %v23151_v18 = vld [vmem:[%s36891_s19 + $0x158] sm:$0xff] }
0x106d   :  { %28896 = vmatprep.subr.bf16.mxu1 %v28895_v53  ;;  %v28907_v26 = vpack.c.bf16 %v23151_v18, %v23150_v25  ;;  %v36475_v25 = vld [vmem:[#allocation3 + $0x81] sm:$0xff]  ;;  %v23174_v18 = vld [vmem:[%s36891_s19 + $0x190] sm:$0xff] }
0x106f   :  { %27886 = vmatmul.mubr.msk.f32.gmra.mrb[68].mxu1 %vm117_vm3, %v36258_v5 }
0x1070   :  { %27888 = vmatprep.mubr.msk.f32.mxu1 %vm117_vm3, %v36262_v0  ;;  %28898 = vmatpush3.bf16.msra.mxu1 %v28895_v53  ;;  %v23153_v53 = vld [vmem:[%s36891_s19 + $0x168] sm:$0xff] }
0x1071   :  { %28900 = vmatprep.subr.bf16.mxu1 %v28899_v4  ;;  %v28911_v29 = vpack.c.bf16 %v23153_v53, %v23152_v58  ;;  %v23176_v53 = vld [vmem:[%s36891_s19 + $0x1a0] sm:$0xff] }
0x1073   :  { %27889 = vmatmul.mubr.msk.f32.gmra.mrb[70].mxu1 %vm117_vm3, %v36415_v30 }
0x1074   :  { %27891 = vmatprep.mubr.msk.f32.mxu1 %vm117_vm3, %v36267_v51  ;;  %28902 = vmatpush3.bf16.msra.mxu1 %v28899_v4  ;;  %v36433_v51 = vld [vmem:[#allocation3 + $0x120] sm:$0xff] }
0x1075   :  { %28904 = vmatprep.subr.bf16.mxu1 %v28903_v21 }
0x1077   :  { %27892 = vmatmul.mubr.msk.f32.gmra.mrb[72].mxu1 %vm117_vm3, %v36271_v13 }
0x1078   :  { %27894 = vmatprep.mubr.msk.f32.mxu1 %vm117_vm3, %v36275_v43 }
0x107b   :  { %27895 = vmatmul.mubr.msk.f32.gmra.mrb[74].mxu1 %vm117_vm3, %v36279_v36 }
0x107c   :  { %27897 = vmatprep.mubr.msk.f32.mxu1 %vm117_vm3, %v36283_v8 }
0x107f   :  { %27898 = vmatmul.mubr.msk.f32.gmra.mrb[76].mxu1 %vm117_vm3, %v36287_v56 }
0x1080   :  { %27900 = vmatprep.mubr.msk.f32.mxu1 %vm117_vm3, %v36291_v42 }
0x1083   :  { %27901 = vmatmul.mubr.msk.f32.gmra.mrb[78].mxu1 %vm117_vm3, %v36433_v51 }
0x1084   :  { %27919 = vmatprep.mubr.msk.f32.mxu1 %vm117_vm3, %v36118_v3  ;;  %v23154_v3 = vld [vmem:[%s36891_s19 + $0x170] sm:$0xff] }
0x1085   :  { %v28915_v4 = vpack.c.bf16 %v23155_v35, %v23154_v3  ;;  %v23179_v35 = vld [vmem:[%s36891_s19 + $0x1b8] sm:$0xff] }
0x1087   :  { %27920 = vmatmul.mubr.msk.f32.vlgmr.msra.gmra.mrb[64].mxu1 %vm117_vm3, %v36130_v63 }
0x1088   :  { %27922 = vmatprep.mubr.msk.f32.mxu1 %vm117_vm3, %v36136_v12  ;;  %28906 = vmatpush3.bf16.msra.mxu1 %v28903_v21  ;;  %v28919_v21 = vpack.c.bf16 %v23173_v27, %v23172_v54  ;;  %v23196_v54 = vld [vmem:[%s36891_s19 + $0x1c0] sm:$0xff]  ;;  %v23197_v27 = vld [vmem:[%s36891_s19 + $0x1c8] sm:$0xff] }
0x1089   :  { %28908 = vmatprep.subr.bf16.mxu1 %v28907_v26 }
0x108b   :  { %27923 = vmatmul.mubr.msk.f32.gmra.mrb[66].mxu1 %vm117_vm3, %v36148_v9 }
0x108c   :  { %27925 = vmatprep.mubr.msk.f32.mxu1 %vm117_vm3, %v36154_v23  ;;  %28910 = vmatpush3.bf16.msra.mxu1 %v28907_v26  ;;  %v23175_v26 = vld [vmem:[%s36891_s19 + $0x198] sm:$0xff] }
0x108d   :  { %28912 = vmatprep.subr.bf16.mxu1 %v28911_v29  ;;  %v28923_v58 = vpack.c.bf16 %v23175_v26, %v23174_v18  ;;  %v36535_v18 = vld [vmem:[#allocation3 + $0x82] sm:$0xff]  ;;  %v23198_v26 = vld [vmem:[%s36891_s19 + $0x1d0] sm:$0xff] }
0x108f   :  { %27926 = vmatmul.mubr.msk.f32.gmra.mrb[68].mxu1 %vm117_vm3, %v36166_v49 }
0x1090   :  { %27928 = vmatprep.mubr.msk.f32.mxu1 %vm117_vm3, %v36172_v57  ;;  %28914 = vmatpush3.bf16.msra.mxu1 %v28911_v29  ;;  %v23177_v29 = vld [vmem:[%s36891_s19 + $0x1a8] sm:$0xff] }
0x1091   :  { %28916 = vmatprep.subr.bf16.mxu1 %v28915_v4  ;;  %v28927_v3 = vpack.c.bf16 %v23177_v29, %v23176_v53  ;;  %v23200_v29 = vld [vmem:[%s36891_s19 + $0x1e0] sm:$0xff] }
0x1093   :  { %27929 = vmatmul.mubr.msk.f32.gmra.mrb[70].mxu1 %vm117_vm3, %v36475_v25 }
0x1094   :  { %27931 = vmatprep.mubr.msk.f32.mxu1 %vm117_vm3, %v36181_v38  ;;  %28918 = vmatpush3.bf16.msra.mxu1 %v28915_v4  ;;  %v36493_v38 = vld [vmem:[#allocation3 + $0x121] sm:$0xff] }
0x1095   :  { %28920 = vmatprep.subr.bf16.mxu1 %v28919_v21 }
0x1097   :  { %27932 = vmatmul.mubr.msk.f32.gmra.mrb[72].mxu1 %vm117_vm3, %v36187_v14 }
0x1098   :  { %27934 = vmatprep.mubr.msk.f32.mxu1 %vm117_vm3, %v36192_v45 }
0x109b   :  { %27935 = vmatmul.mubr.msk.f32.gmra.mrb[74].mxu1 %vm117_vm3, %v36197_v19 }
0x109c   :  { %27937 = vmatprep.mubr.msk.f32.mxu1 %vm117_vm3, %v36201_v33 }
0x109f   :  { %27938 = vmatmul.mubr.msk.f32.gmra.mrb[76].mxu1 %vm117_vm3, %v36205_v48 }
0x10a0   :  { %27940 = vmatprep.mubr.msk.f32.mxu1 %vm117_vm3, %v36209_v2 }
0x10a3   :  { %27941 = vmatmul.mubr.msk.f32.gmra.mrb[78].mxu1 %vm117_vm3, %v36493_v38 }
0x10a4   :  { %27959 = vmatprep.mubr.msk.f32.mxu1 %vm117_vm3, %v36302_v20  ;;  %v23178_v20 = vld [vmem:[%s36891_s19 + $0x1b0] sm:$0xff] }
0x10a5   :  { %v28931_v4 = vpack.c.bf16 %v23179_v35, %v23178_v20  ;;  %v23203_v35 = vld [vmem:[%s36891_s19 + $0x1f8] sm:$0xff] }
0x10a7   :  { %27960 = vmatmul.mubr.msk.f32.vlgmr.msra.gmra.mrb[64].mxu1 %vm117_vm3, %v36312_v32 }
0x10a8   :  { %27962 = vmatprep.mubr.msk.f32.mxu1 %vm117_vm3, %v36316_v39  ;;  %28922 = vmatpush3.bf16.msra.mxu1 %v28919_v21  ;;  %v28935_v21 = vpack.c.bf16 %v23197_v27, %v23196_v54  ;;  %v21006_v27 = vld [vmem:[%s36893_s21 + $0xe0] sm:$0xff] }
0x10a9   :  { %28924 = vmatprep.subr.bf16.mxu1 %v28923_v58 }
0x10ab   :  { %27963 = vmatmul.mubr.msk.f32.gmra.mrb[66].mxu1 %vm117_vm3, %v36326_v60 }
0x10ac   :  { %27965 = vmatprep.mubr.msk.f32.mxu1 %vm117_vm3, %v36330_v40  ;;  %28926 = vmatpush3.bf16.msra.mxu1 %v28923_v58  ;;  %v23199_v58 = vld [vmem:[%s36891_s19 + $0x1d8] sm:$0xff] }
0x10ad   :  { %28928 = vmatprep.subr.bf16.mxu1 %v28927_v3  ;;  %v28939_v53 = vpack.c.bf16 %v23199_v58, %v23198_v26  ;;  %v36746_v58 = vld [vmem:[%s36892_s20] ss:$0 sm:$0xff] }
0x10af   :  { %27966 = vmatmul.mubr.msk.f32.gmra.mrb[68].mxu1 %vm117_vm3, %v36340_v16 }
0x10b0   :  { %27968 = vmatprep.mubr.msk.f32.mxu1 %vm117_vm3, %v36344_v47  ;;  %28930 = vmatpush3.bf16.msra.mxu1 %v28927_v3  ;;  %v23201_v3 = vld [vmem:[%s36891_s19 + $0x1e8] sm:$0xff] }
0x10b1   :  { %28932 = vmatprep.subr.bf16.mxu1 %v28931_v4  ;;  %v28943_v20 = vpack.c.bf16 %v23201_v3, %v23200_v29 }
0x10b3   :  { %27969 = vmatmul.mubr.msk.f32.gmra.mrb[70].mxu1 %vm117_vm3, %v36535_v18 }
0x10b4   :  { %27971 = vmatprep.mubr.msk.f32.mxu1 %vm117_vm3, %v36349_v41  ;;  %28934 = vmatpush3.bf16.msra.mxu1 %v28931_v4  ;;  %v36553_v41 = vld [vmem:[#allocation3 + $0x122] sm:$0xff] }
0x10b5   :  { %28936 = vmatprep.subr.bf16.mxu1 %v28935_v21  ;;  %v23221_v4 = vld [vmem:[%s36891_s19 + $0x208] sm:$0xff] }
0x10b7   :  { %27972 = vmatmul.mubr.msk.f32.gmra.mrb[72].mxu1 %vm117_vm3, %v36353_v37 }
0x10b8   :  { %27974 = vmatprep.mubr.msk.f32.mxu1 %vm117_vm3, %v36357_v22 }
0x10bb   :  { %27975 = vmatmul.mubr.msk.f32.gmra.mrb[74].mxu1 %vm117_vm3, %v36361_v17 }
0x10bc   :  { %27977 = vmatprep.mubr.msk.f32.mxu1 %vm117_vm3, %v36365_v11 }
0x10bf   :  { %27978 = vmatmul.mubr.msk.f32.gmra.mrb[76].mxu1 %vm117_vm3, %v36369_v28 }
0x10c0   :  { %27980 = vmatprep.mubr.msk.f32.mxu1 %vm117_vm3, %v36373_v46 }
0x10c3   :  { %27981 = vmatmul.mubr.msk.f32.gmra.mrb[78].mxu1 %vm117_vm3, %v36553_v41 }
0x10c4   :  { %27999 = vmatprep.mubr.msk.f32.mxu1 %vm117_vm3, %v36230_v6  ;;  %v23202_v6 = vld [vmem:[%s36891_s19 + $0x1f0] sm:$0xff] }
0x10c7   :  { %28000 = vmatmul.mubr.msk.f32.vlgmr.msra.gmra.mrb[64].mxu1 %vm117_vm3, %v36234_v31  ;;  %v28947_v31 = vpack.c.bf16 %v23203_v35, %v23202_v6  ;;  %v37118_v6 = vmax.f32 %v35396_v24, 0.0  ;;  %v37121_v24 = vmax.f32 %v35406_v62, 0.0 }
0x10c8   :  { %28002 = vmatprep.mubr.msk.f32.mxu1 %vm117_vm3, %v36244_v61  ;;  %28938 = vmatpush3.bf16.msra.mxu1 %v28935_v21  ;;  %v23220_v61 = vld [vmem:[%s36891_s19 + $0x200] sm:$0xff]  ;;  %v20981_v21 = vld [vmem:[%s36893_s21 + $0x18] sm:$0xff] }
0x10c9   :  { %28940 = vmatprep.subr.bf16.mxu1 %v28939_v53 }
0x10cb   :  { %28003 = vmatmul.mubr.msk.f32.gmra.mrb[66].mxu1 %vm117_vm3, %v36248_v15  ;;  %v20183_v15 = vld [vmem:[#allocation3 + $0x90] sm:$0xff] }
0x10cc   :  { %28005 = vmatprep.mubr.msk.f32.mxu1 %vm117_vm3, %v36258_v5  ;;  %28942 = vmatpush3.bf16.msra.mxu1 %v28939_v53  ;;  %v28951_v5 = vpack.c.bf16 %v23221_v4, %v23220_v61 }
0x10cd   :  { %28944 = vmatprep.subr.bf16.mxu1 %v28943_v20 }
0x10cf   :  { %28006 = vmatmul.mubr.msk.f32.gmra.mrb[68].mxu1 %vm117_vm3, %v36262_v0  ;;  %v20191_v0 = vld [vmem:[#allocation3 + $0x130] sm:$0xff] }
0x10d0   :  { %28008 = vmatprep.mubr.msk.f32.mxu1 %vm117_vm3, %v36415_v30  ;;  %28946 = vmatpush3.bf16.msra.mxu1 %v28943_v20  ;;  %v23227_v30 = vld [vmem:[%s36891_s19 + $0x238] sm:$0xff] }
0x10d1   :  { %28948 = vmatprep.subr.bf16.mxu1 %v28947_v31 }
0x10d3   :  { %28009 = vmatmul.mubr.msk.f32.gmra.mrb[70].mxu1 %vm117_vm3, %v20183_v15 }
0x10d4   :  { %28011 = vmatprep.mubr.msk.f32.mxu1 %vm117_vm3, %v36271_v13  ;;  %28950 = vmatpush3.bf16.msra.mxu1 %v28947_v31  ;;  %v23222_v13 = vld [vmem:[%s36891_s19 + $0x210] sm:$0xff]  ;;  %v37119_v31 = vmax.f32 %v35398_v52, 0.0 }
0x10d5   :  { %28952 = vmatprep.subr.bf16.mxu1 %v28951_v5 }
0x10d7   :  { %28012 = vmatmul.mubr.msk.f32.gmra.mrb[72].mxu1 %vm117_vm3, %v36275_v43  ;;  %v23223_v43 = vld [vmem:[%s36891_s19 + $0x218] sm:$0xff] }
0x10d8   :  { %28014 = vmatprep.mubr.msk.f32.mxu1 %vm117_vm3, %v36279_v36  ;;  %v28955_v36 = vpack.c.bf16 %v23223_v43, %v23222_v13 }
0x10db   :  { %28015 = vmatmul.mubr.msk.f32.gmra.mrb[74].mxu1 %vm117_vm3, %v36283_v8  ;;  %v23224_v8 = vld [vmem:[%s36891_s19 + $0x220] sm:$0xff] }
0x10dc   :  { %28017 = vmatprep.mubr.msk.f32.mxu1 %vm117_vm3, %v36287_v56  ;;  %v23225_v56 = vld [vmem:[%s36891_s19 + $0x228] sm:$0xff] }
0x10df   :  { %28018 = vmatmul.mubr.msk.f32.gmra.mrb[76].mxu1 %vm117_vm3, %v36291_v42  ;;  %v28959_v42 = vpack.c.bf16 %v23225_v56, %v23224_v8  ;;  %v37120_v8 = vmax.f32 %v35402_v34, 0.0 }
0x10e0   :  { %28020 = vmatprep.mubr.msk.f32.mxu1 %vm117_vm3, %v36433_v51  ;;  %v21003_v51 = vld [vmem:[%s36893_s21 + $0xc8] sm:$0xff] }
0x10e3   :  { %28021 = vmatmul.mubr.msk.f32.gmra.mrb[78].mxu1 %vm117_vm3, %v20191_v0 }
0x10e4   :  { %28039 = vmatprep.mubr.msk.f32.mxu1 %vm117_vm3, %v36130_v63  ;;  %v23226_v63 = vld [vmem:[%s36891_s19 + $0x230] sm:$0xff] }
0x10e7   :  { %28040 = vmatmul.mubr.msk.f32.vlgmr.msra.gmra.mrb[64].mxu1 %vm117_vm3, %v36136_v12  ;;  %v28963_v12 = vpack.c.bf16 %v23227_v30, %v23226_v63 }
0x10e8   :  { %28042 = vmatprep.mubr.msk.f32.mxu1 %vm117_vm3, %v36148_v9  ;;  %28954 = vmatpush3.bf16.msra.mxu1 %v28951_v5  ;;  %v20417_v9 = vld [vmem:[#allocation3 + $0x91] sm:$0xff] }
0x10e9   :  { %28956 = vmatprep.subr.bf16.mxu1 %v28955_v36 }
0x10eb   :  { %28043 = vmatmul.mubr.msk.f32.gmra.mrb[66].mxu1 %vm117_vm3, %v36154_v23  ;;  %v20425_v23 = vld [vmem:[#allocation3 + $0x131] sm:$0xff] }
0x10ec   :  { %28045 = vmatprep.mubr.msk.f32.mxu1 %vm117_vm3, %v36166_v49  ;;  %28958 = vmatpush3.bf16.msra.mxu1 %v28955_v36  ;;  %v20651_v49 = vld [vmem:[#allocation3 + $0x92] sm:$0xff] }
0x10ed   :  { %28960 = vmatprep.subr.bf16.mxu1 %v28959_v42 }
0x10ef   :  { %28046 = vmatmul.mubr.msk.f32.gmra.mrb[68].mxu1 %vm117_vm3, %v36172_v57  ;;  %v20659_v57 = vld [vmem:[#allocation3 + $0x132] sm:$0xff] }
0x10f0   :  { %28048 = vmatprep.mubr.msk.f32.mxu1 %vm117_vm3, %v36475_v25  ;;  %28962 = vmatpush3.bf16.msra.mxu1 %v28959_v42  ;;  %v21007_v25 = vld [vmem:[%s36893_s21 + $0xe8] sm:$0xff] }
0x10f1   :  { %28964 = vmatprep.subr.bf16.mxu1 %v28963_v12  ;;  %v28979_v54 = vpack.c.bf16 %v21007_v25, %v21003_v51 }
0x10f3   :  { %28049 = vmatmul.mubr.msk.f32.gmra.mrb[70].mxu1 %vm117_vm3, %v20417_v9 }
0x10f4   :  { %28051 = vmatprep.mubr.msk.f32.mxu1 %vm117_vm3, %v36187_v14  ;;  %28966 = vmatpush3.bf16.msra.mxu1 %v28963_v12  ;;  %v20979_v14 = vld [vmem:[%s36893_s21 + $0x8] sm:$0xff] }
0x10f7   :  { %28052 = vmatmul.mubr.msk.f32.gmra.mrb[72].mxu1 %vm117_vm3, %v36192_v45  ;;  %v20983_v45 = vld [vmem:[%s36893_s21 + $0x28] sm:$0xff] }
0x10f8   :  { %28054 = vmatprep.mubr.msk.f32.mxu1 %vm117_vm3, %v36197_v19  ;;  %v20978_v19 = vld [vmem:[%s36893_s21] sm:$0xff] }
0x10fb   :  { %28055 = vmatmul.mubr.msk.f32.gmra.mrb[74].mxu1 %vm117_vm3, %v36201_v33  ;;  %v28967_v33 = vpack.c.bf16 %v20983_v45, %v20979_v14  ;;  %v37122_v14 = vmax.f32 %v35420_v44, 0.0  ;;  %v37124_v44 = vmax.f32 %v35440_v1, 0.0  ;;  %v37126_v1 = vmax.f32 %v35466_v55, 0.0 }
0x10fc   :  { %28057 = vmatprep.mubr.msk.f32.mxu1 %vm117_vm3, %v36205_v48  ;;  %v20982_v48 = vld [vmem:[%s36893_s21 + $0x20] sm:$0xff] }
0x10fd   :  { %28968 = vmatprep.subr.bf16.mxu0 %v28967_v33 }
0x10ff   :  { %28058 = vmatmul.mubr.msk.f32.gmra.mrb[76].mxu1 %vm117_vm3, %v36209_v2  ;;  %v28969_v2 = vpack.c.bf16 %v20982_v48, %v20978_v19  ;;  %v37123_v19 = vmax.f32 %v35426_v50, 0.0  ;;  %v37125_v50 = vmax.f32 %v35446_v7, 0.0  ;;  %v37127_v7 = vmax.f32 %v35474_v10, 0.0 }
0x1100   :  { %28060 = vmatprep.mubr.msk.f32.mxu1 %vm117_vm3, %v36493_v38  ;;  %v21002_v38 = vld [vmem:[%s36893_s21 + $0xc0] sm:$0xff] }
0x1101   :  { %28970 = vmatpush1.bf16.msra.mxu0 %v28969_v2 }
0x1103   :  { %28061 = vmatmul.mubr.msk.f32.gmra.mrb[78].mxu1 %vm117_vm3, %v20425_v23 }
0x1104   :  { %28079 = vmatprep.mubr.msk.f32.mxu1 %vm117_vm3, %v36312_v32  ;;  %v20987_v32 = vld [vmem:[%s36893_s21 + $0x48] sm:$0xff] }
0x1107   :  { %28080 = vmatmul.mubr.msk.f32.vlgmr.msra.gmra.mrb[64].mxu1 %vm117_vm3, %v36316_v39  ;;  %v20991_v39 = vld [vmem:[%s36893_s21 + $0x68] sm:$0xff] }
0x1108   :  { %28082 = vmatprep.mubr.msk.f32.mxu1 %vm117_vm3, %v36326_v60  ;;  %v28971_v60 = vpack.c.bf16 %v20991_v39, %v20987_v32 }
0x110a   :  { %28972 = vmatprep.subr.bf16.mxu0 %v28971_v60 }
0x110b   :  { %28083 = vmatmul.mubr.msk.f32.gmra.mrb[66].mxu1 %vm117_vm3, %v36330_v40  ;;  %v20986_v40 = vld [vmem:[%s36893_s21 + $0x40] sm:$0xff] }
0x110c   :  { %28085 = vmatprep.mubr.msk.f32.mxu1 %vm117_vm3, %v36340_v16  ;;  %v20990_v16 = vld [vmem:[%s36893_s21 + $0x60] sm:$0xff] }
0x110f   :  { %28086 = vmatmul.mubr.msk.f32.gmra.mrb[68].mxu1 %vm117_vm3, %v36344_v47  ;;  %v28973_v47 = vpack.c.bf16 %v20990_v16, %v20986_v40 }
0x1110   :  { %28088 = vmatprep.mubr.msk.f32.mxu1 %vm117_vm3, %v36535_v18  ;;  %v20985_v18 = vld [vmem:[%s36893_s21 + $0x38] sm:$0xff] }
0x1111   :  { %28974 = vmatpush1.bf16.msra.mxu0 %v28973_v47  ;;  %v28983_v26 = vpack.c.bf16 %v20985_v18, %v20981_v21 }
0x1113   :  { %28089 = vmatmul.mubr.msk.f32.gmra.mrb[70].mxu1 %vm117_vm3, %v20651_v49 }
0x1114   :  { %28091 = vmatprep.mubr.msk.f32.mxu1 %vm117_vm3, %v36353_v37  ;;  %v20995_v37 = vld [vmem:[%s36893_s21 + $0x88] sm:$0xff] }
0x1117   :  { %28092 = vmatmul.mubr.msk.f32.gmra.mrb[72].mxu1 %vm117_vm3, %v36357_v22  ;;  %v20999_v22 = vld [vmem:[%s36893_s21 + $0xa8] sm:$0xff] }
0x1118   :  { %28094 = vmatprep.mubr.msk.f32.mxu1 %vm117_vm3, %v36361_v17  ;;  %v28975_v17 = vpack.c.bf16 %v20999_v22, %v20995_v37 }
0x111a   :  { %28976 = vmatprep.subr.bf16.mxu0 %v28975_v17 }
0x111b   :  { %28095 = vmatmul.mubr.msk.f32.gmra.mrb[74].mxu1 %vm117_vm3, %v36365_v11  ;;  %v20994_v11 = vld [vmem:[%s36893_s21 + $0x80] sm:$0xff] }
0x111c   :  { %28097 = vmatprep.mubr.msk.f32.mxu1 %vm117_vm3, %v36369_v28  ;;  %v20998_v28 = vld [vmem:[%s36893_s21 + $0xa0] sm:$0xff] }
0x111f   :  { %28098 = vmatmul.mubr.msk.f32.gmra.mrb[76].mxu1 %vm117_vm3, %v36373_v46  ;;  %v28977_v46 = vpack.c.bf16 %v20998_v28, %v20994_v11 }
0x1120   :  { %28100 = vmatprep.mubr.msk.f32.mxu1 %vm117_vm3, %v36553_v41  ;;  %v28981_v41 = vpack.c.bf16 %v21006_v27, %v21002_v38 }
0x1121   :  { %28978 = vmatpush1.bf16.msra.mxu0 %v28977_v46 }
0x1122   :  { %28980 = vmatprep.subr.bf16.mxu0 %v28979_v54 }
0x1123   :  { %28101 = vmatmul.mubr.msk.f32.gmra.mrb[78].mxu1 %vm117_vm3, %v20659_v57 }
0x1125   :  { %28982 = vmatpush1.bf16.msra.mxu0 %v28981_v41 }
0x1126   :  { %28984 = vmatprep.subr.bf16.mxu0 %v28983_v26 }
0x11da   :  { %v28081_v53 = vpop.f32.mrb[64].mxu1 }
0x11db   :  { %v20886_v29 = vadd.f32 %v28081_v53, %v36746_v58  ;;  %v20783_v3 = vpop.f32.mrb[65].mxu1 }
0x11dc   :  { %v20885_v20 = vadd.f32 %v36746_v58, %v20783_v3 }
0x11dd   :  { %v20902_v35 = vadd.f32 %v20886_v29, %v37118_v6 }
0x11de   :  { %v20901_v61 = vadd.f32 %v20885_v20, %v37119_v31  ;;  %v28084_v4 = vpop.f32.mrb[66].mxu1 }
0x11df   :  { %v20918_v15 = vmax.f32 %v20902_v35, 0.0  ;;  %v20888_v5 = vadd.f32 %v28084_v4, %v36746_v58  ;;  %v20793_v0 = vpop.f32.mrb[67].mxu1 }
0x11e0   :  { %v20917_v13 = vmax.f32 %v20901_v61, 0.0  ;;  %v20887_v43 = vadd.f32 %v36746_v58, %v20793_v0 }
0x11e1   :  { %v20934_v36 = vsel %vm117_vm3, %v20918_v15, 0.0  ;;  %v20904_v56 = vadd.f32 %v20888_v5, %v37120_v8  ;;  %v37128_v15 = vld [vmem:[#allocation9_spill] sm:$0xff] }
0x11e2   :  { %v20933_v42 = vsel %vm117_vm3, %v20917_v13, 0.0  ;;  %v20903_v63 = vadd.f32 %v20887_v43, %v37121_v24  ;;  %v28087_v52 = vpop.f32.mrb[68].mxu1  ;;  %v37129_v5 = vmax.f32 %v37128_v15, 0.0  ;;  %v37130_v13 = vld [vmem:[#allocation10_spill] sm:$0xff] }
0x11e3   :  { %v20935_v30 = vadd.f32 %v20934_v36, %v20933_v42  ;;  %v20890_v12 = vadd.f32 %v28087_v52, %v36746_v58  ;;  %v20803_v9 = vpop.f32.mrb[69].mxu1  ;;  %v20920_v23 = vmax.f32 %v20904_v56, 0.0  ;;  %v37131_v43 = vmax.f32 %v37130_v13, 0.0  ;;  %v20992_v13 = vld [vmem:[%s36893_s21 + $0x70] sm:$0xff] }
0x11e4   :  { %v20919_v49 = vmax.f32 %v20903_v63, 0.0  ;;  %v20889_v57 = vadd.f32 %v36746_v58, %v20803_v9 }
0x11e5   :  { %v20906_v45 = vadd.f32 %v20890_v12, %v37122_v14  ;;  %v20938_v39 = vsel %vm117_vm3, %v20920_v23, 0.0  ;;  %v37132_v12 = vld [vmem:[#allocation11_spill] sm:$0xff] }
0x11e6   :  { %v20936_v34 = vsel %vm117_vm3, %v20919_v49, 0.0  ;;  %v20905_v33 = vadd.f32 %v20889_v57, %v37123_v19  ;;  %v28090_v48 = vpop.f32.mrb[70].mxu1  ;;  %v37133_v9 = vmax.f32 %v37132_v12, 0.0  ;;  %v37134_v57 = vld [vmem:[#allocation12_spill] sm:$0xff] }
0x11e7   :  { %v20937_v62 = vadd.f32 %v20936_v34, %v20935_v30  ;;  %v20892_v2 = vadd.f32 %v28090_v48, %v36746_v58  ;;  %v20813_v32 = vpop.f32.mrb[71].mxu1  ;;  %v20922_v60 = vmax.f32 %v20906_v45, 0.0  ;;  %v37135_v14 = vmax.f32 %v37134_v57, 0.0 }
0x11e8   :  { %v20921_v40 = vmax.f32 %v20905_v33, 0.0  ;;  %v20891_v16 = vadd.f32 %v36746_v58, %v20813_v32  ;;  %v21012_v57 = vlaneseq }
0x11e9   :  { %v20939_v47 = vadd.f32 %v20938_v39, %v20937_v62  ;;  %v20908_v37 = vadd.f32 %v20892_v2, %v37124_v44  ;;  %v20942_v25 = vsel %vm117_vm3, %v20922_v60, 0.0 }
0x11ea   :  { %v20940_v22 = vsel %vm117_vm3, %v20921_v40, 0.0  ;;  %v20907_v17 = vadd.f32 %v20891_v16, %v37125_v50  ;;  %v28093_v11 = vpop.f32.mrb[72].mxu1  ;;  %v37136_v16 = vld [vmem:[#allocation13_spill] sm:$0xff] }
0x11eb   :  { %v20941_v28 = vadd.f32 %v20940_v22, %v20939_v47  ;;  %v20894_v46 = vadd.f32 %v28093_v11, %v36746_v58  ;;  %v20823_v51 = vpop.f32.mrb[73].mxu1  ;;  %v20924_v38 = vmax.f32 %v20908_v37, 0.0  ;;  %v37137_v47 = vmax.f32 %v37136_v16, 0.0  ;;  %v37138_v22 = vld [vmem:[#allocation15_spill] sm:$0xff] }
0x11ec   :  { %v20923_v54 = vmax.f32 %v20907_v17, 0.0  ;;  %v20893_v27 = vadd.f32 %v36746_v58, %v20823_v51  ;;  %v37139_v50 = vmax.f32 %v37138_v22, 0.0 }
0x11ed   :  { %v20943_v21 = vadd.f32 %v20942_v25, %v20941_v28  ;;  %v20910_v18 = vadd.f32 %v20894_v46, %v37126_v1  ;;  %v20946_v35 = vsel %vm117_vm3, %v20924_v38, 0.0 }
0x11ee   :  { %v20944_v41 = vsel %vm117_vm3, %v20923_v54, 0.0  ;;  %v20909_v26 = vadd.f32 %v20893_v27, %v37127_v7  ;;  %v28096_v53 = vpop.f32.mrb[74].mxu1 }
0x11ef   :  { %v20945_v29 = vadd.f32 %v20944_v41, %v20943_v21  ;;  %v20926_v3 = vmax.f32 %v20910_v18, 0.0  ;;  %v20896_v20 = vadd.f32 %v28096_v53, %v36746_v58  ;;  %v20833_v6 = vpop.f32.mrb[75].mxu1 }
0x11f0   :  { %v20925_v31 = vmax.f32 %v20909_v26, 0.0  ;;  %v20895_v61 = vadd.f32 %v36746_v58, %v20833_v6  ;;  %v20980_v6 = vld [vmem:[%s36893_s21 + $0x10] sm:$0xff] }
0x11f1   :  { %v20947_v4 = vadd.f32 %v20946_v35, %v20945_v29  ;;  %v20955_v55 = vsel %vm117_vm3, %v20926_v3, 0.0  ;;  %v20912_v0 = vadd.f32 %v20896_v20, %v37129_v5  ;;  %v20984_v35 = vld [vmem:[%s36893_s21 + $0x30] sm:$0xff] }
0x11f2   :  { %v20954_v10 = vsel %vm117_vm3, %v20925_v31, 0.0  ;;  %v20911_v36 = vadd.f32 %v20895_v61, %v37131_v43  ;;  %v28099_v8 = vpop.f32.mrb[76].mxu1  ;;  %v20989_v61 = vld [vmem:[%s36893_s21 + $0x58] sm:$0xff]  ;;  %v28985_v5 = vpack.c.bf16 %v20984_v35, %v20980_v6 }
0x11f3   :  { %v20956_v56 = vadd.f32 %v20955_v55, %v20954_v10  ;;  %v20898_v42 = vadd.f32 %v28099_v8, %v36746_v58  ;;  %v20843_v24 = vpop.f32.mrb[77].mxu1  ;;  %v20928_v63 = vmax.f32 %v20912_v0, 0.0  ;;  %v20948_v19 = vrot.slane %v20947_v4, 4  ;;  %v20988_v10 = vld [vmem:[%s36893_s21 + $0x50] sm:$0xff]  ;;  %v21001_v8 = vld [vmem:[%s36893_s21 + $0xb8] sm:$0xff] }
0x11f4   :  { %v20927_v52 = vmax.f32 %v20911_v36, 0.0  ;;  %v20897_v30 = vadd.f32 %v36746_v58, %v20843_v24  ;;  %v20997_v36 = vld [vmem:[%s36893_s21 + $0x98] sm:$0xff]  ;;  %v20996_v24 = vld [vmem:[%s36893_s21 + $0x90] sm:$0xff] }
0x11f5   :  { %v20914_v23 = vadd.f32 %v20898_v42, %v37133_v9  ;;  %v20959_v2 = vsel %vm117_vm3, %v20928_v63, 0.0  ;;  %v20949_v11 = vadd.f32 %v20948_v19, %v20947_v4  ;;  %v20993_v4 = vld [vmem:[%s36893_s21 + $0x78] sm:$0xff]  ;;  %v28991_v42 = vpack.c.bf16 %v21001_v8, %v20997_v36  ;;  %v21000_v63 = vld [vmem:[%s36893_s21 + $0xb0] sm:$0xff] }
0x11f6   :  { %v20957_v49 = vsel %vm117_vm3, %v20927_v52, 0.0  ;;  %v20913_v45 = vadd.f32 %v20897_v30, %v37135_v14  ;;  %v28102_v34 = vpop.f32.mrb[78].mxu1  ;;  %v28987_v0 = vpack.c.bf16 %v20993_v4, %v20989_v61  ;;  %v21005_v52 = vld [vmem:[%s36893_s21 + $0xd8] sm:$0xff]  ;;  %v21004_v9 = vld [vmem:[%s36893_s21 + $0xd0] sm:$0xff]  ;;  %v21013_v14 = vshrl.u32 %v21012_v57, 7 }
0x11f7   :  { %v20958_v33 = vadd.f32 %v20957_v49, %v20956_v56  ;;  %v20900_v48 = vadd.f32 %v28102_v34, %v36746_v58  ;;  %v20853_v62 = vpop.f32.mrb[79].mxu1  ;;  %v20930_v32 = vmax.f32 %v20914_v23, 0.0  ;;  %v20950_v27 = vrot.slane %v20949_v11, 2  ;;  %v21009_v30 = vld [vmem:[%s36893_s21 + $0xf8] sm:$0xff]  ;;  %v21008_v23 = vld [vmem:[%s36893_s21 + $0xf0] sm:$0xff]  ;;  %s30346_s21 = smov [#allocation4]  }
0x11f8   :  { %v20929_v39 = vmax.f32 %v20913_v45, 0.0  ;;  %v20899_v60 = vadd.f32 %v36746_v58, %v20853_v62  ;;  %v28989_v56 = vpack.c.bf16 %v20992_v13, %v20988_v10  ;;  %v28995_v12 = vpack.c.bf16 %v21009_v30, %v21005_v52 }
0x11f9   :  { %v20960_v40 = vadd.f32 %v20959_v2, %v20958_v33  ;;  %v20916_v44 = vadd.f32 %v20900_v48, %v37137_v47  ;;  %v20963_v46 = vsel %vm117_vm3, %v20930_v32, 0.0  ;;  %v20951_v18 = vadd.f32 %v20950_v27, %v20949_v11  ;;  %v21010_v48 = vld [vmem:[%s36894_s22] sm:$0xf]  ;;  %s21229_s22 = sshll.u32 %s30346_s21, 4  ;;  %s21230_s22 = int_to_ptr.vmem [resolvable:$true] %s21229_s22 }
0x11fa   :  { %v20961_v37 = vsel %vm117_vm3, %v20929_v39, 0.0  ;;  %v20915_v17 = vadd.f32 %v20899_v60, %v37139_v50  ;;  %v28997_v49 = vpack.c.bf16 %v21008_v23, %v21004_v9  ;;  %v21014_v34 = vsub.s32 0, %v21013_v14  ;;  %s30320_s30 = scalar_lea.vmem %s21230_s22, 128  ;;  %p30325_p1 = scmp.lt.s32.totalorder %s21230_s22, %s21230_s22 }
0x11fb   :  { %v20962_v28 = vadd.f32 %v20961_v37, %v20960_v40  ;;  %v20932_v51 = vmax.f32 %v20916_v44, 0.0  ;;  %v20952_v26 = vrot.slane %v20951_v18, 1  ;;  %v21018_v19 = vsub.s32 1, %v21013_v14  ;;  %p30321_p0 = scmp.ne.s32.totalorder %s21230_s22, %s30320_s30  ;;  %p30326_p2 = scmp.lt.s32.totalorder %s30320_s30, %s30320_s30 }
0x11fc   :  { %v20931_v25 = vmax.f32 %v20915_v17, 0.0  ;;  %v21015_v62 = vrot.slane %v21010_v48, %v21014_v34  ;;  %v21022_v60 = vsub.s32 2, %v21013_v14  ;;  %v21026_v40 = vsub.s32 3, %v21013_v14 }
0x11fd   :  { %v20964_v38 = vadd.f32 %v20963_v46, %v20962_v28  ;;  %v20967_v21 = vsel %vm117_vm3, %v20932_v51, 0.0  ;;  %v20953_v20 = vadd.f32 %v20952_v26, %v20951_v18  ;;  %v21019_v2 = vrot.slane %v21010_v48, %v21018_v19  ;;  %p30327_p3 = por %p30326_p2, %p30325_p1 }
0x11fe   :  { %v20965_v54 = vsel %vm117_vm3, %v20931_v25, 0.0  ;;  %v21023_v44 = vrot.slane %v21010_v48, %v21022_v60  ;;  %v21027_v37 = vrot.slane %v21010_v48, %v21026_v40 }
0x11ff   :  { %v20966_v58 = vadd.f32 %v20965_v54, %v20964_v38  ;;  %v20976_v55 = vmul.f32 0.015625, %v20953_v20  ;;  %p30328_p4 = pnand %p30327_p3, %p30321_p0 }
0x1201   :  { %v20968_v1 = vadd.f32 %v20967_v21, %v20966_v58 }
0x1203   :  { %v20969_v41 = vrot.slane %v20968_v1, 4 }
0x1205   :  { %v20970_v7 = vadd.f32 %v20969_v41, %v20968_v1  ;;  %v30345_v41 = vmov 1983009808  }
0x1207   :  { %v20971_v53 = vrot.slane %v20970_v7, 2 }
0x1209   :  { %v20972_v29 = vadd.f32 %v20971_v53, %v20970_v7  ;;  %v21207_v7 = vunpack.c.l.s4 %v30345_v41 }
0x120b   :  { %v20973_v3 = vrot.slane %v20972_v29, 1  ;;  %v21208_v26 = vunpack.c.0.s8 %v21207_v7 }
0x120d   :  { %v20974_v31 = vadd.f32 %v20973_v3, %v20972_v29  ;;  %v21211_v29 = vsub.s32 %v21208_v26, %v21013_v14 }
0x120f   :  { %v20977_v15 = vmul.f32 0.015625, %v20974_v31 }
0x1211   :  { %v21035_v43 = vsel %vm21034_vm5, %v20977_v15, %v20976_v55 }
0x1212   :  { %23245 = vmatmul.mubr.msk.f32.vlgmr.msra.gmra.mrb[80].mxu0 %vm117_vm3, %v21035_v43 }
0x1213   :  { %28986 = vmatpush1.bf16.msra.mxu0 %v28985_v5  ;;  %21173 = vmatprep.mubr.f32.mxu0 %v37117_v59  ;;  %v28993_v59 = vpack.c.bf16 %v21000_v63, %v20996_v24 }
0x1214   :  { %28988 = vmatprep.subr.bf16.mxu0 %v28987_v0 }
0x1217   :  { %28990 = vmatpush1.bf16.msra.mxu0 %v28989_v56 }
0x1218   :  { %28992 = vmatprep.subr.bf16.mxu0 %v28991_v42 }
0x121b   :  { %28994 = vmatpush1.bf16.msra.mxu0 %v28993_v59 }
0x121c   :  { %28996 = vmatprep.subr.bf16.mxu0 %v28995_v12 }
0x121f   :  { %28998 = vmatpush1.bf16.msra.mxu0 %v28997_v49 }
0x1222   :  { %23246 = vmatmul.mubr.msk.f32.vlgmr.msra.gmra.mrb[82].mxu0 %vm117_vm3, %v21035_v43 }
0x12e5   :  { %v21104_v45 = vpop.f32.mrb[80].mxu0 }
0x12e6   :  { %v21106_v33 = vpop.f32.mrb[81].mxu0  ;;  %v21105_v32 = vadd.f32 %v21104_v45, %v21015_v62 }
0x12e7   :  { %v21107_v39 = vadd.f32 %v21106_v33, %v21019_v2 }
0x12e8   :  { %v21180_v16 = vmul.f32 %v21105_v32, %v21105_v32 }
0x12e9   :  { %v21181_v47 = vmul.f32 %v21107_v39, %v21107_v39 }
0x12ea   :  { %v21185_v50 = vsel %vm21184_vm6, %v21180_v16, 0.0 }
0x12eb   :  { %v21186_v17 = vsel %vm21184_vm6, %v21181_v47, 0.0 }
0x12ec   :  { %v21187_v38 = vadd.f32 %v21186_v17, %v21185_v50 }
0x12f5   :  { %v21175_v22 = vpop.f32.mrb[82].mxu0 }
0x12f6   :  { %v21176_v11 = vadd.f32 %v21175_v22, %v21023_v44  ;;  %v21177_v28 = vpop.f32.mrb[83].mxu0 }
0x12f7   :  { %v21178_v46 = vadd.f32 %v21177_v28, %v21027_v37 }
0x12f8   :  { %v21182_v51 = vmul.f32 %v21176_v11, %v21176_v11 }
0x12f9   :  { %v21183_v25 = vmul.f32 %v21178_v46, %v21178_v46 }
0x12fa   :  { %v21188_v54 = vsel %vm21184_vm6, %v21182_v51, 0.0 }
0x12fb   :  { %v21189_v27 = vadd.f32 %v21188_v54, %v21187_v38  ;;  %v21190_v58 = vsel %vm21184_vm6, %v21183_v25, 0.0 }
0x12fd   :  { %v21191_v21 = vadd.f32 %v21190_v58, %v21189_v27 }
0x12ff   :  { %21192 = vadd.xlane.f32.xlu0 %v21191_v21 }
0x138c   :  { %v21193_v1 = vpop.xlane.xlu0 %21192 }
0x138d   :  { %v21194_v18 = vmax.f32 %v21193_v1, 1e-24 }
0x138f   :  { %30318 = vrsqrt.f32 %v21194_v18 }
0x1399   :  { %v30319_v53 = vpop.eup %30318 }
0x139a   :  { %v21196_v3 = vmul.f32 %v30319_v53, %v21105_v32  ;;  %v21197_v20 = vmul.f32 %v30319_v53, %v21107_v39  ;;  %v21198_v6 = vmul.f32 %v30319_v53, %v21176_v11  ;;  %v21199_v35 = vmul.f32 %v30319_v53, %v21178_v46 }
0x139c   :  { %v21204_v31 = vcombine.low %v21196_v3, %v21197_v20  ;;  %v21205_v61 = vcombine.low %v21198_v6, %v21199_v35 }
0x139e   :  { %v21212_v4 = vrot.slane %v21204_v31, %v21211_v29  ;;  %v21219_v55 = vrot.slane %v21205_v61, %v21211_v29 }
0x13a0   :  { %v21220_v15 = vcombine.low %v21212_v4, %v21219_v55 }
0x13a2   :  { %21222 = vst [vmem:[#allocation4] sm:$0xff] %v21220_v15 }
0x13a3   :  { %30331 = shalt.err (!%p30328_p4)
}
0x13a4   :  { %s30332_s15 = scalar_lea.hbm %s36895_s23, 128 }
0x13a5   :  { %p30333_p5 = scmp.ne.s32.totalorder %s36895_s23, %s30332_s15  ;;  %p30336_p6 = scmp.lt.u32.totalorder %s30332_s15, %s36895_s23 }
0x13a7   :  { %p30338_p7 = pnand %p30336_p6, %p30333_p5 }
0x13a9   :  { %30341 = shalt.err (!%p30338_p7)
}
0x13aa   :  { %21232 = dma.vmem_to_hbm [thread:$0]  %s21230_s22, 128, %s36895_s23, [#allocation5]  }
0x13ab   :  { %30342 = dma.done.wait [#allocation5], 128  }
0x13ac   :  { %30343 = vsyncadd [#allocation5], 4294967168 }
0x13ad   :  { %21236 = vsyncpa [#allocation5], 1 }

</bundles_post_ra>
